<compile_context>
chip_gen: v7x
topology: tpu7x:2x2x1
jax: 0.10.0
libtpu: 0.0.40
codegen_flags: <defaults>
</compile_context>

<pallas_src>
import functools
import math

import jax
import jax.numpy as jnp
from jax.experimental import pallas as pl
from jax.experimental.pallas import tpu as pltpu

LATENT = 32


def _round_up(x, m):
    return ((x + m - 1) // m) * m


# ----------------------------------------------------------------------------
# Pallas kernel 1: tiled GEMM, bf16 operands, f32 accumulator, fused bias + act
# ----------------------------------------------------------------------------
def _matmul_bias_act_kernel(a_ref, b_ref, bias_ref, o_ref, acc_ref, *, activation):
    @pl.when(pl.program_id(2) == 0)
    def _init():
        acc_ref[...] = jnp.zeros_like(acc_ref)

    acc_ref[...] += jnp.dot(a_ref[...], b_ref[...], preferred_element_type=jnp.float32)

    @pl.when(pl.program_id(2) == pl.num_programs(2) - 1)
    def _finalize():
        r = acc_ref[...] + bias_ref[...]
        if activation == "relu":
            r = jnp.maximum(r, 0.0)
        elif activation == "sigmoid":
            r = jax.nn.sigmoid(r)
        o_ref[...] = r.astype(o_ref.dtype)


def matmul_bias_act(a, b, bias, activation="none"):
    """act(a @ b + bias).  a:[M,K], b:[K,N], bias:[N].  Returns f32 [M,N]."""
    M, K = a.shape
    K2, N = b.shape
    assert K == K2
    a = a.astype(jnp.bfloat16)
    b = b.astype(jnp.bfloat16)
    bias2 = bias.reshape(1, N).astype(jnp.float32)

    # Full-extent blocks for small dims (no pad-to-128 waste); modest caps otherwise.
    tm = M if M <= 512 else 512
    tn = N if N <= 1024 else 512
    tk = K if K <= 1024 else 1024
    Mp, Np, Kp = _round_up(M, tm), _round_up(N, tn), _round_up(K, tk)
    if (Mp, Kp) != (M, K):
        a = jnp.pad(a, ((0, Mp - M), (0, Kp - K)))
    if (Kp, Np) != (K, N):
        b = jnp.pad(b, ((0, Kp - K), (0, Np - N)))
    if Np != N:
        bias2 = jnp.pad(bias2, ((0, 0), (0, Np - N)))

    out = pl.pallas_call(
        functools.partial(_matmul_bias_act_kernel, activation=activation),
        out_shape=jax.ShapeDtypeStruct((Mp, Np), jnp.float32),
        grid_spec=pltpu.PrefetchScalarGridSpec(
            num_scalar_prefetch=0,
            grid=(Mp // tm, Np // tn, Kp // tk),
            in_specs=[
                pl.BlockSpec((tm, tk), lambda i, j, k: (i, k)),
                pl.BlockSpec((tk, tn), lambda i, j, k: (k, j)),
                pl.BlockSpec((1, tn), lambda i, j, k: (0, j)),
            ],
            out_specs=pl.BlockSpec((tm, tn), lambda i, j, k: (i, j)),
            scratch_shapes=[pltpu.VMEM((tm, tn), jnp.float32)],
        ),
        compiler_params=pltpu.CompilerParams(
            dimension_semantics=("parallel", "parallel", "arbitrary"),
            vmem_limit_bytes=32 * 1024 * 1024,
        ),
    )(a, b, bias2)
    if (Mp, Np) != (M, N):
        out = out[:M, :N]
    return out


# ----------------------------------------------------------------------------
# Pallas kernel 2: elementwise bias + activation over a [rows, channels] slab
# (used after the conv-transpose col2im scatter, where bias can't be fused
#  into the GEMM because output pixels sum overlapping contributions)
# ----------------------------------------------------------------------------
def _bias_act_kernel(x_ref, b_ref, o_ref, *, activation):
    r = x_ref[...] + b_ref[...]
    if activation == "relu":
        r = jnp.maximum(r, 0.0)
    elif activation == "sigmoid":
        r = jax.nn.sigmoid(r)
    o_ref[...] = r.astype(o_ref.dtype)


def bias_act_rows(x2d, bias, activation):
    R, C = x2d.shape
    tr = R if R <= 2048 else 2048
    Rp = _round_up(R, tr)
    if Rp != R:
        x2d = jnp.pad(x2d, ((0, Rp - R), (0, 0)))
    out = pl.pallas_call(
        functools.partial(_bias_act_kernel, activation=activation),
        out_shape=jax.ShapeDtypeStruct((Rp, C), jnp.float32),
        grid_spec=pltpu.PrefetchScalarGridSpec(
            num_scalar_prefetch=0,
            grid=(Rp // tr,),
            in_specs=[
                pl.BlockSpec((tr, C), lambda i: (i, 0)),
                pl.BlockSpec((1, C), lambda i: (0, 0)),
            ],
            out_specs=pl.BlockSpec((tr, C), lambda i: (i, 0)),
        ),
        compiler_params=pltpu.CompilerParams(dimension_semantics=("arbitrary",)),
    )(x2d.astype(jnp.float32), bias.reshape(1, C).astype(jnp.float32))
    return out[:R] if Rp != R else out


# ----------------------------------------------------------------------------
# Conv layers built on the Pallas GEMM
# ----------------------------------------------------------------------------
def conv2d(x_nhwc, wmat, bias, kh, kw, stride, padding, activation):
    """PyTorch Conv2d.  wmat: [kh*kw*Ci, Co] (bf16).  im2col is built in bf16."""
    N, H, W, Ci = x_nhwc.shape
    Co = wmat.shape[1]
    Ho = (H + 2 * padding - kh) // stride + 1
    Wo = (W + 2 * padding - kw) // stride + 1
    xp = jnp.pad(x_nhwc.astype(jnp.bfloat16),
                 ((0, 0), (padding, padding), (padding, padding), (0, 0)))
    cols = []
    for dy in range(kh):
        for dx in range(kw):
            cols.append(xp[:, dy:dy + stride * Ho:stride, dx:dx + stride * Wo:stride, :])
    patches = jnp.concatenate(cols, axis=-1).reshape(N * Ho * Wo, kh * kw * Ci)
    out = matmul_bias_act(patches, wmat, bias, activation)
    return out.reshape(N, Ho, Wo, Co)


def conv_transpose2d(x_nhwc, wmat, bias, kh, kw, stride, padding, activation):
    """PyTorch ConvTranspose2d = dense GEMM over input pixels (K = Ci only, no
    dilated zeros) + phase-grouped col2im scatter + Pallas bias/activation."""
    N, H, W, Ci = x_nhwc.shape
    Co = wmat.shape[1] // (kh * kw)
    s = stride
    Hc, Wc = (H - 1) * s + kh, (W - 1) * s + kw          # un-cropped canvas
    Ho, Wo = Hc - 2 * padding, Wc - 2 * padding

    p = matmul_bias_act(x_nhwc.reshape(N * H * W, Ci), wmat,
                        jnp.zeros((kh * kw * Co,), jnp.float32), "none")
    p = p.reshape(N, H, W, kh, kw, Co)

    # TODO(synk): the col2im interleave below is JAX glue; it could be fused into a
    # Pallas kernel with manual DMA if it ever shows up as a bottleneck.
    canvas = jnp.zeros((N, Hc, Wc, Co), jnp.float32)
    for ph in range(s):
        taps_h = [dy for dy in range(kh) if dy % s == ph]
        for pw in range(s):
            taps_w = [dx for dx in range(kw) if dx % s == pw]
            g = jnp.zeros((N, H - 1 + len(taps_h), W - 1 + len(taps_w), Co), jnp.float32)
            for a_i, dy in enumerate(taps_h):
                for b_i, dx in enumerate(taps_w):
                    g = g.at[:, a_i:a_i + H, b_i:b_i + W, :].add(p[:, :, :, dy, dx, :])
            canvas = canvas.at[:, ph::s, pw::s, :].set(g)

    out = canvas[:, padding:padding + Ho, padding:padding + Wo, :]
    out = bias_act_rows(out.reshape(N * Ho * Wo, Co), bias, activation)
    return out.reshape(N, Ho, Wo, Co)


# ----------------------------------------------------------------------------
# Parameters (PyTorch layouts) and kernel-layout preparation
# ----------------------------------------------------------------------------
def init_params(key, S):
    FLAT = 128 * (S // 8) ** 2
    ks = jax.random.split(key, 18)

    def w(k, shape, fan_in):
        return jax.random.normal(k, shape, jnp.float32) / math.sqrt(fan_in)

    def b(k, n, fan_in):
        return jax.random.uniform(k, (n,), jnp.float32, -1.0, 1.0) / math.sqrt(fan_in)

    p = {}
    p["enc1_w"], p["enc1_b"] = w(ks[0], (32, 15, 3, 3), 15 * 9), b(ks[1], 32, 15 * 9)
    p["enc2_w"], p["enc2_b"] = w(ks[2], (64, 32, 3, 3), 32 * 9), b(ks[3], 64, 32 * 9)
    p["enc3_w"], p["enc3_b"] = w(ks[4], (128, 64, 3, 3), 64 * 9), b(ks[5], 128, 64 * 9)
    p["fc_mu_w"], p["fc_mu_b"] = w(ks[6], (LATENT, FLAT), FLAT), b(ks[7], LATENT, FLAT)
    p["fc_logvar_w"], p["fc_logvar_b"] = w(ks[8], (LATENT, FLAT), FLAT), b(ks[9], LATENT, FLAT)
    p["fc_decode_w"], p["fc_decode_b"] = w(ks[10], (FLAT, LATENT), LATENT), b(ks[11], FLAT, LATENT)
    p["dec1_w"], p["dec1_b"] = w(ks[12], (128, 64, 3, 3), 128 * 9), b(ks[13], 64, 128 * 9)
    p["dec2_w"], p["dec2_b"] = w(ks[14], (64, 32, 4, 4), 64 * 16), b(ks[15], 32, 64 * 16)
    p["dec3_w"], p["dec3_b"] = w(ks[16], (32, 15, 8, 8), 32 * 64), b(ks[17], 15, 32 * 64)
    return p


def prepare_kernel_params(p, He, We):
    """One-time ('offline') conversion of PyTorch-layout weights into the layouts
    the Pallas kernels consume: im2col matrices, NHWC-order fc weights, fused
    mu/logvar weight, bf16 weight storage (biases stay f32)."""
    kp = {}

    def conv_wmat(w):                       # [Co,Ci,kh,kw] -> [kh*kw*Ci, Co]
        Co, Ci, kh, kw = w.shape
        return jnp.transpose(w, (2, 3, 1, 0)).reshape(kh * kw * Ci, Co).astype(jnp.bfloat16)

    def convT_wmat(w):                      # [Ci,Co,kh,kw] -> [Ci, kh*kw*Co]
        Ci, Co, kh, kw = w.shape
        return jnp.transpose(w, (0, 2, 3, 1)).reshape(Ci, kh * kw * Co).astype(jnp.bfloat16)

    kp["enc1_w"], kp["enc1_b"] = conv_wmat(p["enc1_w"]), p["enc1_b"]
    kp["enc2_w"], kp["enc2_b"] = conv_wmat(p["enc2_w"]), p["enc2_b"]
    kp["enc3_w"], kp["enc3_b"] = conv_wmat(p["enc3_w"]), p["enc3_b"]

    def fc_in_perm(w):                      # [L, FLAT(c,h,w)] -> [FLAT(h,w,c), L]
        L = w.shape[0]
        return (w.T.reshape(128, He, We, L).transpose(1, 2, 0, 3)
                .reshape(He * We * 128, L))

    kp["fc_ml_w"] = jnp.concatenate(
        [fc_in_perm(p["fc_mu_w"]), fc_in_perm(p["fc_logvar_w"])], axis=1).astype(jnp.bfloat16)
    kp["fc_ml_b"] = jnp.concatenate([p["fc_mu_b"], p["fc_logvar_b"]])

    L = p["fc_decode_w"].shape[1]
    kp["fc_dec_w"] = (p["fc_decode_w"].T.reshape(L, 128, He, We)
                      .transpose(0, 2, 3, 1).reshape(L, 128 * He * We)).astype(jnp.bfloat16)
    kp["fc_dec_b"] = p["fc_decode_b"].reshape(128, He, We).transpose(1, 2, 0).reshape(-1)

    kp["dec1_w"], kp["dec1_b"] = convT_wmat(p["dec1_w"]), p["dec1_b"]
    kp["dec2_w"], kp["dec2_b"] = convT_wmat(p["dec2_w"]), p["dec2_b"]
    kp["dec3_w"], kp["dec3_b"] = convT_wmat(p["dec3_w"]), p["dec3_b"]
    return kp


# ----------------------------------------------------------------------------
# VAE forward (Pallas path) -- matches the PyTorch module semantics
# ----------------------------------------------------------------------------
@jax.jit
def vae_forward(kp, x_nchw, eps):
    N = x_nchw.shape[0]
    x = jnp.transpose(x_nchw, (0, 2, 3, 1))                      # NCHW -> NHWC (boundary)

    # encoder
    h = conv2d(x, kp["enc1_w"], kp["enc1_b"], 3, 3, 2, 1, "relu")
    h = conv2d(h, kp["enc2_w"], kp["enc2_b"], 3, 3, 2, 1, "relu")
    h = conv2d(h, kp["enc3_w"], kp["enc3_b"], 3, 3, 2, 1, "relu")
    He, We = h.shape[1], h.shape[2]

    # fused fc_mu + fc_logvar (weights pre-permuted to consume NHWC-flatten directly)
    h_flat = h.reshape(N, -1)
    ml = matmul_bias_act(h_flat, kp["fc_ml_w"], kp["fc_ml_b"], "none")
    L = ml.shape[1] // 2
    mu, logvar = ml[:, :L], ml[:, L:]

    # reparameterize: (N, L) elementwise -> plain JAX (a kernel launch is pure overhead)
    z = mu + eps * jnp.exp(0.5 * logvar)

    # decode (fc_decode weight pre-permuted to emit NHWC-flattened output directly)
    d = matmul_bias_act(z, kp["fc_dec_w"], kp["fc_dec_b"], "none")
    d = d.reshape(N, He, We, 128)

    d = conv_transpose2d(d, kp["dec1_w"], kp["dec1_b"], 3, 3, 2, 1, "relu")
    d = conv_transpose2d(d, kp["dec2_w"], kp["dec2_b"], 4, 4, 2, 1, "relu")
    d = conv_transpose2d(d, kp["dec3_w"], kp["dec3_b"], 8, 8, 2, 1, "sigmoid")

    x_rec = jnp.transpose(d, (0, 3, 1, 2))                       # NHWC -> NCHW (boundary)
    return x_rec, mu, logvar


# ----------------------------------------------------------------------------
# Pure-JAX f32 reference of the same module (for the correctness check)
# ----------------------------------------------------------------------------
def reference_forward(p, x_nchw, eps):
    relu = jax.nn.relu

    def conv(x, w, b, s, pad):
        y = jax.lax.conv_general_dilated(
            x, w, (s, s), [(pad, pad), (pad, pad)],
            dimension_numbers=("NCHW", "OIHW", "NCHW"))
        return y + b.reshape(1, -1, 1, 1)

    def convT(x, w, b, s, pad):
        kh, kw = w.shape[2], w.shape[3]
        w2 = jnp.transpose(jnp.flip(w, (2, 3)), (1, 0, 2, 3))    # [Co,Ci,kh,kw]
        y = jax.lax.conv_general_dilated(
            x, w2, (1, 1),
            [(kh - 1 - pad, kh - 1 - pad), (kw - 1 - pad, kw - 1 - pad)],
            lhs_dilation=(s, s), dimension_numbers=("NCHW", "OIHW", "NCHW"))
        return y + b.reshape(1, -1, 1, 1)

    N = x_nchw.shape[0]
    h = relu(conv(x_nchw, p["enc1_w"], p["enc1_b"], 2, 1))
    h = relu(conv(h, p["enc2_w"], p["enc2_b"], 2, 1))
    h = relu(conv(h, p["enc3_w"], p["enc3_b"], 2, 1))
    He, We = h.shape[2], h.shape[3]
    hf = h.reshape(N, -1)
    mu = hf @ p["fc_mu_w"].T + p["fc_mu_b"]
    logvar = hf @ p["fc_logvar_w"].T + p["fc_logvar_b"]
    z = mu + eps * jnp.exp(0.5 * logvar)
    d = (z @ p["fc_decode_w"].T + p["fc_decode_b"]).reshape(N, 128, He, We)
    d = relu(convT(d, p["dec1_w"], p["dec1_b"], 2, 1))
    d = relu(convT(d, p["dec2_w"], p["dec2_b"], 2, 1))
    d = jax.nn.sigmoid(convT(d, p["dec3_w"], p["dec3_b"], 2, 1))
    return d, mu, logvar


if __name__ == "__main__":
    key = jax.random.PRNGKey(0)
    k_param, k_x, k_eps = jax.random.split(key, 3)

    # Small, fast shapes consistent with the module: 15-channel 32x32 input
    # (same architecture; FLAT = 128*(32/8)^2 = 2048 instead of the 256x256 case).
    N, S = 2, 32
    params = init_params(k_param, S)
    kparams = prepare_kernel_params(params, S // 8, S // 8)

    x = jax.random.uniform(k_x, (N, 15, S, S), jnp.float32)
    eps = jax.random.normal(k_eps, (N, LATENT), jnp.float32)     # torch.randn_like(std)

    x_rec, mu, logvar = vae_forward(kparams, x, eps)
    jax.block_until_ready((x_rec, mu, logvar))

    # shape / sanity checks
    assert x_rec.shape == (N, 15, S, S), x_rec.shape
    assert mu.shape == (N, LATENT) and logvar.shape == (N, LATENT)
    assert bool(jnp.all(jnp.isfinite(x_rec))) and bool(jnp.all(jnp.isfinite(mu)))
    assert bool(jnp.all((x_rec >= 0.0) & (x_rec <= 1.0)))

    # numerical check against a pure-JAX reference of the same module
    xr_ref, mu_ref, lv_ref = reference_forward(params, x, eps)
    assert float(jnp.max(jnp.abs(mu - mu_ref))) < 3e-2
    assert float(jnp.max(jnp.abs(logvar - lv_ref))) < 3e-2
    assert float(jnp.max(jnp.abs(x_rec - xr_ref))) < 5e-2

    print("KERNEL_OK")
</pallas_src>

<mosaic_0001>
module attributes {stable_mosaic.version = 11 : i64} {
  func.func @_matmul_bias_act_kernel(%arg0: i32, %arg1: i32, %arg2: i32, %arg3: memref<512x135xbf16, #tpu.memory_space<vmem>>, %arg4: memref<135x32xbf16, #tpu.memory_space<vmem>>, %arg5: memref<1x32xf32, #tpu.memory_space<vmem>>, %arg6: memref<512x32xf32, #tpu.memory_space<vmem>>, %arg7: memref<512x32xf32, #tpu.memory_space<vmem>>) attributes {dimension_semantics = [#tpu.dimension_semantics<parallel>, #tpu.dimension_semantics<parallel>, #tpu.dimension_semantics<arbitrary>], iteration_bounds = array<i64: 1, 1, 1>, scalar_prefetch = 0 : i64, scratch_operands = 1 : i64, tpu.core_type = #tpu.core_type<tc>, window_params = [{transform_indices = @transform_0, window_bounds = array<i64: 512, 135>}, {transform_indices = @transform_1, window_bounds = array<i64: 135, 32>}, {transform_indices = @transform_2, window_bounds = array<i64: 1, 32>}, {transform_indices = @transform_3, window_bounds = array<i64: 512, 32>}]} {
    %c0_i32 = arith.constant 0 : i32
    %0 = arith.cmpi eq, %arg2, %c0_i32 : i32
    %1 = arith.extui %0 : i1 to i32
    %c0_i32_0 = arith.constant 0 : i32
    %2 = arith.cmpi ne, %1, %c0_i32_0 : i32
    scf.if %2 {
      %cst_10 = arith.constant 0.000000e+00 : f32
      %12 = vector.broadcast %cst_10 : f32 to vector<512x32xf32>
      %c0_11 = arith.constant 0 : index
      %c0_12 = arith.constant 0 : index
      %13 = vector.load %arg7[%c0_11, %c0_12] : memref<512x32xf32, #tpu.memory_space<vmem>>, vector<512x32xf32>
      tpu.vector_store %arg7[%c0_11, %c0_12], %12 {strides = array<i32>} : memref<512x32xf32, #tpu.memory_space<vmem>>, vector<512x32xf32>,
    } else {
    }
    %c0 = arith.constant 0 : index
    %c0_1 = arith.constant 0 : index
    %3 = vector.load %arg7[%c0, %c0_1] : memref<512x32xf32, #tpu.memory_space<vmem>>, vector<512x32xf32>
    %c0_2 = arith.constant 0 : index
    %c0_3 = arith.constant 0 : index
    %4 = vector.load %arg3[%c0_2, %c0_3] : memref<512x135xbf16, #tpu.memory_space<vmem>>, vector<512x135xbf16>
    %c0_4 = arith.constant 0 : index
    %c0_5 = arith.constant 0 : index
    %5 = vector.load %arg4[%c0_4, %c0_5] : memref<135x32xbf16, #tpu.memory_space<vmem>>, vector<135x32xbf16>
    %cst = arith.constant dense<0.000000e+00> : vector<512x32xf32>
    %6 = tpu.matmul %4, %5, %cst {dimension_numbers = #tpu.dot_dimension_numbers<[1], [0], [0], [1], [0, 0, 1, 1], [], []>} : vector<512x135xbf16>, vector<135x32xbf16>, vector<512x32xf32> -> vector<512x32xf32>
    %7 = arith.addf %3, %6 : vector<512x32xf32>
    %c0_6 = arith.constant 0 : index
    %c0_7 = arith.constant 0 : index
    %8 = vector.load %arg7[%c0_6, %c0_7] : memref<512x32xf32, #tpu.memory_space<vmem>>, vector<512x32xf32>
    tpu.vector_store %arg7[%c0_6, %c0_7], %7 {strides = array<i32>} : memref<512x32xf32, #tpu.memory_space<vmem>>, vector<512x32xf32>,
    %c0_i32_8 = arith.constant 0 : i32
    %9 = arith.cmpi eq, %arg2, %c0_i32_8 : i32
    %10 = arith.extui %9 : i1 to i32
    %c0_i32_9 = arith.constant 0 : i32
    %11 = arith.cmpi ne, %10, %c0_i32_9 : i32
    scf.if %11 {
      %c0_10 = arith.constant 0 : index
      %c0_11 = arith.constant 0 : index
      %12 = vector.load %arg7[%c0_10, %c0_11] : memref<512x32xf32, #tpu.memory_space<vmem>>, vector<512x32xf32>
      %c0_12 = arith.constant 0 : index
      %c0_13 = arith.constant 0 : index
      %13 = vector.load %arg5[%c0_12, %c0_13] : memref<1x32xf32, #tpu.memory_space<vmem>>, vector<1x32xf32>
      %14 = vector.broadcast %13 : vector<1x32xf32> to vector<512x32xf32>
      %15 = arith.addf %12, %14 : vector<512x32xf32>
      %cst_14 = arith.constant 0.000000e+00 : f32
      %16 = vector.broadcast %cst_14 : f32 to vector<512x32xf32>
      %17 = arith.maximumf %15, %16 : vector<512x32xf32>
      %c0_15 = arith.constant 0 : index
      %c0_16 = arith.constant 0 : index
      %18 = vector.load %arg6[%c0_15, %c0_16] : memref<512x32xf32, #tpu.memory_space<vmem>>, vector<512x32xf32>
      tpu.vector_store %arg6[%c0_15, %c0_16], %17 {strides = array<i32>} : memref<512x32xf32, #tpu.memory_space<vmem>>, vector<512x32xf32>,
    } else {
    }
    return
  }
  func.func @transform_0(%arg0: i32, %arg1: i32, %arg2: i32) -> (i32, i32) {
    %c0_i32 = arith.constant 0 : i32
    return %arg0, %arg2 : i32, i32
  }
  func.func @transform_1(%arg0: i32, %arg1: i32, %arg2: i32) -> (i32, i32) {
    %c0_i32 = arith.constant 0 : i32
    return %arg2, %arg1 : i32, i32
  }
  func.func @transform_2(%arg0: i32, %arg1: i32, %arg2: i32) -> (i32, i32) {
    %c0_i32 = arith.constant 0 : i32
    %c0_i32_0 = arith.constant 0 : i32
    return %c0_i32, %arg1 : i32, i32
  }
  func.func @transform_3(%arg0: i32, %arg1: i32, %arg2: i32) -> (i32, i32) {
    %c0_i32 = arith.constant 0 : i32
    return %arg0, %arg1 : i32, i32
  }
}

module attributes {stable_mosaic.version = 11 : i64} {
  func.func @_matmul_bias_act_kernel(%arg0: i32, %arg1: i32, %arg2: i32, %arg3: memref<128x288xbf16, #tpu.memory_space<vmem>>, %arg4: memref<288x64xbf16, #tpu.memory_space<vmem>>, %arg5: memref<1x64xf32, #tpu.memory_space<vmem>>, %arg6: memref<128x64xf32, #tpu.memory_space<vmem>>, %arg7: memref<128x64xf32, #tpu.memory_space<vmem>>) attributes {dimension_semantics = [#tpu.dimension_semantics<parallel>, #tpu.dimension_semantics<parallel>, #tpu.dimension_semantics<arbitrary>], iteration_bounds = array<i64: 1, 1, 1>, scalar_prefetch = 0 : i64, scratch_operands = 1 : i64, tpu.core_type = #tpu.core_type<tc>, window_params = [{transform_indices = @transform_0, window_bounds = array<i64: 128, 288>}, {transform_indices = @transform_1, window_bounds = array<i64: 288, 64>}, {transform_indices = @transform_2, window_bounds = array<i64: 1, 64>}, {transform_indices = @transform_3, window_bounds = array<i64: 128, 64>}]} {
    %c0_i32 = arith.constant 0 : i32
    %0 = arith.cmpi eq, %arg2, %c0_i32 : i32
    %1 = arith.extui %0 : i1 to i32
    %c0_i32_0 = arith.constant 0 : i32
    %2 = arith.cmpi ne, %1, %c0_i32_0 : i32
    scf.if %2 {
      %cst_10 = arith.constant 0.000000e+00 : f32
      %12 = vector.broadcast %cst_10 : f32 to vector<128x64xf32>
      %c0_11 = arith.constant 0 : index
      %c0_12 = arith.constant 0 : index
      %13 = vector.load %arg7[%c0_11, %c0_12] : memref<128x64xf32, #tpu.memory_space<vmem>>, vector<128x64xf32>
      tpu.vector_store %arg7[%c0_11, %c0_12], %12 {strides = array<i32>} : memref<128x64xf32, #tpu.memory_space<vmem>>, vector<128x64xf32>,
    } else {
    }
    %c0 = arith.constant 0 : index
    %c0_1 = arith.constant 0 : index
    %3 = vector.load %arg7[%c0, %c0_1] : memref<128x64xf32, #tpu.memory_space<vmem>>, vector<128x64xf32>
    %c0_2 = arith.constant 0 : index
    %c0_3 = arith.constant 0 : index
    %4 = vector.load %arg3[%c0_2, %c0_3] : memref<128x288xbf16, #tpu.memory_space<vmem>>, vector<128x288xbf16>
    %c0_4 = arith.constant 0 : index
    %c0_5 = arith.constant 0 : index
    %5 = vector.load %arg4[%c0_4, %c0_5] : memref<288x64xbf16, #tpu.memory_space<vmem>>, vector<288x64xbf16>
    %cst = arith.constant dense<0.000000e+00> : vector<128x64xf32>
    %6 = tpu.matmul %4, %5, %cst {dimension_numbers = #tpu.dot_dimension_numbers<[1], [0], [0], [1], [0, 0, 1, 1], [], []>} : vector<128x288xbf16>, vector<288x64xbf16>, vector<128x64xf32> -> vector<128x64xf32>
    %7 = arith.addf %3, %6 : vector<128x64xf32>
    %c0_6 = arith.constant 0 : index
    %c0_7 = arith.constant 0 : index
    %8 = vector.load %arg7[%c0_6, %c0_7] : memref<128x64xf32, #tpu.memory_space<vmem>>, vector<128x64xf32>
    tpu.vector_store %arg7[%c0_6, %c0_7], %7 {strides = array<i32>} : memref<128x64xf32, #tpu.memory_space<vmem>>, vector<128x64xf32>,
    %c0_i32_8 = arith.constant 0 : i32
    %9 = arith.cmpi eq, %arg2, %c0_i32_8 : i32
    %10 = arith.extui %9 : i1 to i32
    %c0_i32_9 = arith.constant 0 : i32
    %11 = arith.cmpi ne, %10, %c0_i32_9 : i32
    scf.if %11 {
      %c0_10 = arith.constant 0 : index
      %c0_11 = arith.constant 0 : index
      %12 = vector.load %arg7[%c0_10, %c0_11] : memref<128x64xf32, #tpu.memory_space<vmem>>, vector<128x64xf32>
      %c0_12 = arith.constant 0 : index
      %c0_13 = arith.constant 0 : index
      %13 = vector.load %arg5[%c0_12, %c0_13] : memref<1x64xf32, #tpu.memory_space<vmem>>, vector<1x64xf32>
      %14 = vector.broadcast %13 : vector<1x64xf32> to vector<128x64xf32>
      %15 = arith.addf %12, %14 : vector<128x64xf32>
      %cst_14 = arith.constant 0.000000e+00 : f32
      %16 = vector.broadcast %cst_14 : f32 to vector<128x64xf32>
      %17 = arith.maximumf %15, %16 : vector<128x64xf32>
      %c0_15 = arith.constant 0 : index
      %c0_16 = arith.constant 0 : index
      %18 = vector.load %arg6[%c0_15, %c0_16] : memref<128x64xf32, #tpu.memory_space<vmem>>, vector<128x64xf32>
      tpu.vector_store %arg6[%c0_15, %c0_16], %17 {strides = array<i32>} : memref<128x64xf32, #tpu.memory_space<vmem>>, vector<128x64xf32>,
    } else {
    }
    return
  }
  func.func @transform_0(%arg0: i32, %arg1: i32, %arg2: i32) -> (i32, i32) {
    %c0_i32 = arith.constant 0 : i32
    return %arg0, %arg2 : i32, i32
  }
  func.func @transform_1(%arg0: i32, %arg1: i32, %arg2: i32) -> (i32, i32) {
    %c0_i32 = arith.constant 0 : i32
    return %arg2, %arg1 : i32, i32
  }
  func.func @transform_2(%arg0: i32, %arg1: i32, %arg2: i32) -> (i32, i32) {
    %c0_i32 = arith.constant 0 : i32
    %c0_i32_0 = arith.constant 0 : i32
    return %c0_i32, %arg1 : i32, i32
  }
  func.func @transform_3(%arg0: i32, %arg1: i32, %arg2: i32) -> (i32, i32) {
    %c0_i32 = arith.constant 0 : i32
    return %arg0, %arg1 : i32, i32
  }
}

module attributes {stable_mosaic.version = 11 : i64} {
  func.func @_matmul_bias_act_kernel(%arg0: i32, %arg1: i32, %arg2: i32, %arg3: memref<32x576xbf16, #tpu.memory_space<vmem>>, %arg4: memref<576x128xbf16, #tpu.memory_space<vmem>>, %arg5: memref<1x128xf32, #tpu.memory_space<vmem>>, %arg6: memref<32x128xf32, #tpu.memory_space<vmem>>, %arg7: memref<32x128xf32, #tpu.memory_space<vmem>>) attributes {dimension_semantics = [#tpu.dimension_semantics<parallel>, #tpu.dimension_semantics<parallel>, #tpu.dimension_semantics<arbitrary>], iteration_bounds = array<i64: 1, 1, 1>, scalar_prefetch = 0 : i64, scratch_operands = 1 : i64, tpu.core_type = #tpu.core_type<tc>, window_params = [{transform_indices = @transform_0, window_bounds = array<i64: 32, 576>}, {transform_indices = @transform_1, window_bounds = array<i64: 576, 128>}, {transform_indices = @transform_2, window_bounds = array<i64: 1, 128>}, {transform_indices = @transform_3, window_bounds = array<i64: 32, 128>}]} {
    %c0_i32 = arith.constant 0 : i32
    %0 = arith.cmpi eq, %arg2, %c0_i32 : i32
    %1 = arith.extui %0 : i1 to i32
    %c0_i32_0 = arith.constant 0 : i32
    %2 = arith.cmpi ne, %1, %c0_i32_0 : i32
    scf.if %2 {
      %cst_10 = arith.constant 0.000000e+00 : f32
      %12 = vector.broadcast %cst_10 : f32 to vector<32x128xf32>
      %c0_11 = arith.constant 0 : index
      %c0_12 = arith.constant 0 : index
      %13 = vector.load %arg7[%c0_11, %c0_12] : memref<32x128xf32, #tpu.memory_space<vmem>>, vector<32x128xf32>
      tpu.vector_store %arg7[%c0_11, %c0_12], %12 {strides = array<i32>} : memref<32x128xf32, #tpu.memory_space<vmem>>, vector<32x128xf32>,
    } else {
    }
    %c0 = arith.constant 0 : index
    %c0_1 = arith.constant 0 : index
    %3 = vector.load %arg7[%c0, %c0_1] : memref<32x128xf32, #tpu.memory_space<vmem>>, vector<32x128xf32>
    %c0_2 = arith.constant 0 : index
    %c0_3 = arith.constant 0 : index
    %4 = vector.load %arg3[%c0_2, %c0_3] : memref<32x576xbf16, #tpu.memory_space<vmem>>, vector<32x576xbf16>
    %c0_4 = arith.constant 0 : index
    %c0_5 = arith.constant 0 : index
    %5 = vector.load %arg4[%c0_4, %c0_5] : memref<576x128xbf16, #tpu.memory_space<vmem>>, vector<576x128xbf16>
    %cst = arith.constant dense<0.000000e+00> : vector<32x128xf32>
    %6 = tpu.matmul %4, %5, %cst {dimension_numbers = #tpu.dot_dimension_numbers<[1], [0], [0], [1], [0, 0, 1, 1], [], []>} : vector<32x576xbf16>, vector<576x128xbf16>, vector<32x128xf32> -> vector<32x128xf32>
    %7 = arith.addf %3, %6 : vector<32x128xf32>
    %c0_6 = arith.constant 0 : index
    %c0_7 = arith.constant 0 : index
    %8 = vector.load %arg7[%c0_6, %c0_7] : memref<32x128xf32, #tpu.memory_space<vmem>>, vector<32x128xf32>
    tpu.vector_store %arg7[%c0_6, %c0_7], %7 {strides = array<i32>} : memref<32x128xf32, #tpu.memory_space<vmem>>, vector<32x128xf32>,
    %c0_i32_8 = arith.constant 0 : i32
    %9 = arith.cmpi eq, %arg2, %c0_i32_8 : i32
    %10 = arith.extui %9 : i1 to i32
    %c0_i32_9 = arith.constant 0 : i32
    %11 = arith.cmpi ne, %10, %c0_i32_9 : i32
    scf.if %11 {
      %c0_10 = arith.constant 0 : index
      %c0_11 = arith.constant 0 : index
      %12 = vector.load %arg7[%c0_10, %c0_11] : memref<32x128xf32, #tpu.memory_space<vmem>>, vector<32x128xf32>
      %c0_12 = arith.constant 0 : index
      %c0_13 = arith.constant 0 : index
      %13 = vector.load %arg5[%c0_12, %c0_13] : memref<1x128xf32, #tpu.memory_space<vmem>>, vector<1x128xf32>
      %14 = vector.broadcast %13 : vector<1x128xf32> to vector<32x128xf32>
      %15 = arith.addf %12, %14 : vector<32x128xf32>
      %cst_14 = arith.constant 0.000000e+00 : f32
      %16 = vector.broadcast %cst_14 : f32 to vector<32x128xf32>
      %17 = arith.maximumf %15, %16 : vector<32x128xf32>
      %c0_15 = arith.constant 0 : index
      %c0_16 = arith.constant 0 : index
      %18 = vector.load %arg6[%c0_15, %c0_16] : memref<32x128xf32, #tpu.memory_space<vmem>>, vector<32x128xf32>
      tpu.vector_store %arg6[%c0_15, %c0_16], %17 {strides = array<i32>} : memref<32x128xf32, #tpu.memory_space<vmem>>, vector<32x128xf32>,
    } else {
    }
    return
  }
  func.func @transform_0(%arg0: i32, %arg1: i32, %arg2: i32) -> (i32, i32) {
    %c0_i32 = arith.constant 0 : i32
    return %arg0, %arg2 : i32, i32
  }
  func.func @transform_1(%arg0: i32, %arg1: i32, %arg2: i32) -> (i32, i32) {
    %c0_i32 = arith.constant 0 : i32
    return %arg2, %arg1 : i32, i32
  }
  func.func @transform_2(%arg0: i32, %arg1: i32, %arg2: i32) -> (i32, i32) {
    %c0_i32 = arith.constant 0 : i32
    %c0_i32_0 = arith.constant 0 : i32
    return %c0_i32, %arg1 : i32, i32
  }
  func.func @transform_3(%arg0: i32, %arg1: i32, %arg2: i32) -> (i32, i32) {
    %c0_i32 = arith.constant 0 : i32
    return %arg0, %arg1 : i32, i32
  }
}

module attributes {stable_mosaic.version = 11 : i64} {
  func.func @_matmul_bias_act_kernel(%arg0: i32, %arg1: i32, %arg2: i32, %arg3: memref<2x1024xbf16, #tpu.memory_space<vmem>>, %arg4: memref<1024x64xbf16, #tpu.memory_space<vmem>>, %arg5: memref<1x64xf32, #tpu.memory_space<vmem>>, %arg6: memref<2x64xf32, #tpu.memory_space<vmem>>, %arg7: memref<2x64xf32, #tpu.memory_space<vmem>>) attributes {dimension_semantics = [#tpu.dimension_semantics<parallel>, #tpu.dimension_semantics<parallel>, #tpu.dimension_semantics<arbitrary>], iteration_bounds = array<i64: 1, 1, 2>, scalar_prefetch = 0 : i64, scratch_operands = 1 : i64, tpu.core_type = #tpu.core_type<tc>, window_params = [{transform_indices = @transform_0, window_bounds = array<i64: 2, 1024>}, {transform_indices = @transform_1, window_bounds = array<i64: 1024, 64>}, {transform_indices = @transform_2, window_bounds = array<i64: 1, 64>}, {transform_indices = @transform_3, window_bounds = array<i64: 2, 64>}]} {
    %c0_i32 = arith.constant 0 : i32
    %0 = arith.cmpi eq, %arg2, %c0_i32 : i32
    %1 = arith.extui %0 : i1 to i32
    %c0_i32_0 = arith.constant 0 : i32
    %2 = arith.cmpi ne, %1, %c0_i32_0 : i32
    scf.if %2 {
      %cst_9 = arith.constant 0.000000e+00 : f32
      %12 = vector.broadcast %cst_9 : f32 to vector<2x64xf32>
      %c0_10 = arith.constant 0 : index
      %c0_11 = arith.constant 0 : index
      %13 = vector.load %arg7[%c0_10, %c0_11] : memref<2x64xf32, #tpu.memory_space<vmem>>, vector<2x64xf32>
      tpu.vector_store %arg7[%c0_10, %c0_11], %12 {strides = array<i32>} : memref<2x64xf32, #tpu.memory_space<vmem>>, vector<2x64xf32>,
    } else {
    }
    %c0 = arith.constant 0 : index
    %c0_1 = arith.constant 0 : index
    %3 = vector.load %arg7[%c0, %c0_1] : memref<2x64xf32, #tpu.memory_space<vmem>>, vector<2x64xf32>
    %c0_2 = arith.constant 0 : index
    %c0_3 = arith.constant 0 : index
    %4 = vector.load %arg3[%c0_2, %c0_3] : memref<2x1024xbf16, #tpu.memory_space<vmem>>, vector<2x1024xbf16>
    %c0_4 = arith.constant 0 : index
    %c0_5 = arith.constant 0 : index
    %5 = vector.load %arg4[%c0_4, %c0_5] : memref<1024x64xbf16, #tpu.memory_space<vmem>>, vector<1024x64xbf16>
    %cst = arith.constant dense<0.000000e+00> : vector<2x64xf32>
    %6 = tpu.matmul %4, %5, %cst {dimension_numbers = #tpu.dot_dimension_numbers<[1], [0], [0], [1], [0, 0, 1, 1], [], []>} : vector<2x1024xbf16>, vector<1024x64xbf16>, vector<2x64xf32> -> vector<2x64xf32>
    %7 = arith.addf %3, %6 : vector<2x64xf32>
    %c0_6 = arith.constant 0 : index
    %c0_7 = arith.constant 0 : index
    %8 = vector.load %arg7[%c0_6, %c0_7] : memref<2x64xf32, #tpu.memory_space<vmem>>, vector<2x64xf32>
    tpu.vector_store %arg7[%c0_6, %c0_7], %7 {strides = array<i32>} : memref<2x64xf32, #tpu.memory_space<vmem>>, vector<2x64xf32>,
    %c1_i32 = arith.constant 1 : i32
    %9 = arith.cmpi eq, %arg2, %c1_i32 : i32
    %10 = arith.extui %9 : i1 to i32
    %c0_i32_8 = arith.constant 0 : i32
    %11 = arith.cmpi ne, %10, %c0_i32_8 : i32
    scf.if %11 {
      %c0_9 = arith.constant 0 : index
      %c0_10 = arith.constant 0 : index
      %12 = vector.load %arg7[%c0_9, %c0_10] : memref<2x64xf32, #tpu.memory_space<vmem>>, vector<2x64xf32>
      %c0_11 = arith.constant 0 : index
      %c0_12 = arith.constant 0 : index
      %13 = vector.load %arg5[%c0_11, %c0_12] : memref<1x64xf32, #tpu.memory_space<vmem>>, vector<1x64xf32>
      %14 = vector.broadcast %13 : vector<1x64xf32> to vector<2x64xf32>
      %15 = arith.addf %12, %14 : vector<2x64xf32>
      %c0_13 = arith.constant 0 : index
      %c0_14 = arith.constant 0 : index
      %16 = vector.load %arg6[%c0_13, %c0_14] : memref<2x64xf32, #tpu.memory_space<vmem>>, vector<2x64xf32>
      tpu.vector_store %arg6[%c0_13, %c0_14], %15 {strides = array<i32>} : memref<2x64xf32, #tpu.memory_space<vmem>>, vector<2x64xf32>,
    } else {
    }
    return
  }
  func.func @transform_0(%arg0: i32, %arg1: i32, %arg2: i32) -> (i32, i32) {
    %c0_i32 = arith.constant 0 : i32
    return %arg0, %arg2 : i32, i32
  }
  func.func @transform_1(%arg0: i32, %arg1: i32, %arg2: i32) -> (i32, i32) {
    %c0_i32 = arith.constant 0 : i32
    return %arg2, %arg1 : i32, i32
  }
  func.func @transform_2(%arg0: i32, %arg1: i32, %arg2: i32) -> (i32, i32) {
    %c0_i32 = arith.constant 0 : i32
    %c0_i32_0 = arith.constant 0 : i32
    return %c0_i32, %arg1 : i32, i32
  }
  func.func @transform_3(%arg0: i32, %arg1: i32, %arg2: i32) -> (i32, i32) {
    %c0_i32 = arith.constant 0 : i32
    return %arg0, %arg1 : i32, i32
  }
}

module attributes {stable_mosaic.version = 11 : i64} {
  func.func @_matmul_bias_act_kernel(%arg0: i32, %arg1: i32, %arg2: i32, %arg3: memref<2x32xbf16, #tpu.memory_space<vmem>>, %arg4: memref<32x512xbf16, #tpu.memory_space<vmem>>, %arg5: memref<1x512xf32, #tpu.memory_space<vmem>>, %arg6: memref<2x512xf32, #tpu.memory_space<vmem>>, %arg7: memref<2x512xf32, #tpu.memory_space<vmem>>) attributes {dimension_semantics = [#tpu.dimension_semantics<parallel>, #tpu.dimension_semantics<parallel>, #tpu.dimension_semantics<arbitrary>], iteration_bounds = array<i64: 1, 4, 1>, scalar_prefetch = 0 : i64, scratch_operands = 1 : i64, tpu.core_type = #tpu.core_type<tc>, window_params = [{transform_indices = @transform_0, window_bounds = array<i64: 2, 32>}, {transform_indices = @transform_1, window_bounds = array<i64: 32, 512>}, {transform_indices = @transform_2, window_bounds = array<i64: 1, 512>}, {transform_indices = @transform_3, window_bounds = array<i64: 2, 512>}]} {
    %c0_i32 = arith.constant 0 : i32
    %0 = arith.cmpi eq, %arg2, %c0_i32 : i32
    %1 = arith.extui %0 : i1 to i32
    %c0_i32_0 = arith.constant 0 : i32
    %2 = arith.cmpi ne, %1, %c0_i32_0 : i32
    scf.if %2 {
      %cst_10 = arith.constant 0.000000e+00 : f32
      %12 = vector.broadcast %cst_10 : f32 to vector<2x512xf32>
      %c0_11 = arith.constant 0 : index
      %c0_12 = arith.constant 0 : index
      %13 = vector.load %arg7[%c0_11, %c0_12] : memref<2x512xf32, #tpu.memory_space<vmem>>, vector<2x512xf32>
      tpu.vector_store %arg7[%c0_11, %c0_12], %12 {strides = array<i32>} : memref<2x512xf32, #tpu.memory_space<vmem>>, vector<2x512xf32>,
    } else {
    }
    %c0 = arith.constant 0 : index
    %c0_1 = arith.constant 0 : index
    %3 = vector.load %arg7[%c0, %c0_1] : memref<2x512xf32, #tpu.memory_space<vmem>>, vector<2x512xf32>
    %c0_2 = arith.constant 0 : index
    %c0_3 = arith.constant 0 : index
    %4 = vector.load %arg3[%c0_2, %c0_3] : memref<2x32xbf16, #tpu.memory_space<vmem>>, vector<2x32xbf16>
    %c0_4 = arith.constant 0 : index
    %c0_5 = arith.constant 0 : index
    %5 = vector.load %arg4[%c0_4, %c0_5] : memref<32x512xbf16, #tpu.memory_space<vmem>>, vector<32x512xbf16>
    %cst = arith.constant dense<0.000000e+00> : vector<2x512xf32>
    %6 = tpu.matmul %4, %5, %cst {dimension_numbers = #tpu.dot_dimension_numbers<[1], [0], [0], [1], [0, 0, 1, 1], [], []>} : vector<2x32xbf16>, vector<32x512xbf16>, vector<2x512xf32> -> vector<2x512xf32>
    %7 = arith.addf %3, %6 : vector<2x512xf32>
    %c0_6 = arith.constant 0 : index
    %c0_7 = arith.constant 0 : index
    %8 = vector.load %arg7[%c0_6, %c0_7] : memref<2x512xf32, #tpu.memory_space<vmem>>, vector<2x512xf32>
    tpu.vector_store %arg7[%c0_6, %c0_7], %7 {strides = array<i32>} : memref<2x512xf32, #tpu.memory_space<vmem>>, vector<2x512xf32>,
    %c0_i32_8 = arith.constant 0 : i32
    %9 = arith.cmpi eq, %arg2, %c0_i32_8 : i32
    %10 = arith.extui %9 : i1 to i32
    %c0_i32_9 = arith.constant 0 : i32
    %11 = arith.cmpi ne, %10, %c0_i32_9 : i32
    scf.if %11 {
      %c0_10 = arith.constant 0 : index
      %c0_11 = arith.constant 0 : index
      %12 = vector.load %arg7[%c0_10, %c0_11] : memref<2x512xf32, #tpu.memory_space<vmem>>, vector<2x512xf32>
      %c0_12 = arith.constant 0 : index
      %c0_13 = arith.constant 0 : index
      %13 = vector.load %arg5[%c0_12, %c0_13] : memref<1x512xf32, #tpu.memory_space<vmem>>, vector<1x512xf32>
      %14 = vector.broadcast %13 : vector<1x512xf32> to vector<2x512xf32>
      %15 = arith.addf %12, %14 : vector<2x512xf32>
      %c0_14 = arith.constant 0 : index
      %c0_15 = arith.constant 0 : index
      %16 = vector.load %arg6[%c0_14, %c0_15] : memref<2x512xf32, #tpu.memory_space<vmem>>, vector<2x512xf32>
      tpu.vector_store %arg6[%c0_14, %c0_15], %15 {strides = array<i32>} : memref<2x512xf32, #tpu.memory_space<vmem>>, vector<2x512xf32>,
    } else {
    }
    return
  }
  func.func @transform_0(%arg0: i32, %arg1: i32, %arg2: i32) -> (i32, i32) {
    %c0_i32 = arith.constant 0 : i32
    return %arg0, %arg2 : i32, i32
  }
  func.func @transform_1(%arg0: i32, %arg1: i32, %arg2: i32) -> (i32, i32) {
    %c0_i32 = arith.constant 0 : i32
    return %arg2, %arg1 : i32, i32
  }
  func.func @transform_2(%arg0: i32, %arg1: i32, %arg2: i32) -> (i32, i32) {
    %c0_i32 = arith.constant 0 : i32
    %c0_i32_0 = arith.constant 0 : i32
    return %c0_i32, %arg1 : i32, i32
  }
  func.func @transform_3(%arg0: i32, %arg1: i32, %arg2: i32) -> (i32, i32) {
    %c0_i32 = arith.constant 0 : i32
    return %arg0, %arg1 : i32, i32
  }
}

module attributes {stable_mosaic.version = 11 : i64} {
  func.func @_matmul_bias_act_kernel(%arg0: i32, %arg1: i32, %arg2: i32, %arg3: memref<32x128xbf16, #tpu.memory_space<vmem>>, %arg4: memref<128x576xbf16, #tpu.memory_space<vmem>>, %arg5: memref<1x576xf32, #tpu.memory_space<vmem>>, %arg6: memref<32x576xf32, #tpu.memory_space<vmem>>, %arg7: memref<32x576xf32, #tpu.memory_space<vmem>>) attributes {dimension_semantics = [#tpu.dimension_semantics<parallel>, #tpu.dimension_semantics<parallel>, #tpu.dimension_semantics<arbitrary>], iteration_bounds = array<i64: 1, 1, 1>, scalar_prefetch = 0 : i64, scratch_operands = 1 : i64, tpu.core_type = #tpu.core_type<tc>, window_params = [{transform_indices = @transform_0, window_bounds = array<i64: 32, 128>}, {transform_indices = @transform_1, window_bounds = array<i64: 128, 576>}, {transform_indices = @transform_2, window_bounds = array<i64: 1, 576>}, {transform_indices = @transform_3, window_bounds = array<i64: 32, 576>}]} {
    %c0_i32 = arith.constant 0 : i32
    %0 = arith.cmpi eq, %arg2, %c0_i32 : i32
    %1 = arith.extui %0 : i1 to i32
    %c0_i32_0 = arith.constant 0 : i32
    %2 = arith.cmpi ne, %1, %c0_i32_0 : i32
    scf.if %2 {
      %cst_10 = arith.constant 0.000000e+00 : f32
      %12 = vector.broadcast %cst_10 : f32 to vector<32x576xf32>
      %c0_11 = arith.constant 0 : index
      %c0_12 = arith.constant 0 : index
      %13 = vector.load %arg7[%c0_11, %c0_12] : memref<32x576xf32, #tpu.memory_space<vmem>>, vector<32x576xf32>
      tpu.vector_store %arg7[%c0_11, %c0_12], %12 {strides = array<i32>} : memref<32x576xf32, #tpu.memory_space<vmem>>, vector<32x576xf32>,
    } else {
    }
    %c0 = arith.constant 0 : index
    %c0_1 = arith.constant 0 : index
    %3 = vector.load %arg7[%c0, %c0_1] : memref<32x576xf32, #tpu.memory_space<vmem>>, vector<32x576xf32>
    %c0_2 = arith.constant 0 : index
    %c0_3 = arith.constant 0 : index
    %4 = vector.load %arg3[%c0_2, %c0_3] : memref<32x128xbf16, #tpu.memory_space<vmem>>, vector<32x128xbf16>
    %c0_4 = arith.constant 0 : index
    %c0_5 = arith.constant 0 : index
    %5 = vector.load %arg4[%c0_4, %c0_5] : memref<128x576xbf16, #tpu.memory_space<vmem>>, vector<128x576xbf16>
    %cst = arith.constant dense<0.000000e+00> : vector<32x576xf32>
    %6 = tpu.matmul %4, %5, %cst {dimension_numbers = #tpu.dot_dimension_numbers<[1], [0], [0], [1], [0, 0, 1, 1], [], []>} : vector<32x128xbf16>, vector<128x576xbf16>, vector<32x576xf32> -> vector<32x576xf32>
    %7 = arith.addf %3, %6 : vector<32x576xf32>
    %c0_6 = arith.constant 0 : index
    %c0_7 = arith.constant 0 : index
    %8 = vector.load %arg7[%c0_6, %c0_7] : memref<32x576xf32, #tpu.memory_space<vmem>>, vector<32x576xf32>
    tpu.vector_store %arg7[%c0_6, %c0_7], %7 {strides = array<i32>} : memref<32x576xf32, #tpu.memory_space<vmem>>, vector<32x576xf32>,
    %c0_i32_8 = arith.constant 0 : i32
    %9 = arith.cmpi eq, %arg2, %c0_i32_8 : i32
    %10 = arith.extui %9 : i1 to i32
    %c0_i32_9 = arith.constant 0 : i32
    %11 = arith.cmpi ne, %10, %c0_i32_9 : i32
    scf.if %11 {
      %c0_10 = arith.constant 0 : index
      %c0_11 = arith.constant 0 : index
      %12 = vector.load %arg7[%c0_10, %c0_11] : memref<32x576xf32, #tpu.memory_space<vmem>>, vector<32x576xf32>
      %c0_12 = arith.constant 0 : index
      %c0_13 = arith.constant 0 : index
      %13 = vector.load %arg5[%c0_12, %c0_13] : memref<1x576xf32, #tpu.memory_space<vmem>>, vector<1x576xf32>
      %14 = vector.broadcast %13 : vector<1x576xf32> to vector<32x576xf32>
      %15 = arith.addf %12, %14 : vector<32x576xf32>
      %c0_14 = arith.constant 0 : index
      %c0_15 = arith.constant 0 : index
      %16 = vector.load %arg6[%c0_14, %c0_15] : memref<32x576xf32, #tpu.memory_space<vmem>>, vector<32x576xf32>
      tpu.vector_store %arg6[%c0_14, %c0_15], %15 {strides = array<i32>} : memref<32x576xf32, #tpu.memory_space<vmem>>, vector<32x576xf32>,
    } else {
    }
    return
  }
  func.func @transform_0(%arg0: i32, %arg1: i32, %arg2: i32) -> (i32, i32) {
    %c0_i32 = arith.constant 0 : i32
    return %arg0, %arg2 : i32, i32
  }
  func.func @transform_1(%arg0: i32, %arg1: i32, %arg2: i32) -> (i32, i32) {
    %c0_i32 = arith.constant 0 : i32
    return %arg2, %arg1 : i32, i32
  }
  func.func @transform_2(%arg0: i32, %arg1: i32, %arg2: i32) -> (i32, i32) {
    %c0_i32 = arith.constant 0 : i32
    %c0_i32_0 = arith.constant 0 : i32
    return %c0_i32, %arg1 : i32, i32
  }
  func.func @transform_3(%arg0: i32, %arg1: i32, %arg2: i32) -> (i32, i32) {
    %c0_i32 = arith.constant 0 : i32
    return %arg0, %arg1 : i32, i32
  }
}

module attributes {stable_mosaic.version = 11 : i64} {
  func.func @_bias_act_kernel(%arg0: i32, %arg1: memref<98x64xf32, #tpu.memory_space<vmem>>, %arg2: memref<1x64xf32, #tpu.memory_space<vmem>>, %arg3: memref<98x64xf32, #tpu.memory_space<vmem>>) attributes {dimension_semantics = [#tpu.dimension_semantics<arbitrary>], iteration_bounds = array<i64: 1>, scalar_prefetch = 0 : i64, scratch_operands = 0 : i64, tpu.core_type = #tpu.core_type<tc>, window_params = [{transform_indices = @transform_0, window_bounds = array<i64: 98, 64>}, {pipeline_mode = #tpu.pipeline_mode<synchronous>, transform_indices = @transform_1, window_bounds = array<i64: 1, 64>}, {transform_indices = @transform_2, window_bounds = array<i64: 98, 64>}]} {
    %c0 = arith.constant 0 : index
    %c0_0 = arith.constant 0 : index
    %0 = vector.load %arg1[%c0, %c0_0] : memref<98x64xf32, #tpu.memory_space<vmem>>, vector<98x64xf32>
    %c0_1 = arith.constant 0 : index
    %c0_2 = arith.constant 0 : index
    %1 = vector.load %arg2[%c0_1, %c0_2] : memref<1x64xf32, #tpu.memory_space<vmem>>, vector<1x64xf32>
    %2 = vector.broadcast %1 : vector<1x64xf32> to vector<98x64xf32>
    %3 = arith.addf %0, %2 : vector<98x64xf32>
    %cst = arith.constant 0.000000e+00 : f32
    %4 = vector.broadcast %cst : f32 to vector<98x64xf32>
    %5 = arith.maximumf %3, %4 : vector<98x64xf32>
    %c0_3 = arith.constant 0 : index
    %c0_4 = arith.constant 0 : index
    %6 = vector.load %arg3[%c0_3, %c0_4] : memref<98x64xf32, #tpu.memory_space<vmem>>, vector<98x64xf32>
    tpu.vector_store %arg3[%c0_3, %c0_4], %5 {strides = array<i32>} : memref<98x64xf32, #tpu.memory_space<vmem>>, vector<98x64xf32>,
    return
  }
  func.func @transform_0(%arg0: i32) -> (i32, i32) {
    %c0_i32 = arith.constant 0 : i32
    %c0_i32_0 = arith.constant 0 : i32
    return %arg0, %c0_i32 : i32, i32
  }
  func.func @transform_1(%arg0: i32) -> (i32, i32) {
    %c0_i32 = arith.constant 0 : i32
    %c0_i32_0 = arith.constant 0 : i32
    %c0_i32_1 = arith.constant 0 : i32
    return %c0_i32, %c0_i32_0 : i32, i32
  }
  func.func @transform_2(%arg0: i32) -> (i32, i32) {
    %c0_i32 = arith.constant 0 : i32
    %c0_i32_0 = arith.constant 0 : i32
    return %arg0, %c0_i32 : i32, i32
  }
}

module attributes {stable_mosaic.version = 11 : i64} {
  func.func @_matmul_bias_act_kernel(%arg0: i32, %arg1: i32, %arg2: i32, %arg3: memref<98x64xbf16, #tpu.memory_space<vmem>>, %arg4: memref<64x512xbf16, #tpu.memory_space<vmem>>, %arg5: memref<1x512xf32, #tpu.memory_space<vmem>>, %arg6: memref<98x512xf32, #tpu.memory_space<vmem>>, %arg7: memref<98x512xf32, #tpu.memory_space<vmem>>) attributes {dimension_semantics = [#tpu.dimension_semantics<parallel>, #tpu.dimension_semantics<parallel>, #tpu.dimension_semantics<arbitrary>], iteration_bounds = array<i64: 1, 1, 1>, scalar_prefetch = 0 : i64, scratch_operands = 1 : i64, tpu.core_type = #tpu.core_type<tc>, window_params = [{transform_indices = @transform_0, window_bounds = array<i64: 98, 64>}, {transform_indices = @transform_1, window_bounds = array<i64: 64, 512>}, {transform_indices = @transform_2, window_bounds = array<i64: 1, 512>}, {transform_indices = @transform_3, window_bounds = array<i64: 98, 512>}]} {
    %c0_i32 = arith.constant 0 : i32
    %0 = arith.cmpi eq, %arg2, %c0_i32 : i32
    %1 = arith.extui %0 : i1 to i32
    %c0_i32_0 = arith.constant 0 : i32
    %2 = arith.cmpi ne, %1, %c0_i32_0 : i32
    scf.if %2 {
      %cst_10 = arith.constant 0.000000e+00 : f32
      %12 = vector.broadcast %cst_10 : f32 to vector<98x512xf32>
      %c0_11 = arith.constant 0 : index
      %c0_12 = arith.constant 0 : index
      %13 = vector.load %arg7[%c0_11, %c0_12] : memref<98x512xf32, #tpu.memory_space<vmem>>, vector<98x512xf32>
      tpu.vector_store %arg7[%c0_11, %c0_12], %12 {strides = array<i32>} : memref<98x512xf32, #tpu.memory_space<vmem>>, vector<98x512xf32>,
    } else {
    }
    %c0 = arith.constant 0 : index
    %c0_1 = arith.constant 0 : index
    %3 = vector.load %arg7[%c0, %c0_1] : memref<98x512xf32, #tpu.memory_space<vmem>>, vector<98x512xf32>
    %c0_2 = arith.constant 0 : index
    %c0_3 = arith.constant 0 : index
    %4 = vector.load %arg3[%c0_2, %c0_3] : memref<98x64xbf16, #tpu.memory_space<vmem>>, vector<98x64xbf16>
    %c0_4 = arith.constant 0 : index
    %c0_5 = arith.constant 0 : index
    %5 = vector.load %arg4[%c0_4, %c0_5] : memref<64x512xbf16, #tpu.memory_space<vmem>>, vector<64x512xbf16>
    %cst = arith.constant dense<0.000000e+00> : vector<98x512xf32>
    %6 = tpu.matmul %4, %5, %cst {dimension_numbers = #tpu.dot_dimension_numbers<[1], [0], [0], [1], [0, 0, 1, 1], [], []>} : vector<98x64xbf16>, vector<64x512xbf16>, vector<98x512xf32> -> vector<98x512xf32>
    %7 = arith.addf %3, %6 : vector<98x512xf32>
    %c0_6 = arith.constant 0 : index
    %c0_7 = arith.constant 0 : index
    %8 = vector.load %arg7[%c0_6, %c0_7] : memref<98x512xf32, #tpu.memory_space<vmem>>, vector<98x512xf32>
    tpu.vector_store %arg7[%c0_6, %c0_7], %7 {strides = array<i32>} : memref<98x512xf32, #tpu.memory_space<vmem>>, vector<98x512xf32>,
    %c0_i32_8 = arith.constant 0 : i32
    %9 = arith.cmpi eq, %arg2, %c0_i32_8 : i32
    %10 = arith.extui %9 : i1 to i32
    %c0_i32_9 = arith.constant 0 : i32
    %11 = arith.cmpi ne, %10, %c0_i32_9 : i32
    scf.if %11 {
      %c0_10 = arith.constant 0 : index
      %c0_11 = arith.constant 0 : index
      %12 = vector.load %arg7[%c0_10, %c0_11] : memref<98x512xf32, #tpu.memory_space<vmem>>, vector<98x512xf32>
      %c0_12 = arith.constant 0 : index
      %c0_13 = arith.constant 0 : index
      %13 = vector.load %arg5[%c0_12, %c0_13] : memref<1x512xf32, #tpu.memory_space<vmem>>, vector<1x512xf32>
      %14 = vector.broadcast %13 : vector<1x512xf32> to vector<98x512xf32>
      %15 = arith.addf %12, %14 : vector<98x512xf32>
      %c0_14 = arith.constant 0 : index
      %c0_15 = arith.constant 0 : index
      %16 = vector.load %arg6[%c0_14, %c0_15] : memref<98x512xf32, #tpu.memory_space<vmem>>, vector<98x512xf32>
      tpu.vector_store %arg6[%c0_14, %c0_15], %15 {strides = array<i32>} : memref<98x512xf32, #tpu.memory_space<vmem>>, vector<98x512xf32>,
    } else {
    }
    return
  }
  func.func @transform_0(%arg0: i32, %arg1: i32, %arg2: i32) -> (i32, i32) {
    %c0_i32 = arith.constant 0 : i32
    return %arg0, %arg2 : i32, i32
  }
  func.func @transform_1(%arg0: i32, %arg1: i32, %arg2: i32) -> (i32, i32) {
    %c0_i32 = arith.constant 0 : i32
    return %arg2, %arg1 : i32, i32
  }
  func.func @transform_2(%arg0: i32, %arg1: i32, %arg2: i32) -> (i32, i32) {
    %c0_i32 = arith.constant 0 : i32
    %c0_i32_0 = arith.constant 0 : i32
    return %c0_i32, %arg1 : i32, i32
  }
  func.func @transform_3(%arg0: i32, %arg1: i32, %arg2: i32) -> (i32, i32) {
    %c0_i32 = arith.constant 0 : i32
    return %arg0, %arg1 : i32, i32
  }
}

module attributes {stable_mosaic.version = 11 : i64} {
  func.func @_bias_act_kernel(%arg0: i32, %arg1: memref<392x32xf32, #tpu.memory_space<vmem>>, %arg2: memref<1x32xf32, #tpu.memory_space<vmem>>, %arg3: memref<392x32xf32, #tpu.memory_space<vmem>>) attributes {dimension_semantics = [#tpu.dimension_semantics<arbitrary>], iteration_bounds = array<i64: 1>, scalar_prefetch = 0 : i64, scratch_operands = 0 : i64, tpu.core_type = #tpu.core_type<tc>, window_params = [{transform_indices = @transform_0, window_bounds = array<i64: 392, 32>}, {pipeline_mode = #tpu.pipeline_mode<synchronous>, transform_indices = @transform_1, window_bounds = array<i64: 1, 32>}, {transform_indices = @transform_2, window_bounds = array<i64: 392, 32>}]} {
    %c0 = arith.constant 0 : index
    %c0_0 = arith.constant 0 : index
    %0 = vector.load %arg1[%c0, %c0_0] : memref<392x32xf32, #tpu.memory_space<vmem>>, vector<392x32xf32>
    %c0_1 = arith.constant 0 : index
    %c0_2 = arith.constant 0 : index
    %1 = vector.load %arg2[%c0_1, %c0_2] : memref<1x32xf32, #tpu.memory_space<vmem>>, vector<1x32xf32>
    %2 = vector.broadcast %1 : vector<1x32xf32> to vector<392x32xf32>
    %3 = arith.addf %0, %2 : vector<392x32xf32>
    %cst = arith.constant 0.000000e+00 : f32
    %4 = vector.broadcast %cst : f32 to vector<392x32xf32>
    %5 = arith.maximumf %3, %4 : vector<392x32xf32>
    %c0_3 = arith.constant 0 : index
    %c0_4 = arith.constant 0 : index
    %6 = vector.load %arg3[%c0_3, %c0_4] : memref<392x32xf32, #tpu.memory_space<vmem>>, vector<392x32xf32>
    tpu.vector_store %arg3[%c0_3, %c0_4], %5 {strides = array<i32>} : memref<392x32xf32, #tpu.memory_space<vmem>>, vector<392x32xf32>,
    return
  }
  func.func @transform_0(%arg0: i32) -> (i32, i32) {
    %c0_i32 = arith.constant 0 : i32
    %c0_i32_0 = arith.constant 0 : i32
    return %arg0, %c0_i32 : i32, i32
  }
  func.func @transform_1(%arg0: i32) -> (i32, i32) {
    %c0_i32 = arith.constant 0 : i32
    %c0_i32_0 = arith.constant 0 : i32
    %c0_i32_1 = arith.constant 0 : i32
    return %c0_i32, %c0_i32_0 : i32, i32
  }
  func.func @transform_2(%arg0: i32) -> (i32, i32) {
    %c0_i32 = arith.constant 0 : i32
    %c0_i32_0 = arith.constant 0 : i32
    return %arg0, %c0_i32 : i32, i32
  }
}

module attributes {stable_mosaic.version = 11 : i64} {
  func.func @_matmul_bias_act_kernel(%arg0: i32, %arg1: i32, %arg2: i32, %arg3: memref<392x32xbf16, #tpu.memory_space<vmem>>, %arg4: memref<32x960xbf16, #tpu.memory_space<vmem>>, %arg5: memref<1x960xf32, #tpu.memory_space<vmem>>, %arg6: memref<392x960xf32, #tpu.memory_space<vmem>>, %arg7: memref<392x960xf32, #tpu.memory_space<vmem>>) attributes {dimension_semantics = [#tpu.dimension_semantics<parallel>, #tpu.dimension_semantics<parallel>, #tpu.dimension_semantics<arbitrary>], iteration_bounds = array<i64: 1, 1, 1>, scalar_prefetch = 0 : i64, scratch_operands = 1 : i64, tpu.core_type = #tpu.core_type<tc>, window_params = [{transform_indices = @transform_0, window_bounds = array<i64: 392, 32>}, {transform_indices = @transform_1, window_bounds = array<i64: 32, 960>}, {transform_indices = @transform_2, window_bounds = array<i64: 1, 960>}, {transform_indices = @transform_3, window_bounds = array<i64: 392, 960>}]} {
    %c0_i32 = arith.constant 0 : i32
    %0 = arith.cmpi eq, %arg2, %c0_i32 : i32
    %1 = arith.extui %0 : i1 to i32
    %c0_i32_0 = arith.constant 0 : i32
    %2 = arith.cmpi ne, %1, %c0_i32_0 : i32
    scf.if %2 {
      %cst_10 = arith.constant 0.000000e+00 : f32
      %12 = vector.broadcast %cst_10 : f32 to vector<392x960xf32>
      %c0_11 = arith.constant 0 : index
      %c0_12 = arith.constant 0 : index
      %13 = vector.load %arg7[%c0_11, %c0_12] : memref<392x960xf32, #tpu.memory_space<vmem>>, vector<392x960xf32>
      tpu.vector_store %arg7[%c0_11, %c0_12], %12 {strides = array<i32>} : memref<392x960xf32, #tpu.memory_space<vmem>>, vector<392x960xf32>,
    } else {
    }
    %c0 = arith.constant 0 : index
    %c0_1 = arith.constant 0 : index
    %3 = vector.load %arg7[%c0, %c0_1] : memref<392x960xf32, #tpu.memory_space<vmem>>, vector<392x960xf32>
    %c0_2 = arith.constant 0 : index
    %c0_3 = arith.constant 0 : index
    %4 = vector.load %arg3[%c0_2, %c0_3] : memref<392x32xbf16, #tpu.memory_space<vmem>>, vector<392x32xbf16>
    %c0_4 = arith.constant 0 : index
    %c0_5 = arith.constant 0 : index
    %5 = vector.load %arg4[%c0_4, %c0_5] : memref<32x960xbf16, #tpu.memory_space<vmem>>, vector<32x960xbf16>
    %cst = arith.constant dense<0.000000e+00> : vector<392x960xf32>
    %6 = tpu.matmul %4, %5, %cst {dimension_numbers = #tpu.dot_dimension_numbers<[1], [0], [0], [1], [0, 0, 1, 1], [], []>} : vector<392x32xbf16>, vector<32x960xbf16>, vector<392x960xf32> -> vector<392x960xf32>
    %7 = arith.addf %3, %6 : vector<392x960xf32>
    %c0_6 = arith.constant 0 : index
    %c0_7 = arith.constant 0 : index
    %8 = vector.load %arg7[%c0_6, %c0_7] : memref<392x960xf32, #tpu.memory_space<vmem>>, vector<392x960xf32>
    tpu.vector_store %arg7[%c0_6, %c0_7], %7 {strides = array<i32>} : memref<392x960xf32, #tpu.memory_space<vmem>>, vector<392x960xf32>,
    %c0_i32_8 = arith.constant 0 : i32
    %9 = arith.cmpi eq, %arg2, %c0_i32_8 : i32
    %10 = arith.extui %9 : i1 to i32
    %c0_i32_9 = arith.constant 0 : i32
    %11 = arith.cmpi ne, %10, %c0_i32_9 : i32
    scf.if %11 {
      %c0_10 = arith.constant 0 : index
      %c0_11 = arith.constant 0 : index
      %12 = vector.load %arg7[%c0_10, %c0_11] : memref<392x960xf32, #tpu.memory_space<vmem>>, vector<392x960xf32>
      %c0_12 = arith.constant 0 : index
      %c0_13 = arith.constant 0 : index
      %13 = vector.load %arg5[%c0_12, %c0_13] : memref<1x960xf32, #tpu.memory_space<vmem>>, vector<1x960xf32>
      %14 = vector.broadcast %13 : vector<1x960xf32> to vector<392x960xf32>
      %15 = arith.addf %12, %14 : vector<392x960xf32>
      %c0_14 = arith.constant 0 : index
      %c0_15 = arith.constant 0 : index
      %16 = vector.load %arg6[%c0_14, %c0_15] : memref<392x960xf32, #tpu.memory_space<vmem>>, vector<392x960xf32>
      tpu.vector_store %arg6[%c0_14, %c0_15], %15 {strides = array<i32>} : memref<392x960xf32, #tpu.memory_space<vmem>>, vector<392x960xf32>,
    } else {
    }
    return
  }
  func.func @transform_0(%arg0: i32, %arg1: i32, %arg2: i32) -> (i32, i32) {
    %c0_i32 = arith.constant 0 : i32
    return %arg0, %arg2 : i32, i32
  }
  func.func @transform_1(%arg0: i32, %arg1: i32, %arg2: i32) -> (i32, i32) {
    %c0_i32 = arith.constant 0 : i32
    return %arg2, %arg1 : i32, i32
  }
  func.func @transform_2(%arg0: i32, %arg1: i32, %arg2: i32) -> (i32, i32) {
    %c0_i32 = arith.constant 0 : i32
    %c0_i32_0 = arith.constant 0 : i32
    return %c0_i32, %arg1 : i32, i32
  }
  func.func @transform_3(%arg0: i32, %arg1: i32, %arg2: i32) -> (i32, i32) {
    %c0_i32 = arith.constant 0 : i32
    return %arg0, %arg1 : i32, i32
  }
}

module attributes {stable_mosaic.version = 11 : i64} {
  func.func @_bias_act_kernel(%arg0: i32, %arg1: memref<2048x15xf32, #tpu.memory_space<vmem>>, %arg2: memref<1x15xf32, #tpu.memory_space<vmem>>, %arg3: memref<2048x15xf32, #tpu.memory_space<vmem>>) attributes {dimension_semantics = [#tpu.dimension_semantics<arbitrary>], iteration_bounds = array<i64: 1>, scalar_prefetch = 0 : i64, scratch_operands = 0 : i64, tpu.core_type = #tpu.core_type<tc>, window_params = [{transform_indices = @transform_0, window_bounds = array<i64: 2048, 15>}, {pipeline_mode = #tpu.pipeline_mode<synchronous>, transform_indices = @transform_1, window_bounds = array<i64: 1, 15>}, {transform_indices = @transform_2, window_bounds = array<i64: 2048, 15>}]} {
    %c0 = arith.constant 0 : index
    %c0_0 = arith.constant 0 : index
    %0 = vector.load %arg1[%c0, %c0_0] : memref<2048x15xf32, #tpu.memory_space<vmem>>, vector<2048x15xf32>
    %c0_1 = arith.constant 0 : index
    %c0_2 = arith.constant 0 : index
    %1 = vector.load %arg2[%c0_1, %c0_2] : memref<1x15xf32, #tpu.memory_space<vmem>>, vector<1x15xf32>
    %2 = vector.broadcast %1 : vector<1x15xf32> to vector<2048x15xf32>
    %3 = arith.addf %0, %2 : vector<2048x15xf32>
    %4 = arith.negf %3 : vector<2048x15xf32>
    %5 = math.exp %4 : vector<2048x15xf32>
    %cst = arith.constant 1.000000e+00 : f32
    %6 = vector.broadcast %cst : f32 to vector<2048x15xf32>
    %7 = arith.addf %6, %5 : vector<2048x15xf32>
    %8 = arith.divf %6, %7 : vector<2048x15xf32>
    %c0_3 = arith.constant 0 : index
    %c0_4 = arith.constant 0 : index
    %9 = vector.load %arg3[%c0_3, %c0_4] : memref<2048x15xf32, #tpu.memory_space<vmem>>, vector<2048x15xf32>
    tpu.vector_store %arg3[%c0_3, %c0_4], %8 {strides = array<i32>} : memref<2048x15xf32, #tpu.memory_space<vmem>>, vector<2048x15xf32>,
    return
  }
  func.func @transform_0(%arg0: i32) -> (i32, i32) {
    %c0_i32 = arith.constant 0 : i32
    %c0_i32_0 = arith.constant 0 : i32
    return %arg0, %c0_i32 : i32, i32
  }
  func.func @transform_1(%arg0: i32) -> (i32, i32) {
    %c0_i32 = arith.constant 0 : i32
    %c0_i32_0 = arith.constant 0 : i32
    %c0_i32_1 = arith.constant 0 : i32
    return %c0_i32, %c0_i32_0 : i32, i32
  }
  func.func @transform_2(%arg0: i32) -> (i32, i32) {
    %c0_i32 = arith.constant 0 : i32
    %c0_i32_0 = arith.constant 0 : i32
    return %arg0, %c0_i32 : i32, i32
  }
}

</mosaic_0001>

<bundles_post_ra>
// kernel: vae_forward.11
= control target key start
LH: loop header
LB: loop body
LE: loop exit
PB: predicated region body
PF: predicated region fallthrough
CT: control target
= control target key end

     0   :  { %v1593_v0 = vmov 0   ;;  %vm568_vm0 = vcmask 56320   ;;  %vm665_vm1 = vcmask 1042432   ;;  %vm666_vm2 = vcmask 1043456   ;;  %s2383_s1 = inlined_call_operand.vmem [shape: bf16[135,32], index: 1, kind: input, shape index: {}]   ;;  %s2384_s0 = inlined_call_operand.vmem [shape: bf16[512,135], index: 0, kind: input, shape index: {}]   ;;  %s2385_s2 = inlined_call_operand.vmem [shape: f32[1,32], index: 2, kind: input, shape index: {}]   ;;  %s2386_s3 = inlined_call_operand.vmem [shape: f32[512,32], index: 3, kind: output, shape index: {}]  }
   0x1   :  { %672 = vmatprep.subr.bf16.mxu0 %v1593_v0  ;;  %1466 = vmatprep.subr.bf16.mxu1 %v1593_v0  ;;  %v1487_v1 = vld [vmem:[%s2383_s1] sm:$0xff]   ;;  %v1488_v2 = vld [vmem:[%s2383_s1 + $0x8] sm:$0xff]   ;;  %v1489_v3 = vld [vmem:[%s2383_s1 + $0x10] sm:$0xff]   ;;  %v1594_v10 = vmov 65535   ;;  %vm19_vm3 = vcmask 261120   ;;  %v1595_v16 = vmov 0.0  }
   0x2   :  { %673 = vmatpush1.bf16.msra.mxu0 %v1487_v1  ;;  %1475 = vmatpush1.bf16.msra.mxu1 %v1487_v1  ;;  %v1498_v4 = vld [vmem:[%s2384_s0 + $0x4] ss:$8 sps:$4 sm:$0xff]   ;;  %v1490_v5 = vld [vmem:[%s2383_s1 + $0x18] sm:$0xff]   ;;  %v1493_v9 = vld [vmem:[%s2383_s1 + $0x30] sm:$0xff]   ;;  %v667_v11 = vsel %vm665_vm1, 4294967295, %v1594_v10  ;;  %20 = vst.msk [vmem:[#allocation2] sm:$0xff] %vm19_vm3, %v1595_v16 }
   0x3   :  { %674 = vmatprep.subr.bf16.mxu0 %v1593_v0  ;;  %1467 = vmatprep.subr.bf16.mxu1 %v1593_v0  ;;  %v1501_v6 = vld [vmem:[%s2384_s0 + $0x104] ss:$8 sps:$4 sm:$0xff]   ;;  %v1494_v12 = vld [vmem:[%s2383_s1 + $0x38] sm:$0xff]   ;;  %v1495_v13 = vld [vmem:[%s2383_s1 + $0x40] ss:$0 sps:$4 sm:$0xff]   ;;  %v668_v14 = vsel %vm666_vm2, %v667_v11, 0 }
   0x4   :  { %1433 = vmatprep.mubr.msk.bf16.mxu0 %vm568_vm0, %v1498_v4  ;;  %1449 = vmatprep.mubr.msk.bf16.mxu1 %vm568_vm0, %v1501_v6  ;;  %v1491_v7 = vld [vmem:[%s2383_s1 + $0x20] sm:$0xff]   ;;  %v1492_v8 = vld [vmem:[%s2383_s1 + $0x28] sm:$0xff]   ;;  %v1651_v15 = vand.u32 %v1495_v13, %v668_v14  ;;  %21 = vst.msk [vmem:[#allocation2 + $0x8] sm:$0xff] %vm19_vm3, %v1595_v16  ;;  %22 = vst.msk [vmem:[#allocation2 + $0x10] sm:$0xff] %vm19_vm3, %v1595_v16 }
   0x5   :  { %23 = vst.msk [vmem:[#allocation2 + $0x18] sm:$0xff] %vm19_vm3, %v1595_v16  ;;  %24 = vst.msk [vmem:[#allocation2 + $0x20] sm:$0xff] %vm19_vm3, %v1595_v16  ;;  %v1496_v17 = vld [vmem:[%s2384_s0] ss:$8 sps:$4 sm:$0xff]   ;;  %v1502_v19 = vld [vmem:[%s2384_s0 + $0x14] ss:$8 sps:$4 sm:$0xff]  }
   0x6   :  { %675 = vmatpush1.bf16.msra.mxu0 %v1488_v2  ;;  %1476 = vmatpush1.bf16.msra.mxu1 %v1488_v2  ;;  %25 = vst.msk [vmem:[#allocation2 + $0x28] sm:$0xff] %vm19_vm3, %v1595_v16  ;;  %26 = vst.msk [vmem:[#allocation2 + $0x30] sm:$0xff] %vm19_vm3, %v1595_v16  ;;  %v1499_v18 = vld [vmem:[%s2384_s0 + $0x100] ss:$8 sps:$4 sm:$0xff]   ;;  %v1504_v20 = vld [vmem:[%s2384_s0 + $0x114] ss:$8 sps:$4 sm:$0xff]  }
   0x7   :  { %676 = vmatprep.subr.bf16.mxu0 %v1593_v0  ;;  %1468 = vmatprep.subr.bf16.mxu1 %v1593_v0  ;;  %27 = vst.msk [vmem:[#allocation2 + $0x38] sm:$0xff] %vm19_vm3, %v1595_v16  ;;  %28 = vst.msk [vmem:[#allocation2 + $0x40] sm:$0xff] %vm19_vm3, %v1595_v16  ;;  %v1506_v21 = vld [vmem:[%s2384_s0 + $0x10] ss:$8 sps:$4 sm:$0xff]   ;;  %v1508_v23 = vld [vmem:[%s2384_s0 + $0x24] ss:$8 sps:$4 sm:$0xff]  }
   0x8   :  { %29 = vst.msk [vmem:[#allocation2 + $0x48] sm:$0xff] %vm19_vm3, %v1595_v16  ;;  %30 = vst.msk [vmem:[#allocation2 + $0x50] sm:$0xff] %vm19_vm3, %v1595_v16  ;;  %v1507_v22 = vld [vmem:[%s2384_s0 + $0x110] ss:$8 sps:$4 sm:$0xff]   ;;  %v1510_v24 = vld [vmem:[%s2384_s0 + $0x124] ss:$8 sps:$4 sm:$0xff]  }
   0x9   :  { %31 = vst.msk [vmem:[#allocation2 + $0x58] sm:$0xff] %vm19_vm3, %v1595_v16  ;;  %32 = vst.msk [vmem:[#allocation2 + $0x60] sm:$0xff] %vm19_vm3, %v1595_v16  ;;  %v1512_v25 = vld [vmem:[%s2384_s0 + $0x20] ss:$8 sps:$4 sm:$0xff]   ;;  %v1514_v27 = vld [vmem:[%s2384_s0 + $0x34] ss:$8 sps:$4 sm:$0xff]  }
   0xa   :  { %677 = vmatpush1.bf16.msra.mxu0 %v1489_v3  ;;  %1477 = vmatpush1.bf16.msra.mxu1 %v1489_v3  ;;  %33 = vst.msk [vmem:[#allocation2 + $0x68] sm:$0xff] %vm19_vm3, %v1595_v16  ;;  %34 = vst.msk [vmem:[#allocation2 + $0x70] sm:$0xff] %vm19_vm3, %v1595_v16  ;;  %v1513_v26 = vld [vmem:[%s2384_s0 + $0x120] ss:$8 sps:$4 sm:$0xff]   ;;  %v1516_v28 = vld [vmem:[%s2384_s0 + $0x134] ss:$8 sps:$4 sm:$0xff]  }
   0xb   :  { %678 = vmatprep.subr.bf16.mxu0 %v1593_v0  ;;  %1469 = vmatprep.subr.bf16.mxu1 %v1593_v0  ;;  %35 = vst.msk [vmem:[#allocation2 + $0x78] sm:$0xff] %vm19_vm3, %v1595_v16  ;;  %36 = vst.msk [vmem:[#allocation2 + $0x80] sm:$0xff] %vm19_vm3, %v1595_v16  ;;  %v1518_v29 = vld [vmem:[%s2384_s0 + $0x30] ss:$8 sps:$4 sm:$0xff]   ;;  %v1520_v31 = vld [vmem:[%s2384_s0 + $0x44] ss:$8 sps:$4 sm:$0xff]  }
   0xc   :  { %37 = vst.msk [vmem:[#allocation2 + $0x88] sm:$0xff] %vm19_vm3, %v1595_v16  ;;  %38 = vst.msk [vmem:[#allocation2 + $0x90] sm:$0xff] %vm19_vm3, %v1595_v16  ;;  %v1519_v30 = vld [vmem:[%s2384_s0 + $0x130] ss:$8 sps:$4 sm:$0xff]   ;;  %v1522_v32 = vld [vmem:[%s2384_s0 + $0x144] ss:$8 sps:$4 sm:$0xff]  }
   0xd   :  { %39 = vst.msk [vmem:[#allocation2 + $0x98] sm:$0xff] %vm19_vm3, %v1595_v16  ;;  %40 = vst.msk [vmem:[#allocation2 + $0xa0] sm:$0xff] %vm19_vm3, %v1595_v16  ;;  %v1524_v33 = vld [vmem:[%s2384_s0 + $0x40] ss:$8 sps:$4 sm:$0xff]   ;;  %v1526_v35 = vld [vmem:[%s2384_s0 + $0x54] ss:$8 sps:$4 sm:$0xff]  }
   0xe   :  { %679 = vmatpush1.bf16.msra.mxu0 %v1490_v5  ;;  %1478 = vmatpush1.bf16.msra.mxu1 %v1490_v5  ;;  %41 = vst.msk [vmem:[#allocation2 + $0xa8] sm:$0xff] %vm19_vm3, %v1595_v16  ;;  %42 = vst.msk [vmem:[#allocation2 + $0xb0] sm:$0xff] %vm19_vm3, %v1595_v16  ;;  %v1525_v34 = vld [vmem:[%s2384_s0 + $0x140] ss:$8 sps:$4 sm:$0xff]   ;;  %v1528_v36 = vld [vmem:[%s2384_s0 + $0x154] ss:$8 sps:$4 sm:$0xff]  }
   0xf   :  { %680 = vmatprep.subr.bf16.mxu0 %v1593_v0  ;;  %1470 = vmatprep.subr.bf16.mxu1 %v1593_v0  ;;  %43 = vst.msk [vmem:[#allocation2 + $0xb8] sm:$0xff] %vm19_vm3, %v1595_v16  ;;  %44 = vst.msk [vmem:[#allocation2 + $0xc0] sm:$0xff] %vm19_vm3, %v1595_v16  ;;  %v1530_v37 = vld [vmem:[%s2384_s0 + $0x50] ss:$8 sps:$4 sm:$0xff]   ;;  %v1532_v39 = vld [vmem:[%s2384_s0 + $0x64] ss:$8 sps:$4 sm:$0xff]  }
  0x10   :  { %45 = vst.msk [vmem:[#allocation2 + $0xc8] sm:$0xff] %vm19_vm3, %v1595_v16  ;;  %46 = vst.msk [vmem:[#allocation2 + $0xd0] sm:$0xff] %vm19_vm3, %v1595_v16  ;;  %v1531_v38 = vld [vmem:[%s2384_s0 + $0x150] ss:$8 sps:$4 sm:$0xff]   ;;  %v1534_v40 = vld [vmem:[%s2384_s0 + $0x164] ss:$8 sps:$4 sm:$0xff]  }
  0x11   :  { %47 = vst.msk [vmem:[#allocation2 + $0xd8] sm:$0xff] %vm19_vm3, %v1595_v16  ;;  %48 = vst.msk [vmem:[#allocation2 + $0xe0] sm:$0xff] %vm19_vm3, %v1595_v16  ;;  %v1536_v41 = vld [vmem:[%s2384_s0 + $0x60] ss:$8 sps:$4 sm:$0xff]   ;;  %v1538_v43 = vld [vmem:[%s2384_s0 + $0x74] ss:$8 sps:$4 sm:$0xff]  }
  0x12   :  { %681 = vmatpush1.bf16.msra.mxu0 %v1491_v7  ;;  %1479 = vmatpush1.bf16.msra.mxu1 %v1491_v7  ;;  %49 = vst.msk [vmem:[#allocation2 + $0xe8] sm:$0xff] %vm19_vm3, %v1595_v16  ;;  %50 = vst.msk [vmem:[#allocation2 + $0xf0] sm:$0xff] %vm19_vm3, %v1595_v16  ;;  %v1537_v42 = vld [vmem:[%s2384_s0 + $0x160] ss:$8 sps:$4 sm:$0xff]   ;;  %v1540_v44 = vld [vmem:[%s2384_s0 + $0x174] ss:$8 sps:$4 sm:$0xff]  }
  0x13   :  { %682 = vmatprep.subr.bf16.mxu0 %v1593_v0  ;;  %1471 = vmatprep.subr.bf16.mxu1 %v1593_v0  ;;  %51 = vst.msk [vmem:[#allocation2 + $0xf8] sm:$0xff] %vm19_vm3, %v1595_v16  ;;  %52 = vst.msk [vmem:[#allocation2 + $0x100] sm:$0xff] %vm19_vm3, %v1595_v16  ;;  %v1542_v45 = vld [vmem:[%s2384_s0 + $0x70] ss:$8 sps:$4 sm:$0xff]   ;;  %v1544_v47 = vld [vmem:[%s2384_s0 + $0x84] ss:$8 sps:$4 sm:$0xff]  }
  0x14   :  { %53 = vst.msk [vmem:[#allocation2 + $0x108] sm:$0xff] %vm19_vm3, %v1595_v16  ;;  %54 = vst.msk [vmem:[#allocation2 + $0x110] sm:$0xff] %vm19_vm3, %v1595_v16  ;;  %v1543_v46 = vld [vmem:[%s2384_s0 + $0x170] ss:$8 sps:$4 sm:$0xff]   ;;  %v1546_v48 = vld [vmem:[%s2384_s0 + $0x184] ss:$8 sps:$4 sm:$0xff]  }
  0x15   :  { %55 = vst.msk [vmem:[#allocation2 + $0x118] sm:$0xff] %vm19_vm3, %v1595_v16  ;;  %56 = vst.msk [vmem:[#allocation2 + $0x120] sm:$0xff] %vm19_vm3, %v1595_v16  ;;  %v1548_v49 = vld [vmem:[%s2384_s0 + $0x80] ss:$8 sps:$4 sm:$0xff]   ;;  %v1550_v51 = vld [vmem:[%s2384_s0 + $0x94] ss:$8 sps:$4 sm:$0xff]  }
  0x16   :  { %683 = vmatpush1.bf16.msra.mxu0 %v1492_v8  ;;  %1480 = vmatpush1.bf16.msra.mxu1 %v1492_v8  ;;  %57 = vst.msk [vmem:[#allocation2 + $0x128] sm:$0xff] %vm19_vm3, %v1595_v16  ;;  %58 = vst.msk [vmem:[#allocation2 + $0x130] sm:$0xff] %vm19_vm3, %v1595_v16  ;;  %v1549_v50 = vld [vmem:[%s2384_s0 + $0x180] ss:$8 sps:$4 sm:$0xff]   ;;  %v1552_v52 = vld [vmem:[%s2384_s0 + $0x194] ss:$8 sps:$4 sm:$0xff]  }
  0x17   :  { %684 = vmatprep.subr.bf16.mxu0 %v1593_v0  ;;  %1472 = vmatprep.subr.bf16.mxu1 %v1593_v0  ;;  %59 = vst.msk [vmem:[#allocation2 + $0x138] sm:$0xff] %vm19_vm3, %v1595_v16  ;;  %60 = vst.msk [vmem:[#allocation2 + $0x140] sm:$0xff] %vm19_vm3, %v1595_v16  ;;  %v1554_v53 = vld [vmem:[%s2384_s0 + $0x90] ss:$8 sps:$4 sm:$0xff]   ;;  %v1556_v55 = vld [vmem:[%s2384_s0 + $0xa4] ss:$8 sps:$4 sm:$0xff]  }
  0x18   :  { %61 = vst.msk [vmem:[#allocation2 + $0x148] sm:$0xff] %vm19_vm3, %v1595_v16  ;;  %62 = vst.msk [vmem:[#allocation2 + $0x150] sm:$0xff] %vm19_vm3, %v1595_v16  ;;  %v1555_v54 = vld [vmem:[%s2384_s0 + $0x190] ss:$8 sps:$4 sm:$0xff]   ;;  %v1558_v56 = vld [vmem:[%s2384_s0 + $0x1a4] ss:$8 sps:$4 sm:$0xff]  }
  0x19   :  { %63 = vst.msk [vmem:[#allocation2 + $0x158] sm:$0xff] %vm19_vm3, %v1595_v16  ;;  %64 = vst.msk [vmem:[#allocation2 + $0x160] sm:$0xff] %vm19_vm3, %v1595_v16  ;;  %v1560_v57 = vld [vmem:[%s2384_s0 + $0xa0] ss:$8 sps:$4 sm:$0xff]   ;;  %v1562_v59 = vld [vmem:[%s2384_s0 + $0xb4] ss:$8 sps:$4 sm:$0xff]  }
  0x1a   :  { %685 = vmatpush1.bf16.msra.mxu0 %v1493_v9  ;;  %1481 = vmatpush1.bf16.msra.mxu1 %v1493_v9  ;;  %65 = vst.msk [vmem:[#allocation2 + $0x168] sm:$0xff] %vm19_vm3, %v1595_v16  ;;  %66 = vst.msk [vmem:[#allocation2 + $0x170] sm:$0xff] %vm19_vm3, %v1595_v16  ;;  %v1561_v58 = vld [vmem:[%s2384_s0 + $0x1a0] ss:$8 sps:$4 sm:$0xff]   ;;  %v1564_v60 = vld [vmem:[%s2384_s0 + $0x1b4] ss:$8 sps:$4 sm:$0xff]  }
  0x1b   :  { %686 = vmatprep.subr.bf16.mxu0 %v1593_v0  ;;  %1473 = vmatprep.subr.bf16.mxu1 %v1593_v0  ;;  %67 = vst.msk [vmem:[#allocation2 + $0x178] sm:$0xff] %vm19_vm3, %v1595_v16  ;;  %68 = vst.msk [vmem:[#allocation2 + $0x180] sm:$0xff] %vm19_vm3, %v1595_v16  ;;  %v1566_v61 = vld [vmem:[%s2384_s0 + $0xb0] ss:$8 sps:$4 sm:$0xff]   ;;  %v1568_v63 = vld [vmem:[%s2384_s0 + $0xc4] ss:$8 sps:$4 sm:$0xff]  }
  0x1c   :  { %69 = vst.msk [vmem:[#allocation2 + $0x188] sm:$0xff] %vm19_vm3, %v1595_v16  ;;  %70 = vst.msk [vmem:[#allocation2 + $0x190] sm:$0xff] %vm19_vm3, %v1595_v16  ;;  %v1567_v62 = vld [vmem:[%s2384_s0 + $0x1b0] ss:$8 sps:$4 sm:$0xff]   ;;  %v1572_v1 = vld [vmem:[%s2384_s0 + $0xc0] ss:$8 sps:$4 sm:$0xff]  }
  0x1d   :  { %71 = vst.msk [vmem:[#allocation2 + $0x198] sm:$0xff] %vm19_vm3, %v1595_v16  ;;  %72 = vst.msk [vmem:[#allocation2 + $0x1a0] sm:$0xff] %vm19_vm3, %v1595_v16  ;;  %v1573_v2 = vld [vmem:[%s2384_s0 + $0x1c0] ss:$8 sps:$4 sm:$0xff]   ;;  %v1574_v3 = vld [vmem:[%s2384_s0 + $0xd4] ss:$8 sps:$4 sm:$0xff]  }
  0x1e   :  { %687 = vmatpush1.bf16.msra.mxu0 %v1494_v12  ;;  %1482 = vmatpush1.bf16.msra.mxu1 %v1494_v12  ;;  %73 = vst.msk [vmem:[#allocation2 + $0x1a8] sm:$0xff] %vm19_vm3, %v1595_v16  ;;  %74 = vst.msk [vmem:[#allocation2 + $0x1b0] sm:$0xff] %vm19_vm3, %v1595_v16  ;;  %v1576_v4 = vld [vmem:[%s2384_s0 + $0x1d4] ss:$8 sps:$4 sm:$0xff]   ;;  %v1578_v5 = vld [vmem:[%s2384_s0 + $0xd0] ss:$8 sps:$4 sm:$0xff]  }
  0x1f   :  { %688 = vmatprep.subr.bf16.mxu0 %v1593_v0  ;;  %1474 = vmatprep.subr.bf16.mxu1 %v1593_v0  ;;  %75 = vst.msk [vmem:[#allocation2 + $0x1b8] sm:$0xff] %vm19_vm3, %v1595_v16  ;;  %76 = vst.msk [vmem:[#allocation2 + $0x1c0] sm:$0xff] %vm19_vm3, %v1595_v16  ;;  %v1570_v0 = vld [vmem:[%s2384_s0 + $0x1c4] ss:$8 sps:$4 sm:$0xff]   ;;  %v1579_v6 = vld [vmem:[%s2384_s0 + $0x1d0] ss:$8 sps:$4 sm:$0xff]  }
  0x20   :  { %77 = vst.msk [vmem:[#allocation2 + $0x1c8] sm:$0xff] %vm19_vm3, %v1595_v16  ;;  %78 = vst.msk [vmem:[#allocation2 + $0x1d0] sm:$0xff] %vm19_vm3, %v1595_v16  ;;  %v1580_v7 = vld [vmem:[%s2384_s0 + $0xe4] ss:$8 sps:$4 sm:$0xff]   ;;  %v1584_v9 = vld [vmem:[%s2384_s0 + $0xe0] ss:$8 sps:$4 sm:$0xff]  }
  0x21   :  { %79 = vst.msk [vmem:[#allocation2 + $0x1d8] sm:$0xff] %vm19_vm3, %v1595_v16  ;;  %80 = vst.msk [vmem:[#allocation2 + $0x1e0] sm:$0xff] %vm19_vm3, %v1595_v16  ;;  %v1582_v8 = vld [vmem:[%s2384_s0 + $0x1e4] ss:$8 sps:$4 sm:$0xff]   ;;  %v1585_v10 = vld [vmem:[%s2384_s0 + $0x1e0] ss:$8 sps:$4 sm:$0xff]  }
  0x22   :  { %81 = vst.msk [vmem:[#allocation2 + $0x1e8] sm:$0xff] %vm19_vm3, %v1595_v16  ;;  %82 = vst.msk [vmem:[#allocation2 + $0x1f0] sm:$0xff] %vm19_vm3, %v1595_v16  ;;  %689 = vmatpush1.bf16.msra.mxu0 %v1651_v15  ;;  %1483 = vmatpush1.bf16.msra.mxu1 %v1651_v15  ;;  %v1586_v11 = vld [vmem:[%s2384_s0 + $0xf4] ss:$8 sps:$4 sm:$0xff]   ;;  %v1590_v13 = vld [vmem:[%s2384_s0 + $0xf0] ss:$8 sps:$4 sm:$0xff]  }
  0x23   :  { %83 = vst.msk [vmem:[#allocation2 + $0x1f8] sm:$0xff] %vm19_vm3, %v1595_v16  ;;  %v1588_v12 = vld [vmem:[%s2384_s0 + $0x1f4] ss:$8 sps:$4 sm:$0xff]   ;;  %v1591_v14 = vld [vmem:[%s2384_s0 + $0x1f0] ss:$8 sps:$4 sm:$0xff]   ;;  %v84_v15 = vld [vmem:[#allocation2] sm:$0xff] }
  0x24   :  { %v116_v16 = vld [vmem:[#allocation2 + $0x100] sm:$0xff] }
  0x25   :  { %705 = vmatmul.mubr.bf16.vlgmr.msra.gmra.mrb[0].mxu0 %v1496_v17  ;;  %833 = vmatmul.mubr.bf16.vlgmr.msra.gmra.mrb[0].mxu1 %v1499_v18 }
  0x26   :  { %1434 = vmatprep.mubr.msk.bf16.mxu0 %vm568_vm0, %v1502_v19  ;;  %1450 = vmatprep.mubr.msk.bf16.mxu1 %vm568_vm0, %v1504_v20  ;;  %v85_v19 = vld [vmem:[#allocation2 + $0x8] sm:$0xff] }
  0x27   :  { %v117_v20 = vld [vmem:[#allocation2 + $0x108] sm:$0xff] }
  0x2d   :  { %713 = vmatmul.mubr.bf16.gmra.mrb[4].mxu0 %v1506_v21  ;;  %841 = vmatmul.mubr.bf16.gmra.mrb[4].mxu1 %v1507_v22 }
  0x2e   :  { %1435 = vmatprep.mubr.msk.bf16.mxu0 %vm568_vm0, %v1508_v23  ;;  %1451 = vmatprep.mubr.msk.bf16.mxu1 %vm568_vm0, %v1510_v24 }
  0x35   :  { %721 = vmatmul.mubr.bf16.gmra.mrb[8].mxu0 %v1512_v25  ;;  %849 = vmatmul.mubr.bf16.gmra.mrb[8].mxu1 %v1513_v26 }
  0x36   :  { %1436 = vmatprep.mubr.msk.bf16.mxu0 %vm568_vm0, %v1514_v27  ;;  %1452 = vmatprep.mubr.msk.bf16.mxu1 %vm568_vm0, %v1516_v28 }
  0x3d   :  { %729 = vmatmul.mubr.bf16.gmra.mrb[12].mxu0 %v1518_v29  ;;  %857 = vmatmul.mubr.bf16.gmra.mrb[12].mxu1 %v1519_v30 }
  0x3e   :  { %1437 = vmatprep.mubr.msk.bf16.mxu0 %vm568_vm0, %v1520_v31  ;;  %1453 = vmatprep.mubr.msk.bf16.mxu1 %vm568_vm0, %v1522_v32  ;;  %v86_v31 = vld [vmem:[#allocation2 + $0x10] sm:$0xff] }
  0x3f   :  { %v118_v32 = vld [vmem:[#allocation2 + $0x110] sm:$0xff] }
  0x45   :  { %737 = vmatmul.mubr.bf16.gmra.mrb[16].mxu0 %v1524_v33  ;;  %865 = vmatmul.mubr.bf16.gmra.mrb[16].mxu1 %v1525_v34  ;;  %v2006_v33 = vld [vmem:[%s2385_s2] ss:$0 sm:$0xff] }
  0x46   :  { %1438 = vmatprep.mubr.msk.bf16.mxu0 %vm568_vm0, %v1526_v35  ;;  %1454 = vmatprep.mubr.msk.bf16.mxu1 %vm568_vm0, %v1528_v36  ;;  %v87_v36 = vld [vmem:[#allocation2 + $0x18] sm:$0xff] }
  0x4d   :  { %745 = vmatmul.mubr.bf16.gmra.mrb[20].mxu0 %v1530_v37  ;;  %873 = vmatmul.mubr.bf16.gmra.mrb[20].mxu1 %v1531_v38  ;;  %v119_v37 = vld [vmem:[#allocation2 + $0x118] sm:$0xff] }
  0x4e   :  { %1439 = vmatprep.mubr.msk.bf16.mxu0 %vm568_vm0, %v1532_v39  ;;  %1455 = vmatprep.mubr.msk.bf16.mxu1 %vm568_vm0, %v1534_v40 }
  0x55   :  { %753 = vmatmul.mubr.bf16.gmra.mrb[24].mxu0 %v1536_v41  ;;  %881 = vmatmul.mubr.bf16.gmra.mrb[24].mxu1 %v1537_v42 }
  0x56   :  { %1440 = vmatprep.mubr.msk.bf16.mxu0 %vm568_vm0, %v1538_v43  ;;  %1456 = vmatprep.mubr.msk.bf16.mxu1 %vm568_vm0, %v1540_v44 }
  0x5d   :  { %761 = vmatmul.mubr.bf16.gmra.mrb[28].mxu0 %v1542_v45  ;;  %889 = vmatmul.mubr.bf16.gmra.mrb[28].mxu1 %v1543_v46 }
  0x5e   :  { %1441 = vmatprep.mubr.msk.bf16.mxu0 %vm568_vm0, %v1544_v47  ;;  %1457 = vmatprep.mubr.msk.bf16.mxu1 %vm568_vm0, %v1546_v48 }
  0x65   :  { %769 = vmatmul.mubr.bf16.gmra.mrb[32].mxu0 %v1548_v49  ;;  %897 = vmatmul.mubr.bf16.gmra.mrb[32].mxu1 %v1549_v50 }
  0x66   :  { %1442 = vmatprep.mubr.msk.bf16.mxu0 %vm568_vm0, %v1550_v51  ;;  %1458 = vmatprep.mubr.msk.bf16.mxu1 %vm568_vm0, %v1552_v52 }
  0x6d   :  { %777 = vmatmul.mubr.bf16.gmra.mrb[36].mxu0 %v1554_v53  ;;  %905 = vmatmul.mubr.bf16.gmra.mrb[36].mxu1 %v1555_v54 }
  0x6e   :  { %1443 = vmatprep.mubr.msk.bf16.mxu0 %vm568_vm0, %v1556_v55  ;;  %1459 = vmatprep.mubr.msk.bf16.mxu1 %vm568_vm0, %v1558_v56 }
  0x75   :  { %785 = vmatmul.mubr.bf16.gmra.mrb[40].mxu0 %v1560_v57  ;;  %913 = vmatmul.mubr.bf16.gmra.mrb[40].mxu1 %v1561_v58  ;;  %v88_v58 = vld [vmem:[#allocation2 + $0x20] sm:$0xff] }
  0x76   :  { %1444 = vmatprep.mubr.msk.bf16.mxu0 %vm568_vm0, %v1562_v59  ;;  %1460 = vmatprep.mubr.msk.bf16.mxu1 %vm568_vm0, %v1564_v60  ;;  %v120_v59 = vld [vmem:[#allocation2 + $0x120] sm:$0xff] }
  0x7d   :  { %793 = vmatmul.mubr.bf16.gmra.mrb[44].mxu0 %v1566_v61  ;;  %921 = vmatmul.mubr.bf16.gmra.mrb[44].mxu1 %v1567_v62 }
  0x7e   :  { %1445 = vmatprep.mubr.msk.bf16.mxu0 %vm568_vm0, %v1568_v63  ;;  %1461 = vmatprep.mubr.msk.bf16.mxu1 %vm568_vm0, %v1570_v0  ;;  %v89_v0 = vld [vmem:[#allocation2 + $0x28] sm:$0xff] }
  0x85   :  { %801 = vmatmul.mubr.bf16.gmra.mrb[48].mxu0 %v1572_v1  ;;  %929 = vmatmul.mubr.bf16.gmra.mrb[48].mxu1 %v1573_v2  ;;  %v121_v1 = vld [vmem:[#allocation2 + $0x128] sm:$0xff] }
  0x86   :  { %1446 = vmatprep.mubr.msk.bf16.mxu0 %vm568_vm0, %v1574_v3  ;;  %1462 = vmatprep.mubr.msk.bf16.mxu1 %vm568_vm0, %v1576_v4 }
  0x8d   :  { %809 = vmatmul.mubr.bf16.gmra.mrb[52].mxu0 %v1578_v5  ;;  %937 = vmatmul.mubr.bf16.gmra.mrb[52].mxu1 %v1579_v6 }
  0x8e   :  { %1447 = vmatprep.mubr.msk.bf16.mxu0 %vm568_vm0, %v1580_v7  ;;  %1463 = vmatprep.mubr.msk.bf16.mxu1 %vm568_vm0, %v1582_v8 }
  0x95   :  { %817 = vmatmul.mubr.bf16.gmra.mrb[56].mxu0 %v1584_v9  ;;  %945 = vmatmul.mubr.bf16.gmra.mrb[56].mxu1 %v1585_v10 }
  0x96   :  { %1448 = vmatprep.mubr.msk.bf16.mxu0 %vm568_vm0, %v1586_v11  ;;  %1464 = vmatprep.mubr.msk.bf16.mxu1 %vm568_vm0, %v1588_v12 }
  0x9d   :  { %825 = vmatmul.mubr.bf16.gmra.mrb[60].mxu0 %v1590_v13  ;;  %953 = vmatmul.mubr.bf16.gmra.mrb[60].mxu1 %v1591_v14 }
  0xf8   :  { %v706_v17 = vpop.f32.mrb[0].mxu0  ;;  %v834_v18 = vpop.f32.mrb[0].mxu1 }
  0xf9   :  { %v961_v21 = vadd.f32 %v706_v17, %v84_v15  ;;  %v993_v22 = vadd.f32 %v834_v18, %v116_v16  ;;  %v708_v23 = vpop.f32.mrb[1].mxu0  ;;  %v836_v24 = vpop.f32.mrb[1].mxu1 }
  0xfa   :  { %v709_v25 = vpop.f32.mrb[2].mxu0  ;;  %v837_v26 = vpop.f32.mrb[2].mxu1  ;;  %v122_v23 = vld [vmem:[#allocation2 + $0x130] sm:$0xff] }
  0xfb   :  { %1026 = vst.msk [vmem:[#allocation2] sm:$0xff] %vm19_vm3, %v961_v21  ;;  %1058 = vst.msk [vmem:[#allocation2 + $0x100] sm:$0xff] %vm19_vm3, %v993_v22  ;;  %v962_v27 = vadd.f32 %v709_v25, %v85_v19  ;;  %v994_v28 = vadd.f32 %v837_v26, %v117_v20  ;;  %v711_v29 = vpop.f32.mrb[3].mxu0  ;;  %v839_v30 = vpop.f32.mrb[3].mxu1  ;;  %v90_v22 = vld [vmem:[#allocation2 + $0x30] sm:$0xff] }
  0xfc   :  { %v123_v29 = vld [vmem:[#allocation2 + $0x138] sm:$0xff] }
  0xfd   :  { %1027 = vst.msk [vmem:[#allocation2 + $0x8] sm:$0xff] %vm19_vm3, %v962_v27  ;;  %1059 = vst.msk [vmem:[#allocation2 + $0x108] sm:$0xff] %vm19_vm3, %v994_v28  ;;  %v91_v28 = vld [vmem:[#allocation2 + $0x38] sm:$0xff] }
 0x100   :  { %v714_v34 = vpop.f32.mrb[4].mxu0  ;;  %v842_v35 = vpop.f32.mrb[4].mxu1 }
 0x101   :  { %v963_v38 = vadd.f32 %v714_v34, %v86_v31  ;;  %v995_v39 = vadd.f32 %v842_v35, %v118_v32  ;;  %v716_v40 = vpop.f32.mrb[5].mxu0  ;;  %v844_v41 = vpop.f32.mrb[5].mxu1 }
 0x102   :  { %v1093_v42 = vld [vmem:[#allocation2] sm:$0xff]  ;;  %v717_v44 = vpop.f32.mrb[6].mxu0  ;;  %v845_v45 = vpop.f32.mrb[6].mxu1 }
 0x103   :  { %v1125_v43 = vld [vmem:[#allocation2 + $0x100] sm:$0xff]  ;;  %v1164_v46 = vadd.f32 %v2006_v33, %v1093_v42  ;;  %1028 = vst.msk [vmem:[#allocation2 + $0x10] sm:$0xff] %vm19_vm3, %v963_v38  ;;  %1060 = vst.msk [vmem:[#allocation2 + $0x110] sm:$0xff] %vm19_vm3, %v995_v39  ;;  %v964_v48 = vadd.f32 %v717_v44, %v87_v36  ;;  %v996_v49 = vadd.f32 %v845_v45, %v119_v37  ;;  %v719_v50 = vpop.f32.mrb[7].mxu0  ;;  %v847_v51 = vpop.f32.mrb[7].mxu1 }
 0x104   :  { %v1196_v47 = vadd.f32 %v2006_v33, %v1125_v43  ;;  %v1094_v52 = vld [vmem:[#allocation2 + $0x8] sm:$0xff]  ;;  %v92_v51 = vld [vmem:[#allocation2 + $0x40] sm:$0xff] }
 0x105   :  { %v1126_v53 = vld [vmem:[#allocation2 + $0x108] sm:$0xff]  ;;  %v1228_v54 = vmax.f32 %v1164_v46, 0.0  ;;  %v1165_v56 = vadd.f32 %v2006_v33, %v1094_v52  ;;  %1029 = vst.msk [vmem:[#allocation2 + $0x18] sm:$0xff] %vm19_vm3, %v964_v48  ;;  %1061 = vst.msk [vmem:[#allocation2 + $0x118] sm:$0xff] %vm19_vm3, %v996_v49  ;;  %v124_v52 = vld [vmem:[#allocation2 + $0x140] sm:$0xff] }
 0x106   :  { %v1260_v55 = vmax.f32 %v1196_v47, 0.0  ;;  %v1197_v57 = vadd.f32 %v2006_v33, %v1126_v53 }
 0x107   :  { %1292 = vst.msk [vmem:[%s2386_s3] sm:$0xff] %vm19_vm3, %v1228_v54  ;;  %v1229_v60 = vmax.f32 %v1165_v56, 0.0 }
 0x108   :  { %1324 = vst.msk [vmem:[%s2386_s3 + $0x100] sm:$0xff] %vm19_vm3, %v1260_v55  ;;  %v1261_v61 = vmax.f32 %v1197_v57, 0.0  ;;  %v722_v62 = vpop.f32.mrb[8].mxu0  ;;  %v850_v63 = vpop.f32.mrb[8].mxu1  ;;  %v93_v57 = vld [vmem:[#allocation2 + $0x48] sm:$0xff] }
 0x109   :  { %1293 = vst.msk [vmem:[%s2386_s3 + $0x8] sm:$0xff] %vm19_vm3, %v1229_v60  ;;  %v965_v2 = vadd.f32 %v722_v62, %v88_v58  ;;  %v997_v3 = vadd.f32 %v850_v63, %v120_v59  ;;  %v724_v4 = vpop.f32.mrb[9].mxu0  ;;  %v852_v5 = vpop.f32.mrb[9].mxu1  ;;  %v125_v58 = vld [vmem:[#allocation2 + $0x148] sm:$0xff] }
 0x10a   :  { %1325 = vst.msk [vmem:[%s2386_s3 + $0x108] sm:$0xff] %vm19_vm3, %v1261_v61  ;;  %v1095_v6 = vld [vmem:[#allocation2 + $0x10] sm:$0xff]  ;;  %v725_v8 = vpop.f32.mrb[10].mxu0  ;;  %v853_v9 = vpop.f32.mrb[10].mxu1 }
 0x10b   :  { %v1127_v7 = vld [vmem:[#allocation2 + $0x110] sm:$0xff]  ;;  %v1166_v10 = vadd.f32 %v2006_v33, %v1095_v6  ;;  %1030 = vst.msk [vmem:[#allocation2 + $0x20] sm:$0xff] %vm19_vm3, %v965_v2  ;;  %1062 = vst.msk [vmem:[#allocation2 + $0x120] sm:$0xff] %vm19_vm3, %v997_v3  ;;  %v966_v12 = vadd.f32 %v725_v8, %v89_v0  ;;  %v998_v13 = vadd.f32 %v853_v9, %v121_v1  ;;  %v727_v14 = vpop.f32.mrb[11].mxu0  ;;  %v855_v15 = vpop.f32.mrb[11].mxu1 }
 0x10c   :  { %v1198_v11 = vadd.f32 %v2006_v33, %v1127_v7  ;;  %v1096_v16 = vld [vmem:[#allocation2 + $0x18] sm:$0xff]  ;;  %v94_v15 = vld [vmem:[#allocation2 + $0x50] sm:$0xff] }
 0x10d   :  { %v1128_v17 = vld [vmem:[#allocation2 + $0x118] sm:$0xff]  ;;  %v1230_v18 = vmax.f32 %v1166_v10, 0.0  ;;  %v1167_v20 = vadd.f32 %v2006_v33, %v1096_v16  ;;  %1031 = vst.msk [vmem:[#allocation2 + $0x28] sm:$0xff] %vm19_vm3, %v966_v12  ;;  %1063 = vst.msk [vmem:[#allocation2 + $0x128] sm:$0xff] %vm19_vm3, %v998_v13  ;;  %v126_v16 = vld [vmem:[#allocation2 + $0x150] sm:$0xff] }
 0x10e   :  { %v1262_v19 = vmax.f32 %v1198_v11, 0.0  ;;  %v1199_v21 = vadd.f32 %v2006_v33, %v1128_v17 }
 0x10f   :  { %1294 = vst.msk [vmem:[%s2386_s3 + $0x10] sm:$0xff] %vm19_vm3, %v1230_v18  ;;  %v1231_v24 = vmax.f32 %v1167_v20, 0.0 }
 0x110   :  { %1326 = vst.msk [vmem:[%s2386_s3 + $0x110] sm:$0xff] %vm19_vm3, %v1262_v19  ;;  %v1263_v25 = vmax.f32 %v1199_v21, 0.0  ;;  %v730_v26 = vpop.f32.mrb[12].mxu0  ;;  %v858_v27 = vpop.f32.mrb[12].mxu1  ;;  %v95_v21 = vld [vmem:[#allocation2 + $0x58] sm:$0xff] }
 0x111   :  { %1295 = vst.msk [vmem:[%s2386_s3 + $0x18] sm:$0xff] %vm19_vm3, %v1231_v24  ;;  %v967_v30 = vadd.f32 %v730_v26, %v90_v22  ;;  %v999_v31 = vadd.f32 %v858_v27, %v122_v23  ;;  %v732_v32 = vpop.f32.mrb[13].mxu0  ;;  %v860_v34 = vpop.f32.mrb[13].mxu1  ;;  %v127_v22 = vld [vmem:[#allocation2 + $0x158] sm:$0xff] }
 0x112   :  { %1327 = vst.msk [vmem:[%s2386_s3 + $0x118] sm:$0xff] %vm19_vm3, %v1263_v25  ;;  %v1097_v35 = vld [vmem:[#allocation2 + $0x20] sm:$0xff]  ;;  %v733_v37 = vpop.f32.mrb[14].mxu0  ;;  %v861_v38 = vpop.f32.mrb[14].mxu1 }
 0x113   :  { %v1129_v36 = vld [vmem:[#allocation2 + $0x120] sm:$0xff]  ;;  %v1168_v39 = vadd.f32 %v2006_v33, %v1097_v35  ;;  %1032 = vst.msk [vmem:[#allocation2 + $0x30] sm:$0xff] %vm19_vm3, %v967_v30  ;;  %1064 = vst.msk [vmem:[#allocation2 + $0x130] sm:$0xff] %vm19_vm3, %v999_v31  ;;  %v968_v41 = vadd.f32 %v733_v37, %v91_v28  ;;  %v1000_v42 = vadd.f32 %v861_v38, %v123_v29  ;;  %v735_v43 = vpop.f32.mrb[15].mxu0  ;;  %v863_v44 = vpop.f32.mrb[15].mxu1 }
 0x114   :  { %v1200_v40 = vadd.f32 %v2006_v33, %v1129_v36  ;;  %v1098_v45 = vld [vmem:[#allocation2 + $0x28] sm:$0xff]  ;;  %v96_v44 = vld [vmem:[#allocation2 + $0x60] sm:$0xff] }
 0x115   :  { %v1130_v46 = vld [vmem:[#allocation2 + $0x128] sm:$0xff]  ;;  %v1232_v47 = vmax.f32 %v1168_v39, 0.0  ;;  %v1169_v49 = vadd.f32 %v2006_v33, %v1098_v45  ;;  %1033 = vst.msk [vmem:[#allocation2 + $0x38] sm:$0xff] %vm19_vm3, %v968_v41  ;;  %1065 = vst.msk [vmem:[#allocation2 + $0x138] sm:$0xff] %vm19_vm3, %v1000_v42  ;;  %v128_v45 = vld [vmem:[#allocation2 + $0x160] sm:$0xff] }
 0x116   :  { %v1264_v48 = vmax.f32 %v1200_v40, 0.0  ;;  %v1201_v50 = vadd.f32 %v2006_v33, %v1130_v46 }
 0x117   :  { %1296 = vst.msk [vmem:[%s2386_s3 + $0x20] sm:$0xff] %vm19_vm3, %v1232_v47  ;;  %v1233_v53 = vmax.f32 %v1169_v49, 0.0 }
 0x118   :  { %1328 = vst.msk [vmem:[%s2386_s3 + $0x120] sm:$0xff] %vm19_vm3, %v1264_v48  ;;  %v1265_v54 = vmax.f32 %v1201_v50, 0.0  ;;  %v738_v55 = vpop.f32.mrb[16].mxu0  ;;  %v866_v56 = vpop.f32.mrb[16].mxu1  ;;  %v97_v50 = vld [vmem:[#allocation2 + $0x68] sm:$0xff] }
 0x119   :  { %1297 = vst.msk [vmem:[%s2386_s3 + $0x28] sm:$0xff] %vm19_vm3, %v1233_v53  ;;  %v969_v59 = vadd.f32 %v738_v55, %v92_v51  ;;  %v1001_v60 = vadd.f32 %v866_v56, %v124_v52  ;;  %v740_v61 = vpop.f32.mrb[17].mxu0  ;;  %v868_v62 = vpop.f32.mrb[17].mxu1  ;;  %v129_v51 = vld [vmem:[#allocation2 + $0x168] sm:$0xff] }
 0x11a   :  { %1329 = vst.msk [vmem:[%s2386_s3 + $0x128] sm:$0xff] %vm19_vm3, %v1265_v54  ;;  %v1099_v63 = vld [vmem:[#allocation2 + $0x30] sm:$0xff]  ;;  %v741_v1 = vpop.f32.mrb[18].mxu0  ;;  %v869_v2 = vpop.f32.mrb[18].mxu1 }
 0x11b   :  { %v1131_v0 = vld [vmem:[#allocation2 + $0x130] sm:$0xff]  ;;  %v1170_v3 = vadd.f32 %v2006_v33, %v1099_v63  ;;  %1034 = vst.msk [vmem:[#allocation2 + $0x40] sm:$0xff] %vm19_vm3, %v969_v59  ;;  %1066 = vst.msk [vmem:[#allocation2 + $0x140] sm:$0xff] %vm19_vm3, %v1001_v60  ;;  %v970_v5 = vadd.f32 %v741_v1, %v93_v57  ;;  %v1002_v6 = vadd.f32 %v869_v2, %v125_v58  ;;  %v743_v7 = vpop.f32.mrb[19].mxu0  ;;  %v871_v8 = vpop.f32.mrb[19].mxu1 }
 0x11c   :  { %v1202_v4 = vadd.f32 %v2006_v33, %v1131_v0  ;;  %v1100_v9 = vld [vmem:[#allocation2 + $0x38] sm:$0xff]  ;;  %v98_v8 = vld [vmem:[#allocation2 + $0x70] sm:$0xff] }
 0x11d   :  { %v1132_v10 = vld [vmem:[#allocation2 + $0x138] sm:$0xff]  ;;  %v1234_v11 = vmax.f32 %v1170_v3, 0.0  ;;  %v1171_v13 = vadd.f32 %v2006_v33, %v1100_v9  ;;  %1035 = vst.msk [vmem:[#allocation2 + $0x48] sm:$0xff] %vm19_vm3, %v970_v5  ;;  %1067 = vst.msk [vmem:[#allocation2 + $0x148] sm:$0xff] %vm19_vm3, %v1002_v6  ;;  %v130_v9 = vld [vmem:[#allocation2 + $0x170] sm:$0xff] }
 0x11e   :  { %v1266_v12 = vmax.f32 %v1202_v4, 0.0  ;;  %v1203_v14 = vadd.f32 %v2006_v33, %v1132_v10 }
 0x11f   :  { %1298 = vst.msk [vmem:[%s2386_s3 + $0x30] sm:$0xff] %vm19_vm3, %v1234_v11  ;;  %v1235_v17 = vmax.f32 %v1171_v13, 0.0 }
 0x120   :  { %1330 = vst.msk [vmem:[%s2386_s3 + $0x130] sm:$0xff] %vm19_vm3, %v1266_v12  ;;  %v1267_v18 = vmax.f32 %v1203_v14, 0.0  ;;  %v746_v19 = vpop.f32.mrb[20].mxu0  ;;  %v874_v20 = vpop.f32.mrb[20].mxu1  ;;  %v99_v14 = vld [vmem:[#allocation2 + $0x78] sm:$0xff] }
 0x121   :  { %1299 = vst.msk [vmem:[%s2386_s3 + $0x38] sm:$0xff] %vm19_vm3, %v1235_v17  ;;  %v971_v23 = vadd.f32 %v746_v19, %v94_v15  ;;  %v1003_v24 = vadd.f32 %v874_v20, %v126_v16  ;;  %v748_v25 = vpop.f32.mrb[21].mxu0  ;;  %v876_v26 = vpop.f32.mrb[21].mxu1  ;;  %v131_v15 = vld [vmem:[#allocation2 + $0x178] sm:$0xff] }
 0x122   :  { %1331 = vst.msk [vmem:[%s2386_s3 + $0x138] sm:$0xff] %vm19_vm3, %v1267_v18  ;;  %v1101_v27 = vld [vmem:[#allocation2 + $0x40] sm:$0xff]  ;;  %v749_v29 = vpop.f32.mrb[22].mxu0  ;;  %v877_v30 = vpop.f32.mrb[22].mxu1 }
 0x123   :  { %v1133_v28 = vld [vmem:[#allocation2 + $0x140] sm:$0xff]  ;;  %v1172_v31 = vadd.f32 %v2006_v33, %v1101_v27  ;;  %1036 = vst.msk [vmem:[#allocation2 + $0x50] sm:$0xff] %vm19_vm3, %v971_v23  ;;  %1068 = vst.msk [vmem:[#allocation2 + $0x150] sm:$0xff] %vm19_vm3, %v1003_v24  ;;  %v972_v34 = vadd.f32 %v749_v29, %v95_v21  ;;  %v1004_v35 = vadd.f32 %v877_v30, %v127_v22  ;;  %v751_v36 = vpop.f32.mrb[23].mxu0  ;;  %v879_v37 = vpop.f32.mrb[23].mxu1 }
 0x124   :  { %v1204_v32 = vadd.f32 %v2006_v33, %v1133_v28  ;;  %v1102_v38 = vld [vmem:[#allocation2 + $0x48] sm:$0xff]  ;;  %v100_v37 = vld [vmem:[#allocation2 + $0x80] sm:$0xff] }
 0x125   :  { %v1134_v39 = vld [vmem:[#allocation2 + $0x148] sm:$0xff]  ;;  %v1236_v40 = vmax.f32 %v1172_v31, 0.0  ;;  %v1173_v42 = vadd.f32 %v2006_v33, %v1102_v38  ;;  %1037 = vst.msk [vmem:[#allocation2 + $0x58] sm:$0xff] %vm19_vm3, %v972_v34  ;;  %1069 = vst.msk [vmem:[#allocation2 + $0x158] sm:$0xff] %vm19_vm3, %v1004_v35  ;;  %v132_v38 = vld [vmem:[#allocation2 + $0x180] sm:$0xff] }
 0x126   :  { %v1268_v41 = vmax.f32 %v1204_v32, 0.0  ;;  %v1205_v43 = vadd.f32 %v2006_v33, %v1134_v39 }
 0x127   :  { %1300 = vst.msk [vmem:[%s2386_s3 + $0x40] sm:$0xff] %vm19_vm3, %v1236_v40  ;;  %v1237_v46 = vmax.f32 %v1173_v42, 0.0 }
 0x128   :  { %1332 = vst.msk [vmem:[%s2386_s3 + $0x140] sm:$0xff] %vm19_vm3, %v1268_v41  ;;  %v1269_v47 = vmax.f32 %v1205_v43, 0.0  ;;  %v754_v48 = vpop.f32.mrb[24].mxu0  ;;  %v882_v49 = vpop.f32.mrb[24].mxu1  ;;  %v101_v43 = vld [vmem:[#allocation2 + $0x88] sm:$0xff] }
 0x129   :  { %1301 = vst.msk [vmem:[%s2386_s3 + $0x48] sm:$0xff] %vm19_vm3, %v1237_v46  ;;  %v973_v52 = vadd.f32 %v754_v48, %v96_v44  ;;  %v1005_v53 = vadd.f32 %v882_v49, %v128_v45  ;;  %v756_v54 = vpop.f32.mrb[25].mxu0  ;;  %v884_v55 = vpop.f32.mrb[25].mxu1  ;;  %v133_v44 = vld [vmem:[#allocation2 + $0x188] sm:$0xff] }
 0x12a   :  { %1333 = vst.msk [vmem:[%s2386_s3 + $0x148] sm:$0xff] %vm19_vm3, %v1269_v47  ;;  %v1103_v56 = vld [vmem:[#allocation2 + $0x50] sm:$0xff]  ;;  %v757_v58 = vpop.f32.mrb[26].mxu0  ;;  %v885_v59 = vpop.f32.mrb[26].mxu1 }
 0x12b   :  { %v1135_v57 = vld [vmem:[#allocation2 + $0x150] sm:$0xff]  ;;  %v1174_v60 = vadd.f32 %v2006_v33, %v1103_v56  ;;  %1038 = vst.msk [vmem:[#allocation2 + $0x60] sm:$0xff] %vm19_vm3, %v973_v52  ;;  %1070 = vst.msk [vmem:[#allocation2 + $0x160] sm:$0xff] %vm19_vm3, %v1005_v53  ;;  %v974_v62 = vadd.f32 %v757_v58, %v97_v50  ;;  %v1006_v63 = vadd.f32 %v885_v59, %v129_v51  ;;  %v759_v0 = vpop.f32.mrb[27].mxu0  ;;  %v887_v1 = vpop.f32.mrb[27].mxu1 }
 0x12c   :  { %v1206_v61 = vadd.f32 %v2006_v33, %v1135_v57  ;;  %v1104_v2 = vld [vmem:[#allocation2 + $0x58] sm:$0xff]  ;;  %v102_v1 = vld [vmem:[#allocation2 + $0x90] sm:$0xff] }
 0x12d   :  { %v1136_v3 = vld [vmem:[#allocation2 + $0x158] sm:$0xff]  ;;  %v1238_v4 = vmax.f32 %v1174_v60, 0.0  ;;  %v1175_v6 = vadd.f32 %v2006_v33, %v1104_v2  ;;  %1039 = vst.msk [vmem:[#allocation2 + $0x68] sm:$0xff] %vm19_vm3, %v974_v62  ;;  %1071 = vst.msk [vmem:[#allocation2 + $0x168] sm:$0xff] %vm19_vm3, %v1006_v63  ;;  %v134_v2 = vld [vmem:[#allocation2 + $0x190] sm:$0xff] }
 0x12e   :  { %v1270_v5 = vmax.f32 %v1206_v61, 0.0  ;;  %v1207_v7 = vadd.f32 %v2006_v33, %v1136_v3 }
 0x12f   :  { %1302 = vst.msk [vmem:[%s2386_s3 + $0x50] sm:$0xff] %vm19_vm3, %v1238_v4  ;;  %v1239_v10 = vmax.f32 %v1175_v6, 0.0 }
 0x130   :  { %1334 = vst.msk [vmem:[%s2386_s3 + $0x150] sm:$0xff] %vm19_vm3, %v1270_v5  ;;  %v1271_v11 = vmax.f32 %v1207_v7, 0.0  ;;  %v762_v12 = vpop.f32.mrb[28].mxu0  ;;  %v890_v13 = vpop.f32.mrb[28].mxu1  ;;  %v103_v7 = vld [vmem:[#allocation2 + $0x98] sm:$0xff] }
 0x131   :  { %1303 = vst.msk [vmem:[%s2386_s3 + $0x58] sm:$0xff] %vm19_vm3, %v1239_v10  ;;  %v975_v16 = vadd.f32 %v762_v12, %v98_v8  ;;  %v1007_v17 = vadd.f32 %v890_v13, %v130_v9  ;;  %v764_v18 = vpop.f32.mrb[29].mxu0  ;;  %v892_v19 = vpop.f32.mrb[29].mxu1  ;;  %v135_v8 = vld [vmem:[#allocation2 + $0x198] sm:$0xff] }
 0x132   :  { %1335 = vst.msk [vmem:[%s2386_s3 + $0x158] sm:$0xff] %vm19_vm3, %v1271_v11  ;;  %v1105_v20 = vld [vmem:[#allocation2 + $0x60] sm:$0xff]  ;;  %v765_v22 = vpop.f32.mrb[30].mxu0  ;;  %v893_v23 = vpop.f32.mrb[30].mxu1 }
 0x133   :  { %v1137_v21 = vld [vmem:[#allocation2 + $0x160] sm:$0xff]  ;;  %v1176_v24 = vadd.f32 %v2006_v33, %v1105_v20  ;;  %1040 = vst.msk [vmem:[#allocation2 + $0x70] sm:$0xff] %vm19_vm3, %v975_v16  ;;  %1072 = vst.msk [vmem:[#allocation2 + $0x170] sm:$0xff] %vm19_vm3, %v1007_v17  ;;  %v976_v26 = vadd.f32 %v765_v22, %v99_v14  ;;  %v1008_v27 = vadd.f32 %v893_v23, %v131_v15  ;;  %v767_v28 = vpop.f32.mrb[31].mxu0  ;;  %v895_v29 = vpop.f32.mrb[31].mxu1 }
 0x134   :  { %v1208_v25 = vadd.f32 %v2006_v33, %v1137_v21  ;;  %v1106_v30 = vld [vmem:[#allocation2 + $0x68] sm:$0xff]  ;;  %v104_v29 = vld [vmem:[#allocation2 + $0xa0] sm:$0xff] }
 0x135   :  { %v1138_v31 = vld [vmem:[#allocation2 + $0x168] sm:$0xff]  ;;  %v1240_v32 = vmax.f32 %v1176_v24, 0.0  ;;  %v1177_v35 = vadd.f32 %v2006_v33, %v1106_v30  ;;  %1041 = vst.msk [vmem:[#allocation2 + $0x78] sm:$0xff] %vm19_vm3, %v976_v26  ;;  %1073 = vst.msk [vmem:[#allocation2 + $0x178] sm:$0xff] %vm19_vm3, %v1008_v27  ;;  %v136_v30 = vld [vmem:[#allocation2 + $0x1a0] sm:$0xff] }
 0x136   :  { %v1272_v34 = vmax.f32 %v1208_v25, 0.0  ;;  %v1209_v36 = vadd.f32 %v2006_v33, %v1138_v31 }
 0x137   :  { %1304 = vst.msk [vmem:[%s2386_s3 + $0x60] sm:$0xff] %vm19_vm3, %v1240_v32  ;;  %v1241_v39 = vmax.f32 %v1177_v35, 0.0 }
 0x138   :  { %1336 = vst.msk [vmem:[%s2386_s3 + $0x160] sm:$0xff] %vm19_vm3, %v1272_v34  ;;  %v1273_v40 = vmax.f32 %v1209_v36, 0.0  ;;  %v770_v41 = vpop.f32.mrb[32].mxu0  ;;  %v898_v42 = vpop.f32.mrb[32].mxu1  ;;  %v105_v36 = vld [vmem:[#allocation2 + $0xa8] sm:$0xff] }
 0x139   :  { %1305 = vst.msk [vmem:[%s2386_s3 + $0x68] sm:$0xff] %vm19_vm3, %v1241_v39  ;;  %v977_v45 = vadd.f32 %v770_v41, %v100_v37  ;;  %v1009_v46 = vadd.f32 %v898_v42, %v132_v38  ;;  %v772_v47 = vpop.f32.mrb[33].mxu0  ;;  %v900_v48 = vpop.f32.mrb[33].mxu1  ;;  %v137_v37 = vld [vmem:[#allocation2 + $0x1a8] sm:$0xff] }
 0x13a   :  { %1337 = vst.msk [vmem:[%s2386_s3 + $0x168] sm:$0xff] %vm19_vm3, %v1273_v40  ;;  %v1107_v49 = vld [vmem:[#allocation2 + $0x70] sm:$0xff]  ;;  %v773_v51 = vpop.f32.mrb[34].mxu0  ;;  %v901_v52 = vpop.f32.mrb[34].mxu1 }
 0x13b   :  { %v1139_v50 = vld [vmem:[#allocation2 + $0x170] sm:$0xff]  ;;  %v1178_v53 = vadd.f32 %v2006_v33, %v1107_v49  ;;  %1042 = vst.msk [vmem:[#allocation2 + $0x80] sm:$0xff] %vm19_vm3, %v977_v45  ;;  %1074 = vst.msk [vmem:[#allocation2 + $0x180] sm:$0xff] %vm19_vm3, %v1009_v46  ;;  %v978_v55 = vadd.f32 %v773_v51, %v101_v43  ;;  %v1010_v56 = vadd.f32 %v901_v52, %v133_v44  ;;  %v775_v57 = vpop.f32.mrb[35].mxu0  ;;  %v903_v58 = vpop.f32.mrb[35].mxu1 }
 0x13c   :  { %v1210_v54 = vadd.f32 %v2006_v33, %v1139_v50  ;;  %v1108_v59 = vld [vmem:[#allocation2 + $0x78] sm:$0xff]  ;;  %v106_v58 = vld [vmem:[#allocation2 + $0xb0] sm:$0xff] }
 0x13d   :  { %v1140_v60 = vld [vmem:[#allocation2 + $0x178] sm:$0xff]  ;;  %v1242_v61 = vmax.f32 %v1178_v53, 0.0  ;;  %v1179_v63 = vadd.f32 %v2006_v33, %v1108_v59  ;;  %1043 = vst.msk [vmem:[#allocation2 + $0x88] sm:$0xff] %vm19_vm3, %v978_v55  ;;  %1075 = vst.msk [vmem:[#allocation2 + $0x188] sm:$0xff] %vm19_vm3, %v1010_v56  ;;  %v138_v59 = vld [vmem:[#allocation2 + $0x1b0] sm:$0xff] }
 0x13e   :  { %v1274_v62 = vmax.f32 %v1210_v54, 0.0  ;;  %v1211_v0 = vadd.f32 %v2006_v33, %v1140_v60 }
 0x13f   :  { %1306 = vst.msk [vmem:[%s2386_s3 + $0x70] sm:$0xff] %vm19_vm3, %v1242_v61  ;;  %v1243_v3 = vmax.f32 %v1179_v63, 0.0 }
 0x140   :  { %1338 = vst.msk [vmem:[%s2386_s3 + $0x170] sm:$0xff] %vm19_vm3, %v1274_v62  ;;  %v1275_v4 = vmax.f32 %v1211_v0, 0.0  ;;  %v778_v5 = vpop.f32.mrb[36].mxu0  ;;  %v906_v6 = vpop.f32.mrb[36].mxu1  ;;  %v107_v0 = vld [vmem:[#allocation2 + $0xb8] sm:$0xff] }
 0x141   :  { %1307 = vst.msk [vmem:[%s2386_s3 + $0x78] sm:$0xff] %vm19_vm3, %v1243_v3  ;;  %v979_v9 = vadd.f32 %v778_v5, %v102_v1  ;;  %v1011_v10 = vadd.f32 %v906_v6, %v134_v2  ;;  %v780_v11 = vpop.f32.mrb[37].mxu0  ;;  %v908_v12 = vpop.f32.mrb[37].mxu1  ;;  %v139_v1 = vld [vmem:[#allocation2 + $0x1b8] sm:$0xff] }
 0x142   :  { %1339 = vst.msk [vmem:[%s2386_s3 + $0x178] sm:$0xff] %vm19_vm3, %v1275_v4  ;;  %v1109_v13 = vld [vmem:[#allocation2 + $0x80] sm:$0xff]  ;;  %v781_v15 = vpop.f32.mrb[38].mxu0  ;;  %v909_v16 = vpop.f32.mrb[38].mxu1 }
 0x143   :  { %v1141_v14 = vld [vmem:[#allocation2 + $0x180] sm:$0xff]  ;;  %v1180_v17 = vadd.f32 %v2006_v33, %v1109_v13  ;;  %1044 = vst.msk [vmem:[#allocation2 + $0x90] sm:$0xff] %vm19_vm3, %v979_v9  ;;  %1076 = vst.msk [vmem:[#allocation2 + $0x190] sm:$0xff] %vm19_vm3, %v1011_v10  ;;  %v980_v19 = vadd.f32 %v781_v15, %v103_v7  ;;  %v1012_v20 = vadd.f32 %v909_v16, %v135_v8  ;;  %v783_v21 = vpop.f32.mrb[39].mxu0  ;;  %v911_v22 = vpop.f32.mrb[39].mxu1 }
 0x144   :  { %v1212_v18 = vadd.f32 %v2006_v33, %v1141_v14  ;;  %v1110_v23 = vld [vmem:[#allocation2 + $0x88] sm:$0xff]  ;;  %v108_v22 = vld [vmem:[#allocation2 + $0xc0] sm:$0xff] }
 0x145   :  { %v1142_v24 = vld [vmem:[#allocation2 + $0x188] sm:$0xff]  ;;  %v1244_v25 = vmax.f32 %v1180_v17, 0.0  ;;  %v1181_v27 = vadd.f32 %v2006_v33, %v1110_v23  ;;  %1045 = vst.msk [vmem:[#allocation2 + $0x98] sm:$0xff] %vm19_vm3, %v980_v19  ;;  %1077 = vst.msk [vmem:[#allocation2 + $0x198] sm:$0xff] %vm19_vm3, %v1012_v20  ;;  %v140_v23 = vld [vmem:[#allocation2 + $0x1c0] sm:$0xff] }
 0x146   :  { %v1276_v26 = vmax.f32 %v1212_v18, 0.0  ;;  %v1213_v28 = vadd.f32 %v2006_v33, %v1142_v24 }
 0x147   :  { %1308 = vst.msk [vmem:[%s2386_s3 + $0x80] sm:$0xff] %vm19_vm3, %v1244_v25  ;;  %v1245_v31 = vmax.f32 %v1181_v27, 0.0 }
 0x148   :  { %1340 = vst.msk [vmem:[%s2386_s3 + $0x180] sm:$0xff] %vm19_vm3, %v1276_v26  ;;  %v1277_v32 = vmax.f32 %v1213_v28, 0.0  ;;  %v786_v34 = vpop.f32.mrb[40].mxu0  ;;  %v914_v35 = vpop.f32.mrb[40].mxu1  ;;  %v109_v28 = vld [vmem:[#allocation2 + $0xc8] sm:$0xff] }
 0x149   :  { %1309 = vst.msk [vmem:[%s2386_s3 + $0x88] sm:$0xff] %vm19_vm3, %v1245_v31  ;;  %v981_v38 = vadd.f32 %v786_v34, %v104_v29  ;;  %v1013_v39 = vadd.f32 %v914_v35, %v136_v30  ;;  %v788_v40 = vpop.f32.mrb[41].mxu0  ;;  %v916_v41 = vpop.f32.mrb[41].mxu1  ;;  %v141_v29 = vld [vmem:[#allocation2 + $0x1c8] sm:$0xff] }
 0x14a   :  { %1341 = vst.msk [vmem:[%s2386_s3 + $0x188] sm:$0xff] %vm19_vm3, %v1277_v32  ;;  %v1111_v42 = vld [vmem:[#allocation2 + $0x90] sm:$0xff]  ;;  %v789_v44 = vpop.f32.mrb[42].mxu0  ;;  %v917_v45 = vpop.f32.mrb[42].mxu1 }
 0x14b   :  { %v1143_v43 = vld [vmem:[#allocation2 + $0x190] sm:$0xff]  ;;  %v1182_v46 = vadd.f32 %v2006_v33, %v1111_v42  ;;  %1046 = vst.msk [vmem:[#allocation2 + $0xa0] sm:$0xff] %vm19_vm3, %v981_v38  ;;  %1078 = vst.msk [vmem:[#allocation2 + $0x1a0] sm:$0xff] %vm19_vm3, %v1013_v39  ;;  %v982_v48 = vadd.f32 %v789_v44, %v105_v36  ;;  %v1014_v49 = vadd.f32 %v917_v45, %v137_v37  ;;  %v791_v50 = vpop.f32.mrb[43].mxu0  ;;  %v919_v51 = vpop.f32.mrb[43].mxu1 }
 0x14c   :  { %v1214_v47 = vadd.f32 %v2006_v33, %v1143_v43  ;;  %v1112_v52 = vld [vmem:[#allocation2 + $0x98] sm:$0xff]  ;;  %v110_v51 = vld [vmem:[#allocation2 + $0xd0] sm:$0xff] }
 0x14d   :  { %v1144_v53 = vld [vmem:[#allocation2 + $0x198] sm:$0xff]  ;;  %v1246_v54 = vmax.f32 %v1182_v46, 0.0  ;;  %v1183_v56 = vadd.f32 %v2006_v33, %v1112_v52  ;;  %1047 = vst.msk [vmem:[#allocation2 + $0xa8] sm:$0xff] %vm19_vm3, %v982_v48  ;;  %1079 = vst.msk [vmem:[#allocation2 + $0x1a8] sm:$0xff] %vm19_vm3, %v1014_v49  ;;  %v142_v52 = vld [vmem:[#allocation2 + $0x1d0] sm:$0xff] }
 0x14e   :  { %v1278_v55 = vmax.f32 %v1214_v47, 0.0  ;;  %v1215_v57 = vadd.f32 %v2006_v33, %v1144_v53 }
 0x14f   :  { %1310 = vst.msk [vmem:[%s2386_s3 + $0x90] sm:$0xff] %vm19_vm3, %v1246_v54  ;;  %v1247_v60 = vmax.f32 %v1183_v56, 0.0 }
 0x150   :  { %1342 = vst.msk [vmem:[%s2386_s3 + $0x190] sm:$0xff] %vm19_vm3, %v1278_v55  ;;  %v1279_v61 = vmax.f32 %v1215_v57, 0.0  ;;  %v794_v62 = vpop.f32.mrb[44].mxu0  ;;  %v922_v63 = vpop.f32.mrb[44].mxu1  ;;  %v111_v57 = vld [vmem:[#allocation2 + $0xd8] sm:$0xff] }
 0x151   :  { %1311 = vst.msk [vmem:[%s2386_s3 + $0x98] sm:$0xff] %vm19_vm3, %v1247_v60  ;;  %v983_v2 = vadd.f32 %v794_v62, %v106_v58  ;;  %v1015_v3 = vadd.f32 %v922_v63, %v138_v59  ;;  %v796_v4 = vpop.f32.mrb[45].mxu0  ;;  %v924_v5 = vpop.f32.mrb[45].mxu1  ;;  %v143_v58 = vld [vmem:[#allocation2 + $0x1d8] sm:$0xff] }
 0x152   :  { %1343 = vst.msk [vmem:[%s2386_s3 + $0x198] sm:$0xff] %vm19_vm3, %v1279_v61  ;;  %v1113_v6 = vld [vmem:[#allocation2 + $0xa0] sm:$0xff]  ;;  %v797_v8 = vpop.f32.mrb[46].mxu0  ;;  %v925_v9 = vpop.f32.mrb[46].mxu1 }
 0x153   :  { %v1145_v7 = vld [vmem:[#allocation2 + $0x1a0] sm:$0xff]  ;;  %v1184_v10 = vadd.f32 %v2006_v33, %v1113_v6  ;;  %1048 = vst.msk [vmem:[#allocation2 + $0xb0] sm:$0xff] %vm19_vm3, %v983_v2  ;;  %1080 = vst.msk [vmem:[#allocation2 + $0x1b0] sm:$0xff] %vm19_vm3, %v1015_v3  ;;  %v984_v12 = vadd.f32 %v797_v8, %v107_v0  ;;  %v1016_v13 = vadd.f32 %v925_v9, %v139_v1  ;;  %v799_v14 = vpop.f32.mrb[47].mxu0  ;;  %v927_v15 = vpop.f32.mrb[47].mxu1 }
 0x154   :  { %v1216_v11 = vadd.f32 %v2006_v33, %v1145_v7  ;;  %v1114_v16 = vld [vmem:[#allocation2 + $0xa8] sm:$0xff]  ;;  %v112_v15 = vld [vmem:[#allocation2 + $0xe0] sm:$0xff] }
 0x155   :  { %v1146_v17 = vld [vmem:[#allocation2 + $0x1a8] sm:$0xff]  ;;  %v1248_v18 = vmax.f32 %v1184_v10, 0.0  ;;  %v1185_v20 = vadd.f32 %v2006_v33, %v1114_v16  ;;  %1049 = vst.msk [vmem:[#allocation2 + $0xb8] sm:$0xff] %vm19_vm3, %v984_v12  ;;  %1081 = vst.msk [vmem:[#allocation2 + $0x1b8] sm:$0xff] %vm19_vm3, %v1016_v13  ;;  %v144_v16 = vld [vmem:[#allocation2 + $0x1e0] sm:$0xff] }
 0x156   :  { %v1280_v19 = vmax.f32 %v1216_v11, 0.0  ;;  %v1217_v21 = vadd.f32 %v2006_v33, %v1146_v17 }
 0x157   :  { %1312 = vst.msk [vmem:[%s2386_s3 + $0xa0] sm:$0xff] %vm19_vm3, %v1248_v18  ;;  %v1249_v24 = vmax.f32 %v1185_v20, 0.0 }
 0x158   :  { %1344 = vst.msk [vmem:[%s2386_s3 + $0x1a0] sm:$0xff] %vm19_vm3, %v1280_v19  ;;  %v1281_v25 = vmax.f32 %v1217_v21, 0.0  ;;  %v802_v26 = vpop.f32.mrb[48].mxu0  ;;  %v930_v27 = vpop.f32.mrb[48].mxu1  ;;  %v113_v21 = vld [vmem:[#allocation2 + $0xe8] sm:$0xff] }
 0x159   :  { %1313 = vst.msk [vmem:[%s2386_s3 + $0xa8] sm:$0xff] %vm19_vm3, %v1249_v24  ;;  %v985_v30 = vadd.f32 %v802_v26, %v108_v22  ;;  %v1017_v31 = vadd.f32 %v930_v27, %v140_v23  ;;  %v804_v32 = vpop.f32.mrb[49].mxu0  ;;  %v932_v34 = vpop.f32.mrb[49].mxu1  ;;  %v145_v22 = vld [vmem:[#allocation2 + $0x1e8] sm:$0xff] }
 0x15a   :  { %1345 = vst.msk [vmem:[%s2386_s3 + $0x1a8] sm:$0xff] %vm19_vm3, %v1281_v25  ;;  %v1115_v35 = vld [vmem:[#allocation2 + $0xb0] sm:$0xff]  ;;  %v805_v37 = vpop.f32.mrb[50].mxu0  ;;  %v933_v38 = vpop.f32.mrb[50].mxu1 }
 0x15b   :  { %v1147_v36 = vld [vmem:[#allocation2 + $0x1b0] sm:$0xff]  ;;  %v1186_v39 = vadd.f32 %v2006_v33, %v1115_v35  ;;  %1050 = vst.msk [vmem:[#allocation2 + $0xc0] sm:$0xff] %vm19_vm3, %v985_v30  ;;  %1082 = vst.msk [vmem:[#allocation2 + $0x1c0] sm:$0xff] %vm19_vm3, %v1017_v31  ;;  %v986_v41 = vadd.f32 %v805_v37, %v109_v28  ;;  %v1018_v42 = vadd.f32 %v933_v38, %v141_v29  ;;  %v807_v43 = vpop.f32.mrb[51].mxu0  ;;  %v935_v44 = vpop.f32.mrb[51].mxu1 }
 0x15c   :  { %v1218_v40 = vadd.f32 %v2006_v33, %v1147_v36  ;;  %v1116_v45 = vld [vmem:[#allocation2 + $0xb8] sm:$0xff]  ;;  %v114_v44 = vld [vmem:[#allocation2 + $0xf0] sm:$0xff] }
 0x15d   :  { %v1148_v46 = vld [vmem:[#allocation2 + $0x1b8] sm:$0xff]  ;;  %v1250_v47 = vmax.f32 %v1186_v39, 0.0  ;;  %v1187_v49 = vadd.f32 %v2006_v33, %v1116_v45  ;;  %1051 = vst.msk [vmem:[#allocation2 + $0xc8] sm:$0xff] %vm19_vm3, %v986_v41  ;;  %1083 = vst.msk [vmem:[#allocation2 + $0x1c8] sm:$0xff] %vm19_vm3, %v1018_v42  ;;  %v146_v45 = vld [vmem:[#allocation2 + $0x1f0] sm:$0xff] }
 0x15e   :  { %v1282_v48 = vmax.f32 %v1218_v40, 0.0  ;;  %v1219_v50 = vadd.f32 %v2006_v33, %v1148_v46 }
 0x15f   :  { %1314 = vst.msk [vmem:[%s2386_s3 + $0xb0] sm:$0xff] %vm19_vm3, %v1250_v47  ;;  %v1251_v53 = vmax.f32 %v1187_v49, 0.0  ;;  %v115_v49 = vld [vmem:[#allocation2 + $0xf8] sm:$0xff] }
 0x160   :  { %1346 = vst.msk [vmem:[%s2386_s3 + $0x1b0] sm:$0xff] %vm19_vm3, %v1282_v48  ;;  %v1283_v54 = vmax.f32 %v1219_v50, 0.0  ;;  %v810_v55 = vpop.f32.mrb[52].mxu0  ;;  %v938_v56 = vpop.f32.mrb[52].mxu1  ;;  %v147_v50 = vld [vmem:[#allocation2 + $0x1f8] sm:$0xff] }
 0x161   :  { %1315 = vst.msk [vmem:[%s2386_s3 + $0xb8] sm:$0xff] %vm19_vm3, %v1251_v53  ;;  %v987_v59 = vadd.f32 %v810_v55, %v110_v51  ;;  %v1019_v60 = vadd.f32 %v938_v56, %v142_v52  ;;  %v812_v61 = vpop.f32.mrb[53].mxu0  ;;  %v940_v62 = vpop.f32.mrb[53].mxu1 }
 0x162   :  { %1347 = vst.msk [vmem:[%s2386_s3 + $0x1b8] sm:$0xff] %vm19_vm3, %v1283_v54  ;;  %v1117_v63 = vld [vmem:[#allocation2 + $0xc0] sm:$0xff]  ;;  %v813_v1 = vpop.f32.mrb[54].mxu0  ;;  %v941_v2 = vpop.f32.mrb[54].mxu1 }
 0x163   :  { %v1149_v0 = vld [vmem:[#allocation2 + $0x1c0] sm:$0xff]  ;;  %v1188_v3 = vadd.f32 %v2006_v33, %v1117_v63  ;;  %1052 = vst.msk [vmem:[#allocation2 + $0xd0] sm:$0xff] %vm19_vm3, %v987_v59  ;;  %1084 = vst.msk [vmem:[#allocation2 + $0x1d0] sm:$0xff] %vm19_vm3, %v1019_v60  ;;  %v988_v5 = vadd.f32 %v813_v1, %v111_v57  ;;  %v1020_v6 = vadd.f32 %v941_v2, %v143_v58  ;;  %v815_v7 = vpop.f32.mrb[55].mxu0  ;;  %v943_v8 = vpop.f32.mrb[55].mxu1 }
 0x164   :  { %v1220_v4 = vadd.f32 %v2006_v33, %v1149_v0  ;;  %v1118_v9 = vld [vmem:[#allocation2 + $0xc8] sm:$0xff]  ;;  %v1592_v59 = vld [vmem:[%s2385_s2] ss:$0 sm:$0xff] }
 0x165   :  { %v1150_v10 = vld [vmem:[#allocation2 + $0x1c8] sm:$0xff]  ;;  %v1252_v11 = vmax.f32 %v1188_v3, 0.0  ;;  %v1189_v13 = vadd.f32 %v2006_v33, %v1118_v9  ;;  %1053 = vst.msk [vmem:[#allocation2 + $0xd8] sm:$0xff] %vm19_vm3, %v988_v5  ;;  %1085 = vst.msk [vmem:[#allocation2 + $0x1d8] sm:$0xff] %vm19_vm3, %v1020_v6 }
 0x166   :  { %v1284_v12 = vmax.f32 %v1220_v4, 0.0  ;;  %v1221_v14 = vadd.f32 %v2006_v33, %v1150_v10 }
 0x167   :  { %1316 = vst.msk [vmem:[%s2386_s3 + $0xc0] sm:$0xff] %vm19_vm3, %v1252_v11  ;;  %v1253_v17 = vmax.f32 %v1189_v13, 0.0 }
 0x168   :  { %1348 = vst.msk [vmem:[%s2386_s3 + $0x1c0] sm:$0xff] %vm19_vm3, %v1284_v12  ;;  %v1285_v18 = vmax.f32 %v1221_v14, 0.0  ;;  %v818_v19 = vpop.f32.mrb[56].mxu0  ;;  %v946_v20 = vpop.f32.mrb[56].mxu1 }
 0x169   :  { %1317 = vst.msk [vmem:[%s2386_s3 + $0xc8] sm:$0xff] %vm19_vm3, %v1253_v17  ;;  %v989_v23 = vadd.f32 %v818_v19, %v112_v15  ;;  %v1021_v24 = vadd.f32 %v946_v20, %v144_v16  ;;  %v820_v25 = vpop.f32.mrb[57].mxu0  ;;  %v948_v26 = vpop.f32.mrb[57].mxu1 }
 0x16a   :  { %1349 = vst.msk [vmem:[%s2386_s3 + $0x1c8] sm:$0xff] %vm19_vm3, %v1285_v18  ;;  %v1119_v27 = vld [vmem:[#allocation2 + $0xd0] sm:$0xff]  ;;  %v821_v29 = vpop.f32.mrb[58].mxu0  ;;  %v949_v30 = vpop.f32.mrb[58].mxu1 }
 0x16b   :  { %v1151_v28 = vld [vmem:[#allocation2 + $0x1d0] sm:$0xff]  ;;  %v1190_v31 = vadd.f32 %v2006_v33, %v1119_v27  ;;  %1054 = vst.msk [vmem:[#allocation2 + $0xe0] sm:$0xff] %vm19_vm3, %v989_v23  ;;  %1086 = vst.msk [vmem:[#allocation2 + $0x1e0] sm:$0xff] %vm19_vm3, %v1021_v24  ;;  %v990_v34 = vadd.f32 %v821_v29, %v113_v21  ;;  %v1022_v35 = vadd.f32 %v949_v30, %v145_v22  ;;  %v823_v36 = vpop.f32.mrb[59].mxu0  ;;  %v951_v37 = vpop.f32.mrb[59].mxu1 }
 0x16c   :  { %v1222_v32 = vadd.f32 %v2006_v33, %v1151_v28  ;;  %v1120_v38 = vld [vmem:[#allocation2 + $0xd8] sm:$0xff] }
 0x16d   :  { %v1152_v39 = vld [vmem:[#allocation2 + $0x1d8] sm:$0xff]  ;;  %v1254_v40 = vmax.f32 %v1190_v31, 0.0  ;;  %v1191_v42 = vadd.f32 %v2006_v33, %v1120_v38  ;;  %1055 = vst.msk [vmem:[#allocation2 + $0xe8] sm:$0xff] %vm19_vm3, %v990_v34  ;;  %1087 = vst.msk [vmem:[#allocation2 + $0x1e8] sm:$0xff] %vm19_vm3, %v1022_v35 }
 0x16e   :  { %v1286_v41 = vmax.f32 %v1222_v32, 0.0  ;;  %v1223_v43 = vadd.f32 %v2006_v33, %v1152_v39 }
 0x16f   :  { %1318 = vst.msk [vmem:[%s2386_s3 + $0xd0] sm:$0xff] %vm19_vm3, %v1254_v40  ;;  %v1255_v46 = vmax.f32 %v1191_v42, 0.0 }
 0x170   :  { %1350 = vst.msk [vmem:[%s2386_s3 + $0x1d0] sm:$0xff] %vm19_vm3, %v1286_v41  ;;  %v1287_v47 = vmax.f32 %v1223_v43, 0.0  ;;  %v826_v48 = vpop.f32.mrb[60].mxu0  ;;  %v954_v33 = vpop.f32.mrb[60].mxu1 }
 0x171   :  { %1319 = vst.msk [vmem:[%s2386_s3 + $0xd8] sm:$0xff] %vm19_vm3, %v1255_v46  ;;  %v991_v51 = vadd.f32 %v826_v48, %v114_v44  ;;  %v1023_v52 = vadd.f32 %v954_v33, %v146_v45  ;;  %v828_v53 = vpop.f32.mrb[61].mxu0  ;;  %v956_v54 = vpop.f32.mrb[61].mxu1 }
 0x172   :  { %1351 = vst.msk [vmem:[%s2386_s3 + $0x1d8] sm:$0xff] %vm19_vm3, %v1287_v47  ;;  %v1121_v55 = vld [vmem:[#allocation2 + $0xe0] sm:$0xff]  ;;  %v829_v57 = vpop.f32.mrb[62].mxu0  ;;  %v957_v58 = vpop.f32.mrb[62].mxu1 }
 0x173   :  { %v1153_v56 = vld [vmem:[#allocation2 + $0x1e0] sm:$0xff]  ;;  %v1192_v60 = vadd.f32 %v1592_v59, %v1121_v55  ;;  %1056 = vst.msk [vmem:[#allocation2 + $0xf0] sm:$0xff] %vm19_vm3, %v991_v51  ;;  %1088 = vst.msk [vmem:[#allocation2 + $0x1f0] sm:$0xff] %vm19_vm3, %v1023_v52  ;;  %v992_v62 = vadd.f32 %v829_v57, %v115_v49  ;;  %v1024_v63 = vadd.f32 %v957_v58, %v147_v50  ;;  %v831_v0 = vpop.f32.mrb[63].mxu0  ;;  %v959_v1 = vpop.f32.mrb[63].mxu1 }
 0x174   :  { %v1224_v61 = vadd.f32 %v1592_v59, %v1153_v56  ;;  %v1122_v2 = vld [vmem:[#allocation2 + $0xe8] sm:$0xff] }
 0x175   :  { %v1154_v3 = vld [vmem:[#allocation2 + $0x1e8] sm:$0xff]  ;;  %v1256_v4 = vmax.f32 %v1192_v60, 0.0  ;;  %v1193_v6 = vadd.f32 %v1592_v59, %v1122_v2  ;;  %1057 = vst.msk [vmem:[#allocation2 + $0xf8] sm:$0xff] %vm19_vm3, %v992_v62  ;;  %1089 = vst.msk [vmem:[#allocation2 + $0x1f8] sm:$0xff] %vm19_vm3, %v1024_v63 }
 0x176   :  { %v1288_v5 = vmax.f32 %v1224_v61, 0.0  ;;  %v1225_v7 = vadd.f32 %v1592_v59, %v1154_v3 }
 0x177   :  { %1320 = vst.msk [vmem:[%s2386_s3 + $0xe0] sm:$0xff] %vm19_vm3, %v1256_v4  ;;  %v1257_v8 = vmax.f32 %v1193_v6, 0.0 }
 0x178   :  { %1352 = vst.msk [vmem:[%s2386_s3 + $0x1e0] sm:$0xff] %vm19_vm3, %v1288_v5  ;;  %v1289_v9 = vmax.f32 %v1225_v7, 0.0 }
 0x179   :  { %1321 = vst.msk [vmem:[%s2386_s3 + $0xe8] sm:$0xff] %vm19_vm3, %v1257_v8 }
 0x17a   :  { %1353 = vst.msk [vmem:[%s2386_s3 + $0x1e8] sm:$0xff] %vm19_vm3, %v1289_v9  ;;  %v1123_v10 = vld [vmem:[#allocation2 + $0xf0] sm:$0xff] }
 0x17b   :  { %v1155_v11 = vld [vmem:[#allocation2 + $0x1f0] sm:$0xff]  ;;  %v1194_v12 = vadd.f32 %v1592_v59, %v1123_v10 }
 0x17c   :  { %v1226_v13 = vadd.f32 %v1592_v59, %v1155_v11  ;;  %v1124_v14 = vld [vmem:[#allocation2 + $0xf8] sm:$0xff] }
 0x17d   :  { %v1156_v15 = vld [vmem:[#allocation2 + $0x1f8] sm:$0xff]  ;;  %v1258_v16 = vmax.f32 %v1194_v12, 0.0  ;;  %v1195_v18 = vadd.f32 %v1592_v59, %v1124_v14 }
 0x17e   :  { %v1290_v17 = vmax.f32 %v1226_v13, 0.0  ;;  %v1227_v19 = vadd.f32 %v1592_v59, %v1156_v15 }
 0x17f   :  { %1322 = vst.msk [vmem:[%s2386_s3 + $0xf0] sm:$0xff] %vm19_vm3, %v1258_v16  ;;  %v1259_v20 = vmax.f32 %v1195_v18, 0.0 }
 0x180   :  { %1354 = vst.msk [vmem:[%s2386_s3 + $0x1f0] sm:$0xff] %vm19_vm3, %v1290_v17  ;;  %v1291_v21 = vmax.f32 %v1227_v19, 0.0 }
 0x181   :  { %1323 = vst.msk [vmem:[%s2386_s3 + $0xf8] sm:$0xff] %vm19_vm3, %v1259_v20 }
 0x182   :  { %1355 = vst.msk [vmem:[%s2386_s3 + $0x1f8] sm:$0xff] %vm19_vm3, %v1291_v21 }

// kernel: vae_forward.12
= control target key start
LH: loop header
LB: loop body
LE: loop exit
PB: predicated region body
PF: predicated region fallthrough
CT: control target
= control target key end

     0   :  { %vm348_vm0 = vcmask 261120   ;;  %vm19_vm1 = vcmask 523264   ;;  %v890_v42 = vmov 0.0   ;;  %s1174_s1 = inlined_call_operand.vmem [shape: bf16[288,64], index: 1, kind: input, shape index: {}]   ;;  %s1175_s0 = inlined_call_operand.vmem [shape: bf16[128,288], index: 0, kind: input, shape index: {}]   ;;  %s1176_s2 = inlined_call_operand.vmem [shape: f32[1,64], index: 2, kind: input, shape index: {}]   ;;  %s1177_s3 = inlined_call_operand.vmem [shape: f32[128,64], index: 3, kind: output, shape index: {}]  }
   0x1   :  { %v840_v0 = vld [vmem:[%s1174_s1 + $0x40] sm:$0xff]   ;;  %v842_v2 = vld [vmem:[%s1174_s1 + $0x48] sm:$0xff]   ;;  %v844_v4 = vld [vmem:[%s1174_s1 + $0x50] sm:$0xff]   ;;  %22 = vst.msk [vmem:[#allocation2 + $0x10] sm:$0xff] %vm19_vm1, %v890_v42 }
   0x2   :  { %v841_v1 = vld [vmem:[%s1174_s1] sm:$0xff]   ;;  %729 = vmatprep.subr.bf16.mxu0 %v840_v0  ;;  %823 = vmatprep.subr.bf16.mxu1 %v840_v0  ;;  %v843_v3 = vld [vmem:[%s1174_s1 + $0x8] sm:$0xff]   ;;  %v845_v5 = vld [vmem:[%s1174_s1 + $0x10] sm:$0xff]   ;;  %20 = vst.msk [vmem:[#allocation2] sm:$0xff] %vm19_vm1, %v890_v42 }
   0x3   :  { %730 = vmatpush3.bf16.msra.mxu0 %v841_v1  ;;  %831 = vmatpush3.bf16.msra.mxu1 %v841_v1  ;;  %v846_v6 = vld [vmem:[%s1174_s1 + $0x58] sm:$0xff]   ;;  %v848_v8 = vld [vmem:[%s1174_s1 + $0x60] sm:$0xff]   ;;  %v850_v10 = vld [vmem:[%s1174_s1 + $0x68] sm:$0xff]   ;;  %21 = vst.msk [vmem:[#allocation2 + $0x8] sm:$0xff] %vm19_vm1, %v890_v42 }
   0x4   :  { %731 = vmatprep.subr.bf16.mxu0 %v842_v2  ;;  %824 = vmatprep.subr.bf16.mxu1 %v842_v2  ;;  %v847_v7 = vld [vmem:[%s1174_s1 + $0x18] sm:$0xff]   ;;  %v849_v9 = vld [vmem:[%s1174_s1 + $0x20] sm:$0xff]   ;;  %v851_v13 = vld [vmem:[%s1174_s1 + $0x28] sm:$0xff]   ;;  %23 = vst.msk [vmem:[#allocation2 + $0x18] sm:$0xff] %vm19_vm1, %v890_v42 }
   0x5   :  { %v858_v11 = vld [vmem:[%s1175_s0 + $0x4] ss:$12 sps:$4 sm:$0xff]   ;;  %v861_v12 = vld [vmem:[%s1175_s0 + $0x94] ss:$12 sps:$4 sm:$0xff]   ;;  %v854_v16 = vld [vmem:[%s1174_s1 + $0x78] sm:$0xff]   ;;  %24 = vst.msk [vmem:[#allocation2 + $0x20] sm:$0xff] %vm19_vm1, %v890_v42 }
   0x6   :  { %v852_v14 = vld [vmem:[%s1174_s1 + $0x70] sm:$0xff]   ;;  %405 = vmatprep.mubr.bf16.mxu0 %v858_v11  ;;  %453 = vmatprep.mubr.bf16.mxu1 %v861_v12  ;;  %v855_v17 = vld [vmem:[%s1174_s1 + $0x38] sm:$0xff]   ;;  %v856_v18 = vld [vmem:[%s1175_s0] ss:$12 sps:$4 sm:$0xff]   ;;  %25 = vst.msk [vmem:[#allocation2 + $0x28] sm:$0xff] %vm19_vm1, %v890_v42 }
   0x7   :  { %732 = vmatpush3.bf16.msra.mxu0 %v843_v3  ;;  %832 = vmatpush3.bf16.msra.mxu1 %v843_v3  ;;  %v853_v15 = vld [vmem:[%s1174_s1 + $0x30] sm:$0xff]   ;;  %v862_v19 = vld [vmem:[%s1174_s1 + $0x80] sm:$0xff]   ;;  %v863_v21 = vld [vmem:[%s1175_s0 + $0x1c] ss:$12 sps:$4 sm:$0xff]   ;;  %26 = vst.msk [vmem:[#allocation2 + $0x30] sm:$0xff] %vm19_vm1, %v890_v42 }
   0x8   :  { %733 = vmatprep.subr.bf16.mxu0 %v844_v4  ;;  %825 = vmatprep.subr.bf16.mxu1 %v844_v4  ;;  %v859_v20 = vld [vmem:[%s1175_s0 + $0x90] ss:$12 sps:$4 sm:$0xff]   ;;  %v865_v22 = vld [vmem:[%s1175_s0 + $0xac] ss:$12 sps:$4 sm:$0xff]   ;;  %v868_v25 = vld [vmem:[%s1175_s0 + $0xa8] ss:$12 sps:$4 sm:$0xff]  }
   0x9   :  { %v869_v23 = vld [vmem:[%s1174_s1 + $0x88] sm:$0xff]   ;;  %v867_v24 = vld [vmem:[%s1175_s0 + $0x18] ss:$12 sps:$4 sm:$0xff]   ;;  %v870_v26 = vld [vmem:[%s1175_s0 + $0x34] ss:$12 sps:$4 sm:$0xff]   ;;  %27 = vst.msk [vmem:[#allocation2 + $0x38] sm:$0xff] %vm19_vm1, %v890_v42 }
   0xa   :  { %v872_v27 = vld [vmem:[%s1175_s0 + $0x8] ss:$12 sps:$4 sm:$0xff]   ;;  %v873_v28 = vld [vmem:[%s1175_s0 + $0x30] ss:$12 sps:$4 sm:$0xff]   ;;  %v874_v29 = vld [vmem:[%s1175_s0 + $0x20] ss:$12 sps:$4 sm:$0xff]  }
   0xb   :  { %734 = vmatpush3.bf16.msra.mxu0 %v845_v5  ;;  %833 = vmatpush3.bf16.msra.mxu1 %v845_v5  ;;  %v875_v30 = vld [vmem:[%s1175_s0 + $0x4c] ss:$12 sps:$4 sm:$0xff]   ;;  %v878_v32 = vld [vmem:[%s1175_s0 + $0x48] ss:$12 sps:$4 sm:$0xff]   ;;  %v879_v33 = vld [vmem:[%s1175_s0 + $0x50] ss:$12 sps:$4 sm:$0xff]  }
   0xc   :  { %735 = vmatprep.subr.bf16.mxu0 %v846_v6  ;;  %826 = vmatprep.subr.bf16.mxu1 %v846_v6  ;;  %v877_v31 = vld [vmem:[%s1175_s0 + $0x38] ss:$12 sps:$4 sm:$0xff]   ;;  %v882_v35 = vld [vmem:[%s1175_s0 + $0x68] ss:$12 sps:$4 sm:$0xff]   ;;  %v883_v36 = vld [vmem:[%s1175_s0 + $0x60] ss:$12 sps:$4 sm:$0xff]  }
   0xd   :  { %v880_v34 = vld [vmem:[%s1175_s0 + $0x64] ss:$12 sps:$4 sm:$0xff]   ;;  %v884_v37 = vld [vmem:[%s1175_s0 + $0x80] ss:$12 sps:$4 sm:$0xff]   ;;  %v885_v38 = vld [vmem:[%s1175_s0 + $0x7c] ss:$12 sps:$4 sm:$0xff]  }
   0xe   :  { %v887_v39 = vld [vmem:[%s1175_s0 + $0x98] ss:$12 sps:$4 sm:$0xff]   ;;  %v889_v41 = vld [vmem:[%s1175_s0 + $0xb0] ss:$12 sps:$4 sm:$0xff]   ;;  %28 = vst.msk [vmem:[#allocation2 + $0x40] sm:$0xff] %vm19_vm1, %v890_v42  ;;  %29 = vst.msk [vmem:[#allocation2 + $0x48] sm:$0xff] %vm19_vm1, %v890_v42 }
   0xf   :  { %736 = vmatpush3.bf16.msra.mxu0 %v847_v7  ;;  %834 = vmatpush3.bf16.msra.mxu1 %v847_v7  ;;  %v888_v40 = vld [vmem:[%s1175_s0 + $0x78] ss:$12 sps:$4 sm:$0xff]   ;;  %30 = vst.msk [vmem:[#allocation2 + $0x50] sm:$0xff] %vm19_vm1, %v890_v42  ;;  %31 = vst.msk [vmem:[#allocation2 + $0x58] sm:$0xff] %vm19_vm1, %v890_v42  ;;  %v38_v4 = vld [vmem:[#allocation2 + $0x10] sm:$0xff] }
  0x10   :  { %737 = vmatprep.subr.bf16.mxu0 %v848_v8  ;;  %827 = vmatprep.subr.bf16.mxu1 %v848_v8  ;;  %32 = vst.msk [vmem:[#allocation2 + $0x60] sm:$0xff] %vm19_vm1, %v890_v42  ;;  %33 = vst.msk [vmem:[#allocation2 + $0x68] sm:$0xff] %vm19_vm1, %v890_v42  ;;  %v36_v8 = vld [vmem:[#allocation2] sm:$0xff] }
  0x11   :  { %34 = vst.msk [vmem:[#allocation2 + $0x70] sm:$0xff] %vm19_vm1, %v890_v42  ;;  %35 = vst.msk [vmem:[#allocation2 + $0x78] sm:$0xff] %vm19_vm1, %v890_v42 }
  0x13   :  { %738 = vmatpush3.bf16.msra.mxu0 %v849_v9  ;;  %835 = vmatpush3.bf16.msra.mxu1 %v849_v9 }
  0x14   :  { %739 = vmatprep.subr.bf16.mxu0 %v850_v10  ;;  %828 = vmatprep.subr.bf16.mxu1 %v850_v10 }
  0x17   :  { %740 = vmatpush3.bf16.msra.mxu0 %v851_v13  ;;  %836 = vmatpush3.bf16.msra.mxu1 %v851_v13  ;;  %v39_v13 = vld [vmem:[#allocation2 + $0x18] sm:$0xff] }
  0x18   :  { %741 = vmatprep.subr.bf16.mxu0 %v852_v14  ;;  %829 = vmatprep.subr.bf16.mxu1 %v852_v14 }
  0x1b   :  { %742 = vmatpush3.bf16.msra.mxu0 %v853_v15  ;;  %837 = vmatpush3.bf16.msra.mxu1 %v853_v15 }
  0x1c   :  { %743 = vmatprep.subr.bf16.mxu0 %v854_v16  ;;  %830 = vmatprep.subr.bf16.mxu1 %v854_v16 }
  0x1f   :  { %744 = vmatpush3.bf16.msra.mxu0 %v855_v17  ;;  %838 = vmatpush3.bf16.msra.mxu1 %v855_v17 }
  0x20   :  { %803 = vmatprep.subr.bf16.mxu1 %v862_v19 }
  0x22   :  { %406 = vmatmul.mubr.bf16.vlgmr.msra.gmra.mrb[0].mxu0 %v856_v18  ;;  %454 = vmatmul.mubr.bf16.vlgmr.msra.gmra.mrb[0].mxu1 %v859_v20  ;;  %v37_v18 = vld [vmem:[#allocation2 + $0x8] sm:$0xff] }
  0x23   :  { %804 = vmatpush3.bf16.msra.mxu1 %v862_v19  ;;  %413 = vmatprep.mubr.bf16.mxu0 %v863_v21 }
  0x24   :  { %461 = vmatprep.mubr.bf16.mxu1 %v865_v22  ;;  %805 = vmatprep.subr.bf16.mxu1 %v869_v23 }
  0x27   :  { %806 = vmatpush3.bf16.msra.mxu1 %v869_v23 }
  0x2a   :  { %414 = vmatmul.mubr.bf16.gmra.mrb[4].mxu0 %v867_v24  ;;  %462 = vmatmul.mubr.bf16.gmra.mrb[4].mxu1 %v868_v25 }
  0x2b   :  { %421 = vmatprep.mubr.bf16.mxu0 %v870_v26  ;;  %807 = vmatprep.mubr.msk.bf16.mxu1 %vm348_vm0, %v872_v27 }
  0x32   :  { %422 = vmatmul.mubr.bf16.gmra.mrb[8].mxu0 %v873_v28  ;;  %808 = vmatmul.mubr.msk.bf16.vlgmr.msra.gmra.mrb[8].mxu1 %vm348_vm0, %v874_v29  ;;  %v40_v28 = vld [vmem:[#allocation2 + $0x20] sm:$0xff] }
  0x33   :  { %429 = vmatprep.mubr.bf16.mxu0 %v875_v30  ;;  %811 = vmatprep.mubr.msk.bf16.mxu1 %vm348_vm0, %v877_v31  ;;  %v1076_v30 = vld [vmem:[%s1176_s2] ss:$0 sm:$0xff] }
  0x3a   :  { %430 = vmatmul.mubr.bf16.gmra.mrb[12].mxu0 %v878_v32  ;;  %812 = vmatmul.mubr.msk.bf16.gmra.mrb[12].mxu1 %vm348_vm0, %v879_v33 }
  0x3b   :  { %437 = vmatprep.mubr.bf16.mxu0 %v880_v34  ;;  %815 = vmatprep.mubr.msk.bf16.mxu1 %vm348_vm0, %v882_v35  ;;  %v42_v35 = vld [vmem:[#allocation2 + $0x30] sm:$0xff] }
  0x42   :  { %438 = vmatmul.mubr.bf16.gmra.mrb[16].mxu0 %v883_v36  ;;  %816 = vmatmul.mubr.msk.bf16.gmra.mrb[16].mxu1 %vm348_vm0, %v884_v37  ;;  %v41_v37 = vld [vmem:[#allocation2 + $0x28] sm:$0xff] }
  0x43   :  { %445 = vmatprep.mubr.bf16.mxu0 %v885_v38  ;;  %819 = vmatprep.mubr.msk.bf16.mxu1 %vm348_vm0, %v887_v39 }
  0x4a   :  { %446 = vmatmul.mubr.bf16.gmra.mrb[20].mxu0 %v888_v40  ;;  %820 = vmatmul.mubr.msk.bf16.gmra.mrb[20].mxu1 %vm348_vm0, %v889_v41 }
  0xf5   :  { %v745_v43 = vpop.f32.mrb[0].mxu0  ;;  %v781_v44 = vpop.f32.mrb[0].mxu1 }
  0xf6   :  { %v746_v45 = vpop.f32.mrb[1].mxu0  ;;  %v782_v46 = vpop.f32.mrb[1].mxu1 }
  0xf7   :  { %v747_v47 = vadd.f32 %v746_v45, %v745_v43  ;;  %v1061_v48 = vadd.f32 %v782_v46, %v781_v44  ;;  %v748_v49 = vpop.f32.mrb[2].mxu0  ;;  %v784_v50 = vpop.f32.mrb[2].mxu1  ;;  %v43_v46 = vld [vmem:[#allocation2 + $0x38] sm:$0xff] }
  0xf8   :  { %v749_v51 = vpop.f32.mrb[3].mxu0  ;;  %v785_v52 = vpop.f32.mrb[3].mxu1 }
  0xf9   :  { %v750_v53 = vadd.f32 %v749_v51, %v748_v49  ;;  %v1063_v54 = vadd.f32 %v785_v52, %v784_v50 }
  0xfd   :  { %v751_v55 = vpop.f32.mrb[4].mxu0  ;;  %v787_v56 = vpop.f32.mrb[4].mxu1 }
  0xfe   :  { %v752_v57 = vpop.f32.mrb[5].mxu0  ;;  %v788_v58 = vpop.f32.mrb[5].mxu1 }
  0xff   :  { %v753_v59 = vadd.f32 %v752_v57, %v751_v55  ;;  %v1065_v60 = vadd.f32 %v788_v58, %v787_v56  ;;  %v754_v61 = vpop.f32.mrb[6].mxu0  ;;  %v790_v62 = vpop.f32.mrb[6].mxu1 }
 0x100   :  { %v755_v63 = vpop.f32.mrb[7].mxu0  ;;  %v791_v0 = vpop.f32.mrb[7].mxu1 }
 0x101   :  { %v756_v1 = vadd.f32 %v755_v63, %v754_v61  ;;  %v1067_v2 = vadd.f32 %v791_v0, %v790_v62 }
 0x105   :  { %v757_v3 = vpop.f32.mrb[8].mxu0  ;;  %v809_v5 = vpop.f32.mrb[8].mxu1 }
 0x106   :  { %v513_v6 = vadd.f32 %v809_v5, %v753_v59  ;;  %v758_v7 = vpop.f32.mrb[9].mxu0  ;;  %v504_v9 = vpop.f32.mrb[9].mxu1 }
 0x107   :  { %v759_v10 = vadd.f32 %v758_v7, %v757_v3  ;;  %v505_v11 = vadd.f32 %v747_v47, %v504_v9  ;;  %v760_v12 = vpop.f32.mrb[10].mxu0  ;;  %v810_v14 = vpop.f32.mrb[10].mxu1  ;;  %v44_v7 = vld [vmem:[#allocation2 + $0x40] sm:$0xff] }
 0x108   :  { %v569_v15 = vadd.f32 %v513_v6, %v38_v4  ;;  %v516_v16 = vadd.f32 %v810_v14, %v756_v1  ;;  %v761_v17 = vpop.f32.mrb[11].mxu0  ;;  %v507_v19 = vpop.f32.mrb[11].mxu1 }
 0x109   :  { %v567_v20 = vadd.f32 %v505_v11, %v36_v8  ;;  %v762_v21 = vadd.f32 %v761_v17, %v760_v12  ;;  %v508_v22 = vadd.f32 %v750_v53, %v507_v19 }
 0x10a   :  { %586 = vst.msk [vmem:[#allocation2 + $0x10] sm:$0xff] %vm19_vm1, %v569_v15  ;;  %v570_v23 = vadd.f32 %v516_v16, %v39_v13  ;;  %v45_v13 = vld [vmem:[#allocation2 + $0x48] sm:$0xff] }
 0x10b   :  { %584 = vst.msk [vmem:[#allocation2] sm:$0xff] %vm19_vm1, %v567_v20  ;;  %v568_v24 = vadd.f32 %v508_v22, %v37_v18 }
 0x10c   :  { %587 = vst.msk [vmem:[#allocation2 + $0x18] sm:$0xff] %vm19_vm1, %v570_v23 }
 0x10d   :  { %585 = vst.msk [vmem:[#allocation2 + $0x8] sm:$0xff] %vm19_vm1, %v568_v24  ;;  %v763_v25 = vpop.f32.mrb[12].mxu0  ;;  %v813_v26 = vpop.f32.mrb[12].mxu1  ;;  %v50_v24 = vld [vmem:[#allocation2 + $0x70] sm:$0xff] }
 0x10e   :  { %v764_v27 = vpop.f32.mrb[13].mxu0  ;;  %v520_v29 = vpop.f32.mrb[13].mxu1 }
 0x10f   :  { %v765_v31 = vadd.f32 %v764_v27, %v763_v25  ;;  %v521_v32 = vadd.f32 %v759_v10, %v520_v29  ;;  %v766_v33 = vpop.f32.mrb[14].mxu0  ;;  %v814_v34 = vpop.f32.mrb[14].mxu1 }
 0x110   :  { %v767_v36 = vpop.f32.mrb[15].mxu0  ;;  %v523_v38 = vpop.f32.mrb[15].mxu1 }
 0x111   :  { %v605_v39 = vld [vmem:[#allocation2 + $0x10] sm:$0xff]  ;;  %v529_v40 = vadd.f32 %v813_v26, %v765_v31  ;;  %v571_v41 = vadd.f32 %v521_v32, %v40_v28  ;;  %v768_v42 = vadd.f32 %v767_v36, %v766_v33  ;;  %v524_v43 = vadd.f32 %v762_v21, %v523_v38 }
 0x112   :  { %v628_v44 = vadd.f32 %v1076_v30, %v605_v39  ;;  %v603_v45 = vld [vmem:[#allocation2] sm:$0xff] }
 0x113   :  { %v626_v47 = vadd.f32 %v1076_v30, %v603_v45  ;;  %v606_v49 = vld [vmem:[#allocation2 + $0x18] sm:$0xff]  ;;  %v573_v50 = vadd.f32 %v529_v40, %v42_v35  ;;  %588 = vst.msk [vmem:[#allocation2 + $0x20] sm:$0xff] %vm19_vm1, %v571_v41  ;;  %v532_v51 = vadd.f32 %v814_v34, %v768_v42  ;;  %v572_v52 = vadd.f32 %v524_v43, %v41_v37  ;;  %v48_v35 = vld [vmem:[#allocation2 + $0x60] sm:$0xff]  ;;  %v49_v43 = vld [vmem:[#allocation2 + $0x68] sm:$0xff] }
 0x114   :  { %v644_v53 = vmax.f32 %v628_v44, 0.0  ;;  %v629_v55 = vadd.f32 %v1076_v30, %v606_v49  ;;  %v604_v56 = vld [vmem:[#allocation2 + $0x8] sm:$0xff]  ;;  %v51_v37 = vld [vmem:[#allocation2 + $0x78] sm:$0xff] }
 0x115   :  { %v642_v57 = vmax.f32 %v626_v47, 0.0  ;;  %v627_v58 = vadd.f32 %v1076_v30, %v604_v56  ;;  %590 = vst.msk [vmem:[#allocation2 + $0x30] sm:$0xff] %vm19_vm1, %v573_v50  ;;  %v574_v59 = vadd.f32 %v532_v51, %v43_v46  ;;  %589 = vst.msk [vmem:[#allocation2 + $0x28] sm:$0xff] %vm19_vm1, %v572_v52  ;;  %v769_v61 = vpop.f32.mrb[16].mxu0  ;;  %v817_v62 = vpop.f32.mrb[16].mxu1  ;;  %v47_v50 = vld [vmem:[#allocation2 + $0x58] sm:$0xff] }
 0x116   :  { %660 = vst.msk [vmem:[%s1177_s3 + $0x10] sm:$0xff] %vm19_vm1, %v644_v53  ;;  %v645_v63 = vmax.f32 %v629_v55, 0.0  ;;  %v770_v0 = vpop.f32.mrb[17].mxu0  ;;  %v536_v1 = vpop.f32.mrb[17].mxu1 }
 0x117   :  { %658 = vst.msk [vmem:[%s1177_s3] sm:$0xff] %vm19_vm1, %v642_v57  ;;  %v643_v3 = vmax.f32 %v627_v58, 0.0  ;;  %591 = vst.msk [vmem:[#allocation2 + $0x38] sm:$0xff] %vm19_vm1, %v574_v59  ;;  %v771_v4 = vadd.f32 %v770_v0, %v769_v61  ;;  %v772_v5 = vpop.f32.mrb[18].mxu0  ;;  %v818_v6 = vpop.f32.mrb[18].mxu1 }
 0x118   :  { %661 = vst.msk [vmem:[%s1177_s3 + $0x18] sm:$0xff] %vm19_vm1, %v645_v63  ;;  %v773_v8 = vpop.f32.mrb[19].mxu0  ;;  %v539_v9 = vpop.f32.mrb[19].mxu1 }
 0x119   :  { %659 = vst.msk [vmem:[%s1177_s3 + $0x8] sm:$0xff] %vm19_vm1, %v643_v3  ;;  %v537_v10 = vadd.f32 %v771_v4, %v536_v1  ;;  %v774_v11 = vadd.f32 %v773_v8, %v772_v5 }
 0x11a   :  { %v607_v12 = vld [vmem:[#allocation2 + $0x20] sm:$0xff] }
 0x11b   :  { %v630_v14 = vadd.f32 %v1076_v30, %v607_v12  ;;  %v575_v15 = vadd.f32 %v537_v10, %v44_v7  ;;  %v540_v16 = vadd.f32 %v774_v11, %v539_v9 }
 0x11c   :  { %v609_v17 = vld [vmem:[#allocation2 + $0x30] sm:$0xff]  ;;  %v608_v18 = vld [vmem:[#allocation2 + $0x28] sm:$0xff] }
 0x11d   :  { %v632_v19 = vadd.f32 %v1076_v30, %v609_v17  ;;  %v646_v20 = vmax.f32 %v630_v14, 0.0  ;;  %v631_v21 = vadd.f32 %v1076_v30, %v608_v18  ;;  %592 = vst.msk [vmem:[#allocation2 + $0x40] sm:$0xff] %vm19_vm1, %v575_v15  ;;  %v576_v22 = vadd.f32 %v540_v16, %v45_v13  ;;  %v775_v23 = vpop.f32.mrb[20].mxu0  ;;  %v821_v25 = vpop.f32.mrb[20].mxu1 }
 0x11e   :  { %v610_v26 = vld [vmem:[#allocation2 + $0x38] sm:$0xff]  ;;  %v561_v27 = vadd.f32 %v821_v25, %v1065_v60  ;;  %v776_v28 = vpop.f32.mrb[21].mxu0  ;;  %v552_v29 = vpop.f32.mrb[21].mxu1  ;;  %v46_v60 = vld [vmem:[#allocation2 + $0x50] sm:$0xff] }
 0x11f   :  { %v648_v31 = vmax.f32 %v632_v19, 0.0  ;;  %662 = vst.msk [vmem:[%s1177_s3 + $0x20] sm:$0xff] %vm19_vm1, %v646_v20  ;;  %v633_v32 = vadd.f32 %v1076_v30, %v610_v26  ;;  %v647_v33 = vmax.f32 %v631_v21, 0.0  ;;  %593 = vst.msk [vmem:[#allocation2 + $0x48] sm:$0xff] %vm19_vm1, %v576_v22  ;;  %v777_v34 = vadd.f32 %v776_v28, %v775_v23  ;;  %v778_v36 = vpop.f32.mrb[22].mxu0  ;;  %v822_v38 = vpop.f32.mrb[22].mxu1 }
 0x120   :  { %v581_v39 = vadd.f32 %v561_v27, %v50_v24  ;;  %v553_v40 = vadd.f32 %v1061_v48, %v552_v29  ;;  %v564_v41 = vadd.f32 %v822_v38, %v1067_v2  ;;  %v779_v42 = vpop.f32.mrb[23].mxu0  ;;  %v555_v44 = vpop.f32.mrb[23].mxu1 }
 0x121   :  { %664 = vst.msk [vmem:[%s1177_s3 + $0x30] sm:$0xff] %vm19_vm1, %v648_v31  ;;  %v649_v45 = vmax.f32 %v633_v32, 0.0  ;;  %663 = vst.msk [vmem:[%s1177_s3 + $0x28] sm:$0xff] %vm19_vm1, %v647_v33  ;;  %v545_v46 = vadd.f32 %v817_v62, %v777_v34  ;;  %v780_v47 = vadd.f32 %v779_v42, %v778_v36  ;;  %v556_v48 = vadd.f32 %v1063_v54, %v555_v44 }
 0x122   :  { %598 = vst.msk [vmem:[#allocation2 + $0x70] sm:$0xff] %vm19_vm1, %v581_v39  ;;  %v579_v2 = vadd.f32 %v553_v40, %v48_v35  ;;  %v582_v49 = vadd.f32 %v564_v41, %v51_v37 }
 0x123   :  { %665 = vst.msk [vmem:[%s1177_s3 + $0x38] sm:$0xff] %vm19_vm1, %v649_v45  ;;  %v577_v51 = vadd.f32 %v545_v46, %v46_v60  ;;  %v548_v52 = vadd.f32 %v818_v6, %v780_v47  ;;  %v580_v53 = vadd.f32 %v556_v48, %v49_v43 }
 0x124   :  { %v611_v55 = vld [vmem:[#allocation2 + $0x40] sm:$0xff]  ;;  %596 = vst.msk [vmem:[#allocation2 + $0x60] sm:$0xff] %vm19_vm1, %v579_v2  ;;  %599 = vst.msk [vmem:[#allocation2 + $0x78] sm:$0xff] %vm19_vm1, %v582_v49 }
 0x125   :  { %v634_v54 = vadd.f32 %v1076_v30, %v611_v55  ;;  %594 = vst.msk [vmem:[#allocation2 + $0x50] sm:$0xff] %vm19_vm1, %v577_v51  ;;  %v578_v56 = vadd.f32 %v548_v52, %v47_v50  ;;  %597 = vst.msk [vmem:[#allocation2 + $0x68] sm:$0xff] %vm19_vm1, %v580_v53 }
 0x126   :  { %v612_v57 = vld [vmem:[#allocation2 + $0x48] sm:$0xff] }
 0x127   :  { %v650_v58 = vmax.f32 %v634_v54, 0.0  ;;  %v635_v59 = vadd.f32 %v1076_v30, %v612_v57  ;;  %595 = vst.msk [vmem:[#allocation2 + $0x58] sm:$0xff] %vm19_vm1, %v578_v56 }
 0x129   :  { %666 = vst.msk [vmem:[%s1177_s3 + $0x40] sm:$0xff] %vm19_vm1, %v650_v58  ;;  %v651_v61 = vmax.f32 %v635_v59, 0.0  ;;  %v617_v62 = vld [vmem:[#allocation2 + $0x70] sm:$0xff] }
 0x12a   :  { %v640_v63 = vadd.f32 %v1076_v30, %v617_v62 }
 0x12b   :  { %667 = vst.msk [vmem:[%s1177_s3 + $0x48] sm:$0xff] %vm19_vm1, %v651_v61  ;;  %v615_v0 = vld [vmem:[#allocation2 + $0x60] sm:$0xff]  ;;  %v618_v1 = vld [vmem:[#allocation2 + $0x78] sm:$0xff] }
 0x12c   :  { %v656_v3 = vmax.f32 %v640_v63, 0.0  ;;  %v613_v4 = vld [vmem:[#allocation2 + $0x50] sm:$0xff]  ;;  %v638_v5 = vadd.f32 %v1076_v30, %v615_v0  ;;  %v641_v6 = vadd.f32 %v1076_v30, %v618_v1  ;;  %v616_v7 = vld [vmem:[#allocation2 + $0x68] sm:$0xff] }
 0x12d   :  { %v636_v8 = vadd.f32 %v1076_v30, %v613_v4  ;;  %v639_v9 = vadd.f32 %v1076_v30, %v616_v7 }
 0x12e   :  { %672 = vst.msk [vmem:[%s1177_s3 + $0x70] sm:$0xff] %vm19_vm1, %v656_v3  ;;  %v654_v10 = vmax.f32 %v638_v5, 0.0  ;;  %v657_v11 = vmax.f32 %v641_v6, 0.0  ;;  %v614_v12 = vld [vmem:[#allocation2 + $0x58] sm:$0xff] }
 0x12f   :  { %v652_v13 = vmax.f32 %v636_v8, 0.0  ;;  %v637_v14 = vadd.f32 %v1076_v30, %v614_v12  ;;  %v655_v15 = vmax.f32 %v639_v9, 0.0 }
 0x130   :  { %670 = vst.msk [vmem:[%s1177_s3 + $0x60] sm:$0xff] %vm19_vm1, %v654_v10  ;;  %673 = vst.msk [vmem:[%s1177_s3 + $0x78] sm:$0xff] %vm19_vm1, %v657_v11 }
 0x131   :  { %668 = vst.msk [vmem:[%s1177_s3 + $0x50] sm:$0xff] %vm19_vm1, %v652_v13  ;;  %v653_v16 = vmax.f32 %v637_v14, 0.0  ;;  %671 = vst.msk [vmem:[%s1177_s3 + $0x68] sm:$0xff] %vm19_vm1, %v655_v15 }
 0x133   :  { %669 = vst.msk [vmem:[%s1177_s3 + $0x58] sm:$0xff] %vm19_vm1, %v653_v16 }

// kernel: vae_forward.13
= control target key start
LH: loop header
LB: loop body
LE: loop exit
PB: predicated region body
PF: predicated region fallthrough
CT: control target
= control target key end

     0   :  { %vm377_vm0 = vcmask 523264   ;;  %s915_s1 = inlined_call_operand.vmem [shape: bf16[576,128], index: 1, kind: input, shape index: {}]   ;;  %s916_s0 = inlined_call_operand.vmem [shape: bf16[32,576], index: 0, kind: input, shape index: {}]   ;;  %s917_s2 = inlined_call_operand.vmem [shape: f32[1,128], index: 2, kind: input, shape index: {}]   ;;  %s918_s3 = inlined_call_operand.vmem [shape: f32[32,128], index: 3, kind: output, shape index: {}]  }
   0x1   :  { %v692_v0 = vld [vmem:[%s915_s1 + $0x40] sm:$0xff]   ;;  %v696_v4 = vld [vmem:[%s915_s1 + $0x48] sm:$0xff]   ;;  %v700_v8 = vld [vmem:[%s915_s1 + $0x50] sm:$0xff]  }
   0x2   :  { %v693_v1 = vld [vmem:[%s915_s1 + $0xc0] sm:$0xff]   ;;  %618 = vmatprep.subr.bf16.mxu0 %v692_v0  ;;  %v697_v5 = vld [vmem:[%s915_s1 + $0xc8] sm:$0xff]   ;;  %v701_v9 = vld [vmem:[%s915_s1 + $0xd0] sm:$0xff]  }
   0x3   :  { %v694_v2 = vld [vmem:[%s915_s1] sm:$0xff]   ;;  %646 = vmatprep.subr.bf16.mxu1 %v693_v1  ;;  %v698_v6 = vld [vmem:[%s915_s1 + $0x8] sm:$0xff]   ;;  %v702_v10 = vld [vmem:[%s915_s1 + $0x10] sm:$0xff]  }
   0x4   :  { %v695_v3 = vld [vmem:[%s915_s1 + $0x80] sm:$0xff]   ;;  %619 = vmatpush3.bf16.msra.mxu0 %v694_v2  ;;  %v699_v7 = vld [vmem:[%s915_s1 + $0x88] sm:$0xff]   ;;  %v703_v11 = vld [vmem:[%s915_s1 + $0x90] sm:$0xff]  }
   0x5   :  { %647 = vmatpush3.bf16.msra.mxu1 %v695_v3  ;;  %620 = vmatprep.subr.bf16.mxu0 %v696_v4  ;;  %v704_v12 = vld [vmem:[%s915_s1 + $0x58] sm:$0xff]   ;;  %v708_v16 = vld [vmem:[%s915_s1 + $0x60] sm:$0xff]   ;;  %v712_v20 = vld [vmem:[%s915_s1 + $0x68] sm:$0xff]  }
   0x6   :  { %648 = vmatprep.subr.bf16.mxu1 %v697_v5  ;;  %v705_v13 = vld [vmem:[%s915_s1 + $0xd8] sm:$0xff]   ;;  %v709_v17 = vld [vmem:[%s915_s1 + $0xe0] sm:$0xff]   ;;  %v713_v21 = vld [vmem:[%s915_s1 + $0xe8] sm:$0xff]  }
   0x7   :  { %v706_v14 = vld [vmem:[%s915_s1 + $0x18] sm:$0xff]   ;;  %v710_v18 = vld [vmem:[%s915_s1 + $0x20] sm:$0xff]   ;;  %v714_v22 = vld [vmem:[%s915_s1 + $0x28] sm:$0xff]  }
   0x8   :  { %621 = vmatpush3.bf16.msra.mxu0 %v698_v6  ;;  %v707_v15 = vld [vmem:[%s915_s1 + $0x98] sm:$0xff]   ;;  %v711_v19 = vld [vmem:[%s915_s1 + $0xa0] sm:$0xff]   ;;  %v715_v23 = vld [vmem:[%s915_s1 + $0xa8] sm:$0xff]  }
   0x9   :  { %649 = vmatpush3.bf16.msra.mxu1 %v699_v7  ;;  %622 = vmatprep.subr.bf16.mxu0 %v700_v8  ;;  %v716_v24 = vld [vmem:[%s915_s1 + $0x70] sm:$0xff]   ;;  %v720_v28 = vld [vmem:[%s915_s1 + $0x78] sm:$0xff]   ;;  %v729_v35 = vld [vmem:[%s916_s0 + $0xc] ss:$20 sps:$4 sm:$0xff]  }
   0xa   :  { %650 = vmatprep.subr.bf16.mxu1 %v701_v9  ;;  %v717_v25 = vld [vmem:[%s915_s1 + $0xf0] sm:$0xff]   ;;  %v721_v29 = vld [vmem:[%s915_s1 + $0xf8] sm:$0xff]   ;;  %v730_v36 = vld [vmem:[%s915_s1 + $0x100] sm:$0xff]   ;;  %465 = vmatprep.mubr.bf16.mxu1 %v729_v35 }
   0xb   :  { %v718_v26 = vld [vmem:[%s915_s1 + $0x30] sm:$0xff]   ;;  %v722_v30 = vld [vmem:[%s915_s1 + $0x38] sm:$0xff]   ;;  %v731_v37 = vld [vmem:[%s915_s1 + $0x108] sm:$0xff]  }
   0xc   :  { %623 = vmatpush3.bf16.msra.mxu0 %v702_v10  ;;  %v719_v27 = vld [vmem:[%s915_s1 + $0xb0] sm:$0xff]   ;;  %v723_v31 = vld [vmem:[%s915_s1 + $0xb8] sm:$0xff]   ;;  %v732_v38 = vld [vmem:[%s916_s0 + $0x2c] ss:$20 sps:$4 sm:$0xff]  }
   0xd   :  { %651 = vmatpush3.bf16.msra.mxu1 %v703_v11  ;;  %624 = vmatprep.subr.bf16.mxu0 %v704_v12  ;;  %v724_v32 = vld [vmem:[%s916_s0] ss:$20 sps:$4 sm:$0xff]   ;;  %v726_v33 = vld [vmem:[%s916_s0 + $0x4] ss:$20 sps:$4 sm:$0xff]   ;;  %v727_v34 = vld [vmem:[%s916_s0 + $0x8] ss:$20 sps:$4 sm:$0xff]  }
   0xe   :  { %652 = vmatprep.subr.bf16.mxu1 %v705_v13  ;;  %416 = vmatprep.mubr.bf16.mxu0 %v726_v33  ;;  %v734_v39 = vld [vmem:[%s916_s0 + $0x34] ss:$20 sps:$4 sm:$0xff]   ;;  %v737_v42 = vld [vmem:[%s916_s0 + $0x30] ss:$20 sps:$4 sm:$0xff]   ;;  %v739_v44 = vld [vmem:[%s915_s1 + $0x118] sm:$0xff]  }
   0xf   :  { %v736_v40 = vld [vmem:[%s916_s0 + $0x28] ss:$20 sps:$4 sm:$0xff]   ;;  %v738_v41 = vld [vmem:[%s915_s1 + $0x110] sm:$0xff]   ;;  %v741_v45 = vld [vmem:[%s916_s0 + $0x38] ss:$20 sps:$4 sm:$0xff]  }
  0x10   :  { %625 = vmatpush3.bf16.msra.mxu0 %v706_v14  ;;  %v740_v43 = vld [vmem:[%s916_s0 + $0x10] ss:$20 sps:$4 sm:$0xff]   ;;  %v617_v11 = vld [vmem:[%s917_s2] ss:$0 sm:$0xff] }
  0x11   :  { %653 = vmatpush3.bf16.msra.mxu1 %v707_v15  ;;  %626 = vmatprep.subr.bf16.mxu0 %v708_v16 }
  0x12   :  { %654 = vmatprep.subr.bf16.mxu1 %v709_v17 }
  0x14   :  { %627 = vmatpush3.bf16.msra.mxu0 %v710_v18 }
  0x15   :  { %655 = vmatpush3.bf16.msra.mxu1 %v711_v19  ;;  %628 = vmatprep.subr.bf16.mxu0 %v712_v20 }
  0x16   :  { %656 = vmatprep.subr.bf16.mxu1 %v713_v21 }
  0x18   :  { %629 = vmatpush3.bf16.msra.mxu0 %v714_v22 }
  0x19   :  { %657 = vmatpush3.bf16.msra.mxu1 %v715_v23  ;;  %630 = vmatprep.subr.bf16.mxu0 %v716_v24 }
  0x1a   :  { %658 = vmatprep.subr.bf16.mxu1 %v717_v25 }
  0x1c   :  { %631 = vmatpush3.bf16.msra.mxu0 %v718_v26 }
  0x1d   :  { %659 = vmatpush3.bf16.msra.mxu1 %v719_v27  ;;  %632 = vmatprep.subr.bf16.mxu0 %v720_v28 }
  0x1e   :  { %660 = vmatprep.subr.bf16.mxu1 %v721_v29 }
  0x20   :  { %633 = vmatpush3.bf16.msra.mxu0 %v722_v30 }
  0x21   :  { %661 = vmatpush3.bf16.msra.mxu1 %v723_v31  ;;  %680 = vmatprep.subr.bf16.mxu0 %v730_v36 }
  0x23   :  { %417 = vmatmul.mubr.bf16.vlgmr.msra.gmra.mrb[0].mxu0 %v724_v32 }
  0x24   :  { %466 = vmatmul.mubr.bf16.vlgmr.msra.gmra.mrb[0].mxu1 %v727_v34  ;;  %681 = vmatpush3.bf16.msra.mxu0 %v730_v36 }
  0x25   :  { %682 = vmatprep.subr.bf16.mxu0 %v731_v37  ;;  %424 = vmatprep.mubr.bf16.mxu0 %v732_v38 }
  0x26   :  { %473 = vmatprep.mubr.bf16.mxu1 %v734_v39 }
  0x28   :  { %683 = vmatpush3.bf16.msra.mxu0 %v731_v37 }
  0x29   :  { %684 = vmatprep.subr.bf16.mxu0 %v738_v41 }
  0x2b   :  { %425 = vmatmul.mubr.bf16.gmra.mrb[4].mxu0 %v736_v40 }
  0x2c   :  { %474 = vmatmul.mubr.bf16.gmra.mrb[4].mxu1 %v737_v42  ;;  %688 = vmatprep.mubr.msk.bf16.mxu0 %vm377_vm0, %v740_v43 }
  0x2d   :  { %685 = vmatpush3.bf16.msra.mxu0 %v738_v41 }
  0x2e   :  { %686 = vmatprep.subr.bf16.mxu0 %v739_v44 }
  0x31   :  { %687 = vmatpush3.bf16.msra.mxu0 %v739_v44 }
  0x34   :  { %689 = vmatmul.mubr.msk.bf16.vlgmr.msra.gmra.mrb[8].mxu0 %vm377_vm0, %v741_v45 }
  0xf6   :  { %v634_v46 = vpop.f32.mrb[0].mxu0 }
  0xf7   :  { %v662_v47 = vpop.f32.mrb[0].mxu1  ;;  %v635_v48 = vpop.f32.mrb[1].mxu0 }
  0xf8   :  { %v636_v49 = vadd.f32 %v635_v48, %v634_v46  ;;  %v663_v50 = vpop.f32.mrb[1].mxu1  ;;  %v637_v51 = vpop.f32.mrb[2].mxu0 }
  0xf9   :  { %v664_v52 = vadd.f32 %v663_v50, %v662_v47  ;;  %v665_v53 = vpop.f32.mrb[2].mxu1  ;;  %v638_v54 = vpop.f32.mrb[3].mxu0 }
  0xfa   :  { %v639_v55 = vadd.f32 %v638_v54, %v637_v51  ;;  %v666_v56 = vpop.f32.mrb[3].mxu1 }
  0xfb   :  { %v667_v57 = vadd.f32 %v666_v56, %v665_v53  ;;  %v468_v58 = vadd.f32 %v664_v52, %v636_v49 }
  0xfd   :  { %v471_v59 = vadd.f32 %v667_v57, %v639_v55 }
  0xfe   :  { %v640_v60 = vpop.f32.mrb[4].mxu0 }
  0xff   :  { %v668_v61 = vpop.f32.mrb[4].mxu1  ;;  %v641_v62 = vpop.f32.mrb[5].mxu0 }
 0x100   :  { %v642_v63 = vadd.f32 %v641_v62, %v640_v60  ;;  %v669_v0 = vpop.f32.mrb[5].mxu1  ;;  %v643_v1 = vpop.f32.mrb[6].mxu0 }
 0x101   :  { %v670_v2 = vadd.f32 %v669_v0, %v668_v61  ;;  %v671_v3 = vpop.f32.mrb[6].mxu1  ;;  %v644_v4 = vpop.f32.mrb[7].mxu0 }
 0x102   :  { %v645_v5 = vadd.f32 %v644_v4, %v643_v1  ;;  %v672_v6 = vpop.f32.mrb[7].mxu1 }
 0x103   :  { %v673_v7 = vadd.f32 %v672_v6, %v671_v3  ;;  %v476_v8 = vadd.f32 %v670_v2, %v642_v63 }
 0x105   :  { %v479_v9 = vadd.f32 %v673_v7, %v645_v5 }
 0x107   :  { %v690_v10 = vpop.f32.mrb[8].mxu0 }
 0x108   :  { %v525_v12 = vadd.f32 %v690_v10, %v476_v8  ;;  %v516_v13 = vpop.f32.mrb[9].mxu0 }
 0x109   :  { %v517_v14 = vadd.f32 %v516_v13, %v468_v58  ;;  %v691_v15 = vpop.f32.mrb[10].mxu0 }
 0x10a   :  { %v555_v16 = vadd.f32 %v617_v11, %v525_v12  ;;  %v528_v17 = vadd.f32 %v691_v15, %v479_v9  ;;  %v519_v18 = vpop.f32.mrb[11].mxu0 }
 0x10b   :  { %v553_v19 = vadd.f32 %v617_v11, %v517_v14  ;;  %v520_v20 = vadd.f32 %v519_v18, %v471_v59 }
 0x10c   :  { %v559_v21 = vmax.f32 %v555_v16, 0.0  ;;  %v556_v22 = vadd.f32 %v617_v11, %v528_v17 }
 0x10d   :  { %v557_v23 = vmax.f32 %v553_v19, 0.0  ;;  %v554_v24 = vadd.f32 %v617_v11, %v520_v20 }
 0x10e   :  { %563 = vst [vmem:[%s918_s3 + $0x10] sm:$0xff] %v559_v21  ;;  %v560_v25 = vmax.f32 %v556_v22, 0.0 }
 0x10f   :  { %561 = vst [vmem:[%s918_s3] sm:$0xff] %v557_v23  ;;  %v558_v26 = vmax.f32 %v554_v24, 0.0 }
 0x110   :  { %564 = vst [vmem:[%s918_s3 + $0x18] sm:$0xff] %v560_v25 }
 0x111   :  { %562 = vst [vmem:[%s918_s3 + $0x8] sm:$0xff] %v558_v26 }

// kernel: vae_forward.14
= control target key start
LH: loop header
LB: loop body
LE: loop exit
PB: predicated region body
PF: predicated region fallthrough
CT: control target
= control target key end

     0   :  { %s1417_s12 = smov 0   ;;  %s1419_s13 = smov 0   ;;  %s1549_s0 = inlined_call_operand.vmem [shape: bf16[2,2048], index: 0, kind: input, shape index: {}]   ;;  %s1550_s1 = inlined_call_operand.vmem [shape: bf16[2048,64], index: 1, kind: input, shape index: {}]   ;;  %s1551_s2 = inlined_call_operand.vmem [shape: f32[1,64], index: 2, kind: input, shape index: {}]   ;;  %s1552_s3 = inlined_call_operand.vmem [shape: f32[2,64], index: 3, kind: output, shape index: {}]  }
   0x1   :  { %s1421_s14 = smov 0  }
   0x2 LB: > { %s25_s15 = sadd.s32 1, %s1389_s13  ;;  %p1118_p0 = scmp.ge.s32.totalorder %s1393_s14, 1  ;;  %s1393_s14 = sphi %s1421_s14, %s13_s14   ;;  %s1389_s13 = sphi %s1419_s13, %s1554_s13   ;;  %s1385_s12 = sphi %s1417_s12, %s1553_s12  }
   0x3   : > { %p26_p1 = scmp.ge.s32.totalorder %s25_s15, 2  ;;  %p188_p2 = scmp.lt.s32.totalorder %s1393_s14, 3 }
   0x5   : > { %s1556_s15 = smov (%p26_p1, %s25_s15), 0  ;;  %p189_p3 = pnand %p1118_p0, %p188_p2 }
   0x6   : > { %s1119_s16 = sshll.u32 (!%p189_p3), %s1385_s12, 3  ;;  %s1120_s17 = sshll.u32 (!%p189_p3), %s1385_s12, 7 }
   0x7   : > { %192 = sbr.rel (%p189_p3) target bundleno = 321 (0x141), region = 32  ;;  %p231_p4 = scmp.lt.s32.totalorder (!%p189_p3), %s1119_s16, 15 }
   0x8   : > { %p238_p5 = scmp.lt.s32.totalorder (!%p189_p3), %s1120_s17, 255  ;;  %p1122_p6 = scmp.ne.s32.totalorder (!%p189_p3), %s1385_s12, 0 }
   0xe   : > { %s1558_s16 = smov (!%p231_p4, %s1119_s16), 15  ;;  %s1560_s17 = smov (!%p238_p5, %s1120_s17), 255 }
   0xf   : > { %s235_s20 = scalar_lea.vmem %s1549_s0, %s1558_s16  ;;  %s1121_s21 = sshll.u32 %s1560_s17, 2  ;;  %vm261_vm0 = vcmask (!%p1122_p6), 517120   ;;  %v1395_v0 = vmov (!%p1122_p6), 0.0  }
  0x10   : > { %s1448_s24 = scalar_lea.vmem %s1550_s1, %s1121_s21  ;;  %260 = sbr.rel (%p1122_p6) target bundleno = 23 (0x17), region = 36  ;;  %262 = vst.msk [vmem:[#allocation2] sm:$0x3] (!%p1122_p6), %vm261_vm0, %v1395_v0 }
  0x17 PF: > { %v1306_v1 = vld [vmem:[%s1448_s24 + $0x40] sm:$0xff]   ;;  %v1310_v5 = vld [vmem:[%s1448_s24 + $0x48] sm:$0xff]   ;;  %v1314_v9 = vld [vmem:[%s1448_s24 + $0x50] sm:$0xff]   ;;  %v398_v29 = vlaneseq  ;;  %v1396_v37 = vmov 1966171168   ;;  %vm996_vm1 = vcmask 517120  }
  0x18   : > { %v1307_v2 = vld [vmem:[%s1448_s24 + $0xc0] sm:$0xff]   ;;  %1192 = vmatprep.subr.bf16.mxu0 %v1306_v1  ;;  %v1311_v6 = vld [vmem:[%s1448_s24 + $0xc8] sm:$0xff]   ;;  %v1315_v10 = vld [vmem:[%s1448_s24 + $0xd0] sm:$0xff]   ;;  %v396_v38 = vunpack.c.l.s4 %v1396_v37  ;;  %p1187_p7 = scmp.ne.s32.totalorder %s1385_s12, 1 }
  0x19   : > { %v1308_v3 = vld [vmem:[%s1448_s24] sm:$0xff]   ;;  %1214 = vmatprep.subr.bf16.mxu1 %v1307_v2  ;;  %v1312_v7 = vld [vmem:[%s1448_s24 + $0x8] sm:$0xff]   ;;  %v1316_v11 = vld [vmem:[%s1448_s24 + $0x10] sm:$0xff]   ;;  %v399_v34 = vshrl.u32 %v398_v29, 7 }
  0x1a   : > { %v1309_v4 = vld [vmem:[%s1448_s24 + $0x80] sm:$0xff]   ;;  %1193 = vmatpush3.bf16.msra.mxu0 %v1308_v3  ;;  %v1313_v8 = vld [vmem:[%s1448_s24 + $0x88] sm:$0xff]   ;;  %v1317_v12 = vld [vmem:[%s1448_s24 + $0x90] sm:$0xff]   ;;  %v397_v41 = vunpack.c.0.s8 %v396_v38 }
  0x1b   : > { %1215 = vmatpush3.bf16.msra.mxu1 %v1309_v4  ;;  %1194 = vmatprep.subr.bf16.mxu0 %v1310_v5  ;;  %v1318_v13 = vld [vmem:[%s1448_s24 + $0x58] sm:$0xff]   ;;  %v1322_v17 = vld [vmem:[%s1448_s24 + $0x60] sm:$0xff]   ;;  %v1326_v21 = vld [vmem:[%s1448_s24 + $0x68] sm:$0xff]  }
  0x1c   : > { %1216 = vmatprep.subr.bf16.mxu1 %v1311_v6  ;;  %v1319_v14 = vld [vmem:[%s1448_s24 + $0xd8] sm:$0xff]   ;;  %v1323_v18 = vld [vmem:[%s1448_s24 + $0xe0] sm:$0xff]   ;;  %v1327_v22 = vld [vmem:[%s1448_s24 + $0xe8] sm:$0xff]   ;;  %v1490_v42 = vsub.s32 %v397_v41, %v399_v34 }
  0x1d   : > { %v1320_v15 = vld [vmem:[%s1448_s24 + $0x18] sm:$0xff]   ;;  %v1324_v19 = vld [vmem:[%s1448_s24 + $0x20] sm:$0xff]   ;;  %v1328_v23 = vld [vmem:[%s1448_s24 + $0x28] sm:$0xff]  }
  0x1e   : > { %1195 = vmatpush3.bf16.msra.mxu0 %v1312_v7  ;;  %v1321_v16 = vld [vmem:[%s1448_s24 + $0x98] sm:$0xff]   ;;  %v1325_v20 = vld [vmem:[%s1448_s24 + $0xa0] sm:$0xff]   ;;  %v1329_v24 = vld [vmem:[%s1448_s24 + $0xa8] sm:$0xff]  }
  0x1f   : > { %1217 = vmatpush3.bf16.msra.mxu1 %v1313_v8  ;;  %1196 = vmatprep.subr.bf16.mxu0 %v1314_v9  ;;  %v1330_v25 = vld [vmem:[%s1448_s24 + $0x70] sm:$0xff]   ;;  %v1334_v30 = vld [vmem:[%s1448_s24 + $0x78] sm:$0xff]   ;;  %v264_v35 = vld [vmem:[%s235_s20] sm:$0xff] }
  0x20   : > { %1218 = vmatprep.subr.bf16.mxu1 %v1315_v10  ;;  %v1331_v26 = vld [vmem:[%s1448_s24 + $0xf0] sm:$0xff]   ;;  %v1335_v31 = vld [vmem:[%s1448_s24 + $0xf8] sm:$0xff]   ;;  %v1339_v36 = vld [vmem:[%s1448_s24 + $0x140] sm:$0xff]   ;;  %v394_v40 = vcombine.high %v264_v35, %v264_v35  ;;  %v401_v43 = vrot.slane %v264_v35, %v1490_v42 }
  0x21   : > { %v1332_v27 = vld [vmem:[%s1448_s24 + $0x30] sm:$0xff]   ;;  %v1336_v32 = vld [vmem:[%s1448_s24 + $0x38] sm:$0xff]   ;;  %v1340_v39 = vld [vmem:[%s1448_s24 + $0x1c0] sm:$0xff]  }
  0x22   : > { %1197 = vmatpush3.bf16.msra.mxu0 %v1316_v11  ;;  %v1333_v28 = vld [vmem:[%s1448_s24 + $0xb0] sm:$0xff]   ;;  %v1337_v33 = vld [vmem:[%s1448_s24 + $0xb8] sm:$0xff]   ;;  %v1494_v44 = vrot.slane %v394_v40, %v1490_v42  ;;  %v409_v45 = vcombine.high %v401_v43, %v401_v43  ;;  %v417_v46 = vrot.slane %v401_v43, %v1490_v42  ;;  %v1341_v49 = vld [vmem:[%s1448_s24 + $0x100] sm:$0xff]  }
  0x23   : > { %1219 = vmatpush3.bf16.msra.mxu1 %v1317_v12  ;;  %1198 = vmatprep.subr.bf16.mxu0 %v1318_v13  ;;  %v1343_v52 = vld [vmem:[%s1448_s24 + $0x148] sm:$0xff]   ;;  %v1342_v54 = vld [vmem:[%s1448_s24 + $0x180] sm:$0xff]   ;;  %v1347_v58 = vld [vmem:[%s1448_s24 + $0x150] sm:$0xff]  }
  0x24   : > { %1220 = vmatprep.subr.bf16.mxu1 %v1319_v14  ;;  %v410_v47 = vcombine.high %v1494_v44, %v1494_v44  ;;  %v431_v48 = vrot.slane %v409_v45, %v1490_v42  ;;  %v439_v51 = vcombine.high %v417_v46, %v417_v46  ;;  %v1344_v55 = vld [vmem:[%s1448_s24 + $0x1c8] sm:$0xff]   ;;  %v1348_v60 = vld [vmem:[%s1448_s24 + $0x1d0] sm:$0xff]   ;;  %v1351_v62 = vld [vmem:[%s1448_s24 + $0x158] sm:$0xff]  }
  0x25   : > { %v1345_v57 = vld [vmem:[%s1448_s24 + $0x108] sm:$0xff]   ;;  %v1349_v61 = vld [vmem:[%s1448_s24 + $0x110] sm:$0xff]   ;;  %v1352_v0 = vld [vmem:[%s1448_s24 + $0x1d8] sm:$0xff]  }
  0x26   : > { %1199 = vmatpush3.bf16.msra.mxu0 %v1320_v15  ;;  %v438_v50 = vrot.slane %v410_v47, %v1490_v42  ;;  %867 = vmatprep.mubr.bf16.mxu0 %v431_v48  ;;  %v441_v53 = vcombine.high %v431_v48, %v431_v48  ;;  %v1346_v59 = vld [vmem:[%s1448_s24 + $0x188] sm:$0xff]   ;;  %v1350_v63 = vld [vmem:[%s1448_s24 + $0x190] sm:$0xff]   ;;  %v1353_v1 = vld [vmem:[%s1448_s24 + $0x118] sm:$0xff]  }
  0x27   : > { %1221 = vmatpush3.bf16.msra.mxu1 %v1321_v16  ;;  %1200 = vmatprep.subr.bf16.mxu0 %v1322_v17  ;;  %v1355_v2 = vld [vmem:[%s1448_s24 + $0x160] sm:$0xff]   ;;  %v1354_v3 = vld [vmem:[%s1448_s24 + $0x198] sm:$0xff]   ;;  %v1359_v6 = vld [vmem:[%s1448_s24 + $0x168] sm:$0xff]  }
  0x28   : > { %1222 = vmatprep.subr.bf16.mxu1 %v1323_v18  ;;  %v442_v56 = vcombine.high %v438_v50, %v438_v50  ;;  %907 = vmatprep.mubr.bf16.mxu1 %v441_v53  ;;  %v1356_v4 = vld [vmem:[%s1448_s24 + $0x1e0] sm:$0xff]   ;;  %v1360_v8 = vld [vmem:[%s1448_s24 + $0x1e8] sm:$0xff]   ;;  %v1363_v10 = vld [vmem:[%s1448_s24 + $0x170] sm:$0xff]   ;;  %v424_v18 = vrot.slane %v1494_v44, %v1490_v42 }
  0x29   : > { %v1357_v5 = vld [vmem:[%s1448_s24 + $0x120] sm:$0xff]   ;;  %v1361_v9 = vld [vmem:[%s1448_s24 + $0x128] sm:$0xff]   ;;  %v1364_v12 = vld [vmem:[%s1448_s24 + $0x1f0] sm:$0xff]  }
  0x2a   : > { %1201 = vmatpush3.bf16.msra.mxu0 %v1324_v19  ;;  %v1358_v7 = vld [vmem:[%s1448_s24 + $0x1a0] sm:$0xff]   ;;  %v1362_v11 = vld [vmem:[%s1448_s24 + $0x1a8] sm:$0xff]   ;;  %v1365_v13 = vld [vmem:[%s1448_s24 + $0x130] sm:$0xff]  }
  0x2b   : > { %1223 = vmatpush3.bf16.msra.mxu1 %v1325_v20  ;;  %1202 = vmatprep.subr.bf16.mxu0 %v1326_v21  ;;  %v1367_v14 = vld [vmem:[%s1448_s24 + $0x178] sm:$0xff]   ;;  %v1366_v15 = vld [vmem:[%s1448_s24 + $0x1b0] sm:$0xff]   ;;  %v440_v20 = vcombine.high %v424_v18, %v424_v18  ;;  %v263_v42 = vld [vmem:[#allocation2] sm:$0x3] }
  0x2c   : > { %1224 = vmatprep.subr.bf16.mxu1 %v1327_v22  ;;  %v1368_v16 = vld [vmem:[%s1448_s24 + $0x1f8] sm:$0xff]   ;;  %v1188_v47 = vld [vmem:[%s1551_s2] ss:$0 sm:$0xff] (!%p1187_p7) }
  0x2d   : > { %v1369_v17 = vld [vmem:[%s1448_s24 + $0x138] sm:$0xff]  }
  0x2e   : > { %1203 = vmatpush3.bf16.msra.mxu0 %v1328_v23  ;;  %v1370_v19 = vld [vmem:[%s1448_s24 + $0x1b8] sm:$0xff]  }
  0x2f   : > { %1225 = vmatpush3.bf16.msra.mxu1 %v1329_v24  ;;  %1204 = vmatprep.subr.bf16.mxu0 %v1330_v25 }
  0x30   : > { %1226 = vmatprep.subr.bf16.mxu1 %v1331_v26 }
  0x32   : > { %1205 = vmatpush3.bf16.msra.mxu0 %v1332_v27 }
  0x33   : > { %1227 = vmatpush3.bf16.msra.mxu1 %v1333_v28  ;;  %1206 = vmatprep.subr.bf16.mxu0 %v1334_v30 }
  0x34   : > { %1228 = vmatprep.subr.bf16.mxu1 %v1335_v31 }
  0x36   : > { %1207 = vmatpush3.bf16.msra.mxu0 %v1336_v32 }
  0x37   : > { %1229 = vmatpush3.bf16.msra.mxu1 %v1337_v33  ;;  %1236 = vmatprep.subr.bf16.mxu0 %v1339_v36 }
  0x38   : > { %1258 = vmatprep.subr.bf16.mxu1 %v1340_v39 }
  0x39   : > { %868 = vmatmul.mubr.bf16.vlgmr.msra.gmra.mrb[0].mxu0 %v417_v46 }
  0x3a   : > { %1237 = vmatpush3.bf16.msra.mxu0 %v1341_v49  ;;  %908 = vmatmul.mubr.bf16.vlgmr.msra.gmra.mrb[0].mxu1 %v439_v51 }
  0x3b   : > { %1238 = vmatprep.subr.bf16.mxu0 %v1343_v52  ;;  %1259 = vmatpush3.bf16.msra.mxu1 %v1342_v54 }
  0x3c   : > { %947 = vmatprep.mubr.bf16.mxu0 %v438_v50  ;;  %1260 = vmatprep.subr.bf16.mxu1 %v1344_v55 }
  0x3d   : > { %987 = vmatprep.mubr.bf16.mxu1 %v442_v56 }
  0x3e   : > { %1239 = vmatpush3.bf16.msra.mxu0 %v1345_v57 }
  0x3f   : > { %1240 = vmatprep.subr.bf16.mxu0 %v1347_v58  ;;  %1261 = vmatpush3.bf16.msra.mxu1 %v1346_v59 }
  0x40   : > { %1262 = vmatprep.subr.bf16.mxu1 %v1348_v60 }
  0x42   : > { %1241 = vmatpush3.bf16.msra.mxu0 %v1349_v61 }
  0x43   : > { %1242 = vmatprep.subr.bf16.mxu0 %v1351_v62  ;;  %1263 = vmatpush3.bf16.msra.mxu1 %v1350_v63 }
  0x44   : > { %1264 = vmatprep.subr.bf16.mxu1 %v1352_v0 }
  0x46   : > { %1243 = vmatpush3.bf16.msra.mxu0 %v1353_v1 }
  0x47   : > { %1244 = vmatprep.subr.bf16.mxu0 %v1355_v2  ;;  %1265 = vmatpush3.bf16.msra.mxu1 %v1354_v3 }
  0x48   : > { %1266 = vmatprep.subr.bf16.mxu1 %v1356_v4 }
  0x4a   : > { %1245 = vmatpush3.bf16.msra.mxu0 %v1357_v5 }
  0x4b   : > { %1246 = vmatprep.subr.bf16.mxu0 %v1359_v6  ;;  %1267 = vmatpush3.bf16.msra.mxu1 %v1358_v7 }
  0x4c   : > { %1268 = vmatprep.subr.bf16.mxu1 %v1360_v8 }
  0x4e   : > { %1247 = vmatpush3.bf16.msra.mxu0 %v1361_v9 }
  0x4f   : > { %1248 = vmatprep.subr.bf16.mxu0 %v1363_v10  ;;  %1269 = vmatpush3.bf16.msra.mxu1 %v1362_v11 }
  0x50   : > { %1270 = vmatprep.subr.bf16.mxu1 %v1364_v12 }
  0x52   : > { %1249 = vmatpush3.bf16.msra.mxu0 %v1365_v13 }
  0x53   : > { %1250 = vmatprep.subr.bf16.mxu0 %v1367_v14  ;;  %1271 = vmatpush3.bf16.msra.mxu1 %v1366_v15 }
  0x54   : > { %1272 = vmatprep.subr.bf16.mxu1 %v1368_v16 }
  0x56   : > { %1251 = vmatpush3.bf16.msra.mxu0 %v1369_v17 }
  0x57   : > { %1273 = vmatpush3.bf16.msra.mxu1 %v1370_v19 }
  0x59   : > { %948 = vmatmul.mubr.bf16.vlgmr.msra.gmra.mrb[4].mxu0 %v424_v18 }
  0x5a   : > { %988 = vmatmul.mubr.bf16.vlgmr.msra.gmra.mrb[4].mxu1 %v440_v20 }
 0x10c   : > { %v1208_v21 = vpop.f32.mrb[0].mxu0 }
 0x10d   : > { %v1209_v22 = vpop.f32.mrb[1].mxu0  ;;  %v1230_v23 = vpop.f32.mrb[0].mxu1 }
 0x10e   : > { %v1210_v24 = vadd.f32 %v1209_v22, %v1208_v21  ;;  %v1211_v25 = vpop.f32.mrb[2].mxu0  ;;  %v1231_v26 = vpop.f32.mrb[1].mxu1 }
 0x10f   : > { %v1212_v27 = vpop.f32.mrb[3].mxu0  ;;  %v1232_v28 = vadd.f32 %v1231_v26, %v1230_v23  ;;  %v1233_v29 = vpop.f32.mrb[2].mxu1 }
 0x110   : > { %v1234_v30 = vpop.f32.mrb[3].mxu1 }
 0x111   : > { %v910_v31 = vadd.f32 %v1232_v28, %v1210_v24 }
 0x12c   : > { %v1252_v32 = vpop.f32.mrb[4].mxu0 }
 0x12d   : > { %v1253_v33 = vpop.f32.mrb[5].mxu0  ;;  %v1274_v34 = vpop.f32.mrb[4].mxu1 }
 0x12e   : > { %v1254_v35 = vadd.f32 %v1253_v33, %v1252_v32  ;;  %v1255_v36 = vpop.f32.mrb[6].mxu0  ;;  %v1275_v37 = vpop.f32.mrb[5].mxu1 }
 0x12f   : > { %v1256_v38 = vpop.f32.mrb[7].mxu0  ;;  %v1276_v40 = vadd.f32 %v1275_v37, %v1274_v34  ;;  %v1277_v41 = vpop.f32.mrb[6].mxu1 }
 0x130   : > { %v950_v39 = vadd.f32 %v1254_v35, %v910_v31  ;;  %v1278_v43 = vpop.f32.mrb[7].mxu1  ;;  %1001 = sbr.rel (%p1187_p7) target bundleno = 321 (0x141), region = 40 }
 0x132   : > { %v990_v44 = vadd.f32 %v1276_v40, %v950_v39 }
 0x134   : > { %v995_v45 = vadd.f32 %v990_v44, %v263_v42 }
 0x136   : > { %997 = vst.msk [vmem:[#allocation2] sm:$0x3] %vm996_vm1, %v995_v45 }
 0x13d   : > { %v1002_v46 = vld [vmem:[#allocation2] sm:$0x3] }
 0x13e   : > { %v1010_v48 = vadd.f32 %v1188_v47, %v1002_v46 }
 0x140   : > { %1011 = vst.msk [vmem:[%s1552_s3] sm:$0x3] %vm996_vm1, %v1010_v48 }
 0x141 PF: > { %s13_s14 = sadd.s32 1, %s1393_s14   ;;  %s1553_s12 = smov %s1389_s13 }
 0x142   : > { %p10_p8 = scmp.ge.s32.totalorder %s13_s14, 4   ;;  %s1554_s13 = smov %s1556_s15 }
 0x144   :  { %12 = sbr.rel (!%p10_p8) target bundleno = 2 (0x2), region = 76 }

// kernel: vae_forward.15
= control target key start
LH: loop header
LB: loop body
LE: loop exit
PB: predicated region body
PF: predicated region fallthrough
CT: control target
= control target key end

     0   :  { %s753_s12 = smov 0   ;;  %s755_s13 = smov 0   ;;  %s828_s0 = inlined_call_operand.vmem [shape: bf16[2,32], index: 0, kind: input, shape index: {}]   ;;  %s829_s1 = inlined_call_operand.vmem [shape: bf16[32,2048], index: 1, kind: input, shape index: {}]   ;;  %s830_s2 = inlined_call_operand.vmem [shape: f32[1,2048], index: 2, kind: input, shape index: {}]   ;;  %s831_s3 = inlined_call_operand.vmem [shape: f32[2,2048], index: 3, kind: output, shape index: {}]  }
   0x1   :  { %s757_s14 = smov 0   ;;  %s759_s15 = smov 0  }
   0x2   :  { %s761_s16 = smov 0  }
   0x3 LB: > { %s28_s17 = sadd.s32 1, %s725_s15  ;;  %p76_p1 = scmp.ne.s32.totalorder %s717_s13, %s713_s12  ;;  %s729_s16 = sphi %s761_s16, %s13_s16   ;;  %s725_s15 = sphi %s759_s15, %s835_s15   ;;  %s721_s14 = sphi %s757_s14, %s834_s14   ;;  %s717_s13 = sphi %s755_s13, %s833_s13   ;;  %s713_s12 = sphi %s753_s12, %s832_s12  }
   0x4   : > { %p30_p0 = scmp.ge.s32.totalorder %s28_s17, 4  ;;  %p77_p2 = scmp.eq.s32.totalorder %s729_s16, 0 }
   0x5   : > { %s69_s19 = sadd.s32 1, %s717_s13  ;;  %p615_p5 = scmp.ge.s32.totalorder %s729_s16, 4 }
   0x6   : > { %s837_s17 = smov (%p30_p0, %s28_s17), 0  ;;  %p78_p3 = por %p77_p2, %p76_p1 }
   0x7   : > { %s65_s18 = ssub.s32 %s725_s15, %s837_s17  ;;  %165 = sbr.rel (%p615_p5) target bundleno = 22 (0x16), region = 20 }
   0x8   : > { %p67_p4 = scmp.eq.s32.totalorder %s65_s18, 0 }
   0xa   : > { %s788_s20 = scalar_select %p67_p4, %s717_s13, %s69_s19  }
   0xe   : > { %168 = sbr.rel (!%p78_p3) target bundleno = 22 (0x16), region = 24  ;;  %s170_s21 = sand.u32 (%p78_p3), 1, %s717_s13  }
   0xf   : > { %s636_s22 = sshll.u32 (%p78_p3), %s725_s15, 4  ;;  %s616_s23 = sshll.u32 (%p78_p3), %s170_s21, 6 }
  0x10   : > { %s178_s26 = scalar_lea.vmem (%p78_p3), %s829_s1, %s636_s22  ;;  %s172_s27 = scalar_lea.vmem (%p78_p3), [#allocation3], %s616_s23 }
  0x11   : > { %v191_v0 = vld [vmem:[%s178_s26] sm:$0xff] (%p78_p3)  ;;  %v193_v1 = vld [vmem:[%s178_s26 + $0x8] sm:$0xff] (%p78_p3) }
  0x12   : > { %v195_v2 = vld [vmem:[%s178_s26 + $0x40] sm:$0xff] (%p78_p3)  ;;  %192 = vst [vmem:[%s172_s27] sm:$0xff] (%p78_p3), %v191_v0  ;;  %194 = vst [vmem:[%s172_s27 + $0x8] sm:$0xff] (%p78_p3), %v193_v1  ;;  %v197_v3 = vld [vmem:[%s178_s26 + $0x48] sm:$0xff] (%p78_p3) }
  0x13   : > { %196 = vst [vmem:[%s172_s27 + $0x10] sm:$0xff] (%p78_p3), %v195_v2  ;;  %v199_v4 = vld [vmem:[%s178_s26 + $0x80] sm:$0xff] (%p78_p3)  ;;  %v201_v5 = vld [vmem:[%s178_s26 + $0x88] sm:$0xff] (%p78_p3)  ;;  %198 = vst [vmem:[%s172_s27 + $0x18] sm:$0xff] (%p78_p3), %v197_v3 }
  0x14   : > { %200 = vst [vmem:[%s172_s27 + $0x20] sm:$0xff] (%p78_p3), %v199_v4  ;;  %202 = vst [vmem:[%s172_s27 + $0x28] sm:$0xff] (%p78_p3), %v201_v5  ;;  %v203_v6 = vld [vmem:[%s178_s26 + $0xc0] sm:$0xff] (%p78_p3)  ;;  %v205_v7 = vld [vmem:[%s178_s26 + $0xc8] sm:$0xff] (%p78_p3) }
  0x15   : > { %204 = vst [vmem:[%s172_s27 + $0x30] sm:$0xff] %v203_v6  ;;  %206 = vst [vmem:[%s172_s27 + $0x38] sm:$0xff] %v205_v7 }
  0x16 PF: > { %p619_p6 = scmp.ge.s32.totalorder %s729_s16, 1  ;;  %p219_p7 = scmp.lt.s32.totalorder %s729_s16, 5 }
  0x18   : > { %p220_p8 = pnand %p619_p6, %p219_p7 }
  0x19   : > { %s226_s28 = sand.u32 (!%p220_p8), 1, %s713_s12   ;;  %v731_v8 = vmov (!%p220_p8), 0   ;;  %v293_v17 = vld [vmem:[%s828_s0] sm:$0x1] (!%p220_p8)  ;;  %vm342_vm0 = vcmask (!%p220_p8), 261120   ;;  %s621_s6 = sshll.u32 (!%p220_p8), %s721_s14, 2  ;;  %v437_v18 = vlaneseq (!%p220_p8) }
  0x1a   : > { %223 = sbr.rel (%p220_p8) target bundleno = 259 (0x103), region = 51  ;;  %s620_s29 = sshll.u32 (!%p220_p8), %s226_s28, 6  ;;  %378 = vmatprep.mubr.bf16.mxu0 (!%p220_p8), %v731_v8  ;;  %419 = vmatprep.mubr.bf16.mxu1 (!%p220_p8), %v731_v8  ;;  %v732_v20 = vmov (!%p220_p8), 1983009808  }
  0x1b   : > { %s228_s30 = scalar_lea.vmem (!%p220_p8), [#allocation3], %s620_s29  ;;  %p272_p9 = scmp.lt.s32.totalorder (!%p220_p8), %s621_s6, 15  ;;  %v438_v19 = vshrl.u32 (!%p220_p8), %v437_v18, 7  ;;  %v435_v21 = vunpack.c.l.s4 (!%p220_p8), %v732_v20 }
  0x1c   : > { %v679_v9 = vld [vmem:[%s228_s30 + $0x4] ss:$16 sps:$4 sm:$0xff] (!%p220_p8)   ;;  %v681_v10 = vld [vmem:[%s228_s30 + $0xc] ss:$16 sps:$4 sm:$0xff] (!%p220_p8)   ;;  %v683_v11 = vld [vmem:[%s228_s30] ss:$16 sps:$4 sm:$0xff] (!%p220_p8)  }
  0x1d   : > { %346 = vmatprep.subr.bf16.mxu0 (!%p220_p8), %v679_v9  ;;  %v684_v12 = vld [vmem:[%s228_s30 + $0x8] ss:$16 sps:$4 sm:$0xff] (!%p220_p8)   ;;  %387 = vmatprep.subr.bf16.mxu1 (!%p220_p8), %v681_v10  ;;  %v685_v13 = vld [vmem:[%s228_s30 + $0x24] ss:$16 sps:$4 sm:$0xff] (!%p220_p8)   ;;  %v687_v14 = vld [vmem:[%s228_s30 + $0x2c] ss:$16 sps:$4 sm:$0xff] (!%p220_p8)   ;;  %v436_v27 = vunpack.c.0.s8 (!%p220_p8), %v435_v21 }
  0x1e   : > { %347 = vmatpush1.bf16.msra.mxu0 (!%p220_p8), %v683_v11  ;;  %388 = vmatpush1.bf16.msra.mxu1 (!%p220_p8), %v684_v12  ;;  %v689_v15 = vld [vmem:[%s228_s30 + $0x20] ss:$16 sps:$4 sm:$0xff] (!%p220_p8)   ;;  %v690_v16 = vld [vmem:[%s228_s30 + $0x28] ss:$16 sps:$4 sm:$0xff] (!%p220_p8)   ;;  %v460_v22 = vsub.s32 (!%p220_p8), 0, %v438_v19  ;;  %v464_v23 = vsub.s32 (!%p220_p8), 1, %v438_v19 }
  0x1f   : > { %348 = vmatprep.subr.bf16.mxu0 (!%p220_p8), %v685_v13  ;;  %389 = vmatprep.subr.bf16.mxu1 (!%p220_p8), %v687_v14  ;;  %v468_v24 = vsub.s32 (!%p220_p8), 2, %v438_v19  ;;  %v472_v25 = vsub.s32 (!%p220_p8), 3, %v438_v19  ;;  %v439_v32 = vsub.s32 (!%p220_p8), %v436_v27, %v438_v19 }
  0x21   : > { %s839_s6 = smov (!%p272_p9, %s621_s6), 15 }
  0x22   : > { %349 = vmatpush1.bf16.msra.mxu0 %v689_v15  ;;  %390 = vmatpush1.bf16.msra.mxu1 %v690_v16  ;;  %s274_s9 = scalar_lea.vmem %s830_s2, %s839_s6  ;;  %s623_s10 = sshll.u32 %s839_s6, 1 }
  0x23   : > { %v456_v26 = vld [vmem:[%s274_s9] sm:$0xf]  ;;  %s284_s14 = scalar_lea.vmem %s831_s3, %s623_s10 }
  0x24   : > { %v461_v28 = vrot.slane %v456_v26, %v460_v22  ;;  %v465_v29 = vrot.slane %v456_v26, %v464_v23  ;;  %v469_v30 = vrot.slane %v456_v26, %v468_v24  ;;  %v473_v31 = vrot.slane %v456_v26, %v472_v25 }
  0x25   : > { %632 = vmatmul.mubr.msk.bf16.vlgmr.msra.gmra.mrb[0].mxu0 %vm342_vm0, %v293_v17  ;;  %633 = vmatmul.mubr.msk.bf16.vlgmr.msra.gmra.mrb[0].mxu1 %vm342_vm0, %v293_v17 }
  0x26   : > { %v474_v33 = vcombine.low %v461_v28, %v465_v29  ;;  %v475_v34 = vcombine.low %v469_v30, %v473_v31 }
  0x28   : > { %v482_v37 = vrot.slane %v474_v33, %v439_v32  ;;  %v489_v38 = vrot.slane %v475_v34, %v439_v32 }
  0x2a   : > { %v490_v49 = vcombine.low %v482_v37, %v489_v38 }
  0xf8   : > { %v380_v35 = vpop.f32.mrb[0].mxu0  ;;  %v421_v36 = vpop.f32.mrb[0].mxu1 }
  0xf9   : > { %v382_v39 = vpop.f32.mrb[1].mxu0  ;;  %v423_v40 = vpop.f32.mrb[1].mxu1 }
  0xfa   : > { %v432_v41 = vcombine.low %v380_v35, %v382_v39  ;;  %v433_v42 = vcombine.low %v421_v36, %v423_v40  ;;  %v384_v43 = vpop.f32.mrb[2].mxu0  ;;  %v425_v44 = vpop.f32.mrb[2].mxu1 }
  0xfb   : > { %v385_v45 = vpop.f32.mrb[3].mxu0  ;;  %v426_v46 = vpop.f32.mrb[3].mxu1 }
  0xfc   : > { %v440_v47 = vrot.slane %v432_v41, %v439_v32  ;;  %v447_v48 = vrot.slane %v433_v42, %v439_v32 }
  0xfe   : > { %v448_v50 = vcombine.low %v440_v47, %v447_v48 }
 0x100   : > { %v492_v51 = vadd.f32 %v490_v49, %v448_v50 }
 0x102   : > { %493 = vst [vmem:[%s284_s14] sm:$0xff] %v492_v51 }
 0x103 PF: > { %s13_s16 = sadd.s32 1, %s729_s16   ;;  %s832_s12 = smov %s717_s13 }
 0x104   : > { %p10_p10 = scmp.ge.s32.totalorder %s13_s16, 6   ;;  %s833_s13 = smov %s788_s20 }
 0x105   : > { %s834_s14 = smov %s725_s15  ;;  %s835_s15 = smov %s837_s17 }
 0x106   :  { %12 = sbr.rel (!%p10_p10) target bundleno = 3 (0x3), region = 104 }

// kernel: vae_forward.16
= control target key start
LH: loop header
LB: loop body
LE: loop exit
PB: predicated region body
PF: predicated region fallthrough
CT: control target
= control target key end

     0   :  { %v754_v1 = vmov 0   ;;  %vm23_vm0 = vcmask 523264   ;;  %v755_v43 = vmov 0.0   ;;  %v553_v44 = vlaneseq  ;;  %s995_s1 = inlined_call_operand.vmem [shape: bf16[128,576], index: 1, kind: input, shape index: {}]   ;;  %s996_s0 = inlined_call_operand.vmem [shape: bf16[32,128], index: 0, kind: input, shape index: {}]   ;;  %s997_s2 = inlined_call_operand.vmem [shape: f32[1,576], index: 2, kind: input, shape index: {}]   ;;  %s998_s3 = inlined_call_operand.vmem [shape: f32[32,576], index: 3, kind: output, shape index: {}]  }
   0x1   :  { %v696_v0 = vld [vmem:[%s995_s1 + $0x4] ss:$20 sps:$4 sm:$0xff]   ;;  %364 = vmatprep.mubr.bf16.mxu0 %v754_v1  ;;  %417 = vmatprep.mubr.bf16.mxu1 %v754_v1  ;;  %v698_v2 = vld [vmem:[%s995_s1] ss:$20 sps:$4 sm:$0xff]   ;;  %v701_v4 = vld [vmem:[%s995_s1 + $0x28] ss:$20 sps:$4 sm:$0xff]  }
   0x2   :  { %332 = vmatprep.subr.bf16.mxu0 %v696_v0  ;;  %v699_v3 = vld [vmem:[%s995_s1 + $0x2c] ss:$20 sps:$4 sm:$0xff]   ;;  %v702_v5 = vld [vmem:[%s995_s1 + $0x54] ss:$20 sps:$4 sm:$0xff]   ;;  %v704_v6 = vld [vmem:[%s995_s1 + $0x50] ss:$20 sps:$4 sm:$0xff]  }
   0x3   :  { %333 = vmatpush1.bf16.msra.mxu0 %v698_v2  ;;  %v705_v7 = vld [vmem:[%s995_s1 + $0x7c] ss:$20 sps:$4 sm:$0xff]   ;;  %v714_v8 = vld [vmem:[%s995_s1 + $0xc] ss:$20 sps:$4 sm:$0xff]   ;;  %v720_v11 = vld [vmem:[%s995_s1 + $0x34] ss:$20 sps:$4 sm:$0xff]  }
   0x4   :  { %334 = vmatprep.subr.bf16.mxu0 %v699_v3  ;;  %v716_v9 = vld [vmem:[%s995_s1 + $0x8] ss:$20 sps:$4 sm:$0xff]   ;;  %v707_v10 = vld [vmem:[%s995_s1 + $0x78] ss:$20 sps:$4 sm:$0xff]   ;;  %385 = vmatprep.subr.bf16.mxu1 %v714_v8  ;;  %v722_v12 = vld [vmem:[%s995_s1 + $0x30] ss:$20 sps:$4 sm:$0xff]  }
   0x5   :  { %386 = vmatpush1.bf16.msra.mxu1 %v716_v9  ;;  %v708_v13 = vld [vmem:[%s995_s1 + $0xa4] ss:$20 sps:$4 sm:$0xff]   ;;  %v710_v14 = vld [vmem:[%s995_s1 + $0xa0] ss:$20 sps:$4 sm:$0xff]   ;;  %v726_v15 = vld [vmem:[%s995_s1 + $0x5c] ss:$20 sps:$4 sm:$0xff]  }
   0x6   :  { %387 = vmatprep.subr.bf16.mxu1 %v720_v11  ;;  %v728_v16 = vld [vmem:[%s995_s1 + $0x58] ss:$20 sps:$4 sm:$0xff]   ;;  %v713_v18 = vld [vmem:[%s995_s1 + $0xc8] ss:$20 sps:$4 sm:$0xff]   ;;  %v733_v21 = vld [vmem:[%s995_s1 + $0x80] ss:$20 sps:$4 sm:$0xff]  }
   0x7   :  { %335 = vmatpush1.bf16.msra.mxu0 %v701_v4  ;;  %v711_v17 = vld [vmem:[%s995_s1 + $0xcc] ss:$20 sps:$4 sm:$0xff]   ;;  %v731_v19 = vld [vmem:[%s995_s1 + $0x84] ss:$20 sps:$4 sm:$0xff]   ;;  %v717_v20 = vld [vmem:[%s995_s1 + $0xf4] ss:$20 sps:$4 sm:$0xff]  }
   0x8   :  { %336 = vmatprep.subr.bf16.mxu0 %v702_v5  ;;  %v735_v22 = vld [vmem:[%s995_s1 + $0xac] ss:$20 sps:$4 sm:$0xff]   ;;  %v719_v23 = vld [vmem:[%s995_s1 + $0xf0] ss:$20 sps:$4 sm:$0xff]   ;;  %v737_v24 = vld [vmem:[%s995_s1 + $0xa8] ss:$20 sps:$4 sm:$0xff]  }
   0x9   :  { %388 = vmatpush1.bf16.msra.mxu1 %v722_v12  ;;  %v723_v25 = vld [vmem:[%s995_s1 + $0x11c] ss:$20 sps:$4 sm:$0xff]   ;;  %v739_v26 = vld [vmem:[%s995_s1 + $0xd4] ss:$20 sps:$4 sm:$0xff]   ;;  %v725_v27 = vld [vmem:[%s995_s1 + $0x118] ss:$20 sps:$4 sm:$0xff]  }
   0xa   :  { %389 = vmatprep.subr.bf16.mxu1 %v726_v15  ;;  %v730_v28 = vld [vmem:[%s995_s1 + $0x10] ss:$20 sps:$4 sm:$0xff]   ;;  %v745_v32 = vld [vmem:[%s995_s1 + $0xf8] ss:$20 sps:$4 sm:$0xff]   ;;  %v749_v35 = vld [vmem:[%s995_s1 + $0x120] ss:$20 sps:$4 sm:$0xff]  }
   0xb   :  { %337 = vmatpush1.bf16.msra.mxu0 %v704_v6  ;;  %v741_v29 = vld [vmem:[%s995_s1 + $0xd0] ss:$20 sps:$4 sm:$0xff]   ;;  %v734_v33 = vld [vmem:[%s995_s1 + $0x38] ss:$20 sps:$4 sm:$0xff]   ;;  %v738_v36 = vld [vmem:[%s995_s1 + $0x60] ss:$20 sps:$4 sm:$0xff]  }
   0xc   :  { %338 = vmatprep.subr.bf16.mxu0 %v705_v7  ;;  %v743_v30 = vld [vmem:[%s995_s1 + $0xfc] ss:$20 sps:$4 sm:$0xff]   ;;  %v729_v31 = vld [vmem:[%s996_s0] sm:$0xff]   ;;  %v751_v37 = vld [vmem:[%s996_s0 + $0x8] sm:$0xff]   ;;  %34 = vst.msk [vmem:[#allocation2 + $0x70] sm:$0xff] %vm23_vm0, %v755_v43  ;;  %v910_v45 = vshrl.u32 %v553_v44, 7 }
   0xd   :  { %390 = vmatpush1.bf16.msra.mxu1 %v728_v16  ;;  %v747_v34 = vld [vmem:[%s995_s1 + $0x124] ss:$20 sps:$4 sm:$0xff]   ;;  %v742_v38 = vld [vmem:[%s995_s1 + $0x88] ss:$20 sps:$4 sm:$0xff]   ;;  %v752_v41 = vld [vmem:[%s995_s1 + $0x100] ss:$20 sps:$4 sm:$0xff]  }
   0xe   :  { %391 = vmatprep.subr.bf16.mxu1 %v731_v19  ;;  %v746_v39 = vld [vmem:[%s995_s1 + $0xb0] ss:$20 sps:$4 sm:$0xff]   ;;  %v750_v40 = vld [vmem:[%s995_s1 + $0xd8] ss:$20 sps:$4 sm:$0xff]   ;;  %v753_v42 = vld [vmem:[%s995_s1 + $0x128] ss:$20 sps:$4 sm:$0xff]  }
   0xf   :  { %339 = vmatpush1.bf16.msra.mxu0 %v707_v10  ;;  %24 = vst.msk [vmem:[#allocation2 + $0x20] sm:$0xff] %vm23_vm0, %v755_v43  ;;  %29 = vst.msk [vmem:[#allocation2 + $0x48] sm:$0xff] %vm23_vm0, %v755_v43  ;;  %v555_v46 = vsub.s32 0, %v910_v45  ;;  %v916_v47 = vld [vmem:[%s997_s2] sm:$0x1f]  ;;  %v559_v48 = vsub.s32 1, %v910_v45 }
  0x10   :  { %340 = vmatprep.subr.bf16.mxu0 %v708_v13  ;;  %39 = vst.msk [vmem:[#allocation2 + $0x98] sm:$0xff] %vm23_vm0, %v755_v43  ;;  %v563_v56 = vsub.s32 2, %v910_v45  ;;  %v567_v58 = vsub.s32 3, %v910_v45 }
  0x11   :  { %392 = vmatpush1.bf16.msra.mxu1 %v733_v21  ;;  %v556_v49 = vrot.slane %v916_v47, %v555_v46  ;;  %v560_v51 = vrot.slane %v916_v47, %v559_v48 }
  0x12   :  { %393 = vmatprep.subr.bf16.mxu1 %v735_v22  ;;  %v564_v61 = vrot.slane %v916_v47, %v563_v56  ;;  %v568_v0 = vrot.slane %v916_v47, %v567_v58 }
  0x13   :  { %341 = vmatpush1.bf16.msra.mxu0 %v710_v14 }
  0x14   :  { %342 = vmatprep.subr.bf16.mxu0 %v711_v17 }
  0x15   :  { %394 = vmatpush1.bf16.msra.mxu1 %v737_v24 }
  0x16   :  { %395 = vmatprep.subr.bf16.mxu1 %v739_v26  ;;  %v44_v24 = vld [vmem:[#allocation2 + $0x20] sm:$0xff] }
  0x17   :  { %343 = vmatpush1.bf16.msra.mxu0 %v713_v18  ;;  %v59_v26 = vld [vmem:[#allocation2 + $0x98] sm:$0xff] }
  0x18   :  { %344 = vmatprep.subr.bf16.mxu0 %v717_v20 }
  0x19   :  { %396 = vmatpush1.bf16.msra.mxu1 %v741_v29  ;;  %v49_v29 = vld [vmem:[#allocation2 + $0x48] sm:$0xff] }
  0x1a   :  { %397 = vmatprep.subr.bf16.mxu1 %v743_v30 }
  0x1b   :  { %345 = vmatpush1.bf16.msra.mxu0 %v719_v23  ;;  %v54_v23 = vld [vmem:[#allocation2 + $0x70] sm:$0xff] }
  0x1c   :  { %346 = vmatprep.subr.bf16.mxu0 %v723_v25 }
  0x1d   :  { %398 = vmatpush1.bf16.msra.mxu1 %v745_v32  ;;  %v571_v32 = vsub.s32 4, %v910_v45 }
  0x1e   :  { %399 = vmatprep.subr.bf16.mxu1 %v747_v34 }
  0x1f   :  { %347 = vmatpush1.bf16.msra.mxu0 %v725_v27 }
  0x20   :  { %674 = vmatprep.subr.bf16.mxu0 %v730_v28 }
  0x21   :  { %400 = vmatpush1.bf16.msra.mxu1 %v749_v35 }
  0x22   :  { %365 = vmatmul.mubr.bf16.vlgmr.msra.gmra.mrb[0].mxu0 %v729_v31 }
  0x23   :  { %675 = vmatpush3.bf16.msra.mxu0 %v730_v28  ;;  %374 = vmatprep.mubr.bf16.mxu0 %v754_v1 }
  0x24   :  { %676 = vmatprep.subr.bf16.mxu0 %v734_v33  ;;  %418 = vmatmul.mubr.bf16.vlgmr.msra.gmra.mrb[0].mxu1 %v729_v31 }
  0x25   :  { %427 = vmatprep.mubr.bf16.mxu1 %v754_v1 }
  0x27   :  { %677 = vmatpush3.bf16.msra.mxu0 %v734_v33 }
  0x28   :  { %678 = vmatprep.subr.bf16.mxu0 %v738_v36 }
  0x2a   :  { %375 = vmatmul.mubr.bf16.gmra.mrb[4].mxu0 %v751_v37 }
  0x2b   :  { %679 = vmatpush3.bf16.msra.mxu0 %v738_v36  ;;  %690 = vmatprep.mubr.bf16.mxu0 %v729_v31  ;;  %v572_v36 = vrot.slane %v916_v47, %v571_v32 }
  0x2c   :  { %680 = vmatprep.subr.bf16.mxu0 %v742_v38  ;;  %428 = vmatmul.mubr.bf16.gmra.mrb[4].mxu1 %v751_v37 }
  0x2f   :  { %681 = vmatpush3.bf16.msra.mxu0 %v742_v38 }
  0x30   :  { %682 = vmatprep.subr.bf16.mxu0 %v746_v39 }
  0x33   :  { %683 = vmatpush3.bf16.msra.mxu0 %v746_v39 }
  0x34   :  { %684 = vmatprep.subr.bf16.mxu0 %v750_v40 }
  0x37   :  { %685 = vmatpush3.bf16.msra.mxu0 %v750_v40 }
  0x38   :  { %686 = vmatprep.subr.bf16.mxu0 %v752_v41 }
  0x3b   :  { %687 = vmatpush3.bf16.msra.mxu0 %v752_v41 }
  0x3c   :  { %688 = vmatprep.subr.bf16.mxu0 %v753_v42 }
  0x3f   :  { %689 = vmatpush3.bf16.msra.mxu0 %v753_v42 }
  0x42   :  { %691 = vmatmul.mubr.bf16.vlgmr.msra.gmra.mrb[8].mxu0 %v751_v37 }
  0xf5   :  { %v366_v50 = vpop.f32.mrb[0].mxu0 }
  0xf6   :  { %v368_v52 = vpop.f32.mrb[1].mxu0  ;;  %v578_v54 = vadd.f32 %v556_v49, %v366_v50 }
  0xf7   :  { %v370_v53 = vpop.f32.mrb[2].mxu0  ;;  %v579_v57 = vadd.f32 %v560_v51, %v368_v52  ;;  %v419_v63 = vpop.f32.mrb[0].mxu1 }
  0xf8   :  { %v372_v55 = vpop.f32.mrb[3].mxu0  ;;  %598 = vst [vmem:[%s998_s3] sm:$0xff] %v578_v54  ;;  %v583_v59 = vadd.f32 %v556_v49, %v370_v53  ;;  %v421_v2 = vpop.f32.mrb[1].mxu1  ;;  %v580_v6 = vadd.f32 %v564_v61, %v419_v63 }
  0xf9   :  { %599 = vst [vmem:[%s998_s3 + $0x8] sm:$0xff] %v579_v57  ;;  %v584_v60 = vadd.f32 %v560_v51, %v372_v55  ;;  %v423_v4 = vpop.f32.mrb[2].mxu1  ;;  %v581_v10 = vadd.f32 %v568_v0, %v421_v2 }
  0xfa   :  { %603 = vst [vmem:[%s998_s3 + $0x28] sm:$0xff] %v583_v59  ;;  %v425_v8 = vpop.f32.mrb[3].mxu1  ;;  %600 = vst [vmem:[%s998_s3 + $0x10] sm:$0xff] %v580_v6  ;;  %v585_v12 = vadd.f32 %v564_v61, %v423_v4 }
  0xfb   :  { %604 = vst [vmem:[%s998_s3 + $0x30] sm:$0xff] %v584_v60  ;;  %601 = vst [vmem:[%s998_s3 + $0x18] sm:$0xff] %v581_v10  ;;  %v586_v14 = vadd.f32 %v568_v0, %v425_v8 }
  0xfc   :  { %605 = vst [vmem:[%s998_s3 + $0x38] sm:$0xff] %v585_v12 }
  0xfd   :  { %v376_v62 = vpop.f32.mrb[4].mxu0  ;;  %606 = vst [vmem:[%s998_s3 + $0x40] sm:$0xff] %v586_v14 }
  0xfe   :  { %v378_v1 = vpop.f32.mrb[5].mxu0  ;;  %v588_v5 = vadd.f32 %v556_v49, %v376_v62 }
  0xff   :  { %v380_v3 = vpop.f32.mrb[6].mxu0  ;;  %v589_v9 = vadd.f32 %v560_v51, %v378_v1  ;;  %v429_v15 = vpop.f32.mrb[4].mxu1 }
 0x100   :  { %v382_v7 = vpop.f32.mrb[7].mxu0  ;;  %608 = vst [vmem:[%s998_s3 + $0x50] sm:$0xff] %v588_v5  ;;  %v593_v11 = vadd.f32 %v556_v49, %v380_v3  ;;  %v431_v16 = vpop.f32.mrb[5].mxu1  ;;  %v590_v18 = vadd.f32 %v564_v61, %v429_v15 }
 0x101   :  { %609 = vst [vmem:[%s998_s3 + $0x58] sm:$0xff] %v589_v9  ;;  %v594_v13 = vadd.f32 %v560_v51, %v382_v7  ;;  %v433_v17 = vpop.f32.mrb[6].mxu1  ;;  %v591_v20 = vadd.f32 %v568_v0, %v431_v16 }
 0x102   :  { %613 = vst [vmem:[%s998_s3 + $0x78] sm:$0xff] %v593_v11  ;;  %v435_v19 = vpop.f32.mrb[7].mxu1  ;;  %610 = vst [vmem:[%s998_s3 + $0x60] sm:$0xff] %v590_v18  ;;  %v595_v21 = vadd.f32 %v564_v61, %v433_v17 }
 0x103   :  { %614 = vst [vmem:[%s998_s3 + $0x80] sm:$0xff] %v594_v13  ;;  %611 = vst [vmem:[%s998_s3 + $0x68] sm:$0xff] %v591_v20  ;;  %v596_v22 = vadd.f32 %v568_v0, %v435_v19 }
 0x104   :  { %615 = vst [vmem:[%s998_s3 + $0x88] sm:$0xff] %v595_v21 }
 0x105   :  { %616 = vst [vmem:[%s998_s3 + $0x90] sm:$0xff] %v596_v22 }
 0x115   :  { %v692_v25 = vpop.f32.mrb[8].mxu0 }
 0x116   :  { %v501_v27 = vadd.f32 %v692_v25, %v54_v23  ;;  %v472_v28 = vpop.f32.mrb[9].mxu0 }
 0x117   :  { %v491_v30 = vadd.f32 %v472_v28, %v44_v24  ;;  %v693_v31 = vpop.f32.mrb[10].mxu0 }
 0x118   :  { %522 = vst.msk [vmem:[#allocation2 + $0x70] sm:$0xff] %vm23_vm0, %v501_v27  ;;  %v506_v33 = vadd.f32 %v693_v31, %v59_v26  ;;  %v475_v34 = vpop.f32.mrb[11].mxu0 }
 0x119   :  { %512 = vst.msk [vmem:[#allocation2 + $0x20] sm:$0xff] %vm23_vm0, %v491_v30  ;;  %v496_v35 = vadd.f32 %v475_v34, %v49_v29 }
 0x11a   :  { %527 = vst.msk [vmem:[#allocation2 + $0x98] sm:$0xff] %vm23_vm0, %v506_v33 }
 0x11b   :  { %517 = vst.msk [vmem:[#allocation2 + $0x48] sm:$0xff] %vm23_vm0, %v496_v35 }
 0x11f   :  { %v545_v37 = vld [vmem:[#allocation2 + $0x70] sm:$0xff] }
 0x120   :  { %v592_v38 = vadd.f32 %v572_v36, %v545_v37  ;;  %v535_v39 = vld [vmem:[#allocation2 + $0x20] sm:$0xff] }
 0x121   :  { %v582_v40 = vadd.f32 %v572_v36, %v535_v39  ;;  %v550_v41 = vld [vmem:[#allocation2 + $0x98] sm:$0xff] }
 0x122   :  { %612 = vst.msk [vmem:[%s998_s3 + $0x70] sm:$0xff] %vm23_vm0, %v592_v38  ;;  %v597_v42 = vadd.f32 %v572_v36, %v550_v41  ;;  %v540_v43 = vld [vmem:[#allocation2 + $0x48] sm:$0xff] }
 0x123   :  { %602 = vst.msk [vmem:[%s998_s3 + $0x20] sm:$0xff] %vm23_vm0, %v582_v40  ;;  %v587_v44 = vadd.f32 %v572_v36, %v540_v43 }
 0x124   :  { %617 = vst.msk [vmem:[%s998_s3 + $0x98] sm:$0xff] %vm23_vm0, %v597_v42 }
 0x125   :  { %607 = vst.msk [vmem:[%s998_s3 + $0x48] sm:$0xff] %vm23_vm0, %v587_v44 }

// kernel: vae_forward.17
= control target key start
LH: loop header
LB: loop body
LE: loop exit
PB: predicated region body
PF: predicated region fallthrough
CT: control target
= control target key end

     0   :  { %vm57_vm0 = vcmask 523264   ;;  %vm70_vm1 = vcmask 517120   ;;  %s185_s0 = inlined_call_operand.vmem [shape: f32[98,64], index: 0, kind: input, shape index: {}]   ;;  %s186_s1 = inlined_call_operand.vmem [shape: f32[1,64], index: 1, kind: input, shape index: {}]   ;;  %s187_s2 = inlined_call_operand.vmem [shape: f32[98,64], index: 2, kind: output, shape index: {}]  }
   0x1   :  { %v11_v0 = vld [vmem:[%s185_s0] sm:$0xff]  ;;  %v12_v2 = vld [vmem:[%s185_s0 + $0x8] sm:$0xff]  ;;  %v13_v5 = vld [vmem:[%s185_s0 + $0x10] sm:$0xff] }
   0x2   :  { %v76_v1 = vld [vmem:[%s186_s1] ss:$0 sm:$0xff]  ;;  %v14_v6 = vld [vmem:[%s185_s0 + $0x18] sm:$0xff]  ;;  %v16_v11 = vld [vmem:[%s185_s0 + $0x28] sm:$0xff] }
   0x3   :  { %v31_v3 = vadd.f32 %v76_v1, %v11_v0  ;;  %v32_v4 = vadd.f32 %v76_v1, %v12_v2  ;;  %v15_v7 = vld [vmem:[%s185_s0 + $0x20] sm:$0xff]  ;;  %v33_v8 = vadd.f32 %v76_v1, %v13_v5  ;;  %v34_v9 = vadd.f32 %v76_v1, %v14_v6  ;;  %v17_v12 = vld [vmem:[%s185_s0 + $0x30] sm:$0xff]  ;;  %v18_v13 = vld [vmem:[%s185_s0 + $0x38] sm:$0xff] }
   0x4   :  { %v35_v10 = vadd.f32 %v76_v1, %v15_v7  ;;  %v36_v16 = vadd.f32 %v76_v1, %v16_v11  ;;  %v37_v17 = vadd.f32 %v76_v1, %v17_v12  ;;  %v19_v18 = vld [vmem:[%s185_s0 + $0x40] sm:$0xff]  ;;  %v20_v19 = vld [vmem:[%s185_s0 + $0x48] sm:$0xff]  ;;  %v21_v20 = vld [vmem:[%s185_s0 + $0x50] sm:$0xff]  ;;  %v38_v24 = vadd.f32 %v76_v1, %v18_v13 }
   0x5   :  { %v44_v14 = vmax.f32 %v31_v3, 0.0  ;;  %v45_v15 = vmax.f32 %v32_v4, 0.0  ;;  %v46_v21 = vmax.f32 %v33_v8, 0.0  ;;  %v47_v22 = vmax.f32 %v34_v9, 0.0  ;;  %v22_v25 = vld [vmem:[%s185_s0 + $0x58] sm:$0xff] }
   0x6   :  { %v48_v23 = vmax.f32 %v35_v10, 0.0  ;;  %v23_v26 = vld [vmem:[%s185_s0 + $0x60] sm:$0x3]  ;;  %v49_v27 = vmax.f32 %v36_v16, 0.0  ;;  %v50_v28 = vmax.f32 %v37_v17, 0.0  ;;  %v39_v29 = vadd.f32 %v76_v1, %v19_v18 }
   0x7   :  { %58 = vst.msk [vmem:[%s187_s2] sm:$0xff] %vm57_vm0, %v44_v14  ;;  %59 = vst.msk [vmem:[%s187_s2 + $0x8] sm:$0xff] %vm57_vm0, %v45_v15  ;;  %v40_v30 = vadd.f32 %v76_v1, %v20_v19  ;;  %v51_v31 = vmax.f32 %v38_v24, 0.0  ;;  %v41_v32 = vadd.f32 %v76_v1, %v21_v20  ;;  %v42_v33 = vadd.f32 %v76_v1, %v22_v25 }
   0x8   :  { %60 = vst.msk [vmem:[%s187_s2 + $0x10] sm:$0xff] %vm57_vm0, %v46_v21  ;;  %61 = vst.msk [vmem:[%s187_s2 + $0x18] sm:$0xff] %vm57_vm0, %v47_v22  ;;  %v43_v34 = vadd.f32 %v76_v1, %v23_v26  ;;  %v52_v35 = vmax.f32 %v39_v29, 0.0 }
   0x9   :  { %62 = vst.msk [vmem:[%s187_s2 + $0x20] sm:$0xff] %vm57_vm0, %v48_v23  ;;  %63 = vst.msk [vmem:[%s187_s2 + $0x28] sm:$0xff] %vm57_vm0, %v49_v27  ;;  %v53_v36 = vmax.f32 %v40_v30, 0.0  ;;  %v54_v37 = vmax.f32 %v41_v32, 0.0  ;;  %v55_v38 = vmax.f32 %v42_v33, 0.0 }
   0xa   :  { %64 = vst.msk [vmem:[%s187_s2 + $0x30] sm:$0xff] %vm57_vm0, %v50_v28  ;;  %65 = vst.msk [vmem:[%s187_s2 + $0x38] sm:$0xff] %vm57_vm0, %v51_v31  ;;  %v56_v39 = vmax.f32 %v43_v34, 0.0 }
   0xb   :  { %66 = vst.msk [vmem:[%s187_s2 + $0x40] sm:$0xff] %vm57_vm0, %v52_v35  ;;  %67 = vst.msk [vmem:[%s187_s2 + $0x48] sm:$0xff] %vm57_vm0, %v53_v36 }
   0xc   :  { %68 = vst.msk [vmem:[%s187_s2 + $0x50] sm:$0xff] %vm57_vm0, %v54_v37  ;;  %69 = vst.msk [vmem:[%s187_s2 + $0x58] sm:$0xff] %vm57_vm0, %v55_v38 }
   0xd   :  { %71 = vst.msk [vmem:[%s187_s2 + $0x60] sm:$0x3] %vm70_vm1, %v56_v39 }

// kernel: vae_forward.18
= control target key start
LH: loop header
LB: loop body
LE: loop exit
PB: predicated region body
PF: predicated region fallthrough
CT: control target
= control target key end

     0   :  { %v848_v1 = vmov 0   ;;  %v849_v2 = vmov 0.0   ;;  %vm265_vm0 = vcmask 523264   ;;  %v650_v25 = vlaneseq  ;;  %s1186_s1 = inlined_call_operand.vmem [shape: bf16[64,512], index: 1, kind: input, shape index: {}]   ;;  %s1187_s0 = inlined_call_operand.vmem [shape: bf16[98,64], index: 0, kind: input, shape index: {}]   ;;  %s1188_s2 = inlined_call_operand.vmem [shape: f32[1,512], index: 2, kind: input, shape index: {}]   ;;  %s1189_s3 = inlined_call_operand.vmem [shape: f32[98,512], index: 3, kind: output, shape index: {}]  }
   0x1   :  { %v817_v0 = vld [vmem:[%s1186_s1 + $0x4] ss:$16 sps:$4 sm:$0xff]   ;;  %319 = vmatprep.mubr.bf16.mxu0 %v848_v1  ;;  %420 = vmatprep.mubr.bf16.mxu1 %v848_v1  ;;  %67 = vst [vmem:[#allocation2 + $0x180] sm:$0x3] %v849_v2  ;;  %68 = vst [vmem:[#allocation2 + $0x188] sm:$0x3] %v849_v2 }
   0x2   :  { %69 = vst [vmem:[#allocation2 + $0x190] sm:$0x3] %v849_v2  ;;  %70 = vst [vmem:[#allocation2 + $0x198] sm:$0x3] %v849_v2  ;;  %v819_v3 = vld [vmem:[%s1186_s1 + $0xc] ss:$16 sps:$4 sm:$0xff]   ;;  %287 = vmatprep.subr.bf16.mxu0 %v817_v0 }
   0x3   :  { %v821_v4 = vld [vmem:[%s1186_s1] ss:$16 sps:$4 sm:$0xff]   ;;  %v822_v5 = vld [vmem:[%s1186_s1 + $0x8] ss:$16 sps:$4 sm:$0xff]   ;;  %388 = vmatprep.subr.bf16.mxu1 %v819_v3  ;;  %v823_v6 = vld [vmem:[%s1186_s1 + $0x24] ss:$16 sps:$4 sm:$0xff]  }
   0x4   :  { %288 = vmatpush1.bf16.msra.mxu0 %v821_v4  ;;  %389 = vmatpush1.bf16.msra.mxu1 %v822_v5  ;;  %v825_v7 = vld [vmem:[%s1186_s1 + $0x2c] ss:$16 sps:$4 sm:$0xff]   ;;  %v827_v8 = vld [vmem:[%s1186_s1 + $0x20] ss:$16 sps:$4 sm:$0xff]   ;;  %v828_v9 = vld [vmem:[%s1186_s1 + $0x28] ss:$16 sps:$4 sm:$0xff]  }
   0x5   :  { %289 = vmatprep.subr.bf16.mxu0 %v823_v6  ;;  %390 = vmatprep.subr.bf16.mxu1 %v825_v7  ;;  %v829_v10 = vld [vmem:[%s1186_s1 + $0x44] ss:$16 sps:$4 sm:$0xff]   ;;  %v831_v11 = vld [vmem:[%s1186_s1 + $0x4c] ss:$16 sps:$4 sm:$0xff]   ;;  %v833_v12 = vld [vmem:[%s1186_s1 + $0x40] ss:$16 sps:$4 sm:$0xff]  }
   0x6   :  { %v834_v13 = vld [vmem:[%s1186_s1 + $0x48] ss:$16 sps:$4 sm:$0xff]   ;;  %v835_v14 = vld [vmem:[%s1186_s1 + $0x64] ss:$16 sps:$4 sm:$0xff]   ;;  %v837_v15 = vld [vmem:[%s1186_s1 + $0x6c] ss:$16 sps:$4 sm:$0xff]  }
   0x7   :  { %v839_v16 = vld [vmem:[%s1186_s1 + $0x60] ss:$16 sps:$4 sm:$0xff]   ;;  %v840_v17 = vld [vmem:[%s1186_s1 + $0x68] ss:$16 sps:$4 sm:$0xff]   ;;  %v651_v26 = vshrl.u32 %v650_v25, 7 }
   0x8   :  { %290 = vmatpush1.bf16.msra.mxu0 %v827_v8  ;;  %391 = vmatpush1.bf16.msra.mxu1 %v828_v9  ;;  %v841_v18 = vld [vmem:[%s1187_s0] sm:$0xff]   ;;  %v842_v19 = vld [vmem:[%s1187_s0 + $0x8] sm:$0xff]   ;;  %v843_v20 = vld [vmem:[%s1187_s0 + $0x10] sm:$0xff]  }
   0x9   :  { %291 = vmatprep.subr.bf16.mxu0 %v829_v10  ;;  %392 = vmatprep.subr.bf16.mxu1 %v831_v11  ;;  %v844_v21 = vld [vmem:[%s1187_s0 + $0x18] sm:$0xff]   ;;  %v845_v22 = vld [vmem:[%s1187_s0 + $0x20] sm:$0xff]   ;;  %v846_v23 = vld [vmem:[%s1187_s0 + $0x28] sm:$0xff]   ;;  %v652_v27 = vsub.s32 0, %v651_v26  ;;  %v660_v28 = vsub.s32 2, %v651_v26  ;;  %v656_v30 = vsub.s32 1, %v651_v26 }
   0xa   :  { %v847_v24 = vld [vmem:[%s1187_s0 + $0x30] ss:$0 sps:$4 sm:$0x11]   ;;  %v648_v29 = vld [vmem:[%s1188_s2] sm:$0xf]  ;;  %v664_v31 = vsub.s32 3, %v651_v26 }
   0xb   :  { %v970_v32 = vrot.slane %v648_v29, %v652_v27  ;;  %v972_v33 = vrot.slane %v648_v29, %v660_v28  ;;  %v974_v36 = vrot.slane %v648_v29, %v656_v30 }
   0xc   :  { %292 = vmatpush1.bf16.msra.mxu0 %v833_v12  ;;  %393 = vmatpush1.bf16.msra.mxu1 %v834_v13  ;;  %v976_v37 = vrot.slane %v648_v29, %v664_v31 }
   0xd   :  { %293 = vmatprep.subr.bf16.mxu0 %v835_v14  ;;  %394 = vmatprep.subr.bf16.mxu1 %v837_v15 }
  0x10   :  { %294 = vmatpush1.bf16.msra.mxu0 %v839_v16  ;;  %395 = vmatpush1.bf16.msra.mxu1 %v840_v17 }
  0x13   :  { %801 = vmatmul.mubr.msk.bf16.vlgmr.msra.gmra.mrb[0].mxu0 %vm265_vm0, %v841_v18  ;;  %808 = vmatmul.mubr.msk.bf16.vlgmr.msra.gmra.mrb[0].mxu1 %vm265_vm0, %v841_v18 }
  0x14   :  { %329 = vmatprep.mubr.bf16.mxu0 %v848_v1  ;;  %430 = vmatprep.mubr.bf16.mxu1 %v848_v1 }
  0x1b   :  { %802 = vmatmul.mubr.msk.bf16.gmra.mrb[4].mxu0 %vm265_vm0, %v842_v19  ;;  %809 = vmatmul.mubr.msk.bf16.gmra.mrb[4].mxu1 %vm265_vm0, %v842_v19 }
  0x1c   :  { %339 = vmatprep.mubr.bf16.mxu0 %v848_v1  ;;  %440 = vmatprep.mubr.bf16.mxu1 %v848_v1 }
  0x23   :  { %803 = vmatmul.mubr.msk.bf16.gmra.mrb[8].mxu0 %vm265_vm0, %v843_v20  ;;  %810 = vmatmul.mubr.msk.bf16.gmra.mrb[8].mxu1 %vm265_vm0, %v843_v20 }
  0x24   :  { %349 = vmatprep.mubr.bf16.mxu0 %v848_v1  ;;  %450 = vmatprep.mubr.bf16.mxu1 %v848_v1 }
  0x2b   :  { %804 = vmatmul.mubr.msk.bf16.gmra.mrb[12].mxu0 %vm265_vm0, %v844_v21  ;;  %811 = vmatmul.mubr.msk.bf16.gmra.mrb[12].mxu1 %vm265_vm0, %v844_v21 }
  0x2c   :  { %359 = vmatprep.mubr.bf16.mxu0 %v848_v1  ;;  %460 = vmatprep.mubr.bf16.mxu1 %v848_v1 }
  0x33   :  { %805 = vmatmul.mubr.msk.bf16.gmra.mrb[16].mxu0 %vm265_vm0, %v845_v22  ;;  %812 = vmatmul.mubr.msk.bf16.gmra.mrb[16].mxu1 %vm265_vm0, %v845_v22 }
  0x34   :  { %369 = vmatprep.mubr.bf16.mxu0 %v848_v1  ;;  %470 = vmatprep.mubr.bf16.mxu1 %v848_v1 }
  0x3b   :  { %806 = vmatmul.mubr.msk.bf16.gmra.mrb[20].mxu0 %vm265_vm0, %v846_v23  ;;  %813 = vmatmul.mubr.msk.bf16.gmra.mrb[20].mxu1 %vm265_vm0, %v846_v23 }
  0x3c   :  { %379 = vmatprep.mubr.bf16.mxu0 %v848_v1  ;;  %480 = vmatprep.mubr.bf16.mxu1 %v848_v1 }
  0x43   :  { %807 = vmatmul.mubr.msk.bf16.gmra.mrb[24].mxu0 %vm265_vm0, %v847_v24  ;;  %814 = vmatmul.mubr.msk.bf16.gmra.mrb[24].mxu1 %vm265_vm0, %v847_v24 }
  0xe6   :  { %v321_v34 = vpop.f32.mrb[0].mxu0  ;;  %v422_v35 = vpop.f32.mrb[0].mxu1 }
  0xe7   :  { %v323_v38 = vpop.f32.mrb[1].mxu0  ;;  %v424_v39 = vpop.f32.mrb[1].mxu1  ;;  %v670_v42 = vadd.f32 %v970_v32, %v321_v34  ;;  %v672_v43 = vadd.f32 %v972_v33, %v422_v35 }
  0xe8   :  { %v325_v40 = vpop.f32.mrb[2].mxu0  ;;  %v426_v41 = vpop.f32.mrb[2].mxu1  ;;  %v671_v46 = vadd.f32 %v974_v36, %v323_v38  ;;  %v673_v47 = vadd.f32 %v976_v37, %v424_v39 }
  0xe9   :  { %v327_v44 = vpop.f32.mrb[3].mxu0  ;;  %v428_v45 = vpop.f32.mrb[3].mxu1  ;;  %722 = vst [vmem:[%s1189_s3] sm:$0xff] %v670_v42  ;;  %724 = vst [vmem:[%s1189_s3 + $0x10] sm:$0xff] %v672_v43  ;;  %v674_v48 = vadd.f32 %v970_v32, %v325_v40  ;;  %v676_v49 = vadd.f32 %v972_v33, %v426_v41 }
  0xea   :  { %723 = vst [vmem:[%s1189_s3 + $0x8] sm:$0xff] %v671_v46  ;;  %725 = vst [vmem:[%s1189_s3 + $0x18] sm:$0xff] %v673_v47  ;;  %v675_v50 = vadd.f32 %v974_v36, %v327_v44  ;;  %v677_v51 = vadd.f32 %v976_v37, %v428_v45 }
  0xeb   :  { %726 = vst [vmem:[%s1189_s3 + $0x20] sm:$0xff] %v674_v48  ;;  %728 = vst [vmem:[%s1189_s3 + $0x30] sm:$0xff] %v676_v49 }
  0xec   :  { %727 = vst [vmem:[%s1189_s3 + $0x28] sm:$0xff] %v675_v50  ;;  %729 = vst [vmem:[%s1189_s3 + $0x38] sm:$0xff] %v677_v51 }
  0xee   :  { %v331_v52 = vpop.f32.mrb[4].mxu0  ;;  %v432_v53 = vpop.f32.mrb[4].mxu1 }
  0xef   :  { %v333_v54 = vpop.f32.mrb[5].mxu0  ;;  %v434_v55 = vpop.f32.mrb[5].mxu1  ;;  %v678_v58 = vadd.f32 %v970_v32, %v331_v52  ;;  %v680_v59 = vadd.f32 %v972_v33, %v432_v53 }
  0xf0   :  { %v335_v56 = vpop.f32.mrb[6].mxu0  ;;  %v436_v57 = vpop.f32.mrb[6].mxu1  ;;  %v679_v62 = vadd.f32 %v974_v36, %v333_v54  ;;  %v681_v63 = vadd.f32 %v976_v37, %v434_v55 }
  0xf1   :  { %v337_v60 = vpop.f32.mrb[7].mxu0  ;;  %v438_v61 = vpop.f32.mrb[7].mxu1  ;;  %730 = vst [vmem:[%s1189_s3 + $0x40] sm:$0xff] %v678_v58  ;;  %732 = vst [vmem:[%s1189_s3 + $0x50] sm:$0xff] %v680_v59  ;;  %v682_v0 = vadd.f32 %v970_v32, %v335_v56  ;;  %v684_v1 = vadd.f32 %v972_v33, %v436_v57 }
  0xf2   :  { %731 = vst [vmem:[%s1189_s3 + $0x48] sm:$0xff] %v679_v62  ;;  %733 = vst [vmem:[%s1189_s3 + $0x58] sm:$0xff] %v681_v63  ;;  %v683_v2 = vadd.f32 %v974_v36, %v337_v60  ;;  %v685_v3 = vadd.f32 %v976_v37, %v438_v61 }
  0xf3   :  { %734 = vst [vmem:[%s1189_s3 + $0x60] sm:$0xff] %v682_v0  ;;  %736 = vst [vmem:[%s1189_s3 + $0x70] sm:$0xff] %v684_v1 }
  0xf4   :  { %735 = vst [vmem:[%s1189_s3 + $0x68] sm:$0xff] %v683_v2  ;;  %737 = vst [vmem:[%s1189_s3 + $0x78] sm:$0xff] %v685_v3 }
  0xf6   :  { %v341_v4 = vpop.f32.mrb[8].mxu0  ;;  %v442_v5 = vpop.f32.mrb[8].mxu1 }
  0xf7   :  { %v343_v6 = vpop.f32.mrb[9].mxu0  ;;  %v444_v7 = vpop.f32.mrb[9].mxu1  ;;  %v686_v10 = vadd.f32 %v970_v32, %v341_v4  ;;  %v688_v11 = vadd.f32 %v972_v33, %v442_v5 }
  0xf8   :  { %v345_v8 = vpop.f32.mrb[10].mxu0  ;;  %v446_v9 = vpop.f32.mrb[10].mxu1  ;;  %v687_v14 = vadd.f32 %v974_v36, %v343_v6  ;;  %v689_v15 = vadd.f32 %v976_v37, %v444_v7 }
  0xf9   :  { %v347_v12 = vpop.f32.mrb[11].mxu0  ;;  %v448_v13 = vpop.f32.mrb[11].mxu1  ;;  %738 = vst [vmem:[%s1189_s3 + $0x80] sm:$0xff] %v686_v10  ;;  %740 = vst [vmem:[%s1189_s3 + $0x90] sm:$0xff] %v688_v11  ;;  %v690_v16 = vadd.f32 %v970_v32, %v345_v8  ;;  %v692_v17 = vadd.f32 %v972_v33, %v446_v9  ;;  %v119_v8 = vld [vmem:[#allocation2 + $0x180] sm:$0x3] }
  0xfa   :  { %739 = vst [vmem:[%s1189_s3 + $0x88] sm:$0xff] %v687_v14  ;;  %741 = vst [vmem:[%s1189_s3 + $0x98] sm:$0xff] %v689_v15  ;;  %v691_v18 = vadd.f32 %v974_v36, %v347_v12  ;;  %v693_v19 = vadd.f32 %v976_v37, %v448_v13  ;;  %v121_v9 = vld [vmem:[#allocation2 + $0x190] sm:$0x3]  ;;  %v120_v10 = vld [vmem:[#allocation2 + $0x188] sm:$0x3] }
  0xfb   :  { %742 = vst [vmem:[%s1189_s3 + $0xa0] sm:$0xff] %v690_v16  ;;  %744 = vst [vmem:[%s1189_s3 + $0xb0] sm:$0xff] %v692_v17  ;;  %v122_v11 = vld [vmem:[#allocation2 + $0x198] sm:$0x3] }
  0xfc   :  { %743 = vst [vmem:[%s1189_s3 + $0xa8] sm:$0xff] %v691_v18  ;;  %745 = vst [vmem:[%s1189_s3 + $0xb8] sm:$0xff] %v693_v19 }
  0xfe   :  { %v351_v20 = vpop.f32.mrb[12].mxu0  ;;  %v452_v21 = vpop.f32.mrb[12].mxu1 }
  0xff   :  { %v353_v22 = vpop.f32.mrb[13].mxu0  ;;  %v454_v23 = vpop.f32.mrb[13].mxu1  ;;  %v694_v26 = vadd.f32 %v970_v32, %v351_v20  ;;  %v696_v27 = vadd.f32 %v972_v33, %v452_v21 }
 0x100   :  { %v355_v24 = vpop.f32.mrb[14].mxu0  ;;  %v456_v25 = vpop.f32.mrb[14].mxu1  ;;  %v695_v30 = vadd.f32 %v974_v36, %v353_v22  ;;  %v697_v31 = vadd.f32 %v976_v37, %v454_v23 }
 0x101   :  { %v357_v28 = vpop.f32.mrb[15].mxu0  ;;  %v458_v29 = vpop.f32.mrb[15].mxu1  ;;  %746 = vst [vmem:[%s1189_s3 + $0xc0] sm:$0xff] %v694_v26  ;;  %748 = vst [vmem:[%s1189_s3 + $0xd0] sm:$0xff] %v696_v27  ;;  %v698_v34 = vadd.f32 %v970_v32, %v355_v24  ;;  %v700_v35 = vadd.f32 %v972_v33, %v456_v25 }
 0x102   :  { %747 = vst [vmem:[%s1189_s3 + $0xc8] sm:$0xff] %v695_v30  ;;  %749 = vst [vmem:[%s1189_s3 + $0xd8] sm:$0xff] %v697_v31  ;;  %v699_v38 = vadd.f32 %v974_v36, %v357_v28  ;;  %v701_v39 = vadd.f32 %v976_v37, %v458_v29 }
 0x103   :  { %750 = vst [vmem:[%s1189_s3 + $0xe0] sm:$0xff] %v698_v34  ;;  %752 = vst [vmem:[%s1189_s3 + $0xf0] sm:$0xff] %v700_v35 }
 0x104   :  { %751 = vst [vmem:[%s1189_s3 + $0xe8] sm:$0xff] %v699_v38  ;;  %753 = vst [vmem:[%s1189_s3 + $0xf8] sm:$0xff] %v701_v39 }
 0x106   :  { %v361_v40 = vpop.f32.mrb[16].mxu0  ;;  %v462_v41 = vpop.f32.mrb[16].mxu1 }
 0x107   :  { %v363_v42 = vpop.f32.mrb[17].mxu0  ;;  %v464_v43 = vpop.f32.mrb[17].mxu1  ;;  %v702_v46 = vadd.f32 %v970_v32, %v361_v40  ;;  %v704_v47 = vadd.f32 %v972_v33, %v462_v41 }
 0x108   :  { %v365_v44 = vpop.f32.mrb[18].mxu0  ;;  %v466_v45 = vpop.f32.mrb[18].mxu1  ;;  %v703_v50 = vadd.f32 %v974_v36, %v363_v42  ;;  %v705_v51 = vadd.f32 %v976_v37, %v464_v43 }
 0x109   :  { %v367_v48 = vpop.f32.mrb[19].mxu0  ;;  %v468_v49 = vpop.f32.mrb[19].mxu1  ;;  %754 = vst [vmem:[%s1189_s3 + $0x100] sm:$0xff] %v702_v46  ;;  %756 = vst [vmem:[%s1189_s3 + $0x110] sm:$0xff] %v704_v47  ;;  %v706_v52 = vadd.f32 %v970_v32, %v365_v44  ;;  %v708_v53 = vadd.f32 %v972_v33, %v466_v45 }
 0x10a   :  { %755 = vst [vmem:[%s1189_s3 + $0x108] sm:$0xff] %v703_v50  ;;  %757 = vst [vmem:[%s1189_s3 + $0x118] sm:$0xff] %v705_v51  ;;  %v707_v54 = vadd.f32 %v974_v36, %v367_v48  ;;  %v709_v55 = vadd.f32 %v976_v37, %v468_v49 }
 0x10b   :  { %758 = vst [vmem:[%s1189_s3 + $0x120] sm:$0xff] %v706_v52  ;;  %760 = vst [vmem:[%s1189_s3 + $0x130] sm:$0xff] %v708_v53 }
 0x10c   :  { %759 = vst [vmem:[%s1189_s3 + $0x128] sm:$0xff] %v707_v54  ;;  %761 = vst [vmem:[%s1189_s3 + $0x138] sm:$0xff] %v709_v55 }
 0x10e   :  { %v371_v56 = vpop.f32.mrb[20].mxu0  ;;  %v472_v57 = vpop.f32.mrb[20].mxu1 }
 0x10f   :  { %v373_v58 = vpop.f32.mrb[21].mxu0  ;;  %v474_v59 = vpop.f32.mrb[21].mxu1  ;;  %v710_v62 = vadd.f32 %v970_v32, %v371_v56  ;;  %v712_v63 = vadd.f32 %v972_v33, %v472_v57 }
 0x110   :  { %v375_v60 = vpop.f32.mrb[22].mxu0  ;;  %v476_v61 = vpop.f32.mrb[22].mxu1  ;;  %v711_v2 = vadd.f32 %v974_v36, %v373_v58  ;;  %v713_v3 = vadd.f32 %v976_v37, %v474_v59 }
 0x111   :  { %v377_v0 = vpop.f32.mrb[23].mxu0  ;;  %v478_v1 = vpop.f32.mrb[23].mxu1  ;;  %762 = vst [vmem:[%s1189_s3 + $0x140] sm:$0xff] %v710_v62  ;;  %764 = vst [vmem:[%s1189_s3 + $0x150] sm:$0xff] %v712_v63  ;;  %v714_v4 = vadd.f32 %v970_v32, %v375_v60  ;;  %v716_v5 = vadd.f32 %v972_v33, %v476_v61 }
 0x112   :  { %763 = vst [vmem:[%s1189_s3 + $0x148] sm:$0xff] %v711_v2  ;;  %765 = vst [vmem:[%s1189_s3 + $0x158] sm:$0xff] %v713_v3  ;;  %v715_v6 = vadd.f32 %v974_v36, %v377_v0  ;;  %v717_v7 = vadd.f32 %v976_v37, %v478_v1 }
 0x113   :  { %766 = vst [vmem:[%s1189_s3 + $0x160] sm:$0xff] %v714_v4  ;;  %768 = vst [vmem:[%s1189_s3 + $0x170] sm:$0xff] %v716_v5 }
 0x114   :  { %767 = vst [vmem:[%s1189_s3 + $0x168] sm:$0xff] %v715_v6  ;;  %769 = vst [vmem:[%s1189_s3 + $0x178] sm:$0xff] %v717_v7 }
 0x116   :  { %v381_v12 = vpop.f32.mrb[24].mxu0  ;;  %v482_v13 = vpop.f32.mrb[24].mxu1 }
 0x117   :  { %v537_v14 = vadd.f32 %v381_v12, %v119_v8  ;;  %v539_v15 = vadd.f32 %v482_v13, %v121_v9  ;;  %v383_v16 = vpop.f32.mrb[25].mxu0  ;;  %v484_v17 = vpop.f32.mrb[25].mxu1 }
 0x118   :  { %v538_v18 = vadd.f32 %v383_v16, %v120_v10  ;;  %v540_v19 = vadd.f32 %v484_v17, %v122_v11  ;;  %v385_v20 = vpop.f32.mrb[26].mxu0  ;;  %v486_v21 = vpop.f32.mrb[26].mxu1 }
 0x119   :  { %589 = vst [vmem:[#allocation2 + $0x180] sm:$0x3] %v537_v14  ;;  %591 = vst [vmem:[#allocation2 + $0x190] sm:$0x3] %v539_v15  ;;  %v386_v22 = vpop.f32.mrb[27].mxu0  ;;  %v487_v23 = vpop.f32.mrb[27].mxu1 }
 0x11a   :  { %590 = vst [vmem:[#allocation2 + $0x188] sm:$0x3] %v538_v18  ;;  %592 = vst [vmem:[#allocation2 + $0x198] sm:$0x3] %v540_v19 }
 0x120   :  { %v644_v24 = vld [vmem:[#allocation2 + $0x180] sm:$0x3]  ;;  %v646_v25 = vld [vmem:[#allocation2 + $0x190] sm:$0x3] }
 0x121   :  { %v718_v26 = vadd.f32 %v970_v32, %v644_v24  ;;  %v720_v27 = vadd.f32 %v972_v33, %v646_v25  ;;  %v645_v28 = vld [vmem:[#allocation2 + $0x188] sm:$0x3]  ;;  %v647_v29 = vld [vmem:[#allocation2 + $0x198] sm:$0x3] }
 0x122   :  { %v719_v30 = vadd.f32 %v974_v36, %v645_v28  ;;  %v721_v31 = vadd.f32 %v976_v37, %v647_v29 }
 0x123   :  { %770 = vst [vmem:[%s1189_s3 + $0x180] sm:$0x3] %v718_v26  ;;  %772 = vst [vmem:[%s1189_s3 + $0x190] sm:$0x3] %v720_v27 }
 0x124   :  { %771 = vst [vmem:[%s1189_s3 + $0x188] sm:$0x3] %v719_v30  ;;  %773 = vst [vmem:[%s1189_s3 + $0x198] sm:$0x3] %v721_v31 }

// kernel: vae_forward.19
= control target key start
LH: loop header
LB: loop body
LE: loop exit
PB: predicated region body
PF: predicated region fallthrough
CT: control target
= control target key end

     0   :  { %vm165_vm0 = vcmask 261120   ;;  %s632_s0 = inlined_call_operand.vmem [shape: f32[392,32], index: 0, kind: input, shape index: {}]   ;;  %s633_s1 = inlined_call_operand.vmem [shape: f32[1,32], index: 1, kind: input, shape index: {}]   ;;  %s634_s2 = inlined_call_operand.vmem [shape: f32[392,32], index: 2, kind: output, shape index: {}]  }
   0x1   :  { %v11_v0 = vld [vmem:[%s632_s0] sm:$0xff]  ;;  %v12_v2 = vld [vmem:[%s632_s0 + $0x8] sm:$0xff]  ;;  %v13_v5 = vld [vmem:[%s632_s0 + $0x10] sm:$0xff] }
   0x2   :  { %v241_v1 = vld [vmem:[%s633_s1] ss:$0 sm:$0xff]  ;;  %v14_v6 = vld [vmem:[%s632_s0 + $0x18] sm:$0xff]  ;;  %v16_v11 = vld [vmem:[%s632_s0 + $0x28] sm:$0xff] }
   0x3   :  { %v67_v3 = vadd.f32 %v241_v1, %v11_v0  ;;  %v68_v4 = vadd.f32 %v241_v1, %v12_v2  ;;  %v15_v7 = vld [vmem:[%s632_s0 + $0x20] sm:$0xff]  ;;  %v69_v8 = vadd.f32 %v241_v1, %v13_v5  ;;  %v70_v9 = vadd.f32 %v241_v1, %v14_v6  ;;  %v17_v12 = vld [vmem:[%s632_s0 + $0x30] sm:$0xff]  ;;  %v18_v13 = vld [vmem:[%s632_s0 + $0x38] sm:$0xff] }
   0x4   :  { %v71_v10 = vadd.f32 %v241_v1, %v15_v7  ;;  %v72_v16 = vadd.f32 %v241_v1, %v16_v11  ;;  %v73_v17 = vadd.f32 %v241_v1, %v17_v12  ;;  %v19_v18 = vld [vmem:[%s632_s0 + $0x40] sm:$0xff]  ;;  %v20_v19 = vld [vmem:[%s632_s0 + $0x48] sm:$0xff]  ;;  %v21_v20 = vld [vmem:[%s632_s0 + $0x50] sm:$0xff]  ;;  %v74_v24 = vadd.f32 %v241_v1, %v18_v13 }
   0x5   :  { %v116_v14 = vmax.f32 %v67_v3, 0.0  ;;  %v117_v15 = vmax.f32 %v68_v4, 0.0  ;;  %v118_v21 = vmax.f32 %v69_v8, 0.0  ;;  %v119_v22 = vmax.f32 %v70_v9, 0.0  ;;  %v22_v25 = vld [vmem:[%s632_s0 + $0x58] sm:$0xff]  ;;  %v23_v26 = vld [vmem:[%s632_s0 + $0x60] sm:$0xff] }
   0x6   :  { %v120_v23 = vmax.f32 %v71_v10, 0.0  ;;  %v24_v27 = vld [vmem:[%s632_s0 + $0x68] sm:$0xff]  ;;  %v121_v28 = vmax.f32 %v72_v16, 0.0  ;;  %v122_v29 = vmax.f32 %v73_v17, 0.0  ;;  %v75_v30 = vadd.f32 %v241_v1, %v19_v18  ;;  %v25_v32 = vld [vmem:[%s632_s0 + $0x70] sm:$0xff]  ;;  %v26_v33 = vld [vmem:[%s632_s0 + $0x78] sm:$0xff] }
   0x7   :  { %166 = vst.msk [vmem:[%s634_s2] sm:$0xff] %vm165_vm0, %v116_v14  ;;  %167 = vst.msk [vmem:[%s634_s2 + $0x8] sm:$0xff] %vm165_vm0, %v117_v15  ;;  %v76_v31 = vadd.f32 %v241_v1, %v20_v19  ;;  %v123_v34 = vmax.f32 %v74_v24, 0.0  ;;  %v77_v35 = vadd.f32 %v241_v1, %v21_v20  ;;  %v78_v36 = vadd.f32 %v241_v1, %v22_v25  ;;  %v27_v38 = vld [vmem:[%s632_s0 + $0x80] sm:$0xff]  ;;  %v28_v39 = vld [vmem:[%s632_s0 + $0x88] sm:$0xff] }
   0x8   :  { %168 = vst.msk [vmem:[%s634_s2 + $0x10] sm:$0xff] %vm165_vm0, %v118_v21  ;;  %169 = vst.msk [vmem:[%s634_s2 + $0x18] sm:$0xff] %vm165_vm0, %v119_v22  ;;  %v79_v37 = vadd.f32 %v241_v1, %v23_v26  ;;  %v124_v40 = vmax.f32 %v75_v30, 0.0  ;;  %v80_v42 = vadd.f32 %v241_v1, %v24_v27  ;;  %v81_v43 = vadd.f32 %v241_v1, %v25_v32  ;;  %v29_v44 = vld [vmem:[%s632_s0 + $0x90] sm:$0xff]  ;;  %v30_v45 = vld [vmem:[%s632_s0 + $0x98] sm:$0xff] }
   0x9   :  { %170 = vst.msk [vmem:[%s634_s2 + $0x20] sm:$0xff] %vm165_vm0, %v120_v23  ;;  %171 = vst.msk [vmem:[%s634_s2 + $0x28] sm:$0xff] %vm165_vm0, %v121_v28  ;;  %v125_v41 = vmax.f32 %v76_v31, 0.0  ;;  %v31_v46 = vld [vmem:[%s632_s0 + $0xa0] sm:$0xff]  ;;  %v126_v47 = vmax.f32 %v77_v35, 0.0  ;;  %v127_v48 = vmax.f32 %v78_v36, 0.0  ;;  %v82_v50 = vadd.f32 %v241_v1, %v26_v33 }
   0xa   :  { %172 = vst.msk [vmem:[%s634_s2 + $0x30] sm:$0xff] %vm165_vm0, %v122_v29  ;;  %173 = vst.msk [vmem:[%s634_s2 + $0x38] sm:$0xff] %vm165_vm0, %v123_v34  ;;  %v128_v49 = vmax.f32 %v79_v37, 0.0  ;;  %v32_v51 = vld [vmem:[%s632_s0 + $0xa8] sm:$0xff]  ;;  %v33_v52 = vld [vmem:[%s632_s0 + $0xb0] sm:$0xff]  ;;  %v129_v53 = vmax.f32 %v80_v42, 0.0  ;;  %v83_v55 = vadd.f32 %v241_v1, %v27_v38  ;;  %v84_v56 = vadd.f32 %v241_v1, %v28_v39 }
   0xb   :  { %174 = vst.msk [vmem:[%s634_s2 + $0x40] sm:$0xff] %vm165_vm0, %v124_v40  ;;  %175 = vst.msk [vmem:[%s634_s2 + $0x48] sm:$0xff] %vm165_vm0, %v125_v41  ;;  %v130_v54 = vmax.f32 %v81_v43, 0.0  ;;  %v34_v57 = vld [vmem:[%s632_s0 + $0xb8] sm:$0xff]  ;;  %v131_v58 = vmax.f32 %v82_v50, 0.0  ;;  %v85_v59 = vadd.f32 %v241_v1, %v29_v44  ;;  %v86_v60 = vadd.f32 %v241_v1, %v30_v45  ;;  %v35_v62 = vld [vmem:[%s632_s0 + $0xc0] sm:$0xff] }
   0xc   :  { %176 = vst.msk [vmem:[%s634_s2 + $0x50] sm:$0xff] %vm165_vm0, %v126_v47  ;;  %177 = vst.msk [vmem:[%s634_s2 + $0x58] sm:$0xff] %vm165_vm0, %v127_v48  ;;  %v87_v61 = vadd.f32 %v241_v1, %v31_v46  ;;  %v36_v63 = vld [vmem:[%s632_s0 + $0xc8] sm:$0xff]  ;;  %v132_v0 = vmax.f32 %v83_v55, 0.0  ;;  %v133_v2 = vmax.f32 %v84_v56, 0.0  ;;  %v88_v3 = vadd.f32 %v241_v1, %v32_v51  ;;  %v37_v5 = vld [vmem:[%s632_s0 + $0xd0] sm:$0xff] }
   0xd   :  { %178 = vst.msk [vmem:[%s634_s2 + $0x60] sm:$0xff] %vm165_vm0, %v128_v49  ;;  %179 = vst.msk [vmem:[%s634_s2 + $0x68] sm:$0xff] %vm165_vm0, %v129_v53  ;;  %v89_v4 = vadd.f32 %v241_v1, %v33_v52  ;;  %v38_v6 = vld [vmem:[%s632_s0 + $0xd8] sm:$0xff]  ;;  %v39_v7 = vld [vmem:[%s632_s0 + $0xe0] sm:$0xff]  ;;  %v134_v8 = vmax.f32 %v85_v59, 0.0  ;;  %v135_v9 = vmax.f32 %v86_v60, 0.0  ;;  %v90_v11 = vadd.f32 %v241_v1, %v34_v57 }
   0xe   :  { %180 = vst.msk [vmem:[%s634_s2 + $0x70] sm:$0xff] %vm165_vm0, %v130_v54  ;;  %181 = vst.msk [vmem:[%s634_s2 + $0x78] sm:$0xff] %vm165_vm0, %v131_v58  ;;  %v136_v10 = vmax.f32 %v87_v61, 0.0  ;;  %v40_v12 = vld [vmem:[%s632_s0 + $0xe8] sm:$0xff]  ;;  %v41_v13 = vld [vmem:[%s632_s0 + $0xf0] sm:$0xff]  ;;  %v137_v14 = vmax.f32 %v88_v3, 0.0  ;;  %v91_v16 = vadd.f32 %v241_v1, %v35_v62  ;;  %v92_v17 = vadd.f32 %v241_v1, %v36_v63 }
   0xf   :  { %182 = vst.msk [vmem:[%s634_s2 + $0x80] sm:$0xff] %vm165_vm0, %v132_v0  ;;  %183 = vst.msk [vmem:[%s634_s2 + $0x88] sm:$0xff] %vm165_vm0, %v133_v2  ;;  %v138_v15 = vmax.f32 %v89_v4, 0.0  ;;  %v42_v18 = vld [vmem:[%s632_s0 + $0xf8] sm:$0xff]  ;;  %v139_v19 = vmax.f32 %v90_v11, 0.0  ;;  %v93_v20 = vadd.f32 %v241_v1, %v37_v5  ;;  %v94_v21 = vadd.f32 %v241_v1, %v38_v6  ;;  %v43_v23 = vld [vmem:[%s632_s0 + $0x100] sm:$0xff] }
  0x10   :  { %184 = vst.msk [vmem:[%s634_s2 + $0x90] sm:$0xff] %vm165_vm0, %v134_v8  ;;  %185 = vst.msk [vmem:[%s634_s2 + $0x98] sm:$0xff] %vm165_vm0, %v135_v9  ;;  %v95_v22 = vadd.f32 %v241_v1, %v39_v7  ;;  %v44_v24 = vld [vmem:[%s632_s0 + $0x108] sm:$0xff]  ;;  %v140_v25 = vmax.f32 %v91_v16, 0.0  ;;  %v141_v26 = vmax.f32 %v92_v17, 0.0  ;;  %v96_v27 = vadd.f32 %v241_v1, %v40_v12  ;;  %v45_v29 = vld [vmem:[%s632_s0 + $0x110] sm:$0xff] }
  0x11   :  { %186 = vst.msk [vmem:[%s634_s2 + $0xa0] sm:$0xff] %vm165_vm0, %v136_v10  ;;  %187 = vst.msk [vmem:[%s634_s2 + $0xa8] sm:$0xff] %vm165_vm0, %v137_v14  ;;  %v97_v28 = vadd.f32 %v241_v1, %v41_v13  ;;  %v46_v30 = vld [vmem:[%s632_s0 + $0x118] sm:$0xff]  ;;  %v47_v31 = vld [vmem:[%s632_s0 + $0x120] sm:$0xff]  ;;  %v142_v32 = vmax.f32 %v93_v20, 0.0  ;;  %v143_v33 = vmax.f32 %v94_v21, 0.0  ;;  %v98_v35 = vadd.f32 %v241_v1, %v42_v18 }
  0x12   :  { %188 = vst.msk [vmem:[%s634_s2 + $0xb0] sm:$0xff] %vm165_vm0, %v138_v15  ;;  %189 = vst.msk [vmem:[%s634_s2 + $0xb8] sm:$0xff] %vm165_vm0, %v139_v19  ;;  %v144_v34 = vmax.f32 %v95_v22, 0.0  ;;  %v48_v36 = vld [vmem:[%s632_s0 + $0x128] sm:$0xff]  ;;  %v49_v37 = vld [vmem:[%s632_s0 + $0x130] sm:$0xff]  ;;  %v145_v38 = vmax.f32 %v96_v27, 0.0  ;;  %v99_v40 = vadd.f32 %v241_v1, %v43_v23  ;;  %v100_v41 = vadd.f32 %v241_v1, %v44_v24 }
  0x13   :  { %190 = vst.msk [vmem:[%s634_s2 + $0xc0] sm:$0xff] %vm165_vm0, %v140_v25  ;;  %191 = vst.msk [vmem:[%s634_s2 + $0xc8] sm:$0xff] %vm165_vm0, %v141_v26  ;;  %v146_v39 = vmax.f32 %v97_v28, 0.0  ;;  %v50_v42 = vld [vmem:[%s632_s0 + $0x138] sm:$0xff]  ;;  %v147_v43 = vmax.f32 %v98_v35, 0.0  ;;  %v101_v44 = vadd.f32 %v241_v1, %v45_v29  ;;  %v102_v45 = vadd.f32 %v241_v1, %v46_v30  ;;  %v51_v47 = vld [vmem:[%s632_s0 + $0x140] sm:$0xff] }
  0x14   :  { %192 = vst.msk [vmem:[%s634_s2 + $0xd0] sm:$0xff] %vm165_vm0, %v142_v32  ;;  %193 = vst.msk [vmem:[%s634_s2 + $0xd8] sm:$0xff] %vm165_vm0, %v143_v33  ;;  %v103_v46 = vadd.f32 %v241_v1, %v47_v31  ;;  %v52_v48 = vld [vmem:[%s632_s0 + $0x148] sm:$0xff]  ;;  %v148_v49 = vmax.f32 %v99_v40, 0.0  ;;  %v149_v50 = vmax.f32 %v100_v41, 0.0  ;;  %v104_v51 = vadd.f32 %v241_v1, %v48_v36  ;;  %v53_v53 = vld [vmem:[%s632_s0 + $0x150] sm:$0xff] }
  0x15   :  { %194 = vst.msk [vmem:[%s634_s2 + $0xe0] sm:$0xff] %vm165_vm0, %v144_v34  ;;  %195 = vst.msk [vmem:[%s634_s2 + $0xe8] sm:$0xff] %vm165_vm0, %v145_v38  ;;  %v105_v52 = vadd.f32 %v241_v1, %v49_v37  ;;  %v54_v54 = vld [vmem:[%s632_s0 + $0x158] sm:$0xff]  ;;  %v55_v55 = vld [vmem:[%s632_s0 + $0x160] sm:$0xff]  ;;  %v150_v56 = vmax.f32 %v101_v44, 0.0  ;;  %v151_v57 = vmax.f32 %v102_v45, 0.0  ;;  %v106_v59 = vadd.f32 %v241_v1, %v50_v42 }
  0x16   :  { %196 = vst.msk [vmem:[%s634_s2 + $0xf0] sm:$0xff] %vm165_vm0, %v146_v39  ;;  %197 = vst.msk [vmem:[%s634_s2 + $0xf8] sm:$0xff] %vm165_vm0, %v147_v43  ;;  %v152_v58 = vmax.f32 %v103_v46, 0.0  ;;  %v56_v60 = vld [vmem:[%s632_s0 + $0x168] sm:$0xff]  ;;  %v57_v61 = vld [vmem:[%s632_s0 + $0x170] sm:$0xff]  ;;  %v153_v62 = vmax.f32 %v104_v51, 0.0  ;;  %v107_v0 = vadd.f32 %v241_v1, %v51_v47  ;;  %v108_v2 = vadd.f32 %v241_v1, %v52_v48 }
  0x17   :  { %198 = vst.msk [vmem:[%s634_s2 + $0x100] sm:$0xff] %vm165_vm0, %v148_v49  ;;  %199 = vst.msk [vmem:[%s634_s2 + $0x108] sm:$0xff] %vm165_vm0, %v149_v50  ;;  %v154_v63 = vmax.f32 %v105_v52, 0.0  ;;  %v58_v3 = vld [vmem:[%s632_s0 + $0x178] sm:$0xff]  ;;  %v155_v4 = vmax.f32 %v106_v59, 0.0  ;;  %v109_v5 = vadd.f32 %v241_v1, %v53_v53  ;;  %v110_v6 = vadd.f32 %v241_v1, %v54_v54  ;;  %v59_v8 = vld [vmem:[%s632_s0 + $0x180] sm:$0xff] }
  0x18   :  { %200 = vst.msk [vmem:[%s634_s2 + $0x110] sm:$0xff] %vm165_vm0, %v150_v56  ;;  %201 = vst.msk [vmem:[%s634_s2 + $0x118] sm:$0xff] %vm165_vm0, %v151_v57  ;;  %v111_v7 = vadd.f32 %v241_v1, %v55_v55  ;;  %v156_v9 = vmax.f32 %v107_v0, 0.0  ;;  %v157_v10 = vmax.f32 %v108_v2, 0.0  ;;  %v112_v11 = vadd.f32 %v241_v1, %v56_v60 }
  0x19   :  { %202 = vst.msk [vmem:[%s634_s2 + $0x120] sm:$0xff] %vm165_vm0, %v152_v58  ;;  %203 = vst.msk [vmem:[%s634_s2 + $0x128] sm:$0xff] %vm165_vm0, %v153_v62  ;;  %v113_v12 = vadd.f32 %v241_v1, %v57_v61  ;;  %v158_v13 = vmax.f32 %v109_v5, 0.0  ;;  %v159_v14 = vmax.f32 %v110_v6, 0.0  ;;  %v114_v16 = vadd.f32 %v241_v1, %v58_v3 }
  0x1a   :  { %204 = vst.msk [vmem:[%s634_s2 + $0x130] sm:$0xff] %vm165_vm0, %v154_v63  ;;  %205 = vst.msk [vmem:[%s634_s2 + $0x138] sm:$0xff] %vm165_vm0, %v155_v4  ;;  %v160_v15 = vmax.f32 %v111_v7, 0.0  ;;  %v161_v17 = vmax.f32 %v112_v11, 0.0  ;;  %v115_v19 = vadd.f32 %v241_v1, %v59_v8 }
  0x1b   :  { %206 = vst.msk [vmem:[%s634_s2 + $0x140] sm:$0xff] %vm165_vm0, %v156_v9  ;;  %207 = vst.msk [vmem:[%s634_s2 + $0x148] sm:$0xff] %vm165_vm0, %v157_v10  ;;  %v162_v18 = vmax.f32 %v113_v12, 0.0  ;;  %v163_v20 = vmax.f32 %v114_v16, 0.0 }
  0x1c   :  { %208 = vst.msk [vmem:[%s634_s2 + $0x150] sm:$0xff] %vm165_vm0, %v158_v13  ;;  %209 = vst.msk [vmem:[%s634_s2 + $0x158] sm:$0xff] %vm165_vm0, %v159_v14  ;;  %v164_v1 = vmax.f32 %v115_v19, 0.0 }
  0x1d   :  { %210 = vst.msk [vmem:[%s634_s2 + $0x160] sm:$0xff] %vm165_vm0, %v160_v15  ;;  %211 = vst.msk [vmem:[%s634_s2 + $0x168] sm:$0xff] %vm165_vm0, %v161_v17 }
  0x1e   :  { %212 = vst.msk [vmem:[%s634_s2 + $0x170] sm:$0xff] %vm165_vm0, %v162_v18  ;;  %213 = vst.msk [vmem:[%s634_s2 + $0x178] sm:$0xff] %vm165_vm0, %v163_v20 }
  0x1f   :  { %214 = vst.msk [vmem:[%s634_s2 + $0x180] sm:$0xff] %vm165_vm0, %v164_v1 }

// kernel: vae_forward.20
= control target key start
LH: loop header
LB: loop body
LE: loop exit
PB: predicated region body
PF: predicated region fallthrough
CT: control target
= control target key end

     0   :  { %v4466_v3 = vmov 0   ;;  %vm1072_vm0 = vcmask 261120   ;;  %v3454_v58 = vlaneseq  ;;  %vm26_vm1 = vcmask 523264   ;;  %s6663_s1 = inlined_call_operand.vmem [shape: bf16[32,960], index: 1, kind: input, shape index: {}]   ;;  %s6664_s0 = inlined_call_operand.vmem [shape: bf16[392,32], index: 0, kind: input, shape index: {}]   ;;  %s6665_s2 = inlined_call_operand.vmem [shape: f32[1,960], index: 2, kind: input, shape index: {}]   ;;  %s6666_s3 = inlined_call_operand.vmem [shape: f32[392,960], index: 3, kind: output, shape index: {}]  }
   0x1   :  { %v853_v0 = vld [vmem:[%s6663_s1] sm:$0xff]  ;;  %v854_v2 = vld [vmem:[%s6663_s1 + $0x8] sm:$0xff]  ;;  %1180 = vmatprep.mubr.bf16.mxu0 %v4466_v3  ;;  %1461 = vmatprep.mubr.bf16.mxu1 %v4466_v3  ;;  %v855_v15 = vld [vmem:[%s6663_s1 + $0x10] sm:$0xff] }
   0x2   :  { %v857_v1 = vld [vmem:[%s6663_s1 + $0x20] sm:$0xff]  ;;  %v858_v5 = vld [vmem:[%s6663_s1 + $0x28] sm:$0xff]  ;;  %v859_v17 = vld [vmem:[%s6663_s1 + $0x30] sm:$0xff]  ;;  %v4759_v59 = vshrl.u32 %v3454_v58, 7 }
   0x3   :  { %v4308_v4 = vcombine.high %v853_v0, %v857_v1  ;;  %v4307_v6 = vcombine.low %v853_v0, %v857_v1  ;;  %v861_v7 = vld [vmem:[%s6663_s1 + $0x40] sm:$0xff]  ;;  %v4310_v9 = vcombine.high %v854_v2, %v858_v5  ;;  %v4309_v10 = vcombine.low %v854_v2, %v858_v5  ;;  %v862_v12 = vld [vmem:[%s6663_s1 + $0x48] sm:$0xff]  ;;  %v856_v18 = vld [vmem:[%s6663_s1 + $0x18] sm:$0xff] }
   0x4   :  { %v865_v8 = vld [vmem:[%s6663_s1 + $0x60] sm:$0xff]  ;;  %v866_v13 = vld [vmem:[%s6663_s1 + $0x68] sm:$0xff]  ;;  %v860_v19 = vld [vmem:[%s6663_s1 + $0x38] sm:$0xff]  ;;  %v4312_v21 = vcombine.high %v855_v15, %v859_v17  ;;  %v4311_v24 = vcombine.low %v855_v15, %v859_v17  ;;  %v3456_v60 = vsub.s32 0, %v4759_v59  ;;  %v3464_v61 = vsub.s32 2, %v4759_v59 }
   0x5   :  { %v4316_v11 = vcombine.high %v861_v7, %v865_v8  ;;  %1148 = vmatprep.subr.bf16.mxu0 %v4308_v4  ;;  %v4318_v14 = vcombine.high %v862_v12, %v866_v13  ;;  %1429 = vmatprep.subr.bf16.mxu1 %v4310_v9  ;;  %v4315_v16 = vcombine.low %v861_v7, %v865_v8  ;;  %v4529_v23 = vld [vmem:[%s6664_s0] sm:$0xff]   ;;  %v4540_v26 = vld [vmem:[%s6664_s0 + $0x8] sm:$0xff]   ;;  %v863_v27 = vld [vmem:[%s6663_s1 + $0x50] sm:$0xff]  ;;  %v3460_v62 = vsub.s32 1, %v4759_v59 }
   0x6   :  { %1149 = vmatpush1.bf16.msra.mxu0 %v4307_v6  ;;  %1430 = vmatpush1.bf16.msra.mxu1 %v4309_v10  ;;  %v4317_v20 = vcombine.low %v862_v12, %v866_v13  ;;  %v4314_v22 = vcombine.high %v856_v18, %v860_v19  ;;  %v4313_v25 = vcombine.low %v856_v18, %v860_v19  ;;  %v867_v28 = vld [vmem:[%s6663_s1 + $0x70] sm:$0xff]  ;;  %v864_v29 = vld [vmem:[%s6663_s1 + $0x58] sm:$0xff]  ;;  %v4585_v37 = vld [vmem:[%s6664_s0 + $0x20] sm:$0xff]   ;;  %v3468_v0 = vsub.s32 3, %v4759_v59 }
   0x7   :  { %1150 = vmatprep.subr.bf16.mxu0 %v4316_v11  ;;  %1431 = vmatprep.subr.bf16.mxu1 %v4318_v14  ;;  %v4319_v30 = vcombine.low %v863_v27, %v867_v28  ;;  %v4320_v31 = vcombine.high %v863_v27, %v867_v28  ;;  %v868_v32 = vld [vmem:[%s6663_s1 + $0x78] sm:$0xff]  ;;  %v4563_v35 = vld [vmem:[%s6664_s0 + $0x10] sm:$0xff]   ;;  %v4596_v38 = vld [vmem:[%s6664_s0 + $0x28] sm:$0xff]  }
   0x8   :  { %v4321_v33 = vcombine.low %v864_v29, %v868_v32  ;;  %v4322_v34 = vcombine.high %v864_v29, %v868_v32  ;;  %v4574_v36 = vld [vmem:[%s6664_s0 + $0x18] sm:$0xff]   ;;  %v4607_v39 = vld [vmem:[%s6664_s0 + $0x30] sm:$0xff]   ;;  %v4629_v41 = vld [vmem:[%s6664_s0 + $0x40] sm:$0xff]  }
   0x9   :  { %v4618_v40 = vld [vmem:[%s6664_s0 + $0x38] sm:$0xff]   ;;  %v4640_v42 = vld [vmem:[%s6664_s0 + $0x48] sm:$0xff]   ;;  %v4435_v43 = vld [vmem:[%s6664_s0 + $0x50] sm:$0xff]  }
   0xa   :  { %1151 = vmatpush1.bf16.msra.mxu0 %v4315_v16  ;;  %1432 = vmatpush1.bf16.msra.mxu1 %v4317_v20  ;;  %v4436_v44 = vld [vmem:[%s6664_s0 + $0x58] sm:$0xff]   ;;  %v4437_v45 = vld [vmem:[%s6664_s0 + $0x60] sm:$0xff]   ;;  %v4438_v46 = vld [vmem:[%s6664_s0 + $0x68] sm:$0xff]  }
   0xb   :  { %1710 = vmatprep.subr.bf16.mxu0 %v4312_v21  ;;  %1991 = vmatprep.subr.bf16.mxu1 %v4314_v22  ;;  %v4439_v47 = vld [vmem:[%s6664_s0 + $0x70] sm:$0xff]   ;;  %v4440_v48 = vld [vmem:[%s6664_s0 + $0x78] sm:$0xff]   ;;  %v4441_v49 = vld [vmem:[%s6664_s0 + $0x80] sm:$0xff]  }
   0xc   :  { %v4442_v50 = vld [vmem:[%s6664_s0 + $0x88] sm:$0xff]   ;;  %v4443_v51 = vld [vmem:[%s6664_s0 + $0x90] sm:$0xff]   ;;  %v4444_v52 = vld [vmem:[%s6664_s0 + $0x98] sm:$0xff]  }
   0xd   :  { %4323 = vmatmul.mubr.msk.bf16.vlgmr.msra.gmra.mrb[0].mxu0 %vm1072_vm0, %v4529_v23  ;;  %4348 = vmatmul.mubr.msk.bf16.vlgmr.msra.gmra.mrb[0].mxu1 %vm1072_vm0, %v4529_v23  ;;  %v4445_v53 = vld [vmem:[%s6664_s0 + $0xa0] sm:$0xff]   ;;  %v4446_v54 = vld [vmem:[%s6664_s0 + $0xa8] sm:$0xff]   ;;  %v4447_v55 = vld [vmem:[%s6664_s0 + $0xb0] sm:$0xff]  }
   0xe   :  { %1711 = vmatpush1.bf16.msra.mxu0 %v4311_v24  ;;  %1992 = vmatpush1.bf16.msra.mxu1 %v4313_v25  ;;  %v4448_v56 = vld [vmem:[%s6664_s0 + $0xb8] sm:$0xff]   ;;  %v4449_v57 = vld [vmem:[%s6664_s0 + $0xc0] ss:$0 sps:$4 sm:$0xff]  }
   0xf   :  { %1190 = vmatprep.mubr.bf16.mxu0 %v4466_v3  ;;  %1471 = vmatprep.mubr.bf16.mxu1 %v4466_v3  ;;  %v3452_v63 = vld [vmem:[%s6665_s2] sm:$0xff] }
  0x10   :  { %1712 = vmatprep.subr.bf16.mxu0 %v4320_v31  ;;  %1993 = vmatprep.subr.bf16.mxu1 %v4322_v34  ;;  %v4773_v1 = vrot.slane %v3452_v63, %v3456_v60  ;;  %v4776_v4 = vrot.slane %v3452_v63, %v3464_v61  ;;  %v4778_v5 = vrot.slane %v3452_v63, %v3460_v62 }
  0x11   :  { %v4780_v8 = vrot.slane %v3452_v63, %v3468_v0 }
  0x12   :  { %1713 = vmatpush1.bf16.msra.mxu0 %v4319_v30  ;;  %1994 = vmatpush1.bf16.msra.mxu1 %v4321_v33 }
  0x15   :  { %4324 = vmatmul.mubr.msk.bf16.gmra.mrb[4].mxu0 %vm1072_vm0, %v4540_v26  ;;  %4349 = vmatmul.mubr.msk.bf16.gmra.mrb[4].mxu1 %vm1072_vm0, %v4540_v26 }
  0x16   :  { %1200 = vmatprep.mubr.bf16.mxu0 %v4466_v3  ;;  %1481 = vmatprep.mubr.bf16.mxu1 %v4466_v3 }
  0x1d   :  { %4325 = vmatmul.mubr.msk.bf16.gmra.mrb[8].mxu0 %vm1072_vm0, %v4563_v35  ;;  %4350 = vmatmul.mubr.msk.bf16.gmra.mrb[8].mxu1 %vm1072_vm0, %v4563_v35 }
  0x1e   :  { %1210 = vmatprep.mubr.bf16.mxu0 %v4466_v3  ;;  %1491 = vmatprep.mubr.bf16.mxu1 %v4466_v3 }
  0x25   :  { %4326 = vmatmul.mubr.msk.bf16.gmra.mrb[12].mxu0 %vm1072_vm0, %v4574_v36  ;;  %4351 = vmatmul.mubr.msk.bf16.gmra.mrb[12].mxu1 %vm1072_vm0, %v4574_v36 }
  0x26   :  { %1220 = vmatprep.mubr.bf16.mxu0 %v4466_v3  ;;  %1501 = vmatprep.mubr.bf16.mxu1 %v4466_v3 }
  0x2d   :  { %4327 = vmatmul.mubr.msk.bf16.gmra.mrb[16].mxu0 %vm1072_vm0, %v4585_v37  ;;  %4352 = vmatmul.mubr.msk.bf16.gmra.mrb[16].mxu1 %vm1072_vm0, %v4585_v37 }
  0x2e   :  { %1230 = vmatprep.mubr.bf16.mxu0 %v4466_v3  ;;  %1511 = vmatprep.mubr.bf16.mxu1 %v4466_v3 }
  0x35   :  { %4328 = vmatmul.mubr.msk.bf16.gmra.mrb[20].mxu0 %vm1072_vm0, %v4596_v38  ;;  %4353 = vmatmul.mubr.msk.bf16.gmra.mrb[20].mxu1 %vm1072_vm0, %v4596_v38 }
  0x36   :  { %1240 = vmatprep.mubr.bf16.mxu0 %v4466_v3  ;;  %1521 = vmatprep.mubr.bf16.mxu1 %v4466_v3 }
  0x3d   :  { %4329 = vmatmul.mubr.msk.bf16.gmra.mrb[24].mxu0 %vm1072_vm0, %v4607_v39  ;;  %4354 = vmatmul.mubr.msk.bf16.gmra.mrb[24].mxu1 %vm1072_vm0, %v4607_v39 }
  0x3e   :  { %1250 = vmatprep.mubr.bf16.mxu0 %v4466_v3  ;;  %1531 = vmatprep.mubr.bf16.mxu1 %v4466_v3 }
  0x45   :  { %4330 = vmatmul.mubr.msk.bf16.gmra.mrb[28].mxu0 %vm1072_vm0, %v4618_v40  ;;  %4355 = vmatmul.mubr.msk.bf16.gmra.mrb[28].mxu1 %vm1072_vm0, %v4618_v40 }
  0x46   :  { %1260 = vmatprep.mubr.bf16.mxu0 %v4466_v3  ;;  %1541 = vmatprep.mubr.bf16.mxu1 %v4466_v3 }
  0x4d   :  { %4331 = vmatmul.mubr.msk.bf16.gmra.mrb[32].mxu0 %vm1072_vm0, %v4629_v41  ;;  %4356 = vmatmul.mubr.msk.bf16.gmra.mrb[32].mxu1 %vm1072_vm0, %v4629_v41 }
  0x4e   :  { %1270 = vmatprep.mubr.bf16.mxu0 %v4466_v3  ;;  %1551 = vmatprep.mubr.bf16.mxu1 %v4466_v3 }
  0x55   :  { %4332 = vmatmul.mubr.msk.bf16.gmra.mrb[36].mxu0 %vm1072_vm0, %v4640_v42  ;;  %4357 = vmatmul.mubr.msk.bf16.gmra.mrb[36].mxu1 %vm1072_vm0, %v4640_v42 }
  0x56   :  { %1280 = vmatprep.mubr.bf16.mxu0 %v4466_v3  ;;  %1561 = vmatprep.mubr.bf16.mxu1 %v4466_v3 }
  0x5d   :  { %4333 = vmatmul.mubr.msk.bf16.gmra.mrb[40].mxu0 %vm1072_vm0, %v4435_v43  ;;  %4358 = vmatmul.mubr.msk.bf16.gmra.mrb[40].mxu1 %vm1072_vm0, %v4435_v43 }
  0x5e   :  { %1290 = vmatprep.mubr.bf16.mxu0 %v4466_v3  ;;  %1571 = vmatprep.mubr.bf16.mxu1 %v4466_v3 }
  0x65   :  { %4334 = vmatmul.mubr.msk.bf16.gmra.mrb[44].mxu0 %vm1072_vm0, %v4436_v44  ;;  %4359 = vmatmul.mubr.msk.bf16.gmra.mrb[44].mxu1 %vm1072_vm0, %v4436_v44 }
  0x66   :  { %1300 = vmatprep.mubr.bf16.mxu0 %v4466_v3  ;;  %1581 = vmatprep.mubr.bf16.mxu1 %v4466_v3 }
  0x6d   :  { %4335 = vmatmul.mubr.msk.bf16.gmra.mrb[48].mxu0 %vm1072_vm0, %v4437_v45  ;;  %4360 = vmatmul.mubr.msk.bf16.gmra.mrb[48].mxu1 %vm1072_vm0, %v4437_v45 }
  0x6e   :  { %1310 = vmatprep.mubr.bf16.mxu0 %v4466_v3  ;;  %1591 = vmatprep.mubr.bf16.mxu1 %v4466_v3 }
  0x75   :  { %4336 = vmatmul.mubr.msk.bf16.gmra.mrb[52].mxu0 %vm1072_vm0, %v4438_v46  ;;  %4361 = vmatmul.mubr.msk.bf16.gmra.mrb[52].mxu1 %vm1072_vm0, %v4438_v46 }
  0x76   :  { %1320 = vmatprep.mubr.bf16.mxu0 %v4466_v3  ;;  %1601 = vmatprep.mubr.bf16.mxu1 %v4466_v3 }
  0x7d   :  { %4337 = vmatmul.mubr.msk.bf16.gmra.mrb[56].mxu0 %vm1072_vm0, %v4439_v47  ;;  %4362 = vmatmul.mubr.msk.bf16.gmra.mrb[56].mxu1 %vm1072_vm0, %v4439_v47 }
  0x7e   :  { %1330 = vmatprep.mubr.bf16.mxu0 %v4466_v3  ;;  %1611 = vmatprep.mubr.bf16.mxu1 %v4466_v3 }
  0x85   :  { %4338 = vmatmul.mubr.msk.bf16.gmra.mrb[60].mxu0 %vm1072_vm0, %v4440_v48  ;;  %4363 = vmatmul.mubr.msk.bf16.gmra.mrb[60].mxu1 %vm1072_vm0, %v4440_v48 }
  0x86   :  { %1340 = vmatprep.mubr.bf16.mxu0 %v4466_v3  ;;  %1621 = vmatprep.mubr.bf16.mxu1 %v4466_v3 }
  0x8d   :  { %4339 = vmatmul.mubr.msk.bf16.gmra.mrb[64].mxu0 %vm1072_vm0, %v4441_v49  ;;  %4364 = vmatmul.mubr.msk.bf16.gmra.mrb[64].mxu1 %vm1072_vm0, %v4441_v49 }
  0x8e   :  { %1350 = vmatprep.mubr.bf16.mxu0 %v4466_v3  ;;  %1631 = vmatprep.mubr.bf16.mxu1 %v4466_v3 }
  0x95   :  { %4340 = vmatmul.mubr.msk.bf16.gmra.mrb[68].mxu0 %vm1072_vm0, %v4442_v50  ;;  %4365 = vmatmul.mubr.msk.bf16.gmra.mrb[68].mxu1 %vm1072_vm0, %v4442_v50 }
  0x96   :  { %1360 = vmatprep.mubr.bf16.mxu0 %v4466_v3  ;;  %1641 = vmatprep.mubr.bf16.mxu1 %v4466_v3 }
  0x9d   :  { %4341 = vmatmul.mubr.msk.bf16.gmra.mrb[72].mxu0 %vm1072_vm0, %v4443_v51  ;;  %4366 = vmatmul.mubr.msk.bf16.gmra.mrb[72].mxu1 %vm1072_vm0, %v4443_v51 }
  0x9e   :  { %1370 = vmatprep.mubr.bf16.mxu0 %v4466_v3  ;;  %1651 = vmatprep.mubr.bf16.mxu1 %v4466_v3 }
  0xa5   :  { %4342 = vmatmul.mubr.msk.bf16.gmra.mrb[76].mxu0 %vm1072_vm0, %v4444_v52  ;;  %4367 = vmatmul.mubr.msk.bf16.gmra.mrb[76].mxu1 %vm1072_vm0, %v4444_v52 }
  0xa6   :  { %1380 = vmatprep.mubr.bf16.mxu0 %v4466_v3  ;;  %1661 = vmatprep.mubr.bf16.mxu1 %v4466_v3 }
  0xad   :  { %4343 = vmatmul.mubr.msk.bf16.gmra.mrb[80].mxu0 %vm1072_vm0, %v4445_v53  ;;  %4368 = vmatmul.mubr.msk.bf16.gmra.mrb[80].mxu1 %vm1072_vm0, %v4445_v53 }
  0xae   :  { %1390 = vmatprep.mubr.bf16.mxu0 %v4466_v3  ;;  %1671 = vmatprep.mubr.bf16.mxu1 %v4466_v3 }
  0xb5   :  { %4344 = vmatmul.mubr.msk.bf16.gmra.mrb[84].mxu0 %vm1072_vm0, %v4446_v54  ;;  %4369 = vmatmul.mubr.msk.bf16.gmra.mrb[84].mxu1 %vm1072_vm0, %v4446_v54 }
  0xb6   :  { %1400 = vmatprep.mubr.bf16.mxu0 %v4466_v3  ;;  %1681 = vmatprep.mubr.bf16.mxu1 %v4466_v3 }
  0xbd   :  { %4345 = vmatmul.mubr.msk.bf16.gmra.mrb[88].mxu0 %vm1072_vm0, %v4447_v55  ;;  %4370 = vmatmul.mubr.msk.bf16.gmra.mrb[88].mxu1 %vm1072_vm0, %v4447_v55 }
  0xbe   :  { %1410 = vmatprep.mubr.bf16.mxu0 %v4466_v3  ;;  %1691 = vmatprep.mubr.bf16.mxu1 %v4466_v3 }
  0xc5   :  { %4346 = vmatmul.mubr.msk.bf16.gmra.mrb[92].mxu0 %vm1072_vm0, %v4448_v56  ;;  %4371 = vmatmul.mubr.msk.bf16.gmra.mrb[92].mxu1 %vm1072_vm0, %v4448_v56 }
  0xc6   :  { %1420 = vmatprep.mubr.bf16.mxu0 %v4466_v3  ;;  %1701 = vmatprep.mubr.bf16.mxu1 %v4466_v3 }
  0xcd   :  { %4347 = vmatmul.mubr.msk.bf16.gmra.mrb[96].mxu0 %vm1072_vm0, %v4449_v57  ;;  %4372 = vmatmul.mubr.msk.bf16.gmra.mrb[96].mxu1 %vm1072_vm0, %v4449_v57 }
  0xce   :  { %1742 = vmatprep.mubr.bf16.mxu0 %v4466_v3  ;;  %2023 = vmatprep.mubr.bf16.mxu1 %v4466_v3 }
  0xd5   :  { %4373 = vmatmul.mubr.msk.bf16.vlgmr.msra.gmra.mrb[100].mxu0 %vm1072_vm0, %v4529_v23  ;;  %4398 = vmatmul.mubr.msk.bf16.vlgmr.msra.gmra.mrb[100].mxu1 %vm1072_vm0, %v4529_v23 }
  0xd6   :  { %1752 = vmatprep.mubr.bf16.mxu0 %v4466_v3  ;;  %2033 = vmatprep.mubr.bf16.mxu1 %v4466_v3 }
  0xdd   :  { %4374 = vmatmul.mubr.msk.bf16.gmra.mrb[104].mxu0 %vm1072_vm0, %v4540_v26  ;;  %4399 = vmatmul.mubr.msk.bf16.gmra.mrb[104].mxu1 %vm1072_vm0, %v4540_v26 }
  0xde   :  { %1762 = vmatprep.mubr.bf16.mxu0 %v4466_v3  ;;  %2043 = vmatprep.mubr.bf16.mxu1 %v4466_v3 }
  0xe0   :  { %v1182_v2 = vpop.f32.mrb[0].mxu0  ;;  %v1463_v6 = vpop.f32.mrb[0].mxu1 }
  0xe1   :  { %v1184_v7 = vpop.f32.mrb[1].mxu0  ;;  %v1465_v9 = vpop.f32.mrb[1].mxu1  ;;  %v3494_v11 = vadd.f32 %v4773_v1, %v1182_v2  ;;  %v3496_v14 = vadd.f32 %v4776_v4, %v1463_v6 }
  0xe2   :  { %v1186_v10 = vpop.f32.mrb[2].mxu0  ;;  %v1467_v12 = vpop.f32.mrb[2].mxu1  ;;  %v3495_v15 = vadd.f32 %v4778_v5, %v1184_v7  ;;  %v3497_v17 = vadd.f32 %v4780_v8, %v1465_v9 }
  0xe3   :  { %v1188_v13 = vpop.f32.mrb[3].mxu0  ;;  %v1469_v16 = vpop.f32.mrb[3].mxu1  ;;  %3886 = vst [vmem:[%s6666_s3] sm:$0xff] %v3494_v11  ;;  %v3502_v18 = vadd.f32 %v4773_v1, %v1186_v10  ;;  %3888 = vst [vmem:[%s6666_s3 + $0x10] sm:$0xff] %v3496_v14  ;;  %v3504_v19 = vadd.f32 %v4776_v4, %v1467_v12 }
  0xe4   :  { %3887 = vst [vmem:[%s6666_s3 + $0x8] sm:$0xff] %v3495_v15  ;;  %v3503_v20 = vadd.f32 %v4778_v5, %v1188_v13  ;;  %3889 = vst [vmem:[%s6666_s3 + $0x18] sm:$0xff] %v3497_v17  ;;  %v3505_v21 = vadd.f32 %v4780_v8, %v1469_v16 }
  0xe5   :  { %4375 = vmatmul.mubr.msk.bf16.gmra.mrb[108].mxu0 %vm1072_vm0, %v4563_v35  ;;  %4400 = vmatmul.mubr.msk.bf16.gmra.mrb[108].mxu1 %vm1072_vm0, %v4563_v35  ;;  %3894 = vst [vmem:[%s6666_s3 + $0x40] sm:$0xff] %v3502_v18  ;;  %3896 = vst [vmem:[%s6666_s3 + $0x50] sm:$0xff] %v3504_v19 }
  0xe6   :  { %1772 = vmatprep.mubr.bf16.mxu0 %v4466_v3  ;;  %2053 = vmatprep.mubr.bf16.mxu1 %v4466_v3  ;;  %3895 = vst [vmem:[%s6666_s3 + $0x48] sm:$0xff] %v3503_v20  ;;  %3897 = vst [vmem:[%s6666_s3 + $0x58] sm:$0xff] %v3505_v21 }
  0xe8   :  { %v1192_v22 = vpop.f32.mrb[4].mxu0  ;;  %v1473_v23 = vpop.f32.mrb[4].mxu1 }
  0xe9   :  { %v1194_v24 = vpop.f32.mrb[5].mxu0  ;;  %v1475_v25 = vpop.f32.mrb[5].mxu1  ;;  %v3510_v27 = vadd.f32 %v4773_v1, %v1192_v22  ;;  %v3512_v30 = vadd.f32 %v4776_v4, %v1473_v23 }
  0xea   :  { %v1196_v26 = vpop.f32.mrb[6].mxu0  ;;  %v1477_v28 = vpop.f32.mrb[6].mxu1  ;;  %v3511_v31 = vadd.f32 %v4778_v5, %v1194_v24  ;;  %v3513_v33 = vadd.f32 %v4780_v8, %v1475_v25 }
  0xeb   :  { %v1198_v29 = vpop.f32.mrb[7].mxu0  ;;  %v1479_v32 = vpop.f32.mrb[7].mxu1  ;;  %3902 = vst [vmem:[%s6666_s3 + $0x80] sm:$0xff] %v3510_v27  ;;  %v3518_v34 = vadd.f32 %v4773_v1, %v1196_v26  ;;  %3904 = vst [vmem:[%s6666_s3 + $0x90] sm:$0xff] %v3512_v30  ;;  %v3520_v35 = vadd.f32 %v4776_v4, %v1477_v28 }
  0xec   :  { %3903 = vst [vmem:[%s6666_s3 + $0x88] sm:$0xff] %v3511_v31  ;;  %v3519_v43 = vadd.f32 %v4778_v5, %v1198_v29  ;;  %3905 = vst [vmem:[%s6666_s3 + $0x98] sm:$0xff] %v3513_v33  ;;  %v3521_v44 = vadd.f32 %v4780_v8, %v1479_v32 }
  0xed   :  { %4376 = vmatmul.mubr.msk.bf16.gmra.mrb[112].mxu0 %vm1072_vm0, %v4574_v36  ;;  %4401 = vmatmul.mubr.msk.bf16.gmra.mrb[112].mxu1 %vm1072_vm0, %v4574_v36  ;;  %3910 = vst [vmem:[%s6666_s3 + $0xc0] sm:$0xff] %v3518_v34  ;;  %3912 = vst [vmem:[%s6666_s3 + $0xd0] sm:$0xff] %v3520_v35 }
  0xee   :  { %1782 = vmatprep.mubr.bf16.mxu0 %v4466_v3  ;;  %2063 = vmatprep.mubr.bf16.mxu1 %v4466_v3  ;;  %3911 = vst [vmem:[%s6666_s3 + $0xc8] sm:$0xff] %v3519_v43  ;;  %3913 = vst [vmem:[%s6666_s3 + $0xd8] sm:$0xff] %v3521_v44 }
  0xf0   :  { %v1202_v36 = vpop.f32.mrb[8].mxu0  ;;  %v1483_v45 = vpop.f32.mrb[8].mxu1 }
  0xf1   :  { %v1204_v46 = vpop.f32.mrb[9].mxu0  ;;  %v1485_v47 = vpop.f32.mrb[9].mxu1  ;;  %v3526_v49 = vadd.f32 %v4773_v1, %v1202_v36  ;;  %v3528_v52 = vadd.f32 %v4776_v4, %v1483_v45 }
  0xf2   :  { %v1206_v48 = vpop.f32.mrb[10].mxu0  ;;  %v1487_v50 = vpop.f32.mrb[10].mxu1  ;;  %v3527_v53 = vadd.f32 %v4778_v5, %v1204_v46  ;;  %v3529_v55 = vadd.f32 %v4780_v8, %v1485_v47 }
  0xf3   :  { %v1208_v51 = vpop.f32.mrb[11].mxu0  ;;  %v1489_v54 = vpop.f32.mrb[11].mxu1  ;;  %3918 = vst [vmem:[%s6666_s3 + $0x100] sm:$0xff] %v3526_v49  ;;  %v3534_v56 = vadd.f32 %v4773_v1, %v1206_v48  ;;  %3920 = vst [vmem:[%s6666_s3 + $0x110] sm:$0xff] %v3528_v52  ;;  %v3536_v57 = vadd.f32 %v4776_v4, %v1487_v50 }
  0xf4   :  { %3919 = vst [vmem:[%s6666_s3 + $0x108] sm:$0xff] %v3527_v53  ;;  %v3535_v58 = vadd.f32 %v4778_v5, %v1208_v51  ;;  %3921 = vst [vmem:[%s6666_s3 + $0x118] sm:$0xff] %v3529_v55  ;;  %v3537_v60 = vadd.f32 %v4780_v8, %v1489_v54 }
  0xf5   :  { %4377 = vmatmul.mubr.msk.bf16.gmra.mrb[116].mxu0 %vm1072_vm0, %v4585_v37  ;;  %4402 = vmatmul.mubr.msk.bf16.gmra.mrb[116].mxu1 %vm1072_vm0, %v4585_v37  ;;  %3926 = vst [vmem:[%s6666_s3 + $0x140] sm:$0xff] %v3534_v56  ;;  %3928 = vst [vmem:[%s6666_s3 + $0x150] sm:$0xff] %v3536_v57 }
  0xf6   :  { %1792 = vmatprep.mubr.bf16.mxu0 %v4466_v3  ;;  %2073 = vmatprep.mubr.bf16.mxu1 %v4466_v3  ;;  %3927 = vst [vmem:[%s6666_s3 + $0x148] sm:$0xff] %v3535_v58  ;;  %3929 = vst [vmem:[%s6666_s3 + $0x158] sm:$0xff] %v3537_v60 }
  0xf8   :  { %v1212_v37 = vpop.f32.mrb[12].mxu0  ;;  %v1493_v61 = vpop.f32.mrb[12].mxu1 }
  0xf9   :  { %v1214_v62 = vpop.f32.mrb[13].mxu0  ;;  %v1495_v63 = vpop.f32.mrb[13].mxu1  ;;  %v3542_v2 = vadd.f32 %v4773_v1, %v1212_v37  ;;  %v3544_v9 = vadd.f32 %v4776_v4, %v1493_v61 }
  0xfa   :  { %v1216_v0 = vpop.f32.mrb[14].mxu0  ;;  %v1497_v6 = vpop.f32.mrb[14].mxu1  ;;  %v3543_v10 = vadd.f32 %v4778_v5, %v1214_v62  ;;  %v3545_v12 = vadd.f32 %v4780_v8, %v1495_v63 }
  0xfb   :  { %v1218_v7 = vpop.f32.mrb[15].mxu0  ;;  %v1499_v11 = vpop.f32.mrb[15].mxu1  ;;  %3934 = vst [vmem:[%s6666_s3 + $0x180] sm:$0xff] %v3542_v2  ;;  %v3550_v13 = vadd.f32 %v4773_v1, %v1216_v0  ;;  %3936 = vst [vmem:[%s6666_s3 + $0x190] sm:$0xff] %v3544_v9  ;;  %v3552_v14 = vadd.f32 %v4776_v4, %v1497_v6 }
  0xfc   :  { %3935 = vst [vmem:[%s6666_s3 + $0x188] sm:$0xff] %v3543_v10  ;;  %v3551_v15 = vadd.f32 %v4778_v5, %v1218_v7  ;;  %3937 = vst [vmem:[%s6666_s3 + $0x198] sm:$0xff] %v3545_v12  ;;  %v3553_v16 = vadd.f32 %v4780_v8, %v1499_v11 }
  0xfd   :  { %4378 = vmatmul.mubr.msk.bf16.gmra.mrb[120].mxu0 %vm1072_vm0, %v4596_v38  ;;  %4403 = vmatmul.mubr.msk.bf16.gmra.mrb[120].mxu1 %vm1072_vm0, %v4596_v38  ;;  %3942 = vst [vmem:[%s6666_s3 + $0x1c0] sm:$0xff] %v3550_v13  ;;  %3944 = vst [vmem:[%s6666_s3 + $0x1d0] sm:$0xff] %v3552_v14 }
  0xfe   :  { %1802 = vmatprep.mubr.bf16.mxu0 %v4466_v3  ;;  %2083 = vmatprep.mubr.bf16.mxu1 %v4466_v3  ;;  %3943 = vst [vmem:[%s6666_s3 + $0x1c8] sm:$0xff] %v3551_v15  ;;  %3945 = vst [vmem:[%s6666_s3 + $0x1d8] sm:$0xff] %v3553_v16 }
 0x100   :  { %v1222_v38 = vpop.f32.mrb[16].mxu0  ;;  %v1503_v17 = vpop.f32.mrb[16].mxu1 }
 0x101   :  { %v1224_v18 = vpop.f32.mrb[17].mxu0  ;;  %v1505_v19 = vpop.f32.mrb[17].mxu1  ;;  %v3558_v21 = vadd.f32 %v4773_v1, %v1222_v38  ;;  %v3560_v24 = vadd.f32 %v4776_v4, %v1503_v17 }
 0x102   :  { %v1226_v20 = vpop.f32.mrb[18].mxu0  ;;  %v1507_v22 = vpop.f32.mrb[18].mxu1  ;;  %v3559_v25 = vadd.f32 %v4778_v5, %v1224_v18  ;;  %v3561_v27 = vadd.f32 %v4780_v8, %v1505_v19 }
 0x103   :  { %v1228_v23 = vpop.f32.mrb[19].mxu0  ;;  %v1509_v26 = vpop.f32.mrb[19].mxu1  ;;  %3950 = vst [vmem:[%s6666_s3 + $0x200] sm:$0xff] %v3558_v21  ;;  %v3566_v28 = vadd.f32 %v4773_v1, %v1226_v20  ;;  %3952 = vst [vmem:[%s6666_s3 + $0x210] sm:$0xff] %v3560_v24  ;;  %v3568_v29 = vadd.f32 %v4776_v4, %v1507_v22 }
 0x104   :  { %3951 = vst [vmem:[%s6666_s3 + $0x208] sm:$0xff] %v3559_v25  ;;  %v3567_v30 = vadd.f32 %v4778_v5, %v1228_v23  ;;  %3953 = vst [vmem:[%s6666_s3 + $0x218] sm:$0xff] %v3561_v27  ;;  %v3569_v31 = vadd.f32 %v4780_v8, %v1509_v26 }
 0x105   :  { %4379 = vmatmul.mubr.msk.bf16.gmra.mrb[124].mxu0 %vm1072_vm0, %v4607_v39  ;;  %4404 = vmatmul.mubr.msk.bf16.gmra.mrb[124].mxu1 %vm1072_vm0, %v4607_v39  ;;  %3958 = vst [vmem:[%s6666_s3 + $0x240] sm:$0xff] %v3566_v28  ;;  %3960 = vst [vmem:[%s6666_s3 + $0x250] sm:$0xff] %v3568_v29 }
 0x106   :  { %1812 = vmatprep.mubr.bf16.mxu0 %v4466_v3  ;;  %2093 = vmatprep.mubr.bf16.mxu1 %v4466_v3  ;;  %3959 = vst [vmem:[%s6666_s3 + $0x248] sm:$0xff] %v3567_v30  ;;  %3961 = vst [vmem:[%s6666_s3 + $0x258] sm:$0xff] %v3569_v31  ;;  %v4467_v30 = vmov 0.0  }
 0x107   :  { %27 = vst.msk [vmem:[#allocation2 + $0x38] sm:$0xff] %vm26_vm1, %v4467_v30  ;;  %35 = vst.msk [vmem:[#allocation2 + $0x78] sm:$0xff] %vm26_vm1, %v4467_v30 }
 0x108   :  { %v1232_v39 = vpop.f32.mrb[20].mxu0  ;;  %v1513_v32 = vpop.f32.mrb[20].mxu1  ;;  %43 = vst.msk [vmem:[#allocation2 + $0xb8] sm:$0xff] %vm26_vm1, %v4467_v30  ;;  %51 = vst.msk [vmem:[#allocation2 + $0xf8] sm:$0xff] %vm26_vm1, %v4467_v30 }
 0x109   :  { %v1234_v33 = vpop.f32.mrb[21].mxu0  ;;  %v1515_v34 = vpop.f32.mrb[21].mxu1  ;;  %v3574_v43 = vadd.f32 %v4773_v1, %v1232_v39  ;;  %v3576_v45 = vadd.f32 %v4776_v4, %v1513_v32  ;;  %59 = vst.msk [vmem:[#allocation2 + $0x138] sm:$0xff] %vm26_vm1, %v4467_v30  ;;  %67 = vst.msk [vmem:[#allocation2 + $0x178] sm:$0xff] %vm26_vm1, %v4467_v30 }
 0x10a   :  { %v1236_v35 = vpop.f32.mrb[22].mxu0  ;;  %v1517_v44 = vpop.f32.mrb[22].mxu1  ;;  %v3575_v46 = vadd.f32 %v4778_v5, %v1234_v33  ;;  %v3577_v48 = vadd.f32 %v4780_v8, %v1515_v34  ;;  %75 = vst.msk [vmem:[#allocation2 + $0x1b8] sm:$0xff] %vm26_vm1, %v4467_v30  ;;  %83 = vst.msk [vmem:[#allocation2 + $0x1f8] sm:$0xff] %vm26_vm1, %v4467_v30 }
 0x10b   :  { %v1238_v36 = vpop.f32.mrb[23].mxu0  ;;  %v1519_v47 = vpop.f32.mrb[23].mxu1  ;;  %3966 = vst [vmem:[%s6666_s3 + $0x280] sm:$0xff] %v3574_v43  ;;  %v3582_v49 = vadd.f32 %v4773_v1, %v1236_v35  ;;  %3968 = vst [vmem:[%s6666_s3 + $0x290] sm:$0xff] %v3576_v45  ;;  %v3584_v50 = vadd.f32 %v4776_v4, %v1517_v44  ;;  %v4450_v35 = vld [vmem:[%s6664_s0 + $0x50] sm:$0xff]  }
 0x10c   :  { %3967 = vst [vmem:[%s6666_s3 + $0x288] sm:$0xff] %v3575_v46  ;;  %v3583_v51 = vadd.f32 %v4778_v5, %v1238_v36  ;;  %3969 = vst [vmem:[%s6666_s3 + $0x298] sm:$0xff] %v3577_v48  ;;  %v3585_v52 = vadd.f32 %v4780_v8, %v1519_v47 }
 0x10d   :  { %4380 = vmatmul.mubr.msk.bf16.gmra.mrb[128].mxu0 %vm1072_vm0, %v4618_v40  ;;  %4405 = vmatmul.mubr.msk.bf16.gmra.mrb[128].mxu1 %vm1072_vm0, %v4618_v40  ;;  %3974 = vst [vmem:[%s6666_s3 + $0x2c0] sm:$0xff] %v3582_v49  ;;  %3976 = vst [vmem:[%s6666_s3 + $0x2d0] sm:$0xff] %v3584_v50 }
 0x10e   :  { %1822 = vmatprep.mubr.bf16.mxu0 %v4466_v3  ;;  %2103 = vmatprep.mubr.bf16.mxu1 %v4466_v3  ;;  %3975 = vst [vmem:[%s6666_s3 + $0x2c8] sm:$0xff] %v3583_v51  ;;  %3977 = vst [vmem:[%s6666_s3 + $0x2d8] sm:$0xff] %v3585_v52 }
 0x10f   :  { %91 = vst.msk [vmem:[#allocation2 + $0x238] sm:$0xff] %vm26_vm1, %v4467_v30  ;;  %99 = vst.msk [vmem:[#allocation2 + $0x278] sm:$0xff] %vm26_vm1, %v4467_v30 }
 0x110   :  { %v1242_v40 = vpop.f32.mrb[24].mxu0  ;;  %v1523_v53 = vpop.f32.mrb[24].mxu1  ;;  %107 = vst.msk [vmem:[#allocation2 + $0x2b8] sm:$0xff] %vm26_vm1, %v4467_v30  ;;  %115 = vst.msk [vmem:[#allocation2 + $0x2f8] sm:$0xff] %vm26_vm1, %v4467_v30 }
 0x111   :  { %v1244_v54 = vpop.f32.mrb[25].mxu0  ;;  %v1525_v55 = vpop.f32.mrb[25].mxu1  ;;  %v3590_v57 = vadd.f32 %v4773_v1, %v1242_v40  ;;  %v3592_v37 = vadd.f32 %v4776_v4, %v1523_v53  ;;  %123 = vst.msk [vmem:[#allocation2 + $0x338] sm:$0xff] %vm26_vm1, %v4467_v30  ;;  %131 = vst.msk [vmem:[#allocation2 + $0x378] sm:$0xff] %vm26_vm1, %v4467_v30 }
 0x112   :  { %v1246_v56 = vpop.f32.mrb[26].mxu0  ;;  %v1527_v58 = vpop.f32.mrb[26].mxu1  ;;  %v3591_v61 = vadd.f32 %v4778_v5, %v1244_v54  ;;  %v3593_v63 = vadd.f32 %v4780_v8, %v1525_v55  ;;  %139 = vst.msk [vmem:[#allocation2 + $0x3b8] sm:$0xff] %vm26_vm1, %v4467_v30  ;;  %147 = vst.msk [vmem:[#allocation2 + $0x3f8] sm:$0xff] %vm26_vm1, %v4467_v30 }
 0x113   :  { %v1248_v60 = vpop.f32.mrb[27].mxu0  ;;  %v1529_v62 = vpop.f32.mrb[27].mxu1  ;;  %3982 = vst [vmem:[%s6666_s3 + $0x300] sm:$0xff] %v3590_v57  ;;  %v3598_v0 = vadd.f32 %v4773_v1, %v1246_v56  ;;  %3984 = vst [vmem:[%s6666_s3 + $0x310] sm:$0xff] %v3592_v37  ;;  %v3600_v2 = vadd.f32 %v4776_v4, %v1527_v58  ;;  %v4451_v57 = vld [vmem:[%s6664_s0 + $0x58] sm:$0xff]  }
 0x114   :  { %3983 = vst [vmem:[%s6666_s3 + $0x308] sm:$0xff] %v3591_v61  ;;  %v3599_v6 = vadd.f32 %v4778_v5, %v1248_v60  ;;  %3985 = vst [vmem:[%s6666_s3 + $0x318] sm:$0xff] %v3593_v63  ;;  %v3601_v7 = vadd.f32 %v4780_v8, %v1529_v62 }
 0x115   :  { %4381 = vmatmul.mubr.msk.bf16.gmra.mrb[132].mxu0 %vm1072_vm0, %v4629_v41  ;;  %4406 = vmatmul.mubr.msk.bf16.gmra.mrb[132].mxu1 %vm1072_vm0, %v4629_v41  ;;  %3990 = vst [vmem:[%s6666_s3 + $0x340] sm:$0xff] %v3598_v0  ;;  %3992 = vst [vmem:[%s6666_s3 + $0x350] sm:$0xff] %v3600_v2 }
 0x116   :  { %1832 = vmatprep.mubr.bf16.mxu0 %v4466_v3  ;;  %2113 = vmatprep.mubr.bf16.mxu1 %v4466_v3  ;;  %3991 = vst [vmem:[%s6666_s3 + $0x348] sm:$0xff] %v3599_v6  ;;  %3993 = vst [vmem:[%s6666_s3 + $0x358] sm:$0xff] %v3601_v7 }
 0x117   :  { %155 = vst.msk [vmem:[#allocation2 + $0x438] sm:$0xff] %vm26_vm1, %v4467_v30  ;;  %163 = vst.msk [vmem:[#allocation2 + $0x478] sm:$0xff] %vm26_vm1, %v4467_v30 }
 0x118   :  { %v1252_v41 = vpop.f32.mrb[28].mxu0  ;;  %v1533_v9 = vpop.f32.mrb[28].mxu1  ;;  %171 = vst.msk [vmem:[#allocation2 + $0x4b8] sm:$0xff] %vm26_vm1, %v4467_v30  ;;  %179 = vst.msk [vmem:[#allocation2 + $0x4f8] sm:$0xff] %vm26_vm1, %v4467_v30 }
 0x119   :  { %v1254_v10 = vpop.f32.mrb[29].mxu0  ;;  %v1535_v11 = vpop.f32.mrb[29].mxu1  ;;  %v3606_v13 = vadd.f32 %v4773_v1, %v1252_v41  ;;  %v3608_v16 = vadd.f32 %v4776_v4, %v1533_v9  ;;  %187 = vst.msk [vmem:[#allocation2 + $0x538] sm:$0xff] %vm26_vm1, %v4467_v30  ;;  %195 = vst.msk [vmem:[#allocation2 + $0x578] sm:$0xff] %vm26_vm1, %v4467_v30 }
 0x11a   :  { %v1256_v12 = vpop.f32.mrb[30].mxu0  ;;  %v1537_v14 = vpop.f32.mrb[30].mxu1  ;;  %v3607_v38 = vadd.f32 %v4778_v5, %v1254_v10  ;;  %v3609_v18 = vadd.f32 %v4780_v8, %v1535_v11  ;;  %203 = vst.msk [vmem:[#allocation2 + $0x5b8] sm:$0xff] %vm26_vm1, %v4467_v30  ;;  %211 = vst.msk [vmem:[#allocation2 + $0x5f8] sm:$0xff] %vm26_vm1, %v4467_v30 }
 0x11b   :  { %v1258_v15 = vpop.f32.mrb[31].mxu0  ;;  %v1539_v17 = vpop.f32.mrb[31].mxu1  ;;  %3998 = vst [vmem:[%s6666_s3 + $0x380] sm:$0xff] %v3606_v13  ;;  %v3614_v19 = vadd.f32 %v4773_v1, %v1256_v12  ;;  %4000 = vst [vmem:[%s6666_s3 + $0x390] sm:$0xff] %v3608_v16  ;;  %v3616_v20 = vadd.f32 %v4776_v4, %v1537_v14  ;;  %v4452_v14 = vld [vmem:[%s6664_s0 + $0x60] sm:$0xff]  }
 0x11c   :  { %3999 = vst [vmem:[%s6666_s3 + $0x388] sm:$0xff] %v3607_v38  ;;  %v3615_v21 = vadd.f32 %v4778_v5, %v1258_v15  ;;  %4001 = vst [vmem:[%s6666_s3 + $0x398] sm:$0xff] %v3609_v18  ;;  %v3617_v22 = vadd.f32 %v4780_v8, %v1539_v17 }
 0x11d   :  { %4382 = vmatmul.mubr.msk.bf16.gmra.mrb[136].mxu0 %vm1072_vm0, %v4640_v42  ;;  %4407 = vmatmul.mubr.msk.bf16.gmra.mrb[136].mxu1 %vm1072_vm0, %v4640_v42  ;;  %4006 = vst [vmem:[%s6666_s3 + $0x3c0] sm:$0xff] %v3614_v19  ;;  %4008 = vst [vmem:[%s6666_s3 + $0x3d0] sm:$0xff] %v3616_v20 }
 0x11e   :  { %1842 = vmatprep.mubr.bf16.mxu0 %v4466_v3  ;;  %2123 = vmatprep.mubr.bf16.mxu1 %v4466_v3  ;;  %4007 = vst [vmem:[%s6666_s3 + $0x3c8] sm:$0xff] %v3615_v21  ;;  %4009 = vst [vmem:[%s6666_s3 + $0x3d8] sm:$0xff] %v3617_v22 }
 0x11f   :  { %219 = vst.msk [vmem:[#allocation2 + $0x638] sm:$0xff] %vm26_vm1, %v4467_v30  ;;  %227 = vst.msk [vmem:[#allocation2 + $0x678] sm:$0xff] %vm26_vm1, %v4467_v30 }
 0x120   :  { %v1262_v42 = vpop.f32.mrb[32].mxu0  ;;  %v1543_v23 = vpop.f32.mrb[32].mxu1  ;;  %235 = vst.msk [vmem:[#allocation2 + $0x6b8] sm:$0xff] %vm26_vm1, %v4467_v30  ;;  %243 = vst.msk [vmem:[#allocation2 + $0x6f8] sm:$0xff] %vm26_vm1, %v4467_v30 }
 0x121   :  { %v1264_v24 = vpop.f32.mrb[33].mxu0  ;;  %v1545_v25 = vpop.f32.mrb[33].mxu1  ;;  %v3622_v27 = vadd.f32 %v4773_v1, %v1262_v42  ;;  %251 = vst.msk [vmem:[#allocation2 + $0x738] sm:$0xff] %vm26_vm1, %v4467_v30  ;;  %259 = vst.msk [vmem:[#allocation2 + $0x778] sm:$0xff] %vm26_vm1, %v4467_v30  ;;  %v3624_v31 = vadd.f32 %v4776_v4, %v1543_v23 }
 0x122   :  { %v1266_v26 = vpop.f32.mrb[34].mxu0  ;;  %v1547_v28 = vpop.f32.mrb[34].mxu1  ;;  %267 = vst.msk [vmem:[#allocation2 + $0x7b8] sm:$0xff] %vm26_vm1, %v4467_v30  ;;  %275 = vst.msk [vmem:[#allocation2 + $0x7f8] sm:$0xff] %vm26_vm1, %v4467_v30  ;;  %v3623_v39 = vadd.f32 %v4778_v5, %v1264_v24  ;;  %v3625_v33 = vadd.f32 %v4780_v8, %v1545_v25 }
 0x123   :  { %v1268_v29 = vpop.f32.mrb[35].mxu0  ;;  %283 = vst.msk [vmem:[#allocation2 + $0x838] sm:$0xff] %vm26_vm1, %v4467_v30  ;;  %291 = vst.msk [vmem:[#allocation2 + $0x878] sm:$0xff] %vm26_vm1, %v4467_v30  ;;  %v1549_v32 = vpop.f32.mrb[35].mxu1  ;;  %v3630_v34 = vadd.f32 %v4773_v1, %v1266_v26  ;;  %v3632_v43 = vadd.f32 %v4776_v4, %v1547_v28 }
 0x124   :  { %299 = vst.msk [vmem:[#allocation2 + $0x8b8] sm:$0xff] %vm26_vm1, %v4467_v30  ;;  %307 = vst.msk [vmem:[#allocation2 + $0x8f8] sm:$0xff] %vm26_vm1, %v4467_v30  ;;  %v3631_v44 = vadd.f32 %v4778_v5, %v1268_v29  ;;  %v3633_v36 = vadd.f32 %v4780_v8, %v1549_v32  ;;  %v4453_v29 = vld [vmem:[%s6664_s0 + $0x68] sm:$0xff]  }
 0x125   :  { %315 = vst.msk [vmem:[#allocation2 + $0x938] sm:$0xff] %vm26_vm1, %v4467_v30  ;;  %323 = vst.msk [vmem:[#allocation2 + $0x978] sm:$0xff] %vm26_vm1, %v4467_v30  ;;  %4383 = vmatmul.mubr.msk.bf16.gmra.mrb[140].mxu0 %vm1072_vm0, %v4450_v35  ;;  %4408 = vmatmul.mubr.msk.bf16.gmra.mrb[140].mxu1 %vm1072_vm0, %v4450_v35 }
 0x126   :  { %331 = vst.msk [vmem:[#allocation2 + $0x9b8] sm:$0xff] %vm26_vm1, %v4467_v30  ;;  %339 = vst.msk [vmem:[#allocation2 + $0x9f8] sm:$0xff] %vm26_vm1, %v4467_v30  ;;  %1852 = vmatprep.mubr.bf16.mxu0 %v4466_v3  ;;  %2133 = vmatprep.mubr.bf16.mxu1 %v4466_v3 }
 0x127   :  { %347 = vst.msk [vmem:[#allocation2 + $0xa38] sm:$0xff] %vm26_vm1, %v4467_v30  ;;  %355 = vst.msk [vmem:[#allocation2 + $0xa78] sm:$0xff] %vm26_vm1, %v4467_v30 }
 0x128   :  { %363 = vst.msk [vmem:[#allocation2 + $0xab8] sm:$0xff] %vm26_vm1, %v4467_v30  ;;  %371 = vst.msk [vmem:[#allocation2 + $0xaf8] sm:$0xff] %vm26_vm1, %v4467_v30  ;;  %v1272_v45 = vpop.f32.mrb[36].mxu0  ;;  %v1553_v46 = vpop.f32.mrb[36].mxu1 }
 0x129   :  { %379 = vst.msk [vmem:[#allocation2 + $0xb38] sm:$0xff] %vm26_vm1, %v4467_v30  ;;  %387 = vst.msk [vmem:[#allocation2 + $0xb78] sm:$0xff] %vm26_vm1, %v4467_v30  ;;  %v1274_v47 = vpop.f32.mrb[37].mxu0  ;;  %v1555_v48 = vpop.f32.mrb[37].mxu1  ;;  %v3638_v50 = vadd.f32 %v4773_v1, %v1272_v45  ;;  %v3640_v40 = vadd.f32 %v4776_v4, %v1553_v46 }
 0x12a   :  { %395 = vst.msk [vmem:[#allocation2 + $0xbb8] sm:$0xff] %vm26_vm1, %v4467_v30  ;;  %403 = vst.msk [vmem:[#allocation2 + $0xbf8] sm:$0xff] %vm26_vm1, %v4467_v30  ;;  %v1276_v49 = vpop.f32.mrb[38].mxu0  ;;  %v1557_v51 = vpop.f32.mrb[38].mxu1  ;;  %v3639_v53 = vadd.f32 %v4778_v5, %v1274_v47  ;;  %v3641_v55 = vadd.f32 %v4780_v8, %v1555_v48 }
 0x12b   :  { %411 = vst.msk [vmem:[#allocation2 + $0xc38] sm:$0xff] %vm26_vm1, %v4467_v30  ;;  %4014 = vst [vmem:[%s6666_s3 + $0x400] sm:$0xff] %v3622_v27  ;;  %v1278_v52 = vpop.f32.mrb[39].mxu0  ;;  %v1559_v54 = vpop.f32.mrb[39].mxu1  ;;  %v3646_v56 = vadd.f32 %v4773_v1, %v1276_v49  ;;  %v3648_v58 = vadd.f32 %v4776_v4, %v1557_v51  ;;  %v4454_v51 = vld [vmem:[%s6664_s0 + $0x70] sm:$0xff]  }
 0x12c   :  { %4016 = vst [vmem:[%s6666_s3 + $0x410] sm:$0xff] %v3624_v31  ;;  %4015 = vst [vmem:[%s6666_s3 + $0x408] sm:$0xff] %v3623_v39  ;;  %v3647_v60 = vadd.f32 %v4778_v5, %v1278_v52  ;;  %v3649_v37 = vadd.f32 %v4780_v8, %v1559_v54 }
 0x12d   :  { %4017 = vst [vmem:[%s6666_s3 + $0x418] sm:$0xff] %v3625_v33  ;;  %4022 = vst [vmem:[%s6666_s3 + $0x440] sm:$0xff] %v3630_v34  ;;  %4384 = vmatmul.mubr.msk.bf16.gmra.mrb[144].mxu0 %vm1072_vm0, %v4451_v57  ;;  %4409 = vmatmul.mubr.msk.bf16.gmra.mrb[144].mxu1 %vm1072_vm0, %v4451_v57 }
 0x12e   :  { %4024 = vst [vmem:[%s6666_s3 + $0x450] sm:$0xff] %v3632_v43  ;;  %4023 = vst [vmem:[%s6666_s3 + $0x448] sm:$0xff] %v3631_v44  ;;  %1862 = vmatprep.mubr.bf16.mxu0 %v4466_v3  ;;  %2143 = vmatprep.mubr.bf16.mxu1 %v4466_v3 }
 0x12f   :  { %4025 = vst [vmem:[%s6666_s3 + $0x458] sm:$0xff] %v3633_v36  ;;  %4030 = vst [vmem:[%s6666_s3 + $0x480] sm:$0xff] %v3638_v50 }
 0x130   :  { %4032 = vst [vmem:[%s6666_s3 + $0x490] sm:$0xff] %v3640_v40  ;;  %4031 = vst [vmem:[%s6666_s3 + $0x488] sm:$0xff] %v3639_v53  ;;  %v1282_v61 = vpop.f32.mrb[40].mxu0  ;;  %v1563_v62 = vpop.f32.mrb[40].mxu1 }
 0x131   :  { %4033 = vst [vmem:[%s6666_s3 + $0x498] sm:$0xff] %v3641_v55  ;;  %4038 = vst [vmem:[%s6666_s3 + $0x4c0] sm:$0xff] %v3646_v56  ;;  %v1284_v63 = vpop.f32.mrb[41].mxu0  ;;  %v1565_v0 = vpop.f32.mrb[41].mxu1  ;;  %v3654_v6 = vadd.f32 %v4773_v1, %v1282_v61  ;;  %v3656_v9 = vadd.f32 %v4776_v4, %v1563_v62 }
 0x132   :  { %4040 = vst [vmem:[%s6666_s3 + $0x4d0] sm:$0xff] %v3648_v58  ;;  %4039 = vst [vmem:[%s6666_s3 + $0x4c8] sm:$0xff] %v3647_v60  ;;  %v1286_v2 = vpop.f32.mrb[42].mxu0  ;;  %v1567_v7 = vpop.f32.mrb[42].mxu1  ;;  %v3655_v10 = vadd.f32 %v4778_v5, %v1284_v63  ;;  %v3657_v12 = vadd.f32 %v4780_v8, %v1565_v0 }
 0x133   :  { %4041 = vst [vmem:[%s6666_s3 + $0x4d8] sm:$0xff] %v3649_v37  ;;  %v1288_v41 = vpop.f32.mrb[43].mxu0  ;;  %v1569_v11 = vpop.f32.mrb[43].mxu1  ;;  %4046 = vst [vmem:[%s6666_s3 + $0x500] sm:$0xff] %v3654_v6  ;;  %v3662_v13 = vadd.f32 %v4773_v1, %v1286_v2  ;;  %v3664_v15 = vadd.f32 %v4776_v4, %v1567_v7  ;;  %v4455_v7 = vld [vmem:[%s6664_s0 + $0x78] sm:$0xff]  }
 0x134   :  { %4048 = vst [vmem:[%s6666_s3 + $0x510] sm:$0xff] %v3656_v9  ;;  %4047 = vst [vmem:[%s6666_s3 + $0x508] sm:$0xff] %v3655_v10  ;;  %v3663_v16 = vadd.f32 %v4778_v5, %v1288_v41  ;;  %v3665_v38 = vadd.f32 %v4780_v8, %v1569_v11 }
 0x135   :  { %4385 = vmatmul.mubr.msk.bf16.gmra.mrb[148].mxu0 %vm1072_vm0, %v4452_v14  ;;  %4410 = vmatmul.mubr.msk.bf16.gmra.mrb[148].mxu1 %vm1072_vm0, %v4452_v14  ;;  %4049 = vst [vmem:[%s6666_s3 + $0x518] sm:$0xff] %v3657_v12  ;;  %4054 = vst [vmem:[%s6666_s3 + $0x540] sm:$0xff] %v3662_v13 }
 0x136   :  { %1872 = vmatprep.mubr.bf16.mxu0 %v4466_v3  ;;  %2153 = vmatprep.mubr.bf16.mxu1 %v4466_v3  ;;  %4056 = vst [vmem:[%s6666_s3 + $0x550] sm:$0xff] %v3664_v15  ;;  %4055 = vst [vmem:[%s6666_s3 + $0x548] sm:$0xff] %v3663_v16 }
 0x137   :  { %4057 = vst [vmem:[%s6666_s3 + $0x558] sm:$0xff] %v3665_v38 }
 0x138   :  { %v1292_v17 = vpop.f32.mrb[44].mxu0  ;;  %v1573_v18 = vpop.f32.mrb[44].mxu1 }
 0x139   :  { %v1294_v19 = vpop.f32.mrb[45].mxu0  ;;  %v1575_v20 = vpop.f32.mrb[45].mxu1  ;;  %v3670_v22 = vadd.f32 %v4773_v1, %v1292_v17  ;;  %v3672_v24 = vadd.f32 %v4776_v4, %v1573_v18 }
 0x13a   :  { %v1296_v21 = vpop.f32.mrb[46].mxu0  ;;  %v1577_v42 = vpop.f32.mrb[46].mxu1  ;;  %v3671_v25 = vadd.f32 %v4778_v5, %v1294_v19  ;;  %v3673_v27 = vadd.f32 %v4780_v8, %v1575_v20 }
 0x13b   :  { %v1298_v23 = vpop.f32.mrb[47].mxu0  ;;  %v1579_v26 = vpop.f32.mrb[47].mxu1  ;;  %4062 = vst [vmem:[%s6666_s3 + $0x580] sm:$0xff] %v3670_v22  ;;  %v3678_v28 = vadd.f32 %v4773_v1, %v1296_v21  ;;  %4064 = vst [vmem:[%s6666_s3 + $0x590] sm:$0xff] %v3672_v24  ;;  %v3680_v30 = vadd.f32 %v4776_v4, %v1577_v42  ;;  %v4456_v42 = vld [vmem:[%s6664_s0 + $0x80] sm:$0xff]  }
 0x13c   :  { %4063 = vst [vmem:[%s6666_s3 + $0x588] sm:$0xff] %v3671_v25  ;;  %v3679_v31 = vadd.f32 %v4778_v5, %v1298_v23  ;;  %4065 = vst [vmem:[%s6666_s3 + $0x598] sm:$0xff] %v3673_v27  ;;  %v3681_v39 = vadd.f32 %v4780_v8, %v1579_v26 }
 0x13d   :  { %4386 = vmatmul.mubr.msk.bf16.gmra.mrb[152].mxu0 %vm1072_vm0, %v4453_v29  ;;  %4411 = vmatmul.mubr.msk.bf16.gmra.mrb[152].mxu1 %vm1072_vm0, %v4453_v29  ;;  %4070 = vst [vmem:[%s6666_s3 + $0x5c0] sm:$0xff] %v3678_v28  ;;  %4072 = vst [vmem:[%s6666_s3 + $0x5d0] sm:$0xff] %v3680_v30 }
 0x13e   :  { %1882 = vmatprep.mubr.bf16.mxu0 %v4466_v3  ;;  %2163 = vmatprep.mubr.bf16.mxu1 %v4466_v3  ;;  %4071 = vst [vmem:[%s6666_s3 + $0x5c8] sm:$0xff] %v3679_v31  ;;  %4073 = vst [vmem:[%s6666_s3 + $0x5d8] sm:$0xff] %v3681_v39 }
 0x140   :  { %v1302_v32 = vpop.f32.mrb[48].mxu0  ;;  %v1583_v33 = vpop.f32.mrb[48].mxu1 }
 0x141   :  { %v1304_v34 = vpop.f32.mrb[49].mxu0  ;;  %v1585_v35 = vpop.f32.mrb[49].mxu1  ;;  %v3686_v44 = vadd.f32 %v4773_v1, %v1302_v32  ;;  %v3688_v46 = vadd.f32 %v4776_v4, %v1583_v33 }
 0x142   :  { %v1306_v43 = vpop.f32.mrb[50].mxu0  ;;  %v1587_v36 = vpop.f32.mrb[50].mxu1  ;;  %v3687_v47 = vadd.f32 %v4778_v5, %v1304_v34  ;;  %v3689_v49 = vadd.f32 %v4780_v8, %v1585_v35 }
 0x143   :  { %v1308_v45 = vpop.f32.mrb[51].mxu0  ;;  %v1589_v48 = vpop.f32.mrb[51].mxu1  ;;  %4078 = vst [vmem:[%s6666_s3 + $0x600] sm:$0xff] %v3686_v44  ;;  %v3694_v50 = vadd.f32 %v4773_v1, %v1306_v43  ;;  %4080 = vst [vmem:[%s6666_s3 + $0x610] sm:$0xff] %v3688_v46  ;;  %v3696_v52 = vadd.f32 %v4776_v4, %v1587_v36  ;;  %v4457_v36 = vld [vmem:[%s6664_s0 + $0x88] sm:$0xff]  }
 0x144   :  { %4079 = vst [vmem:[%s6666_s3 + $0x608] sm:$0xff] %v3687_v47  ;;  %v3695_v40 = vadd.f32 %v4778_v5, %v1308_v45  ;;  %4081 = vst [vmem:[%s6666_s3 + $0x618] sm:$0xff] %v3689_v49  ;;  %v3697_v53 = vadd.f32 %v4780_v8, %v1589_v48 }
 0x145   :  { %4387 = vmatmul.mubr.msk.bf16.gmra.mrb[156].mxu0 %vm1072_vm0, %v4454_v51  ;;  %4412 = vmatmul.mubr.msk.bf16.gmra.mrb[156].mxu1 %vm1072_vm0, %v4454_v51  ;;  %4086 = vst [vmem:[%s6666_s3 + $0x640] sm:$0xff] %v3694_v50  ;;  %4088 = vst [vmem:[%s6666_s3 + $0x650] sm:$0xff] %v3696_v52 }
 0x146   :  { %1892 = vmatprep.mubr.bf16.mxu0 %v4466_v3  ;;  %2173 = vmatprep.mubr.bf16.mxu1 %v4466_v3  ;;  %4087 = vst [vmem:[%s6666_s3 + $0x648] sm:$0xff] %v3695_v40  ;;  %4089 = vst [vmem:[%s6666_s3 + $0x658] sm:$0xff] %v3697_v53 }
 0x148   :  { %v1312_v54 = vpop.f32.mrb[52].mxu0  ;;  %v1593_v55 = vpop.f32.mrb[52].mxu1 }
 0x149   :  { %v1314_v56 = vpop.f32.mrb[53].mxu0  ;;  %v1595_v57 = vpop.f32.mrb[53].mxu1  ;;  %v3702_v60 = vadd.f32 %v4773_v1, %v1312_v54  ;;  %v3704_v62 = vadd.f32 %v4776_v4, %v1593_v55 }
 0x14a   :  { %v1316_v58 = vpop.f32.mrb[54].mxu0  ;;  %v1597_v37 = vpop.f32.mrb[54].mxu1  ;;  %v3703_v63 = vadd.f32 %v4778_v5, %v1314_v56  ;;  %v3705_v2 = vadd.f32 %v4780_v8, %v1595_v57 }
 0x14b   :  { %v1318_v61 = vpop.f32.mrb[55].mxu0  ;;  %v1599_v0 = vpop.f32.mrb[55].mxu1  ;;  %4094 = vst [vmem:[%s6666_s3 + $0x680] sm:$0xff] %v3702_v60  ;;  %v3710_v6 = vadd.f32 %v4773_v1, %v1316_v58  ;;  %4096 = vst [vmem:[%s6666_s3 + $0x690] sm:$0xff] %v3704_v62  ;;  %v3712_v41 = vadd.f32 %v4776_v4, %v1597_v37  ;;  %v4458_v37 = vld [vmem:[%s6664_s0 + $0x90] sm:$0xff]  }
 0x14c   :  { %4095 = vst [vmem:[%s6666_s3 + $0x688] sm:$0xff] %v3703_v63  ;;  %v3711_v9 = vadd.f32 %v4778_v5, %v1318_v61  ;;  %4097 = vst [vmem:[%s6666_s3 + $0x698] sm:$0xff] %v3705_v2  ;;  %v3713_v10 = vadd.f32 %v4780_v8, %v1599_v0 }
 0x14d   :  { %4388 = vmatmul.mubr.msk.bf16.gmra.mrb[160].mxu0 %vm1072_vm0, %v4455_v7  ;;  %4413 = vmatmul.mubr.msk.bf16.gmra.mrb[160].mxu1 %vm1072_vm0, %v4455_v7  ;;  %4102 = vst [vmem:[%s6666_s3 + $0x6c0] sm:$0xff] %v3710_v6  ;;  %4104 = vst [vmem:[%s6666_s3 + $0x6d0] sm:$0xff] %v3712_v41 }
 0x14e   :  { %1902 = vmatprep.mubr.bf16.mxu0 %v4466_v3  ;;  %2183 = vmatprep.mubr.bf16.mxu1 %v4466_v3  ;;  %4103 = vst [vmem:[%s6666_s3 + $0x6c8] sm:$0xff] %v3711_v9  ;;  %4105 = vst [vmem:[%s6666_s3 + $0x6d8] sm:$0xff] %v3713_v10 }
 0x150   :  { %v1322_v11 = vpop.f32.mrb[56].mxu0  ;;  %v1603_v12 = vpop.f32.mrb[56].mxu1 }
 0x151   :  { %v1324_v13 = vpop.f32.mrb[57].mxu0  ;;  %v1605_v14 = vpop.f32.mrb[57].mxu1  ;;  %v3718_v16 = vadd.f32 %v4773_v1, %v1322_v11  ;;  %v3720_v18 = vadd.f32 %v4776_v4, %v1603_v12 }
 0x152   :  { %v1326_v15 = vpop.f32.mrb[58].mxu0  ;;  %v1607_v38 = vpop.f32.mrb[58].mxu1  ;;  %v3719_v19 = vadd.f32 %v4778_v5, %v1324_v13  ;;  %v3721_v21 = vadd.f32 %v4780_v8, %v1605_v14 }
 0x153   :  { %v1328_v17 = vpop.f32.mrb[59].mxu0  ;;  %v1609_v20 = vpop.f32.mrb[59].mxu1  ;;  %4110 = vst [vmem:[%s6666_s3 + $0x700] sm:$0xff] %v3718_v16  ;;  %v3726_v22 = vadd.f32 %v4773_v1, %v1326_v15  ;;  %4112 = vst [vmem:[%s6666_s3 + $0x710] sm:$0xff] %v3720_v18  ;;  %v3728_v23 = vadd.f32 %v4776_v4, %v1607_v38  ;;  %v4459_v38 = vld [vmem:[%s6664_s0 + $0x98] sm:$0xff]  }
 0x154   :  { %4111 = vst [vmem:[%s6666_s3 + $0x708] sm:$0xff] %v3719_v19  ;;  %v3727_v24 = vadd.f32 %v4778_v5, %v1328_v17  ;;  %4113 = vst [vmem:[%s6666_s3 + $0x718] sm:$0xff] %v3721_v21  ;;  %v3729_v25 = vadd.f32 %v4780_v8, %v1609_v20 }
 0x155   :  { %4389 = vmatmul.mubr.msk.bf16.gmra.mrb[164].mxu0 %vm1072_vm0, %v4456_v42  ;;  %4414 = vmatmul.mubr.msk.bf16.gmra.mrb[164].mxu1 %vm1072_vm0, %v4456_v42  ;;  %4118 = vst [vmem:[%s6666_s3 + $0x740] sm:$0xff] %v3726_v22  ;;  %4120 = vst [vmem:[%s6666_s3 + $0x750] sm:$0xff] %v3728_v23 }
 0x156   :  { %1912 = vmatprep.mubr.bf16.mxu0 %v4466_v3  ;;  %2193 = vmatprep.mubr.bf16.mxu1 %v4466_v3  ;;  %4119 = vst [vmem:[%s6666_s3 + $0x748] sm:$0xff] %v3727_v24  ;;  %4121 = vst [vmem:[%s6666_s3 + $0x758] sm:$0xff] %v3729_v25 }
 0x158   :  { %v1332_v26 = vpop.f32.mrb[60].mxu0  ;;  %v1613_v27 = vpop.f32.mrb[60].mxu1 }
 0x159   :  { %v1334_v28 = vpop.f32.mrb[61].mxu0  ;;  %v1615_v29 = vpop.f32.mrb[61].mxu1  ;;  %v3734_v31 = vadd.f32 %v4773_v1, %v1332_v26  ;;  %v3736_v33 = vadd.f32 %v4776_v4, %v1613_v27 }
 0x15a   :  { %v1336_v30 = vpop.f32.mrb[62].mxu0  ;;  %v1617_v39 = vpop.f32.mrb[62].mxu1  ;;  %v3735_v34 = vadd.f32 %v4778_v5, %v1334_v28  ;;  %v3737_v43 = vadd.f32 %v4780_v8, %v1615_v29 }
 0x15b   :  { %v1338_v32 = vpop.f32.mrb[63].mxu0  ;;  %v1619_v35 = vpop.f32.mrb[63].mxu1  ;;  %4126 = vst [vmem:[%s6666_s3 + $0x780] sm:$0xff] %v3734_v31  ;;  %v3742_v44 = vadd.f32 %v4773_v1, %v1336_v30  ;;  %4128 = vst [vmem:[%s6666_s3 + $0x790] sm:$0xff] %v3736_v33  ;;  %v3744_v45 = vadd.f32 %v4776_v4, %v1617_v39  ;;  %v4460_v39 = vld [vmem:[%s6664_s0 + $0xa0] sm:$0xff]  }
 0x15c   :  { %4127 = vst [vmem:[%s6666_s3 + $0x788] sm:$0xff] %v3735_v34  ;;  %v3743_v46 = vadd.f32 %v4778_v5, %v1338_v32  ;;  %4129 = vst [vmem:[%s6666_s3 + $0x798] sm:$0xff] %v3737_v43  ;;  %v3745_v47 = vadd.f32 %v4780_v8, %v1619_v35 }
 0x15d   :  { %4390 = vmatmul.mubr.msk.bf16.gmra.mrb[168].mxu0 %vm1072_vm0, %v4457_v36  ;;  %4415 = vmatmul.mubr.msk.bf16.gmra.mrb[168].mxu1 %vm1072_vm0, %v4457_v36  ;;  %4134 = vst [vmem:[%s6666_s3 + $0x7c0] sm:$0xff] %v3742_v44  ;;  %4136 = vst [vmem:[%s6666_s3 + $0x7d0] sm:$0xff] %v3744_v45 }
 0x15e   :  { %1922 = vmatprep.mubr.bf16.mxu0 %v4466_v3  ;;  %2203 = vmatprep.mubr.bf16.mxu1 %v4466_v3  ;;  %4135 = vst [vmem:[%s6666_s3 + $0x7c8] sm:$0xff] %v3743_v46  ;;  %4137 = vst [vmem:[%s6666_s3 + $0x7d8] sm:$0xff] %v3745_v47 }
 0x160   :  { %v1342_v48 = vpop.f32.mrb[64].mxu0  ;;  %v1623_v49 = vpop.f32.mrb[64].mxu1 }
 0x161   :  { %v1344_v50 = vpop.f32.mrb[65].mxu0  ;;  %v1625_v51 = vpop.f32.mrb[65].mxu1  ;;  %v3750_v40 = vadd.f32 %v4773_v1, %v1342_v48  ;;  %v3752_v55 = vadd.f32 %v4776_v4, %v1623_v49 }
 0x162   :  { %v1346_v52 = vpop.f32.mrb[66].mxu0  ;;  %v1627_v53 = vpop.f32.mrb[66].mxu1  ;;  %v3751_v56 = vadd.f32 %v4778_v5, %v1344_v50  ;;  %v3753_v58 = vadd.f32 %v4780_v8, %v1625_v51 }
 0x163   :  { %v1348_v54 = vpop.f32.mrb[67].mxu0  ;;  %v1629_v57 = vpop.f32.mrb[67].mxu1  ;;  %4142 = vst [vmem:[%s6666_s3 + $0x800] sm:$0xff] %v3750_v40  ;;  %v3758_v60 = vadd.f32 %v4773_v1, %v1346_v52  ;;  %4144 = vst [vmem:[%s6666_s3 + $0x810] sm:$0xff] %v3752_v55  ;;  %v3760_v61 = vadd.f32 %v4776_v4, %v1627_v53  ;;  %v4461_v53 = vld [vmem:[%s6664_s0 + $0xa8] sm:$0xff]  }
 0x164   :  { %4143 = vst [vmem:[%s6666_s3 + $0x808] sm:$0xff] %v3751_v56  ;;  %v3759_v62 = vadd.f32 %v4778_v5, %v1348_v54  ;;  %4145 = vst [vmem:[%s6666_s3 + $0x818] sm:$0xff] %v3753_v58  ;;  %v3761_v63 = vadd.f32 %v4780_v8, %v1629_v57 }
 0x165   :  { %4391 = vmatmul.mubr.msk.bf16.gmra.mrb[172].mxu0 %vm1072_vm0, %v4458_v37  ;;  %4416 = vmatmul.mubr.msk.bf16.gmra.mrb[172].mxu1 %vm1072_vm0, %v4458_v37  ;;  %4150 = vst [vmem:[%s6666_s3 + $0x840] sm:$0xff] %v3758_v60  ;;  %4152 = vst [vmem:[%s6666_s3 + $0x850] sm:$0xff] %v3760_v61 }
 0x166   :  { %1932 = vmatprep.mubr.bf16.mxu0 %v4466_v3  ;;  %2213 = vmatprep.mubr.bf16.mxu1 %v4466_v3  ;;  %4151 = vst [vmem:[%s6666_s3 + $0x848] sm:$0xff] %v3759_v62  ;;  %4153 = vst [vmem:[%s6666_s3 + $0x858] sm:$0xff] %v3761_v63 }
 0x168   :  { %v1352_v0 = vpop.f32.mrb[68].mxu0  ;;  %v1633_v2 = vpop.f32.mrb[68].mxu1 }
 0x169   :  { %v1354_v6 = vpop.f32.mrb[69].mxu0  ;;  %v1635_v7 = vpop.f32.mrb[69].mxu1  ;;  %v3766_v9 = vadd.f32 %v4773_v1, %v1352_v0  ;;  %v3768_v12 = vadd.f32 %v4776_v4, %v1633_v2 }
 0x16a   :  { %v1356_v41 = vpop.f32.mrb[70].mxu0  ;;  %v1637_v10 = vpop.f32.mrb[70].mxu1  ;;  %v3767_v13 = vadd.f32 %v4778_v5, %v1354_v6  ;;  %v3769_v15 = vadd.f32 %v4780_v8, %v1635_v7 }
 0x16b   :  { %v1358_v11 = vpop.f32.mrb[71].mxu0  ;;  %v1639_v14 = vpop.f32.mrb[71].mxu1  ;;  %4158 = vst [vmem:[%s6666_s3 + $0x880] sm:$0xff] %v3766_v9  ;;  %v3774_v16 = vadd.f32 %v4773_v1, %v1356_v41  ;;  %4160 = vst [vmem:[%s6666_s3 + $0x890] sm:$0xff] %v3768_v12  ;;  %v3776_v17 = vadd.f32 %v4776_v4, %v1637_v10  ;;  %v4462_v10 = vld [vmem:[%s6664_s0 + $0xb0] sm:$0xff]  }
 0x16c   :  { %4159 = vst [vmem:[%s6666_s3 + $0x888] sm:$0xff] %v3767_v13  ;;  %v3775_v18 = vadd.f32 %v4778_v5, %v1358_v11  ;;  %4161 = vst [vmem:[%s6666_s3 + $0x898] sm:$0xff] %v3769_v15  ;;  %v3777_v19 = vadd.f32 %v4780_v8, %v1639_v14 }
 0x16d   :  { %4392 = vmatmul.mubr.msk.bf16.gmra.mrb[176].mxu0 %vm1072_vm0, %v4459_v38  ;;  %4417 = vmatmul.mubr.msk.bf16.gmra.mrb[176].mxu1 %vm1072_vm0, %v4459_v38  ;;  %4166 = vst [vmem:[%s6666_s3 + $0x8c0] sm:$0xff] %v3774_v16  ;;  %4168 = vst [vmem:[%s6666_s3 + $0x8d0] sm:$0xff] %v3776_v17 }
 0x16e   :  { %1942 = vmatprep.mubr.bf16.mxu0 %v4466_v3  ;;  %2223 = vmatprep.mubr.bf16.mxu1 %v4466_v3  ;;  %4167 = vst [vmem:[%s6666_s3 + $0x8c8] sm:$0xff] %v3775_v18  ;;  %4169 = vst [vmem:[%s6666_s3 + $0x8d8] sm:$0xff] %v3777_v19 }
 0x170   :  { %v1362_v20 = vpop.f32.mrb[72].mxu0  ;;  %v1643_v21 = vpop.f32.mrb[72].mxu1 }
 0x171   :  { %v1364_v22 = vpop.f32.mrb[73].mxu0  ;;  %v1645_v42 = vpop.f32.mrb[73].mxu1  ;;  %v3782_v24 = vadd.f32 %v4773_v1, %v1362_v20  ;;  %v3784_v27 = vadd.f32 %v4776_v4, %v1643_v21 }
 0x172   :  { %v1366_v23 = vpop.f32.mrb[74].mxu0  ;;  %v1647_v25 = vpop.f32.mrb[74].mxu1  ;;  %v3783_v28 = vadd.f32 %v4778_v5, %v1364_v22  ;;  %v3785_v30 = vadd.f32 %v4780_v8, %v1645_v42 }
 0x173   :  { %v1368_v26 = vpop.f32.mrb[75].mxu0  ;;  %v1649_v29 = vpop.f32.mrb[75].mxu1  ;;  %4174 = vst [vmem:[%s6666_s3 + $0x900] sm:$0xff] %v3782_v24  ;;  %v3790_v31 = vadd.f32 %v4773_v1, %v1366_v23  ;;  %4176 = vst [vmem:[%s6666_s3 + $0x910] sm:$0xff] %v3784_v27  ;;  %v3792_v32 = vadd.f32 %v4776_v4, %v1647_v25  ;;  %v4463_v25 = vld [vmem:[%s6664_s0 + $0xb8] sm:$0xff]  }
 0x174   :  { %4175 = vst [vmem:[%s6666_s3 + $0x908] sm:$0xff] %v3783_v28  ;;  %v3791_v33 = vadd.f32 %v4778_v5, %v1368_v26  ;;  %4177 = vst [vmem:[%s6666_s3 + $0x918] sm:$0xff] %v3785_v30  ;;  %v3793_v34 = vadd.f32 %v4780_v8, %v1649_v29 }
 0x175   :  { %4393 = vmatmul.mubr.msk.bf16.gmra.mrb[180].mxu0 %vm1072_vm0, %v4460_v39  ;;  %4418 = vmatmul.mubr.msk.bf16.gmra.mrb[180].mxu1 %vm1072_vm0, %v4460_v39  ;;  %4182 = vst [vmem:[%s6666_s3 + $0x940] sm:$0xff] %v3790_v31  ;;  %4184 = vst [vmem:[%s6666_s3 + $0x950] sm:$0xff] %v3792_v32 }
 0x176   :  { %1952 = vmatprep.mubr.bf16.mxu0 %v4466_v3  ;;  %2233 = vmatprep.mubr.bf16.mxu1 %v4466_v3  ;;  %4183 = vst [vmem:[%s6666_s3 + $0x948] sm:$0xff] %v3791_v33  ;;  %4185 = vst [vmem:[%s6666_s3 + $0x958] sm:$0xff] %v3793_v34 }
 0x178   :  { %v1372_v35 = vpop.f32.mrb[76].mxu0  ;;  %v1653_v43 = vpop.f32.mrb[76].mxu1 }
 0x179   :  { %v1374_v44 = vpop.f32.mrb[77].mxu0  ;;  %v1655_v36 = vpop.f32.mrb[77].mxu1  ;;  %v3798_v46 = vadd.f32 %v4773_v1, %v1372_v35  ;;  %v3800_v49 = vadd.f32 %v4776_v4, %v1653_v43 }
 0x17a   :  { %v1376_v45 = vpop.f32.mrb[78].mxu0  ;;  %v1657_v47 = vpop.f32.mrb[78].mxu1  ;;  %v3799_v50 = vadd.f32 %v4778_v5, %v1374_v44  ;;  %v3801_v52 = vadd.f32 %v4780_v8, %v1655_v36 }
 0x17b   :  { %v1378_v48 = vpop.f32.mrb[79].mxu0  ;;  %v1659_v51 = vpop.f32.mrb[79].mxu1  ;;  %4190 = vst [vmem:[%s6666_s3 + $0x980] sm:$0xff] %v3798_v46  ;;  %v3806_v40 = vadd.f32 %v4773_v1, %v1376_v45  ;;  %4192 = vst [vmem:[%s6666_s3 + $0x990] sm:$0xff] %v3800_v49  ;;  %v3808_v54 = vadd.f32 %v4776_v4, %v1657_v47  ;;  %v4464_v46 = vld [vmem:[%s6664_s0 + $0xc0] ss:$0 sps:$4 sm:$0xff]  }
 0x17c   :  { %4191 = vst [vmem:[%s6666_s3 + $0x988] sm:$0xff] %v3799_v50  ;;  %v3807_v55 = vadd.f32 %v4778_v5, %v1378_v48  ;;  %4193 = vst [vmem:[%s6666_s3 + $0x998] sm:$0xff] %v3801_v52  ;;  %v3809_v56 = vadd.f32 %v4780_v8, %v1659_v51 }
 0x17d   :  { %4394 = vmatmul.mubr.msk.bf16.gmra.mrb[184].mxu0 %vm1072_vm0, %v4461_v53  ;;  %4419 = vmatmul.mubr.msk.bf16.gmra.mrb[184].mxu1 %vm1072_vm0, %v4461_v53  ;;  %4198 = vst [vmem:[%s6666_s3 + $0x9c0] sm:$0xff] %v3806_v40  ;;  %4200 = vst [vmem:[%s6666_s3 + $0x9d0] sm:$0xff] %v3808_v54 }
 0x17e   :  { %1962 = vmatprep.mubr.bf16.mxu0 %v4466_v3  ;;  %2243 = vmatprep.mubr.bf16.mxu1 %v4466_v3  ;;  %4199 = vst [vmem:[%s6666_s3 + $0x9c8] sm:$0xff] %v3807_v55  ;;  %4201 = vst [vmem:[%s6666_s3 + $0x9d8] sm:$0xff] %v3809_v56 }
 0x180   :  { %v1382_v57 = vpop.f32.mrb[80].mxu0  ;;  %v1663_v58 = vpop.f32.mrb[80].mxu1 }
 0x181   :  { %v1384_v60 = vpop.f32.mrb[81].mxu0  ;;  %v1665_v37 = vpop.f32.mrb[81].mxu1  ;;  %v3814_v62 = vadd.f32 %v4773_v1, %v1382_v57  ;;  %v3816_v2 = vadd.f32 %v4776_v4, %v1663_v58 }
 0x182   :  { %v1386_v61 = vpop.f32.mrb[82].mxu0  ;;  %v1667_v63 = vpop.f32.mrb[82].mxu1  ;;  %v3815_v6 = vadd.f32 %v4778_v5, %v1384_v60  ;;  %v3817_v41 = vadd.f32 %v4780_v8, %v1665_v37 }
 0x183   :  { %v1388_v0 = vpop.f32.mrb[83].mxu0  ;;  %v1669_v7 = vpop.f32.mrb[83].mxu1  ;;  %4206 = vst [vmem:[%s6666_s3 + $0xa00] sm:$0xff] %v3814_v62  ;;  %v3822_v9 = vadd.f32 %v4773_v1, %v1386_v61  ;;  %4208 = vst [vmem:[%s6666_s3 + $0xa10] sm:$0xff] %v3816_v2  ;;  %v3824_v11 = vadd.f32 %v4776_v4, %v1667_v63 }
 0x184   :  { %4207 = vst [vmem:[%s6666_s3 + $0xa08] sm:$0xff] %v3815_v6  ;;  %v3823_v12 = vadd.f32 %v4778_v5, %v1388_v0  ;;  %4209 = vst [vmem:[%s6666_s3 + $0xa18] sm:$0xff] %v3817_v41  ;;  %v3825_v13 = vadd.f32 %v4780_v8, %v1669_v7 }
 0x185   :  { %4395 = vmatmul.mubr.msk.bf16.gmra.mrb[188].mxu0 %vm1072_vm0, %v4462_v10  ;;  %4420 = vmatmul.mubr.msk.bf16.gmra.mrb[188].mxu1 %vm1072_vm0, %v4462_v10  ;;  %4214 = vst [vmem:[%s6666_s3 + $0xa40] sm:$0xff] %v3822_v9  ;;  %4216 = vst [vmem:[%s6666_s3 + $0xa50] sm:$0xff] %v3824_v11 }
 0x186   :  { %1972 = vmatprep.mubr.bf16.mxu0 %v4466_v3  ;;  %2253 = vmatprep.mubr.bf16.mxu1 %v4466_v3  ;;  %4215 = vst [vmem:[%s6666_s3 + $0xa48] sm:$0xff] %v3823_v12  ;;  %4217 = vst [vmem:[%s6666_s3 + $0xa58] sm:$0xff] %v3825_v13  ;;  %v3472_v13 = vsub.s32 4, %v4759_v59 }
 0x188   :  { %v1392_v14 = vpop.f32.mrb[84].mxu0  ;;  %v1673_v15 = vpop.f32.mrb[84].mxu1 }
 0x189   :  { %v1394_v16 = vpop.f32.mrb[85].mxu0  ;;  %v1675_v38 = vpop.f32.mrb[85].mxu1  ;;  %v3830_v18 = vadd.f32 %v4773_v1, %v1392_v14  ;;  %v3832_v21 = vadd.f32 %v4776_v4, %v1673_v15 }
 0x18a   :  { %v1396_v17 = vpop.f32.mrb[86].mxu0  ;;  %v1677_v19 = vpop.f32.mrb[86].mxu1  ;;  %v3831_v22 = vadd.f32 %v4778_v5, %v1394_v16  ;;  %v3833_v23 = vadd.f32 %v4780_v8, %v1675_v38  ;;  %v3480_v38 = vsub.s32 6, %v4759_v59 }
 0x18b   :  { %v1398_v20 = vpop.f32.mrb[87].mxu0  ;;  %v1679_v42 = vpop.f32.mrb[87].mxu1  ;;  %4222 = vst [vmem:[%s6666_s3 + $0xa80] sm:$0xff] %v3830_v18  ;;  %v3838_v24 = vadd.f32 %v4773_v1, %v1396_v17  ;;  %4224 = vst [vmem:[%s6666_s3 + $0xa90] sm:$0xff] %v3832_v21  ;;  %v3840_v26 = vadd.f32 %v4776_v4, %v1677_v19  ;;  %v3476_v17 = vsub.s32 5, %v4759_v59 }
 0x18c   :  { %4223 = vst [vmem:[%s6666_s3 + $0xa88] sm:$0xff] %v3831_v22  ;;  %v3839_v27 = vadd.f32 %v4778_v5, %v1398_v20  ;;  %4225 = vst [vmem:[%s6666_s3 + $0xa98] sm:$0xff] %v3833_v23  ;;  %v3841_v28 = vadd.f32 %v4780_v8, %v1679_v42  ;;  %v419_v20 = vld [vmem:[#allocation2 + $0x38] sm:$0xff] }
 0x18d   :  { %4396 = vmatmul.mubr.msk.bf16.gmra.mrb[192].mxu0 %vm1072_vm0, %v4463_v25  ;;  %4421 = vmatmul.mubr.msk.bf16.gmra.mrb[192].mxu1 %vm1072_vm0, %v4463_v25  ;;  %4230 = vst [vmem:[%s6666_s3 + $0xac0] sm:$0xff] %v3838_v24  ;;  %4232 = vst [vmem:[%s6666_s3 + $0xad0] sm:$0xff] %v3840_v26  ;;  %v427_v24 = vld [vmem:[#allocation2 + $0x78] sm:$0xff] }
 0x18e   :  { %1982 = vmatprep.mubr.bf16.mxu0 %v4466_v3  ;;  %2263 = vmatprep.mubr.bf16.mxu1 %v4466_v3  ;;  %4231 = vst [vmem:[%s6666_s3 + $0xac8] sm:$0xff] %v3839_v27  ;;  %4233 = vst [vmem:[%s6666_s3 + $0xad8] sm:$0xff] %v3841_v28 }
 0x190   :  { %v1402_v29 = vpop.f32.mrb[88].mxu0  ;;  %v1683_v30 = vpop.f32.mrb[88].mxu1 }
 0x191   :  { %v1404_v31 = vpop.f32.mrb[89].mxu0  ;;  %v1685_v39 = vpop.f32.mrb[89].mxu1  ;;  %v3846_v33 = vadd.f32 %v4773_v1, %v1402_v29  ;;  %v3848_v35 = vadd.f32 %v4776_v4, %v1683_v30 }
 0x192   :  { %v1406_v32 = vpop.f32.mrb[90].mxu0  ;;  %v1687_v3 = vpop.f32.mrb[90].mxu1  ;;  %v3847_v43 = vadd.f32 %v4778_v5, %v1404_v31  ;;  %v3849_v36 = vadd.f32 %v4780_v8, %v1685_v39  ;;  %v3484_v39 = vsub.s32 7, %v4759_v59 }
 0x193   :  { %v1408_v34 = vpop.f32.mrb[91].mxu0  ;;  %v1689_v44 = vpop.f32.mrb[91].mxu1  ;;  %4238 = vst [vmem:[%s6666_s3 + $0xb00] sm:$0xff] %v3846_v33  ;;  %v3854_v45 = vadd.f32 %v4773_v1, %v1406_v32  ;;  %4240 = vst [vmem:[%s6666_s3 + $0xb10] sm:$0xff] %v3848_v35  ;;  %v3856_v47 = vadd.f32 %v4776_v4, %v1687_v3  ;;  %v435_v35 = vld [vmem:[#allocation2 + $0xb8] sm:$0xff] }
 0x194   :  { %4239 = vst [vmem:[%s6666_s3 + $0xb08] sm:$0xff] %v3847_v43  ;;  %v3855_v48 = vadd.f32 %v4778_v5, %v1408_v34  ;;  %4241 = vst [vmem:[%s6666_s3 + $0xb18] sm:$0xff] %v3849_v36  ;;  %v3857_v49 = vadd.f32 %v4780_v8, %v1689_v44 }
 0x195   :  { %4397 = vmatmul.mubr.msk.bf16.gmra.mrb[196].mxu0 %vm1072_vm0, %v4464_v46  ;;  %4422 = vmatmul.mubr.msk.bf16.gmra.mrb[196].mxu1 %vm1072_vm0, %v4464_v46  ;;  %4246 = vst [vmem:[%s6666_s3 + $0xb40] sm:$0xff] %v3854_v45  ;;  %4248 = vst [vmem:[%s6666_s3 + $0xb50] sm:$0xff] %v3856_v47  ;;  %v443_v47 = vld [vmem:[#allocation2 + $0xf8] sm:$0xff] }
 0x196   :  { %4247 = vst [vmem:[%s6666_s3 + $0xb48] sm:$0xff] %v3855_v48  ;;  %4249 = vst [vmem:[%s6666_s3 + $0xb58] sm:$0xff] %v3857_v49 }
 0x198   :  { %v1412_v50 = vpop.f32.mrb[92].mxu0  ;;  %v1693_v51 = vpop.f32.mrb[92].mxu1 }
 0x199   :  { %v1414_v52 = vpop.f32.mrb[93].mxu0  ;;  %v1695_v40 = vpop.f32.mrb[93].mxu1  ;;  %v3862_v54 = vadd.f32 %v4773_v1, %v1412_v50  ;;  %v3864_v57 = vadd.f32 %v4776_v4, %v1693_v51 }
 0x19a   :  { %v1416_v53 = vpop.f32.mrb[94].mxu0  ;;  %v1697_v55 = vpop.f32.mrb[94].mxu1  ;;  %v3863_v58 = vadd.f32 %v4778_v5, %v1414_v52  ;;  %v3865_v37 = vadd.f32 %v4780_v8, %v1695_v40 }
 0x19b   :  { %v1418_v56 = vpop.f32.mrb[95].mxu0  ;;  %v1699_v60 = vpop.f32.mrb[95].mxu1  ;;  %4254 = vst [vmem:[%s6666_s3 + $0xb80] sm:$0xff] %v3862_v54  ;;  %v3870_v61 = vadd.f32 %v4773_v1, %v1416_v53  ;;  %4256 = vst [vmem:[%s6666_s3 + $0xb90] sm:$0xff] %v3864_v57  ;;  %v3872_v62 = vadd.f32 %v4776_v4, %v1697_v55 }
 0x19c   :  { %4255 = vst [vmem:[%s6666_s3 + $0xb88] sm:$0xff] %v3863_v58  ;;  %v3871_v63 = vadd.f32 %v4778_v5, %v1418_v56  ;;  %4257 = vst [vmem:[%s6666_s3 + $0xb98] sm:$0xff] %v3865_v37  ;;  %v3873_v0 = vadd.f32 %v4780_v8, %v1699_v60 }
 0x19d   :  { %4262 = vst [vmem:[%s6666_s3 + $0xbc0] sm:$0xff] %v3870_v61  ;;  %4264 = vst [vmem:[%s6666_s3 + $0xbd0] sm:$0xff] %v3872_v62 }
 0x19e   :  { %4263 = vst [vmem:[%s6666_s3 + $0xbc8] sm:$0xff] %v3871_v63  ;;  %4265 = vst [vmem:[%s6666_s3 + $0xbd8] sm:$0xff] %v3873_v0  ;;  %v451_v63 = vld [vmem:[#allocation2 + $0x138] sm:$0xff] }
 0x1a0   :  { %v1422_v2 = vpop.f32.mrb[96].mxu0  ;;  %v1703_v6 = vpop.f32.mrb[96].mxu1 }
 0x1a1   :  { %v1424_v7 = vpop.f32.mrb[97].mxu0  ;;  %v1705_v41 = vpop.f32.mrb[97].mxu1  ;;  %v3878_v10 = vadd.f32 %v4773_v1, %v1422_v2  ;;  %v3880_v14 = vadd.f32 %v4776_v4, %v1703_v6  ;;  %v4465_v1 = vld [vmem:[%s6665_s2] sm:$0xff] }
 0x1a2   :  { %v1426_v9 = vpop.f32.mrb[98].mxu0  ;;  %v1707_v11 = vpop.f32.mrb[98].mxu1  ;;  %v3879_v15 = vadd.f32 %v4778_v5, %v1424_v7  ;;  %v3881_v18 = vadd.f32 %v4780_v8, %v1705_v41  ;;  %v5772_v4 = vrot.slane %v4465_v1, %v3472_v13  ;;  %v5774_v8 = vrot.slane %v4465_v1, %v3480_v38  ;;  %v459_v41 = vld [vmem:[#allocation2 + $0x178] sm:$0xff] }
 0x1a3   :  { %v1427_v12 = vpop.f32.mrb[99].mxu0  ;;  %v1708_v16 = vpop.f32.mrb[99].mxu1  ;;  %4270 = vst [vmem:[%s6666_s3 + $0xc00] sm:$0xff] %v3878_v10  ;;  %4272 = vst [vmem:[%s6666_s3 + $0xc10] sm:$0xff] %v3880_v14  ;;  %v5776_v19 = vrot.slane %v4465_v1, %v3476_v17  ;;  %v5805_v43 = vrot.slane %v4465_v1, %v3484_v39 }
 0x1a4   :  { %4271 = vst [vmem:[%s6666_s3 + $0xc08] sm:$0xff] %v3879_v15  ;;  %4273 = vst [vmem:[%s6666_s3 + $0xc18] sm:$0xff] %v3881_v18 }
 0x1a8   :  { %v1744_v5 = vpop.f32.mrb[100].mxu0  ;;  %v2025_v21 = vpop.f32.mrb[100].mxu1 }
 0x1a9   :  { %v1746_v22 = vpop.f32.mrb[101].mxu0  ;;  %v2027_v42 = vpop.f32.mrb[101].mxu1  ;;  %v3498_v25 = vadd.f32 %v5772_v4, %v1744_v5  ;;  %v3500_v29 = vadd.f32 %v5774_v8, %v2025_v21 }
 0x1aa   :  { %v1748_v23 = vpop.f32.mrb[102].mxu0  ;;  %v2279_v26 = vadd.f32 %v2027_v42, %v419_v20  ;;  %v2029_v27 = vpop.f32.mrb[102].mxu1  ;;  %v3499_v30 = vadd.f32 %v5776_v19, %v1746_v22  ;;  %v467_v42 = vld [vmem:[#allocation2 + $0x1b8] sm:$0xff] }
 0x1ab   :  { %v1750_v28 = vpop.f32.mrb[103].mxu0  ;;  %v2031_v31 = vpop.f32.mrb[103].mxu1  ;;  %3890 = vst [vmem:[%s6666_s3 + $0x20] sm:$0xff] %v3498_v25  ;;  %v3506_v32 = vadd.f32 %v5772_v4, %v1748_v23  ;;  %3892 = vst [vmem:[%s6666_s3 + $0x30] sm:$0xff] %v3500_v29  ;;  %v3508_v3 = vadd.f32 %v5774_v8, %v2029_v27  ;;  %v475_v27 = vld [vmem:[#allocation2 + $0x1f8] sm:$0xff] }
 0x1ac   :  { %2672 = vst.msk [vmem:[#allocation2 + $0x38] sm:$0xff] %vm26_vm1, %v2279_v26  ;;  %v2287_v33 = vadd.f32 %v2031_v31, %v427_v24  ;;  %3891 = vst [vmem:[%s6666_s3 + $0x28] sm:$0xff] %v3499_v30  ;;  %v3507_v34 = vadd.f32 %v5776_v19, %v1750_v28 }
 0x1ad   :  { %3898 = vst [vmem:[%s6666_s3 + $0x60] sm:$0xff] %v3506_v32  ;;  %3900 = vst [vmem:[%s6666_s3 + $0x70] sm:$0xff] %v3508_v3 }
 0x1ae   :  { %2680 = vst.msk [vmem:[#allocation2 + $0x78] sm:$0xff] %vm26_vm1, %v2287_v33  ;;  %3899 = vst [vmem:[%s6666_s3 + $0x68] sm:$0xff] %v3507_v34 }
 0x1b0   :  { %v1754_v59 = vpop.f32.mrb[104].mxu0  ;;  %v2035_v44 = vpop.f32.mrb[104].mxu1 }
 0x1b1   :  { %v1756_v36 = vpop.f32.mrb[105].mxu0  ;;  %v2037_v45 = vpop.f32.mrb[105].mxu1  ;;  %v3514_v48 = vadd.f32 %v5772_v4, %v1754_v59  ;;  %v3516_v40 = vadd.f32 %v5774_v8, %v2035_v44 }
 0x1b2   :  { %v1758_v46 = vpop.f32.mrb[106].mxu0  ;;  %v2295_v49 = vadd.f32 %v2037_v45, %v435_v35  ;;  %v2039_v50 = vpop.f32.mrb[106].mxu1  ;;  %v3515_v53 = vadd.f32 %v5776_v19, %v1756_v36 }
 0x1b3   :  { %v1760_v51 = vpop.f32.mrb[107].mxu0  ;;  %v3067_v52 = vld [vmem:[#allocation2 + $0x38] sm:$0xff]  ;;  %v2041_v54 = vpop.f32.mrb[107].mxu1  ;;  %3906 = vst [vmem:[%s6666_s3 + $0xa0] sm:$0xff] %v3514_v48  ;;  %v3522_v56 = vadd.f32 %v5772_v4, %v1758_v46  ;;  %3908 = vst [vmem:[%s6666_s3 + $0xb0] sm:$0xff] %v3516_v40  ;;  %v3524_v60 = vadd.f32 %v5774_v8, %v2039_v50 }
 0x1b4   :  { %v3501_v55 = vadd.f32 %v5805_v43, %v3067_v52  ;;  %2688 = vst.msk [vmem:[#allocation2 + $0xb8] sm:$0xff] %vm26_vm1, %v2295_v49  ;;  %v2303_v57 = vadd.f32 %v2041_v54, %v443_v47  ;;  %3907 = vst [vmem:[%s6666_s3 + $0xa8] sm:$0xff] %v3515_v53  ;;  %v3523_v37 = vadd.f32 %v5776_v19, %v1760_v51  ;;  %v483_v48 = vld [vmem:[#allocation2 + $0x238] sm:$0xff] }
 0x1b5   :  { %v3075_v58 = vld [vmem:[#allocation2 + $0x78] sm:$0xff]  ;;  %3914 = vst [vmem:[%s6666_s3 + $0xe0] sm:$0xff] %v3522_v56  ;;  %3916 = vst [vmem:[%s6666_s3 + $0xf0] sm:$0xff] %v3524_v60 }
 0x1b6   :  { %3893 = vst.msk [vmem:[%s6666_s3 + $0x38] sm:$0xff] %vm26_vm1, %v3501_v55  ;;  %v3509_v61 = vadd.f32 %v5805_v43, %v3075_v58  ;;  %2696 = vst.msk [vmem:[#allocation2 + $0xf8] sm:$0xff] %vm26_vm1, %v2303_v57  ;;  %v491_v40 = vld [vmem:[#allocation2 + $0x278] sm:$0xff] }
 0x1b7   :  { %3915 = vst [vmem:[%s6666_s3 + $0xe8] sm:$0xff] %v3523_v37 }
 0x1b8   :  { %v1764_v62 = vpop.f32.mrb[108].mxu0  ;;  %3901 = vst.msk [vmem:[%s6666_s3 + $0x78] sm:$0xff] %vm26_vm1, %v3509_v61  ;;  %v2045_v0 = vpop.f32.mrb[108].mxu1 }
 0x1b9   :  { %v1766_v2 = vpop.f32.mrb[109].mxu0  ;;  %v2047_v6 = vpop.f32.mrb[109].mxu1  ;;  %v3530_v9 = vadd.f32 %v5772_v4, %v1764_v62  ;;  %v3532_v14 = vadd.f32 %v5774_v8, %v2045_v0 }
 0x1ba   :  { %v1768_v7 = vpop.f32.mrb[110].mxu0  ;;  %v2311_v10 = vadd.f32 %v2047_v6, %v451_v63  ;;  %v2049_v11 = vpop.f32.mrb[110].mxu1  ;;  %v3531_v15 = vadd.f32 %v5776_v19, %v1766_v2 }
 0x1bb   :  { %v1770_v12 = vpop.f32.mrb[111].mxu0  ;;  %v3083_v13 = vld [vmem:[#allocation2 + $0xb8] sm:$0xff]  ;;  %v2051_v16 = vpop.f32.mrb[111].mxu1  ;;  %3922 = vst [vmem:[%s6666_s3 + $0x120] sm:$0xff] %v3530_v9  ;;  %v3538_v17 = vadd.f32 %v5772_v4, %v1768_v7  ;;  %3924 = vst [vmem:[%s6666_s3 + $0x130] sm:$0xff] %v3532_v14  ;;  %v3540_v5 = vadd.f32 %v5774_v8, %v2049_v11 }
 0x1bc   :  { %v3517_v38 = vadd.f32 %v5805_v43, %v3083_v13  ;;  %2704 = vst.msk [vmem:[#allocation2 + $0x138] sm:$0xff] %vm26_vm1, %v2311_v10  ;;  %v2319_v18 = vadd.f32 %v2051_v16, %v459_v41  ;;  %3923 = vst [vmem:[%s6666_s3 + $0x128] sm:$0xff] %v3531_v15  ;;  %v3539_v20 = vadd.f32 %v5776_v19, %v1770_v12  ;;  %v499_v9 = vld [vmem:[#allocation2 + $0x2b8] sm:$0xff] }
 0x1bd   :  { %v3091_v1 = vld [vmem:[#allocation2 + $0xf8] sm:$0xff]  ;;  %3930 = vst [vmem:[%s6666_s3 + $0x160] sm:$0xff] %v3538_v17  ;;  %3932 = vst [vmem:[%s6666_s3 + $0x170] sm:$0xff] %v3540_v5 }
 0x1be   :  { %3909 = vst.msk [vmem:[%s6666_s3 + $0xb8] sm:$0xff] %vm26_vm1, %v3517_v38  ;;  %v3525_v21 = vadd.f32 %v5805_v43, %v3091_v1  ;;  %2712 = vst.msk [vmem:[#allocation2 + $0x178] sm:$0xff] %vm26_vm1, %v2319_v18  ;;  %v507_v14 = vld [vmem:[#allocation2 + $0x2f8] sm:$0xff] }
 0x1bf   :  { %3931 = vst [vmem:[%s6666_s3 + $0x168] sm:$0xff] %v3539_v20 }
 0x1c0   :  { %v1774_v22 = vpop.f32.mrb[112].mxu0  ;;  %3917 = vst.msk [vmem:[%s6666_s3 + $0xf8] sm:$0xff] %vm26_vm1, %v3525_v21  ;;  %v2055_v23 = vpop.f32.mrb[112].mxu1 }
 0x1c1   :  { %v1776_v24 = vpop.f32.mrb[113].mxu0  ;;  %v2057_v25 = vpop.f32.mrb[113].mxu1  ;;  %v3546_v28 = vadd.f32 %v5772_v4, %v1774_v22  ;;  %v3548_v32 = vadd.f32 %v5774_v8, %v2055_v23 }
 0x1c2   :  { %v1778_v26 = vpop.f32.mrb[114].mxu0  ;;  %v2327_v29 = vadd.f32 %v2057_v25, %v467_v42  ;;  %v2059_v30 = vpop.f32.mrb[114].mxu1  ;;  %v3547_v33 = vadd.f32 %v5776_v19, %v1776_v24 }
 0x1c3   :  { %v1780_v31 = vpop.f32.mrb[115].mxu0  ;;  %v3099_v39 = vld [vmem:[#allocation2 + $0x138] sm:$0xff]  ;;  %v2061_v3 = vpop.f32.mrb[115].mxu1  ;;  %3938 = vst [vmem:[%s6666_s3 + $0x1a0] sm:$0xff] %v3546_v28  ;;  %v3554_v59 = vadd.f32 %v5772_v4, %v1778_v26  ;;  %3940 = vst [vmem:[%s6666_s3 + $0x1b0] sm:$0xff] %v3548_v32  ;;  %v3556_v36 = vadd.f32 %v5774_v8, %v2059_v30 }
 0x1c4   :  { %v3533_v34 = vadd.f32 %v5805_v43, %v3099_v39  ;;  %2720 = vst.msk [vmem:[#allocation2 + $0x1b8] sm:$0xff] %vm26_vm1, %v2327_v29  ;;  %v2335_v35 = vadd.f32 %v2061_v3, %v475_v27  ;;  %3939 = vst [vmem:[%s6666_s3 + $0x1a8] sm:$0xff] %v3547_v33  ;;  %v3555_v45 = vadd.f32 %v5776_v19, %v1780_v31  ;;  %v515_v28 = vld [vmem:[#allocation2 + $0x338] sm:$0xff] }
 0x1c5   :  { %v3107_v44 = vld [vmem:[#allocation2 + $0x178] sm:$0xff]  ;;  %3946 = vst [vmem:[%s6666_s3 + $0x1e0] sm:$0xff] %v3554_v59  ;;  %3948 = vst [vmem:[%s6666_s3 + $0x1f0] sm:$0xff] %v3556_v36 }
 0x1c6   :  { %3925 = vst.msk [vmem:[%s6666_s3 + $0x138] sm:$0xff] %vm26_vm1, %v3533_v34  ;;  %v3541_v46 = vadd.f32 %v5805_v43, %v3107_v44  ;;  %2728 = vst.msk [vmem:[#allocation2 + $0x1f8] sm:$0xff] %vm26_vm1, %v2335_v35  ;;  %v523_v32 = vld [vmem:[#allocation2 + $0x378] sm:$0xff] }
 0x1c7   :  { %3947 = vst [vmem:[%s6666_s3 + $0x1e8] sm:$0xff] %v3555_v45 }
 0x1c8   :  { %v1784_v47 = vpop.f32.mrb[116].mxu0  ;;  %3933 = vst.msk [vmem:[%s6666_s3 + $0x178] sm:$0xff] %vm26_vm1, %v3541_v46  ;;  %v2065_v49 = vpop.f32.mrb[116].mxu1 }
 0x1c9   :  { %v1786_v50 = vpop.f32.mrb[117].mxu0  ;;  %v2067_v51 = vpop.f32.mrb[117].mxu1  ;;  %v3562_v53 = vadd.f32 %v5772_v4, %v1784_v47  ;;  %v3564_v58 = vadd.f32 %v5774_v8, %v2065_v49 }
 0x1ca   :  { %v1788_v52 = vpop.f32.mrb[118].mxu0  ;;  %v2343_v54 = vadd.f32 %v2067_v51, %v483_v48  ;;  %v2069_v55 = vpop.f32.mrb[118].mxu1  ;;  %v3563_v60 = vadd.f32 %v5776_v19, %v1786_v50 }
 0x1cb   :  { %v1790_v56 = vpop.f32.mrb[119].mxu0  ;;  %v3115_v57 = vld [vmem:[#allocation2 + $0x1b8] sm:$0xff]  ;;  %v2071_v37 = vpop.f32.mrb[119].mxu1  ;;  %3954 = vst [vmem:[%s6666_s3 + $0x220] sm:$0xff] %v3562_v53  ;;  %v3570_v62 = vadd.f32 %v5772_v4, %v1788_v52  ;;  %3956 = vst [vmem:[%s6666_s3 + $0x230] sm:$0xff] %v3564_v58  ;;  %v3572_v2 = vadd.f32 %v5774_v8, %v2069_v55 }
 0x1cc   :  { %v3549_v61 = vadd.f32 %v5805_v43, %v3115_v57  ;;  %2736 = vst.msk [vmem:[#allocation2 + $0x238] sm:$0xff] %vm26_vm1, %v2343_v54  ;;  %v2351_v63 = vadd.f32 %v2071_v37, %v491_v40  ;;  %3955 = vst [vmem:[%s6666_s3 + $0x228] sm:$0xff] %v3563_v60  ;;  %v3571_v6 = vadd.f32 %v5776_v19, %v1790_v56  ;;  %v531_v53 = vld [vmem:[#allocation2 + $0x3b8] sm:$0xff] }
 0x1cd   :  { %v3123_v0 = vld [vmem:[#allocation2 + $0x1f8] sm:$0xff]  ;;  %3962 = vst [vmem:[%s6666_s3 + $0x260] sm:$0xff] %v3570_v62  ;;  %3964 = vst [vmem:[%s6666_s3 + $0x270] sm:$0xff] %v3572_v2 }
 0x1ce   :  { %3941 = vst.msk [vmem:[%s6666_s3 + $0x1b8] sm:$0xff] %vm26_vm1, %v3549_v61  ;;  %v3557_v7 = vadd.f32 %v5805_v43, %v3123_v0  ;;  %2744 = vst.msk [vmem:[#allocation2 + $0x278] sm:$0xff] %vm26_vm1, %v2351_v63  ;;  %v539_v58 = vld [vmem:[#allocation2 + $0x3f8] sm:$0xff] }
 0x1cf   :  { %3963 = vst [vmem:[%s6666_s3 + $0x268] sm:$0xff] %v3571_v6 }
 0x1d0   :  { %v1794_v41 = vpop.f32.mrb[120].mxu0  ;;  %3949 = vst.msk [vmem:[%s6666_s3 + $0x1f8] sm:$0xff] %vm26_vm1, %v3557_v7  ;;  %v2075_v10 = vpop.f32.mrb[120].mxu1 }
 0x1d1   :  { %v1796_v11 = vpop.f32.mrb[121].mxu0  ;;  %v2077_v12 = vpop.f32.mrb[121].mxu1  ;;  %v3578_v15 = vadd.f32 %v5772_v4, %v1794_v41  ;;  %v3580_v1 = vadd.f32 %v5774_v8, %v2075_v10 }
 0x1d2   :  { %v1798_v13 = vpop.f32.mrb[122].mxu0  ;;  %v2359_v16 = vadd.f32 %v2077_v12, %v499_v9  ;;  %v2079_v38 = vpop.f32.mrb[122].mxu1  ;;  %v3579_v5 = vadd.f32 %v5776_v19, %v1796_v11 }
 0x1d3   :  { %v1800_v17 = vpop.f32.mrb[123].mxu0  ;;  %v3131_v18 = vld [vmem:[#allocation2 + $0x238] sm:$0xff]  ;;  %v2081_v20 = vpop.f32.mrb[123].mxu1  ;;  %3970 = vst [vmem:[%s6666_s3 + $0x2a0] sm:$0xff] %v3578_v15  ;;  %v3586_v22 = vadd.f32 %v5772_v4, %v1798_v13  ;;  %3972 = vst [vmem:[%s6666_s3 + $0x2b0] sm:$0xff] %v3580_v1  ;;  %v3588_v24 = vadd.f32 %v5774_v8, %v2079_v38 }
 0x1d4   :  { %v3565_v21 = vadd.f32 %v5805_v43, %v3131_v18  ;;  %2752 = vst.msk [vmem:[#allocation2 + $0x2b8] sm:$0xff] %vm26_vm1, %v2359_v16  ;;  %v2367_v42 = vadd.f32 %v2081_v20, %v507_v14  ;;  %3971 = vst [vmem:[%s6666_s3 + $0x2a8] sm:$0xff] %v3579_v5  ;;  %v3587_v25 = vadd.f32 %v5776_v19, %v1800_v17  ;;  %v547_v15 = vld [vmem:[#allocation2 + $0x438] sm:$0xff] }
 0x1d5   :  { %v3139_v23 = vld [vmem:[#allocation2 + $0x278] sm:$0xff]  ;;  %3978 = vst [vmem:[%s6666_s3 + $0x2e0] sm:$0xff] %v3586_v22  ;;  %3980 = vst [vmem:[%s6666_s3 + $0x2f0] sm:$0xff] %v3588_v24 }
 0x1d6   :  { %3957 = vst.msk [vmem:[%s6666_s3 + $0x238] sm:$0xff] %vm26_vm1, %v3565_v21  ;;  %v3573_v26 = vadd.f32 %v5805_v43, %v3139_v23  ;;  %2760 = vst.msk [vmem:[#allocation2 + $0x2f8] sm:$0xff] %vm26_vm1, %v2367_v42  ;;  %v555_v1 = vld [vmem:[#allocation2 + $0x478] sm:$0xff] }
 0x1d7   :  { %3979 = vst [vmem:[%s6666_s3 + $0x2e8] sm:$0xff] %v3587_v25 }
 0x1d8   :  { %v1804_v27 = vpop.f32.mrb[124].mxu0  ;;  %3965 = vst.msk [vmem:[%s6666_s3 + $0x278] sm:$0xff] %vm26_vm1, %v3573_v26  ;;  %v2085_v29 = vpop.f32.mrb[124].mxu1 }
 0x1d9   :  { %v1806_v30 = vpop.f32.mrb[125].mxu0  ;;  %v2087_v31 = vpop.f32.mrb[125].mxu1  ;;  %v3594_v33 = vadd.f32 %v5772_v4, %v1804_v27  ;;  %v3596_v44 = vadd.f32 %v5774_v8, %v2085_v29 }
 0x1da   :  { %v1808_v39 = vpop.f32.mrb[126].mxu0  ;;  %v2375_v3 = vadd.f32 %v2087_v31, %v515_v28  ;;  %v2089_v34 = vpop.f32.mrb[126].mxu1  ;;  %v3595_v36 = vadd.f32 %v5776_v19, %v1806_v30 }
 0x1db   :  { %v1810_v59 = vpop.f32.mrb[127].mxu0  ;;  %v3147_v35 = vld [vmem:[#allocation2 + $0x2b8] sm:$0xff]  ;;  %v2091_v45 = vpop.f32.mrb[127].mxu1  ;;  %3986 = vst [vmem:[%s6666_s3 + $0x320] sm:$0xff] %v3594_v33  ;;  %v3602_v47 = vadd.f32 %v5772_v4, %v1808_v39  ;;  %3988 = vst [vmem:[%s6666_s3 + $0x330] sm:$0xff] %v3596_v44  ;;  %v3604_v50 = vadd.f32 %v5774_v8, %v2089_v34 }
 0x1dc   :  { %v3581_v46 = vadd.f32 %v5805_v43, %v3147_v35  ;;  %2768 = vst.msk [vmem:[#allocation2 + $0x338] sm:$0xff] %vm26_vm1, %v2375_v3  ;;  %v2383_v48 = vadd.f32 %v2091_v45, %v523_v32  ;;  %3987 = vst [vmem:[%s6666_s3 + $0x328] sm:$0xff] %v3595_v36  ;;  %v3603_v51 = vadd.f32 %v5776_v19, %v1810_v59  ;;  %v563_v33 = vld [vmem:[#allocation2 + $0x4b8] sm:$0xff] }
 0x1dd   :  { %v3155_v49 = vld [vmem:[#allocation2 + $0x2f8] sm:$0xff]  ;;  %3994 = vst [vmem:[%s6666_s3 + $0x360] sm:$0xff] %v3602_v47  ;;  %3996 = vst [vmem:[%s6666_s3 + $0x370] sm:$0xff] %v3604_v50 }
 0x1de   :  { %3973 = vst.msk [vmem:[%s6666_s3 + $0x2b8] sm:$0xff] %vm26_vm1, %v3581_v46  ;;  %v3589_v52 = vadd.f32 %v5805_v43, %v3155_v49  ;;  %2776 = vst.msk [vmem:[#allocation2 + $0x378] sm:$0xff] %vm26_vm1, %v2383_v48  ;;  %v571_v44 = vld [vmem:[#allocation2 + $0x4f8] sm:$0xff] }
 0x1df   :  { %3995 = vst [vmem:[%s6666_s3 + $0x368] sm:$0xff] %v3603_v51 }
 0x1e0   :  { %v1814_v40 = vpop.f32.mrb[128].mxu0  ;;  %3981 = vst.msk [vmem:[%s6666_s3 + $0x2f8] sm:$0xff] %vm26_vm1, %v3589_v52  ;;  %v2095_v54 = vpop.f32.mrb[128].mxu1 }
 0x1e1   :  { %v1816_v55 = vpop.f32.mrb[129].mxu0  ;;  %v2097_v56 = vpop.f32.mrb[129].mxu1  ;;  %v3610_v60 = vadd.f32 %v5772_v4, %v1814_v40  ;;  %v3612_v0 = vadd.f32 %v5774_v8, %v2095_v54 }
 0x1e2   :  { %v1818_v57 = vpop.f32.mrb[130].mxu0  ;;  %v2391_v37 = vadd.f32 %v2097_v56, %v531_v53  ;;  %v2099_v61 = vpop.f32.mrb[130].mxu1  ;;  %v3611_v2 = vadd.f32 %v5776_v19, %v1816_v55 }
 0x1e3   :  { %v1820_v62 = vpop.f32.mrb[131].mxu0  ;;  %v3163_v63 = vld [vmem:[#allocation2 + $0x338] sm:$0xff]  ;;  %v2101_v6 = vpop.f32.mrb[131].mxu1  ;;  %4002 = vst [vmem:[%s6666_s3 + $0x3a0] sm:$0xff] %v3610_v60  ;;  %v3618_v41 = vadd.f32 %v5772_v4, %v1818_v57  ;;  %4004 = vst [vmem:[%s6666_s3 + $0x3b0] sm:$0xff] %v3612_v0  ;;  %v3620_v11 = vadd.f32 %v5774_v8, %v2099_v61 }
 0x1e4   :  { %v3597_v7 = vadd.f32 %v5805_v43, %v3163_v63  ;;  %2784 = vst.msk [vmem:[#allocation2 + $0x3b8] sm:$0xff] %vm26_vm1, %v2391_v37  ;;  %v2399_v9 = vadd.f32 %v2101_v6, %v539_v58  ;;  %4003 = vst [vmem:[%s6666_s3 + $0x3a8] sm:$0xff] %v3611_v2  ;;  %v3619_v12 = vadd.f32 %v5776_v19, %v1820_v62  ;;  %v579_v60 = vld [vmem:[#allocation2 + $0x538] sm:$0xff] }
 0x1e5   :  { %v3171_v10 = vld [vmem:[#allocation2 + $0x378] sm:$0xff]  ;;  %4010 = vst [vmem:[%s6666_s3 + $0x3e0] sm:$0xff] %v3618_v41  ;;  %4012 = vst [vmem:[%s6666_s3 + $0x3f0] sm:$0xff] %v3620_v11 }
 0x1e6   :  { %3989 = vst.msk [vmem:[%s6666_s3 + $0x338] sm:$0xff] %vm26_vm1, %v3597_v7  ;;  %v3605_v13 = vadd.f32 %v5805_v43, %v3171_v10  ;;  %2792 = vst.msk [vmem:[#allocation2 + $0x3f8] sm:$0xff] %vm26_vm1, %v2399_v9  ;;  %v587_v0 = vld [vmem:[#allocation2 + $0x578] sm:$0xff] }
 0x1e7   :  { %4011 = vst [vmem:[%s6666_s3 + $0x3e8] sm:$0xff] %v3619_v12 }
 0x1e8   :  { %v1824_v14 = vpop.f32.mrb[132].mxu0  ;;  %3997 = vst.msk [vmem:[%s6666_s3 + $0x378] sm:$0xff] %vm26_vm1, %v3605_v13  ;;  %v2105_v16 = vpop.f32.mrb[132].mxu1 }
 0x1e9   :  { %v1826_v38 = vpop.f32.mrb[133].mxu0  ;;  %v2107_v17 = vpop.f32.mrb[133].mxu1  ;;  %v3626_v5 = vadd.f32 %v5772_v4, %v1824_v14  ;;  %v3628_v23 = vadd.f32 %v5774_v8, %v2105_v16 }
 0x1ea   :  { %v1828_v18 = vpop.f32.mrb[134].mxu0  ;;  %v2407_v20 = vadd.f32 %v2107_v17, %v547_v15  ;;  %v2109_v21 = vpop.f32.mrb[134].mxu1  ;;  %v3627_v24 = vadd.f32 %v5776_v19, %v1826_v38 }
 0x1eb   :  { %v1830_v22 = vpop.f32.mrb[135].mxu0  ;;  %v3179_v42 = vld [vmem:[#allocation2 + $0x3b8] sm:$0xff]  ;;  %v2111_v25 = vpop.f32.mrb[135].mxu1  ;;  %4018 = vst [vmem:[%s6666_s3 + $0x420] sm:$0xff] %v3626_v5  ;;  %v3634_v27 = vadd.f32 %v5772_v4, %v1828_v18  ;;  %4020 = vst [vmem:[%s6666_s3 + $0x430] sm:$0xff] %v3628_v23  ;;  %v3636_v30 = vadd.f32 %v5774_v8, %v2109_v21 }
 0x1ec   :  { %v3613_v26 = vadd.f32 %v5805_v43, %v3179_v42  ;;  %2800 = vst.msk [vmem:[#allocation2 + $0x438] sm:$0xff] %vm26_vm1, %v2407_v20  ;;  %v2415_v28 = vadd.f32 %v2111_v25, %v555_v1  ;;  %4019 = vst [vmem:[%s6666_s3 + $0x428] sm:$0xff] %v3627_v24  ;;  %v3635_v31 = vadd.f32 %v5776_v19, %v1830_v22  ;;  %v595_v5 = vld [vmem:[#allocation2 + $0x5b8] sm:$0xff] }
 0x1ed   :  { %v3187_v29 = vld [vmem:[#allocation2 + $0x3f8] sm:$0xff]  ;;  %4026 = vst [vmem:[%s6666_s3 + $0x460] sm:$0xff] %v3634_v27  ;;  %4028 = vst [vmem:[%s6666_s3 + $0x470] sm:$0xff] %v3636_v30 }
 0x1ee   :  { %4005 = vst.msk [vmem:[%s6666_s3 + $0x3b8] sm:$0xff] %vm26_vm1, %v3613_v26  ;;  %v3621_v39 = vadd.f32 %v5805_v43, %v3187_v29  ;;  %2808 = vst.msk [vmem:[#allocation2 + $0x478] sm:$0xff] %vm26_vm1, %v2415_v28  ;;  %v603_v23 = vld [vmem:[#allocation2 + $0x5f8] sm:$0xff] }
 0x1ef   :  { %4027 = vst [vmem:[%s6666_s3 + $0x468] sm:$0xff] %v3635_v31 }
 0x1f0   :  { %v1834_v32 = vpop.f32.mrb[136].mxu0  ;;  %4013 = vst.msk [vmem:[%s6666_s3 + $0x3f8] sm:$0xff] %vm26_vm1, %v3621_v39  ;;  %v2115_v3 = vpop.f32.mrb[136].mxu1 }
 0x1f1   :  { %v1836_v34 = vpop.f32.mrb[137].mxu0  ;;  %v2117_v59 = vpop.f32.mrb[137].mxu1  ;;  %v3642_v36 = vadd.f32 %v5772_v4, %v1834_v32  ;;  %v3644_v49 = vadd.f32 %v5774_v8, %v2115_v3 }
 0x1f2   :  { %v1838_v35 = vpop.f32.mrb[138].mxu0  ;;  %v2423_v45 = vadd.f32 %v2117_v59, %v563_v33  ;;  %v2119_v46 = vpop.f32.mrb[138].mxu1  ;;  %v3643_v50 = vadd.f32 %v5776_v19, %v1836_v34 }
 0x1f3   :  { %v1840_v47 = vpop.f32.mrb[139].mxu0  ;;  %v3195_v48 = vld [vmem:[#allocation2 + $0x438] sm:$0xff]  ;;  %v2121_v51 = vpop.f32.mrb[139].mxu1  ;;  %4034 = vst [vmem:[%s6666_s3 + $0x4a0] sm:$0xff] %v3642_v36  ;;  %v3650_v40 = vadd.f32 %v5772_v4, %v1838_v35  ;;  %4036 = vst [vmem:[%s6666_s3 + $0x4b0] sm:$0xff] %v3644_v49  ;;  %v3652_v55 = vadd.f32 %v5774_v8, %v2119_v46 }
 0x1f4   :  { %v3629_v52 = vadd.f32 %v5805_v43, %v3195_v48  ;;  %2816 = vst.msk [vmem:[#allocation2 + $0x4b8] sm:$0xff] %vm26_vm1, %v2423_v45  ;;  %v2431_v53 = vadd.f32 %v2121_v51, %v571_v44  ;;  %4035 = vst [vmem:[%s6666_s3 + $0x4a8] sm:$0xff] %v3643_v50  ;;  %v3651_v56 = vadd.f32 %v5776_v19, %v1840_v47  ;;  %v611_v36 = vld [vmem:[#allocation2 + $0x638] sm:$0xff] }
 0x1f5   :  { %v3203_v54 = vld [vmem:[#allocation2 + $0x478] sm:$0xff]  ;;  %4042 = vst [vmem:[%s6666_s3 + $0x4e0] sm:$0xff] %v3650_v40  ;;  %4044 = vst [vmem:[%s6666_s3 + $0x4f0] sm:$0xff] %v3652_v55 }
 0x1f6   :  { %4021 = vst.msk [vmem:[%s6666_s3 + $0x438] sm:$0xff] %vm26_vm1, %v3629_v52  ;;  %v3637_v57 = vadd.f32 %v5805_v43, %v3203_v54  ;;  %2824 = vst.msk [vmem:[#allocation2 + $0x4f8] sm:$0xff] %vm26_vm1, %v2431_v53  ;;  %v619_v49 = vld [vmem:[#allocation2 + $0x678] sm:$0xff] }
 0x1f7   :  { %4043 = vst [vmem:[%s6666_s3 + $0x4e8] sm:$0xff] %v3651_v56 }
 0x1f8   :  { %v1844_v58 = vpop.f32.mrb[140].mxu0  ;;  %4029 = vst.msk [vmem:[%s6666_s3 + $0x478] sm:$0xff] %vm26_vm1, %v3637_v57  ;;  %v2125_v37 = vpop.f32.mrb[140].mxu1 }
 0x1f9   :  { %v1846_v61 = vpop.f32.mrb[141].mxu0  ;;  %v2127_v62 = vpop.f32.mrb[141].mxu1  ;;  %v3658_v2 = vadd.f32 %v5772_v4, %v1844_v58  ;;  %v3660_v10 = vadd.f32 %v5774_v8, %v2125_v37 }
 0x1fa   :  { %v1848_v63 = vpop.f32.mrb[142].mxu0  ;;  %v2439_v6 = vadd.f32 %v2127_v62, %v579_v60  ;;  %v2129_v7 = vpop.f32.mrb[142].mxu1  ;;  %v3659_v11 = vadd.f32 %v5776_v19, %v1846_v61 }
 0x1fb   :  { %v1850_v41 = vpop.f32.mrb[143].mxu0  ;;  %v3211_v9 = vld [vmem:[#allocation2 + $0x4b8] sm:$0xff]  ;;  %v2131_v12 = vpop.f32.mrb[143].mxu1  ;;  %4050 = vst [vmem:[%s6666_s3 + $0x520] sm:$0xff] %v3658_v2  ;;  %v3666_v14 = vadd.f32 %v5772_v4, %v1848_v63  ;;  %4052 = vst [vmem:[%s6666_s3 + $0x530] sm:$0xff] %v3660_v10  ;;  %v3668_v38 = vadd.f32 %v5774_v8, %v2129_v7 }
 0x1fc   :  { %v3645_v13 = vadd.f32 %v5805_v43, %v3211_v9  ;;  %2832 = vst.msk [vmem:[#allocation2 + $0x538] sm:$0xff] %vm26_vm1, %v2439_v6  ;;  %v2447_v15 = vadd.f32 %v2131_v12, %v587_v0  ;;  %4051 = vst [vmem:[%s6666_s3 + $0x528] sm:$0xff] %v3659_v11  ;;  %v3667_v17 = vadd.f32 %v5776_v19, %v1850_v41  ;;  %v627_v2 = vld [vmem:[#allocation2 + $0x6b8] sm:$0xff] }
 0x1fd   :  { %v3219_v16 = vld [vmem:[#allocation2 + $0x4f8] sm:$0xff]  ;;  %4058 = vst [vmem:[%s6666_s3 + $0x560] sm:$0xff] %v3666_v14  ;;  %4060 = vst [vmem:[%s6666_s3 + $0x570] sm:$0xff] %v3668_v38 }
 0x1fe   :  { %4037 = vst.msk [vmem:[%s6666_s3 + $0x4b8] sm:$0xff] %vm26_vm1, %v3645_v13  ;;  %v3653_v18 = vadd.f32 %v5805_v43, %v3219_v16  ;;  %2840 = vst.msk [vmem:[#allocation2 + $0x578] sm:$0xff] %vm26_vm1, %v2447_v15  ;;  %v635_v10 = vld [vmem:[#allocation2 + $0x6f8] sm:$0xff] }
 0x1ff   :  { %4059 = vst [vmem:[%s6666_s3 + $0x568] sm:$0xff] %v3667_v17 }
 0x200   :  { %v1854_v1 = vpop.f32.mrb[144].mxu0  ;;  %4045 = vst.msk [vmem:[%s6666_s3 + $0x4f8] sm:$0xff] %vm26_vm1, %v3653_v18  ;;  %v2135_v20 = vpop.f32.mrb[144].mxu1 }
 0x201   :  { %v1856_v21 = vpop.f32.mrb[145].mxu0  ;;  %v2137_v22 = vpop.f32.mrb[145].mxu1  ;;  %v3674_v24 = vadd.f32 %v5772_v4, %v1854_v1  ;;  %v3676_v29 = vadd.f32 %v5774_v8, %v2135_v20 }
 0x202   :  { %v1858_v42 = vpop.f32.mrb[146].mxu0  ;;  %v2455_v25 = vadd.f32 %v2137_v22, %v595_v5  ;;  %v2139_v26 = vpop.f32.mrb[146].mxu1  ;;  %v3675_v30 = vadd.f32 %v5776_v19, %v1856_v21 }
 0x203   :  { %v1860_v27 = vpop.f32.mrb[147].mxu0  ;;  %v3227_v28 = vld [vmem:[#allocation2 + $0x538] sm:$0xff]  ;;  %v2141_v31 = vpop.f32.mrb[147].mxu1  ;;  %4066 = vst [vmem:[%s6666_s3 + $0x5a0] sm:$0xff] %v3674_v24  ;;  %v3682_v32 = vadd.f32 %v5772_v4, %v1858_v42  ;;  %4068 = vst [vmem:[%s6666_s3 + $0x5b0] sm:$0xff] %v3676_v29  ;;  %v3684_v34 = vadd.f32 %v5774_v8, %v2139_v26 }
 0x204   :  { %v3661_v39 = vadd.f32 %v5805_v43, %v3227_v28  ;;  %2848 = vst.msk [vmem:[#allocation2 + $0x5b8] sm:$0xff] %vm26_vm1, %v2455_v25  ;;  %v2463_v33 = vadd.f32 %v2141_v31, %v603_v23  ;;  %4067 = vst [vmem:[%s6666_s3 + $0x5a8] sm:$0xff] %v3675_v30  ;;  %v3683_v59 = vadd.f32 %v5776_v19, %v1860_v27  ;;  %v643_v24 = vld [vmem:[#allocation2 + $0x738] sm:$0xff] }
 0x205   :  { %v3235_v3 = vld [vmem:[#allocation2 + $0x578] sm:$0xff]  ;;  %4074 = vst [vmem:[%s6666_s3 + $0x5e0] sm:$0xff] %v3682_v32  ;;  %4076 = vst [vmem:[%s6666_s3 + $0x5f0] sm:$0xff] %v3684_v34 }
 0x206   :  { %4053 = vst.msk [vmem:[%s6666_s3 + $0x538] sm:$0xff] %vm26_vm1, %v3661_v39  ;;  %v3669_v35 = vadd.f32 %v5805_v43, %v3235_v3  ;;  %2856 = vst.msk [vmem:[#allocation2 + $0x5f8] sm:$0xff] %vm26_vm1, %v2463_v33  ;;  %v651_v29 = vld [vmem:[#allocation2 + $0x778] sm:$0xff] }
 0x207   :  { %4075 = vst [vmem:[%s6666_s3 + $0x5e8] sm:$0xff] %v3683_v59 }
 0x208   :  { %v1864_v44 = vpop.f32.mrb[148].mxu0  ;;  %4061 = vst.msk [vmem:[%s6666_s3 + $0x578] sm:$0xff] %vm26_vm1, %v3669_v35  ;;  %v2145_v45 = vpop.f32.mrb[148].mxu1 }
 0x209   :  { %v1866_v46 = vpop.f32.mrb[149].mxu0  ;;  %v2147_v47 = vpop.f32.mrb[149].mxu1  ;;  %v3690_v50 = vadd.f32 %v5772_v4, %v1864_v44  ;;  %v3692_v54 = vadd.f32 %v5774_v8, %v2145_v45 }
 0x20a   :  { %v1868_v48 = vpop.f32.mrb[150].mxu0  ;;  %v2471_v51 = vadd.f32 %v2147_v47, %v611_v36  ;;  %v2149_v52 = vpop.f32.mrb[150].mxu1  ;;  %v3691_v55 = vadd.f32 %v5776_v19, %v1866_v46 }
 0x20b   :  { %v1870_v40 = vpop.f32.mrb[151].mxu0  ;;  %v3243_v53 = vld [vmem:[#allocation2 + $0x5b8] sm:$0xff]  ;;  %v2151_v56 = vpop.f32.mrb[151].mxu1  ;;  %4082 = vst [vmem:[%s6666_s3 + $0x620] sm:$0xff] %v3690_v50  ;;  %v3698_v58 = vadd.f32 %v5772_v4, %v1868_v48  ;;  %4084 = vst [vmem:[%s6666_s3 + $0x630] sm:$0xff] %v3692_v54  ;;  %v3700_v61 = vadd.f32 %v5774_v8, %v2149_v52 }
 0x20c   :  { %v3677_v57 = vadd.f32 %v5805_v43, %v3243_v53  ;;  %2864 = vst.msk [vmem:[#allocation2 + $0x638] sm:$0xff] %vm26_vm1, %v2471_v51  ;;  %v2479_v60 = vadd.f32 %v2151_v56, %v619_v49  ;;  %4083 = vst [vmem:[%s6666_s3 + $0x628] sm:$0xff] %v3691_v55  ;;  %v3699_v62 = vadd.f32 %v5776_v19, %v1870_v40  ;;  %v659_v50 = vld [vmem:[#allocation2 + $0x7b8] sm:$0xff] }
 0x20d   :  { %v3251_v37 = vld [vmem:[#allocation2 + $0x5f8] sm:$0xff]  ;;  %4090 = vst [vmem:[%s6666_s3 + $0x660] sm:$0xff] %v3698_v58  ;;  %4092 = vst [vmem:[%s6666_s3 + $0x670] sm:$0xff] %v3700_v61 }
 0x20e   :  { %4069 = vst.msk [vmem:[%s6666_s3 + $0x5b8] sm:$0xff] %vm26_vm1, %v3677_v57  ;;  %v3685_v63 = vadd.f32 %v5805_v43, %v3251_v37  ;;  %2872 = vst.msk [vmem:[#allocation2 + $0x678] sm:$0xff] %vm26_vm1, %v2479_v60  ;;  %v667_v54 = vld [vmem:[#allocation2 + $0x7f8] sm:$0xff] }
 0x20f   :  { %4091 = vst [vmem:[%s6666_s3 + $0x668] sm:$0xff] %v3699_v62 }
 0x210   :  { %v1874_v0 = vpop.f32.mrb[152].mxu0  ;;  %4077 = vst.msk [vmem:[%s6666_s3 + $0x5f8] sm:$0xff] %vm26_vm1, %v3685_v63  ;;  %v2155_v6 = vpop.f32.mrb[152].mxu1 }
 0x211   :  { %v1876_v7 = vpop.f32.mrb[153].mxu0  ;;  %v2157_v41 = vpop.f32.mrb[153].mxu1  ;;  %v3706_v11 = vadd.f32 %v5772_v4, %v1874_v0  ;;  %v3708_v16 = vadd.f32 %v5774_v8, %v2155_v6 }
 0x212   :  { %v1878_v9 = vpop.f32.mrb[154].mxu0  ;;  %v2487_v12 = vadd.f32 %v2157_v41, %v627_v2  ;;  %v2159_v13 = vpop.f32.mrb[154].mxu1  ;;  %v3707_v38 = vadd.f32 %v5776_v19, %v1876_v7 }
 0x213   :  { %v1880_v14 = vpop.f32.mrb[155].mxu0  ;;  %v3259_v15 = vld [vmem:[#allocation2 + $0x638] sm:$0xff]  ;;  %v2161_v17 = vpop.f32.mrb[155].mxu1  ;;  %4098 = vst [vmem:[%s6666_s3 + $0x6a0] sm:$0xff] %v3706_v11  ;;  %v3714_v1 = vadd.f32 %v5772_v4, %v1878_v9  ;;  %4100 = vst [vmem:[%s6666_s3 + $0x6b0] sm:$0xff] %v3708_v16  ;;  %v3716_v21 = vadd.f32 %v5774_v8, %v2159_v13 }
 0x214   :  { %v3693_v18 = vadd.f32 %v5805_v43, %v3259_v15  ;;  %2880 = vst.msk [vmem:[#allocation2 + $0x6b8] sm:$0xff] %vm26_vm1, %v2487_v12  ;;  %v2495_v5 = vadd.f32 %v2161_v17, %v635_v10  ;;  %4099 = vst [vmem:[%s6666_s3 + $0x6a8] sm:$0xff] %v3707_v38  ;;  %v3715_v22 = vadd.f32 %v5776_v19, %v1880_v14  ;;  %v675_v11 = vld [vmem:[#allocation2 + $0x838] sm:$0xff] }
 0x215   :  { %v3267_v20 = vld [vmem:[#allocation2 + $0x678] sm:$0xff]  ;;  %4106 = vst [vmem:[%s6666_s3 + $0x6e0] sm:$0xff] %v3714_v1  ;;  %4108 = vst [vmem:[%s6666_s3 + $0x6f0] sm:$0xff] %v3716_v21 }
 0x216   :  { %4085 = vst.msk [vmem:[%s6666_s3 + $0x638] sm:$0xff] %vm26_vm1, %v3693_v18  ;;  %v3701_v42 = vadd.f32 %v5805_v43, %v3267_v20  ;;  %2888 = vst.msk [vmem:[#allocation2 + $0x6f8] sm:$0xff] %vm26_vm1, %v2495_v5  ;;  %v683_v16 = vld [vmem:[#allocation2 + $0x878] sm:$0xff] }
 0x217   :  { %4107 = vst [vmem:[%s6666_s3 + $0x6e8] sm:$0xff] %v3715_v22 }
 0x218   :  { %v1884_v23 = vpop.f32.mrb[156].mxu0  ;;  %4093 = vst.msk [vmem:[%s6666_s3 + $0x678] sm:$0xff] %vm26_vm1, %v3701_v42  ;;  %v2165_v25 = vpop.f32.mrb[156].mxu1 }
 0x219   :  { %v1886_v26 = vpop.f32.mrb[157].mxu0  ;;  %v2167_v27 = vpop.f32.mrb[157].mxu1  ;;  %v3722_v30 = vadd.f32 %v5772_v4, %v1884_v23  ;;  %v3724_v3 = vadd.f32 %v5774_v8, %v2165_v25 }
 0x21a   :  { %v1888_v28 = vpop.f32.mrb[158].mxu0  ;;  %v2503_v31 = vadd.f32 %v2167_v27, %v643_v24  ;;  %v2169_v39 = vpop.f32.mrb[158].mxu1  ;;  %v3723_v34 = vadd.f32 %v5776_v19, %v1886_v26 }
 0x21b   :  { %v1890_v32 = vpop.f32.mrb[159].mxu0  ;;  %v3275_v33 = vld [vmem:[#allocation2 + $0x6b8] sm:$0xff]  ;;  %v2171_v59 = vpop.f32.mrb[159].mxu1  ;;  %4114 = vst [vmem:[%s6666_s3 + $0x720] sm:$0xff] %v3722_v30  ;;  %v3730_v44 = vadd.f32 %v5772_v4, %v1888_v28  ;;  %4116 = vst [vmem:[%s6666_s3 + $0x730] sm:$0xff] %v3724_v3  ;;  %v3732_v46 = vadd.f32 %v5774_v8, %v2169_v39 }
 0x21c   :  { %v3709_v35 = vadd.f32 %v5805_v43, %v3275_v33  ;;  %2896 = vst.msk [vmem:[#allocation2 + $0x738] sm:$0xff] %vm26_vm1, %v2503_v31  ;;  %v2511_v36 = vadd.f32 %v2171_v59, %v651_v29  ;;  %4115 = vst [vmem:[%s6666_s3 + $0x728] sm:$0xff] %v3723_v34  ;;  %v3731_v47 = vadd.f32 %v5776_v19, %v1890_v32  ;;  %v691_v30 = vld [vmem:[#allocation2 + $0x8b8] sm:$0xff] }
 0x21d   :  { %v3283_v45 = vld [vmem:[#allocation2 + $0x6f8] sm:$0xff]  ;;  %4122 = vst [vmem:[%s6666_s3 + $0x760] sm:$0xff] %v3730_v44  ;;  %4124 = vst [vmem:[%s6666_s3 + $0x770] sm:$0xff] %v3732_v46 }
 0x21e   :  { %4101 = vst.msk [vmem:[%s6666_s3 + $0x6b8] sm:$0xff] %vm26_vm1, %v3709_v35  ;;  %v3717_v48 = vadd.f32 %v5805_v43, %v3283_v45  ;;  %2904 = vst.msk [vmem:[#allocation2 + $0x778] sm:$0xff] %vm26_vm1, %v2511_v36  ;;  %v699_v3 = vld [vmem:[#allocation2 + $0x8f8] sm:$0xff] }
 0x21f   :  { %4123 = vst [vmem:[%s6666_s3 + $0x768] sm:$0xff] %v3731_v47 }
 0x220   :  { %v1894_v49 = vpop.f32.mrb[160].mxu0  ;;  %4109 = vst.msk [vmem:[%s6666_s3 + $0x6f8] sm:$0xff] %vm26_vm1, %v3717_v48  ;;  %v2175_v51 = vpop.f32.mrb[160].mxu1 }
 0x221   :  { %v1896_v52 = vpop.f32.mrb[161].mxu0  ;;  %v2177_v40 = vpop.f32.mrb[161].mxu1  ;;  %v3738_v55 = vadd.f32 %v5772_v4, %v1894_v49  ;;  %v3740_v37 = vadd.f32 %v5774_v8, %v2175_v51 }
 0x222   :  { %v1898_v53 = vpop.f32.mrb[162].mxu0  ;;  %v2519_v56 = vadd.f32 %v2177_v40, %v659_v50  ;;  %v2179_v57 = vpop.f32.mrb[162].mxu1  ;;  %v3739_v61 = vadd.f32 %v5776_v19, %v1896_v52 }
 0x223   :  { %v1900_v58 = vpop.f32.mrb[163].mxu0  ;;  %v3291_v60 = vld [vmem:[#allocation2 + $0x738] sm:$0xff]  ;;  %v2181_v62 = vpop.f32.mrb[163].mxu1  ;;  %4130 = vst [vmem:[%s6666_s3 + $0x7a0] sm:$0xff] %v3738_v55  ;;  %v3746_v0 = vadd.f32 %v5772_v4, %v1898_v53  ;;  %4132 = vst [vmem:[%s6666_s3 + $0x7b0] sm:$0xff] %v3740_v37  ;;  %v3748_v7 = vadd.f32 %v5774_v8, %v2179_v57 }
 0x224   :  { %v3725_v63 = vadd.f32 %v5805_v43, %v3291_v60  ;;  %2912 = vst.msk [vmem:[#allocation2 + $0x7b8] sm:$0xff] %vm26_vm1, %v2519_v56  ;;  %v2527_v2 = vadd.f32 %v2181_v62, %v667_v54  ;;  %4131 = vst [vmem:[%s6666_s3 + $0x7a8] sm:$0xff] %v3739_v61  ;;  %v3747_v41 = vadd.f32 %v5776_v19, %v1900_v58  ;;  %v707_v55 = vld [vmem:[#allocation2 + $0x938] sm:$0xff] }
 0x225   :  { %v3299_v6 = vld [vmem:[#allocation2 + $0x778] sm:$0xff]  ;;  %4138 = vst [vmem:[%s6666_s3 + $0x7e0] sm:$0xff] %v3746_v0  ;;  %4140 = vst [vmem:[%s6666_s3 + $0x7f0] sm:$0xff] %v3748_v7 }
 0x226   :  { %4117 = vst.msk [vmem:[%s6666_s3 + $0x738] sm:$0xff] %vm26_vm1, %v3725_v63  ;;  %v3733_v9 = vadd.f32 %v5805_v43, %v3299_v6  ;;  %2920 = vst.msk [vmem:[#allocation2 + $0x7f8] sm:$0xff] %vm26_vm1, %v2527_v2  ;;  %v715_v37 = vld [vmem:[#allocation2 + $0x978] sm:$0xff] }
 0x227   :  { %4139 = vst [vmem:[%s6666_s3 + $0x7e8] sm:$0xff] %v3747_v41 }
 0x228   :  { %v1904_v10 = vpop.f32.mrb[164].mxu0  ;;  %4125 = vst.msk [vmem:[%s6666_s3 + $0x778] sm:$0xff] %vm26_vm1, %v3733_v9  ;;  %v2185_v12 = vpop.f32.mrb[164].mxu1 }
 0x229   :  { %v1906_v13 = vpop.f32.mrb[165].mxu0  ;;  %v2187_v14 = vpop.f32.mrb[165].mxu1  ;;  %v3754_v38 = vadd.f32 %v5772_v4, %v1904_v10  ;;  %v3756_v20 = vadd.f32 %v5774_v8, %v2185_v12 }
 0x22a   :  { %v1908_v15 = vpop.f32.mrb[166].mxu0  ;;  %v2535_v17 = vadd.f32 %v2187_v14, %v675_v11  ;;  %v2189_v18 = vpop.f32.mrb[166].mxu1  ;;  %v3755_v21 = vadd.f32 %v5776_v19, %v1906_v13 }
 0x22b   :  { %v1910_v1 = vpop.f32.mrb[167].mxu0  ;;  %v3307_v5 = vld [vmem:[#allocation2 + $0x7b8] sm:$0xff]  ;;  %v2191_v22 = vpop.f32.mrb[167].mxu1  ;;  %4146 = vst [vmem:[%s6666_s3 + $0x820] sm:$0xff] %v3754_v38  ;;  %v3762_v23 = vadd.f32 %v5772_v4, %v1908_v15  ;;  %4148 = vst [vmem:[%s6666_s3 + $0x830] sm:$0xff] %v3756_v20  ;;  %v3764_v26 = vadd.f32 %v5774_v8, %v2189_v18 }
 0x22c   :  { %v3741_v42 = vadd.f32 %v5805_v43, %v3307_v5  ;;  %2928 = vst.msk [vmem:[#allocation2 + $0x838] sm:$0xff] %vm26_vm1, %v2535_v17  ;;  %v2543_v24 = vadd.f32 %v2191_v22, %v683_v16  ;;  %4147 = vst [vmem:[%s6666_s3 + $0x828] sm:$0xff] %v3755_v21  ;;  %v3763_v27 = vadd.f32 %v5776_v19, %v1910_v1  ;;  %v723_v38 = vld [vmem:[#allocation2 + $0x9b8] sm:$0xff] }
 0x22d   :  { %v3315_v25 = vld [vmem:[#allocation2 + $0x7f8] sm:$0xff]  ;;  %4154 = vst [vmem:[%s6666_s3 + $0x860] sm:$0xff] %v3762_v23  ;;  %4156 = vst [vmem:[%s6666_s3 + $0x870] sm:$0xff] %v3764_v26 }
 0x22e   :  { %4133 = vst.msk [vmem:[%s6666_s3 + $0x7b8] sm:$0xff] %vm26_vm1, %v3741_v42  ;;  %v3749_v28 = vadd.f32 %v5805_v43, %v3315_v25  ;;  %2936 = vst.msk [vmem:[#allocation2 + $0x878] sm:$0xff] %vm26_vm1, %v2543_v24  ;;  %v731_v20 = vld [vmem:[#allocation2 + $0x9f8] sm:$0xff] }
 0x22f   :  { %4155 = vst [vmem:[%s6666_s3 + $0x868] sm:$0xff] %v3763_v27 }
 0x230   :  { %v1914_v29 = vpop.f32.mrb[168].mxu0  ;;  %4141 = vst.msk [vmem:[%s6666_s3 + $0x7f8] sm:$0xff] %vm26_vm1, %v3749_v28  ;;  %v2195_v31 = vpop.f32.mrb[168].mxu1 }
 0x231   :  { %v1916_v39 = vpop.f32.mrb[169].mxu0  ;;  %v2197_v32 = vpop.f32.mrb[169].mxu1  ;;  %v3770_v34 = vadd.f32 %v5772_v4, %v1914_v29  ;;  %v3772_v45 = vadd.f32 %v5774_v8, %v2195_v31 }
 0x232   :  { %v1918_v33 = vpop.f32.mrb[170].mxu0  ;;  %v2551_v59 = vadd.f32 %v2197_v32, %v691_v30  ;;  %v2199_v35 = vpop.f32.mrb[170].mxu1  ;;  %v3771_v46 = vadd.f32 %v5776_v19, %v1916_v39 }
 0x233   :  { %v1920_v44 = vpop.f32.mrb[171].mxu0  ;;  %v3323_v36 = vld [vmem:[#allocation2 + $0x838] sm:$0xff]  ;;  %v2201_v47 = vpop.f32.mrb[171].mxu1  ;;  %4162 = vst [vmem:[%s6666_s3 + $0x8a0] sm:$0xff] %v3770_v34  ;;  %v3778_v49 = vadd.f32 %v5772_v4, %v1918_v33  ;;  %4164 = vst [vmem:[%s6666_s3 + $0x8b0] sm:$0xff] %v3772_v45  ;;  %v3780_v52 = vadd.f32 %v5774_v8, %v2199_v35 }
 0x234   :  { %v3757_v48 = vadd.f32 %v5805_v43, %v3323_v36  ;;  %2944 = vst.msk [vmem:[#allocation2 + $0x8b8] sm:$0xff] %vm26_vm1, %v2551_v59  ;;  %v2559_v50 = vadd.f32 %v2201_v47, %v699_v3  ;;  %4163 = vst [vmem:[%s6666_s3 + $0x8a8] sm:$0xff] %v3771_v46  ;;  %v3779_v40 = vadd.f32 %v5776_v19, %v1920_v44  ;;  %v739_v34 = vld [vmem:[#allocation2 + $0xa38] sm:$0xff] }
 0x235   :  { %v3331_v51 = vld [vmem:[#allocation2 + $0x878] sm:$0xff]  ;;  %4170 = vst [vmem:[%s6666_s3 + $0x8e0] sm:$0xff] %v3778_v49  ;;  %4172 = vst [vmem:[%s6666_s3 + $0x8f0] sm:$0xff] %v3780_v52 }
 0x236   :  { %4149 = vst.msk [vmem:[%s6666_s3 + $0x838] sm:$0xff] %vm26_vm1, %v3757_v48  ;;  %v3765_v53 = vadd.f32 %v5805_v43, %v3331_v51  ;;  %2952 = vst.msk [vmem:[#allocation2 + $0x8f8] sm:$0xff] %vm26_vm1, %v2559_v50  ;;  %v747_v45 = vld [vmem:[#allocation2 + $0xa78] sm:$0xff] }
 0x237   :  { %4171 = vst [vmem:[%s6666_s3 + $0x8e8] sm:$0xff] %v3779_v40 }
 0x238   :  { %v1924_v54 = vpop.f32.mrb[172].mxu0  ;;  %4157 = vst.msk [vmem:[%s6666_s3 + $0x878] sm:$0xff] %vm26_vm1, %v3765_v53  ;;  %v2205_v56 = vpop.f32.mrb[172].mxu1 }
 0x239   :  { %v1926_v57 = vpop.f32.mrb[173].mxu0  ;;  %v2207_v58 = vpop.f32.mrb[173].mxu1  ;;  %v3786_v61 = vadd.f32 %v5772_v4, %v1924_v54  ;;  %v3788_v6 = vadd.f32 %v5774_v8, %v2205_v56 }
 0x23a   :  { %v1928_v60 = vpop.f32.mrb[174].mxu0  ;;  %v2567_v62 = vadd.f32 %v2207_v58, %v707_v55  ;;  %v2209_v63 = vpop.f32.mrb[174].mxu1  ;;  %v3787_v7 = vadd.f32 %v5776_v19, %v1926_v57 }
 0x23b   :  { %v1930_v0 = vpop.f32.mrb[175].mxu0  ;;  %v3339_v2 = vld [vmem:[#allocation2 + $0x8b8] sm:$0xff]  ;;  %v2211_v41 = vpop.f32.mrb[175].mxu1  ;;  %4178 = vst [vmem:[%s6666_s3 + $0x920] sm:$0xff] %v3786_v61  ;;  %v3794_v10 = vadd.f32 %v5772_v4, %v1928_v60  ;;  %4180 = vst [vmem:[%s6666_s3 + $0x930] sm:$0xff] %v3788_v6  ;;  %v3796_v13 = vadd.f32 %v5774_v8, %v2209_v63 }
 0x23c   :  { %v3773_v9 = vadd.f32 %v5805_v43, %v3339_v2  ;;  %2960 = vst.msk [vmem:[#allocation2 + $0x938] sm:$0xff] %vm26_vm1, %v2567_v62  ;;  %v2575_v11 = vadd.f32 %v2211_v41, %v715_v37  ;;  %4179 = vst [vmem:[%s6666_s3 + $0x928] sm:$0xff] %v3787_v7  ;;  %v3795_v14 = vadd.f32 %v5776_v19, %v1930_v0  ;;  %v755_v61 = vld [vmem:[#allocation2 + $0xab8] sm:$0xff] }
 0x23d   :  { %v3347_v12 = vld [vmem:[#allocation2 + $0x8f8] sm:$0xff]  ;;  %4186 = vst [vmem:[%s6666_s3 + $0x960] sm:$0xff] %v3794_v10  ;;  %4188 = vst [vmem:[%s6666_s3 + $0x970] sm:$0xff] %v3796_v13 }
 0x23e   :  { %4165 = vst.msk [vmem:[%s6666_s3 + $0x8b8] sm:$0xff] %vm26_vm1, %v3773_v9  ;;  %v3781_v15 = vadd.f32 %v5805_v43, %v3347_v12  ;;  %2968 = vst.msk [vmem:[#allocation2 + $0x978] sm:$0xff] %vm26_vm1, %v2575_v11  ;;  %v763_v6 = vld [vmem:[#allocation2 + $0xaf8] sm:$0xff] }
 0x23f   :  { %4187 = vst [vmem:[%s6666_s3 + $0x968] sm:$0xff] %v3795_v14 }
 0x240   :  { %v1934_v16 = vpop.f32.mrb[176].mxu0  ;;  %4173 = vst.msk [vmem:[%s6666_s3 + $0x8f8] sm:$0xff] %vm26_vm1, %v3781_v15  ;;  %v2215_v17 = vpop.f32.mrb[176].mxu1 }
 0x241   :  { %v1936_v18 = vpop.f32.mrb[177].mxu0  ;;  %v2217_v1 = vpop.f32.mrb[177].mxu1  ;;  %v3802_v21 = vadd.f32 %v5772_v4, %v1934_v16  ;;  %v3804_v25 = vadd.f32 %v5774_v8, %v2215_v17 }
 0x242   :  { %v1938_v5 = vpop.f32.mrb[178].mxu0  ;;  %v2583_v22 = vadd.f32 %v2217_v1, %v723_v38  ;;  %v2219_v42 = vpop.f32.mrb[178].mxu1  ;;  %v3803_v26 = vadd.f32 %v5776_v19, %v1936_v18 }
 0x243   :  { %v1940_v23 = vpop.f32.mrb[179].mxu0  ;;  %v3355_v24 = vld [vmem:[#allocation2 + $0x938] sm:$0xff]  ;;  %v2221_v27 = vpop.f32.mrb[179].mxu1  ;;  %4194 = vst [vmem:[%s6666_s3 + $0x9a0] sm:$0xff] %v3802_v21  ;;  %v3810_v29 = vadd.f32 %v5772_v4, %v1938_v5  ;;  %4196 = vst [vmem:[%s6666_s3 + $0x9b0] sm:$0xff] %v3804_v25  ;;  %v3812_v39 = vadd.f32 %v5774_v8, %v2219_v42 }
 0x244   :  { %v3789_v28 = vadd.f32 %v5805_v43, %v3355_v24  ;;  %2976 = vst.msk [vmem:[#allocation2 + $0x9b8] sm:$0xff] %vm26_vm1, %v2583_v22  ;;  %v2591_v30 = vadd.f32 %v2221_v27, %v731_v20  ;;  %4195 = vst [vmem:[%s6666_s3 + $0x9a8] sm:$0xff] %v3803_v26  ;;  %v3811_v32 = vadd.f32 %v5776_v19, %v1940_v23  ;;  %v771_v21 = vld [vmem:[#allocation2 + $0xb38] sm:$0xff] }
 0x245   :  { %v3363_v31 = vld [vmem:[#allocation2 + $0x978] sm:$0xff]  ;;  %4202 = vst [vmem:[%s6666_s3 + $0x9e0] sm:$0xff] %v3810_v29  ;;  %4204 = vst [vmem:[%s6666_s3 + $0x9f0] sm:$0xff] %v3812_v39 }
 0x246   :  { %4181 = vst.msk [vmem:[%s6666_s3 + $0x938] sm:$0xff] %vm26_vm1, %v3789_v28  ;;  %v3797_v33 = vadd.f32 %v5805_v43, %v3363_v31  ;;  %2984 = vst.msk [vmem:[#allocation2 + $0x9f8] sm:$0xff] %vm26_vm1, %v2591_v30  ;;  %v779_v25 = vld [vmem:[#allocation2 + $0xb78] sm:$0xff] }
 0x247   :  { %4203 = vst [vmem:[%s6666_s3 + $0x9e8] sm:$0xff] %v3811_v32 }
 0x248   :  { %v1944_v3 = vpop.f32.mrb[180].mxu0  ;;  %4189 = vst.msk [vmem:[%s6666_s3 + $0x978] sm:$0xff] %vm26_vm1, %v3797_v33  ;;  %v2225_v59 = vpop.f32.mrb[180].mxu1 }
 0x249   :  { %v1946_v35 = vpop.f32.mrb[181].mxu0  ;;  %v2227_v44 = vpop.f32.mrb[181].mxu1  ;;  %v3818_v46 = vadd.f32 %v5772_v4, %v1944_v3  ;;  %v3820_v51 = vadd.f32 %v5774_v8, %v2225_v59 }
 0x24a   :  { %v1948_v36 = vpop.f32.mrb[182].mxu0  ;;  %v2599_v47 = vadd.f32 %v2227_v44, %v739_v34  ;;  %v2229_v48 = vpop.f32.mrb[182].mxu1  ;;  %v3819_v52 = vadd.f32 %v5776_v19, %v1946_v35 }
 0x24b   :  { %v1950_v49 = vpop.f32.mrb[183].mxu0  ;;  %v3371_v50 = vld [vmem:[#allocation2 + $0x9b8] sm:$0xff]  ;;  %v2231_v40 = vpop.f32.mrb[183].mxu1  ;;  %4210 = vst [vmem:[%s6666_s3 + $0xa20] sm:$0xff] %v3818_v46  ;;  %v3826_v54 = vadd.f32 %v5772_v4, %v1948_v36  ;;  %4212 = vst [vmem:[%s6666_s3 + $0xa30] sm:$0xff] %v3820_v51  ;;  %v3828_v57 = vadd.f32 %v5774_v8, %v2229_v48 }
 0x24c   :  { %v3805_v53 = vadd.f32 %v5805_v43, %v3371_v50  ;;  %2992 = vst.msk [vmem:[#allocation2 + $0xa38] sm:$0xff] %vm26_vm1, %v2599_v47  ;;  %v2607_v55 = vadd.f32 %v2231_v40, %v747_v45  ;;  %4211 = vst [vmem:[%s6666_s3 + $0xa28] sm:$0xff] %v3819_v52  ;;  %v3827_v58 = vadd.f32 %v5776_v19, %v1950_v49  ;;  %v787_v46 = vld [vmem:[#allocation2 + $0xbb8] sm:$0xff] }
 0x24d   :  { %v3379_v56 = vld [vmem:[#allocation2 + $0x9f8] sm:$0xff]  ;;  %4218 = vst [vmem:[%s6666_s3 + $0xa60] sm:$0xff] %v3826_v54  ;;  %4220 = vst [vmem:[%s6666_s3 + $0xa70] sm:$0xff] %v3828_v57 }
 0x24e   :  { %4197 = vst.msk [vmem:[%s6666_s3 + $0x9b8] sm:$0xff] %vm26_vm1, %v3805_v53  ;;  %v3813_v60 = vadd.f32 %v5805_v43, %v3379_v56  ;;  %3000 = vst.msk [vmem:[#allocation2 + $0xa78] sm:$0xff] %vm26_vm1, %v2607_v55  ;;  %v795_v51 = vld [vmem:[#allocation2 + $0xbf8] sm:$0xff] }
 0x24f   :  { %4219 = vst [vmem:[%s6666_s3 + $0xa68] sm:$0xff] %v3827_v58 }
 0x250   :  { %v1954_v37 = vpop.f32.mrb[184].mxu0  ;;  %4205 = vst.msk [vmem:[%s6666_s3 + $0x9f8] sm:$0xff] %vm26_vm1, %v3813_v60  ;;  %v2235_v62 = vpop.f32.mrb[184].mxu1 }
 0x251   :  { %v1956_v63 = vpop.f32.mrb[185].mxu0  ;;  %v2237_v0 = vpop.f32.mrb[185].mxu1  ;;  %v3834_v7 = vadd.f32 %v5772_v4, %v1954_v37  ;;  %v3836_v12 = vadd.f32 %v5774_v8, %v2235_v62 }
 0x252   :  { %v1958_v2 = vpop.f32.mrb[186].mxu0  ;;  %v2615_v41 = vadd.f32 %v2237_v0, %v755_v61  ;;  %v2239_v9 = vpop.f32.mrb[186].mxu1  ;;  %v3835_v13 = vadd.f32 %v5776_v19, %v1956_v63 }
 0x253   :  { %v1960_v10 = vpop.f32.mrb[187].mxu0  ;;  %v3387_v11 = vld [vmem:[#allocation2 + $0xa38] sm:$0xff]  ;;  %v2241_v14 = vpop.f32.mrb[187].mxu1  ;;  %4226 = vst [vmem:[%s6666_s3 + $0xaa0] sm:$0xff] %v3834_v7  ;;  %v3842_v16 = vadd.f32 %v5772_v4, %v1958_v2  ;;  %4228 = vst [vmem:[%s6666_s3 + $0xab0] sm:$0xff] %v3836_v12  ;;  %v3844_v18 = vadd.f32 %v5774_v8, %v2239_v9 }
 0x254   :  { %v3821_v15 = vadd.f32 %v5805_v43, %v3387_v11  ;;  %3008 = vst.msk [vmem:[#allocation2 + $0xab8] sm:$0xff] %vm26_vm1, %v2615_v41  ;;  %v2623_v38 = vadd.f32 %v2241_v14, %v763_v6  ;;  %4227 = vst [vmem:[%s6666_s3 + $0xaa8] sm:$0xff] %v3835_v13  ;;  %v3843_v1 = vadd.f32 %v5776_v19, %v1960_v10  ;;  %v803_v7 = vld [vmem:[#allocation2 + $0xc38] sm:$0xff] }
 0x255   :  { %v3395_v17 = vld [vmem:[#allocation2 + $0xa78] sm:$0xff]  ;;  %4234 = vst [vmem:[%s6666_s3 + $0xae0] sm:$0xff] %v3842_v16  ;;  %4236 = vst [vmem:[%s6666_s3 + $0xaf0] sm:$0xff] %v3844_v18 }
 0x256   :  { %4213 = vst.msk [vmem:[%s6666_s3 + $0xa38] sm:$0xff] %vm26_vm1, %v3821_v15  ;;  %v3829_v5 = vadd.f32 %v5805_v43, %v3395_v17  ;;  %3016 = vst.msk [vmem:[#allocation2 + $0xaf8] sm:$0xff] %vm26_vm1, %v2623_v38 }
 0x257   :  { %4235 = vst [vmem:[%s6666_s3 + $0xae8] sm:$0xff] %v3843_v1 }
 0x258   :  { %v1964_v20 = vpop.f32.mrb[188].mxu0  ;;  %4221 = vst.msk [vmem:[%s6666_s3 + $0xa78] sm:$0xff] %vm26_vm1, %v3829_v5  ;;  %v2245_v22 = vpop.f32.mrb[188].mxu1 }
 0x259   :  { %v1966_v42 = vpop.f32.mrb[189].mxu0  ;;  %v2247_v23 = vpop.f32.mrb[189].mxu1  ;;  %v3850_v26 = vadd.f32 %v5772_v4, %v1964_v20  ;;  %v3852_v31 = vadd.f32 %v5774_v8, %v2245_v22 }
 0x25a   :  { %v1968_v24 = vpop.f32.mrb[190].mxu0  ;;  %v2631_v27 = vadd.f32 %v2247_v23, %v771_v21  ;;  %v2249_v28 = vpop.f32.mrb[190].mxu1  ;;  %v3851_v39 = vadd.f32 %v5776_v19, %v1966_v42 }
 0x25b   :  { %v1970_v29 = vpop.f32.mrb[191].mxu0  ;;  %v3403_v30 = vld [vmem:[#allocation2 + $0xab8] sm:$0xff]  ;;  %v2251_v32 = vpop.f32.mrb[191].mxu1  ;;  %4242 = vst [vmem:[%s6666_s3 + $0xb20] sm:$0xff] %v3850_v26  ;;  %v3858_v3 = vadd.f32 %v5772_v4, %v1968_v24  ;;  %4244 = vst [vmem:[%s6666_s3 + $0xb30] sm:$0xff] %v3852_v31  ;;  %v3860_v35 = vadd.f32 %v5774_v8, %v2249_v28 }
 0x25c   :  { %v3837_v33 = vadd.f32 %v5805_v43, %v3403_v30  ;;  %3024 = vst.msk [vmem:[#allocation2 + $0xb38] sm:$0xff] %vm26_vm1, %v2631_v27  ;;  %v2639_v34 = vadd.f32 %v2251_v32, %v779_v25  ;;  %4243 = vst [vmem:[%s6666_s3 + $0xb28] sm:$0xff] %v3851_v39  ;;  %v3859_v44 = vadd.f32 %v5776_v19, %v1970_v29 }
 0x25d   :  { %v3411_v59 = vld [vmem:[#allocation2 + $0xaf8] sm:$0xff]  ;;  %4250 = vst [vmem:[%s6666_s3 + $0xb60] sm:$0xff] %v3858_v3  ;;  %4252 = vst [vmem:[%s6666_s3 + $0xb70] sm:$0xff] %v3860_v35 }
 0x25e   :  { %4229 = vst.msk [vmem:[%s6666_s3 + $0xab8] sm:$0xff] %vm26_vm1, %v3837_v33  ;;  %v3845_v36 = vadd.f32 %v5805_v43, %v3411_v59  ;;  %3032 = vst.msk [vmem:[#allocation2 + $0xb78] sm:$0xff] %vm26_vm1, %v2639_v34 }
 0x25f   :  { %4251 = vst [vmem:[%s6666_s3 + $0xb68] sm:$0xff] %v3859_v44 }
 0x260   :  { %v1974_v45 = vpop.f32.mrb[192].mxu0  ;;  %4237 = vst.msk [vmem:[%s6666_s3 + $0xaf8] sm:$0xff] %vm26_vm1, %v3845_v36  ;;  %v2255_v47 = vpop.f32.mrb[192].mxu1 }
 0x261   :  { %v1976_v48 = vpop.f32.mrb[193].mxu0  ;;  %v2257_v49 = vpop.f32.mrb[193].mxu1  ;;  %v3866_v52 = vadd.f32 %v5772_v4, %v1974_v45  ;;  %v3868_v56 = vadd.f32 %v5774_v8, %v2255_v47 }
 0x262   :  { %v1978_v50 = vpop.f32.mrb[194].mxu0  ;;  %v2647_v40 = vadd.f32 %v2257_v49, %v787_v46  ;;  %v2259_v53 = vpop.f32.mrb[194].mxu1  ;;  %v3867_v57 = vadd.f32 %v5776_v19, %v1976_v48 }
 0x263   :  { %v1980_v54 = vpop.f32.mrb[195].mxu0  ;;  %v3419_v55 = vld [vmem:[#allocation2 + $0xb38] sm:$0xff]  ;;  %v2261_v58 = vpop.f32.mrb[195].mxu1  ;;  %4258 = vst [vmem:[%s6666_s3 + $0xba0] sm:$0xff] %v3866_v52  ;;  %v3874_v37 = vadd.f32 %v5772_v4, %v1978_v50  ;;  %4260 = vst [vmem:[%s6666_s3 + $0xbb0] sm:$0xff] %v3868_v56  ;;  %v3876_v63 = vadd.f32 %v5774_v8, %v2259_v53 }
 0x264   :  { %v3853_v60 = vadd.f32 %v5805_v43, %v3419_v55  ;;  %3040 = vst.msk [vmem:[#allocation2 + $0xbb8] sm:$0xff] %vm26_vm1, %v2647_v40  ;;  %v2655_v61 = vadd.f32 %v2261_v58, %v795_v51  ;;  %4259 = vst [vmem:[%s6666_s3 + $0xba8] sm:$0xff] %v3867_v57  ;;  %v3875_v0 = vadd.f32 %v5776_v19, %v1980_v54 }
 0x265   :  { %v3427_v62 = vld [vmem:[#allocation2 + $0xb78] sm:$0xff]  ;;  %4266 = vst [vmem:[%s6666_s3 + $0xbe0] sm:$0xff] %v3874_v37  ;;  %4268 = vst [vmem:[%s6666_s3 + $0xbf0] sm:$0xff] %v3876_v63 }
 0x266   :  { %4245 = vst.msk [vmem:[%s6666_s3 + $0xb38] sm:$0xff] %vm26_vm1, %v3853_v60  ;;  %v3861_v2 = vadd.f32 %v5805_v43, %v3427_v62  ;;  %3048 = vst.msk [vmem:[#allocation2 + $0xbf8] sm:$0xff] %vm26_vm1, %v2655_v61 }
 0x267   :  { %4267 = vst [vmem:[%s6666_s3 + $0xbe8] sm:$0xff] %v3875_v0 }
 0x268   :  { %v1984_v6 = vpop.f32.mrb[196].mxu0  ;;  %4253 = vst.msk [vmem:[%s6666_s3 + $0xb78] sm:$0xff] %vm26_vm1, %v3861_v2  ;;  %v2265_v41 = vpop.f32.mrb[196].mxu1 }
 0x269   :  { %v1986_v9 = vpop.f32.mrb[197].mxu0  ;;  %v2267_v10 = vpop.f32.mrb[197].mxu1  ;;  %v3882_v12 = vadd.f32 %v5772_v4, %v1984_v6  ;;  %v3884_v38 = vadd.f32 %v5774_v8, %v2265_v41 }
 0x26a   :  { %v1988_v11 = vpop.f32.mrb[198].mxu0  ;;  %v2663_v13 = vadd.f32 %v2267_v10, %v803_v7  ;;  %v2269_v14 = vpop.f32.mrb[198].mxu1  ;;  %v3883_v17 = vadd.f32 %v5776_v19, %v1986_v9 }
 0x26b   :  { %v1989_v15 = vpop.f32.mrb[199].mxu0  ;;  %v3435_v16 = vld [vmem:[#allocation2 + $0xbb8] sm:$0xff]  ;;  %v2270_v18 = vpop.f32.mrb[199].mxu1  ;;  %4274 = vst [vmem:[%s6666_s3 + $0xc20] sm:$0xff] %v3882_v12  ;;  %4276 = vst [vmem:[%s6666_s3 + $0xc30] sm:$0xff] %v3884_v38 }
 0x26c   :  { %v3869_v1 = vadd.f32 %v5805_v43, %v3435_v16  ;;  %3056 = vst.msk [vmem:[#allocation2 + $0xc38] sm:$0xff] %vm26_vm1, %v2663_v13  ;;  %4275 = vst [vmem:[%s6666_s3 + $0xc28] sm:$0xff] %v3883_v17 }
 0x26d   :  { %v3443_v5 = vld [vmem:[#allocation2 + $0xbf8] sm:$0xff] }
 0x26e   :  { %4261 = vst.msk [vmem:[%s6666_s3 + $0xbb8] sm:$0xff] %vm26_vm1, %v3869_v1  ;;  %v3877_v4 = vadd.f32 %v5805_v43, %v3443_v5 }
 0x270   :  { %4269 = vst.msk [vmem:[%s6666_s3 + $0xbf8] sm:$0xff] %vm26_vm1, %v3877_v4 }
 0x273   :  { %v3451_v8 = vld [vmem:[#allocation2 + $0xc38] sm:$0xff] }
 0x274   :  { %v3885_v19 = vadd.f32 %v5805_v43, %v3451_v8 }
 0x276   :  { %4277 = vst.msk [vmem:[%s6666_s3 + $0xc38] sm:$0xff] %vm26_vm1, %v3885_v19 }

// kernel: vae_forward.21
= control target key start
LH: loop header
LB: loop body
LE: loop exit
PB: predicated region body
PF: predicated region fallthrough
CT: control target
= control target key end

     0   :  { %vm2066_vm0 = vcmask 121856   ;;  %s5700_s0 = inlined_call_operand.vmem [shape: f32[2048,15], index: 0, kind: input, shape index: {}]   ;;  %s5701_s1 = inlined_call_operand.vmem [shape: f32[1,15], index: 1, kind: input, shape index: {}]   ;;  %s5702_s2 = inlined_call_operand.vmem [shape: f32[2048,15], index: 2, kind: output, shape index: {}]  }
   0x1   :  { %v11_v0 = vld [vmem:[%s5700_s0] sm:$0xff]  ;;  %v12_v2 = vld [vmem:[%s5700_s0 + $0x8] sm:$0xff]  ;;  %v13_v5 = vld [vmem:[%s5700_s0 + $0x10] sm:$0xff] }
   0x2   :  { %v3633_v1 = vld [vmem:[%s5701_s1] ss:$0 sm:$0xff]  ;;  %v14_v6 = vld [vmem:[%s5700_s0 + $0x18] sm:$0xff]  ;;  %v16_v11 = vld [vmem:[%s5700_s0 + $0x28] sm:$0xff] }
   0x3   :  { %v274_v3 = vadd.f32 %v3633_v1, %v11_v0  ;;  %v275_v4 = vadd.f32 %v3633_v1, %v12_v2  ;;  %v15_v7 = vld [vmem:[%s5700_s0 + $0x20] sm:$0xff]  ;;  %v276_v8 = vadd.f32 %v3633_v1, %v13_v5  ;;  %v277_v9 = vadd.f32 %v3633_v1, %v14_v6  ;;  %v17_v12 = vld [vmem:[%s5700_s0 + $0x30] sm:$0xff]  ;;  %v18_v13 = vld [vmem:[%s5700_s0 + $0x38] sm:$0xff] }
   0x4   :  { %v278_v10 = vadd.f32 %v3633_v1, %v15_v7  ;;  %v279_v16 = vadd.f32 %v3633_v1, %v16_v11  ;;  %v280_v17 = vadd.f32 %v3633_v1, %v17_v12  ;;  %v19_v18 = vld [vmem:[%s5700_s0 + $0x40] sm:$0xff]  ;;  %v20_v19 = vld [vmem:[%s5700_s0 + $0x48] sm:$0xff]  ;;  %v281_v22 = vadd.f32 %v3633_v1, %v18_v13  ;;  %v21_v25 = vld [vmem:[%s5700_s0 + $0x50] sm:$0xff] }
   0x5   :  { %v2328_v14 = vmul.f32 -1.442695, %v274_v3  ;;  %v2329_v15 = vmul.f32 -1.442695, %v275_v4  ;;  %v2330_v20 = vmul.f32 -1.442695, %v276_v8  ;;  %v282_v24 = vadd.f32 %v3633_v1, %v19_v18 }
   0x6   :  { %v2331_v21 = vmul.f32 -1.442695, %v277_v9  ;;  %v2332_v23 = vmul.f32 -1.442695, %v278_v10  ;;  %v22_v26 = vld [vmem:[%s5700_s0 + $0x58] sm:$0xff]  ;;  %v283_v28 = vadd.f32 %v3633_v1, %v20_v19  ;;  %v23_v29 = vld [vmem:[%s5700_s0 + $0x60] sm:$0xff]  ;;  %v284_v31 = vadd.f32 %v3633_v1, %v21_v25 }
   0x7   :  { %2584 = vpow2.f32 %v2328_v14  ;;  %v2333_v27 = vmul.f32 -1.442695, %v279_v16  ;;  %v2334_v30 = vmul.f32 -1.442695, %v280_v17  ;;  %v2335_v32 = vmul.f32 -1.442695, %v281_v22 }
   0x8   :  { %2586 = vpow2.f32 %v2329_v15  ;;  %v285_v33 = vadd.f32 %v3633_v1, %v22_v26  ;;  %v2336_v34 = vmul.f32 -1.442695, %v282_v24  ;;  %v286_v35 = vadd.f32 %v3633_v1, %v23_v29  ;;  %v24_v51 = vld [vmem:[%s5700_s0 + $0x68] sm:$0xff]  ;;  %v25_v54 = vld [vmem:[%s5700_s0 + $0x70] sm:$0xff]  ;;  %v26_v57 = vld [vmem:[%s5700_s0 + $0x78] sm:$0xff] }
   0x9   :  { %2588 = vpow2.f32 %v2330_v20  ;;  %v2337_v36 = vmul.f32 -1.442695, %v283_v28  ;;  %v2338_v37 = vmul.f32 -1.442695, %v284_v31  ;;  %v287_v60 = vadd.f32 %v3633_v1, %v24_v51  ;;  %v27_v61 = vld [vmem:[%s5700_s0 + $0x80] sm:$0xff]  ;;  %v28_v2 = vld [vmem:[%s5700_s0 + $0x88] sm:$0xff] }
   0xa   :  { %2590 = vpow2.f32 %v2331_v21  ;;  %v2339_v38 = vmul.f32 -1.442695, %v285_v33  ;;  %v2340_v39 = vmul.f32 -1.442695, %v286_v35  ;;  %v288_v0 = vadd.f32 %v3633_v1, %v25_v54  ;;  %v29_v6 = vld [vmem:[%s5700_s0 + $0x90] sm:$0xff]  ;;  %v30_v10 = vld [vmem:[%s5700_s0 + $0x98] sm:$0xff] }
   0xb   :  { %2592 = vpow2.f32 %v2332_v23  ;;  %v289_v5 = vadd.f32 %v3633_v1, %v26_v57  ;;  %v290_v9 = vadd.f32 %v3633_v1, %v27_v61  ;;  %v2341_v13 = vmul.f32 -1.442695, %v287_v60  ;;  %v31_v15 = vld [vmem:[%s5700_s0 + $0xa0] sm:$0xff]  ;;  %v32_v20 = vld [vmem:[%s5700_s0 + $0xa8] sm:$0xff]  ;;  %v33_v24 = vld [vmem:[%s5700_s0 + $0xb0] sm:$0xff] }
   0xc   :  { %2594 = vpow2.f32 %v2333_v27  ;;  %v291_v14 = vadd.f32 %v3633_v1, %v28_v2  ;;  %v2342_v18 = vmul.f32 -1.442695, %v288_v0  ;;  %v292_v19 = vadd.f32 %v3633_v1, %v29_v6  ;;  %v34_v28 = vld [vmem:[%s5700_s0 + $0xb8] sm:$0xff] }
   0xd   :  { %2596 = vpow2.f32 %v2334_v30  ;;  %v2343_v22 = vmul.f32 -1.442695, %v289_v5  ;;  %v293_v23 = vadd.f32 %v3633_v1, %v30_v10  ;;  %v2344_v26 = vmul.f32 -1.442695, %v290_v9  ;;  %v38_v6 = vld [vmem:[%s5700_s0 + $0xd8] sm:$0xff]  ;;  %v39_v9 = vld [vmem:[%s5700_s0 + $0xe0] sm:$0xff] }
   0xe   :  { %2598 = vpow2.f32 %v2335_v32  ;;  %v294_v27 = vadd.f32 %v3633_v1, %v31_v15  ;;  %v2345_v30 = vmul.f32 -1.442695, %v291_v14  ;;  %v295_v31 = vadd.f32 %v3633_v1, %v32_v20  ;;  %v35_v32 = vld [vmem:[%s5700_s0 + $0xc0] sm:$0xff] }
   0xf   :  { %2600 = vpow2.f32 %v2336_v34  ;;  %v2346_v34 = vmul.f32 -1.442695, %v292_v19  ;;  %v296_v35 = vadd.f32 %v3633_v1, %v33_v24  ;;  %v302_v20 = vadd.f32 %v3633_v1, %v39_v9 }
  0x10   :  { %2602 = vpow2.f32 %v2337_v36  ;;  %v36_v36 = vld [vmem:[%s5700_s0 + $0xc8] sm:$0xff] }
  0x11   :  { %v2585_v40 = vpop.eup %2584  ;;  %2604 = vpow2.f32 %v2338_v37 }
  0x12   :  { %v2587_v41 = vpop.eup %2586  ;;  %v1298_v42 = vadd.f32 1.0, %v2585_v40  ;;  %2606 = vpow2.f32 %v2339_v38  ;;  %v2347_v38 = vmul.f32 -1.442695, %v293_v23 }
  0x13   :  { %v2589_v43 = vpop.eup %2588  ;;  %v1299_v44 = vadd.f32 1.0, %v2587_v41  ;;  %2608 = vpow2.f32 %v2340_v39  ;;  %v297_v39 = vadd.f32 %v3633_v1, %v34_v28  ;;  %v2348_v41 = vmul.f32 -1.442695, %v294_v27 }
  0x14   :  { %v2591_v45 = vpop.eup %2590  ;;  %2610 = vrcp.f32 %v1298_v42  ;;  %v1300_v46 = vadd.f32 1.0, %v2589_v43  ;;  %v298_v42 = vadd.f32 %v3633_v1, %v35_v32 }
  0x15   :  { %v2593_v47 = vpop.eup %2592  ;;  %2612 = vrcp.f32 %v1299_v44  ;;  %v1301_v48 = vadd.f32 1.0, %v2591_v45  ;;  %v2349_v44 = vmul.f32 -1.442695, %v295_v31  ;;  %v299_v45 = vadd.f32 %v3633_v1, %v36_v36 }
  0x16   :  { %v2595_v49 = vpop.eup %2594  ;;  %2614 = vrcp.f32 %v1300_v46  ;;  %v1302_v50 = vadd.f32 1.0, %v2593_v47  ;;  %v2350_v47 = vmul.f32 -1.442695, %v296_v35  ;;  %v2352_v51 = vmul.f32 -1.442695, %v298_v42  ;;  %v45_v35 = vld [vmem:[%s5700_s0 + $0x110] sm:$0xff] }
  0x17   :  { %v2597_v52 = vpop.eup %2596  ;;  %2616 = vrcp.f32 %v1301_v48  ;;  %v1303_v53 = vadd.f32 1.0, %v2595_v49  ;;  %v2351_v49 = vmul.f32 -1.442695, %v297_v39  ;;  %v46_v39 = vld [vmem:[%s5700_s0 + $0x118] sm:$0xff] }
  0x18   :  { %v2599_v55 = vpop.eup %2598  ;;  %2618 = vrcp.f32 %v1302_v50  ;;  %v1304_v56 = vadd.f32 1.0, %v2597_v52 }
  0x19   :  { %v2601_v58 = vpop.eup %2600  ;;  %2620 = vrcp.f32 %v1303_v53  ;;  %v1305_v59 = vadd.f32 1.0, %v2599_v55  ;;  %v2353_v53 = vmul.f32 -1.442695, %v299_v45 }
  0x1a   :  { %v2603_v62 = vpop.eup %2602  ;;  %2622 = vrcp.f32 %v1304_v56  ;;  %v1306_v63 = vadd.f32 1.0, %v2601_v58 }
  0x1b   :  { %v2605_v3 = vpop.eup %2604  ;;  %2624 = vrcp.f32 %v1305_v59  ;;  %v1307_v4 = vadd.f32 1.0, %v2603_v62 }
  0x1c   :  { %v2607_v7 = vpop.eup %2606  ;;  %2626 = vrcp.f32 %v1306_v63  ;;  %v1308_v8 = vadd.f32 1.0, %v2605_v3  ;;  %v37_v3 = vld [vmem:[%s5700_s0 + $0xd0] sm:$0xff] }
  0x1d   :  { %v2609_v11 = vpop.eup %2608  ;;  %2628 = vrcp.f32 %v1307_v4  ;;  %v1309_v12 = vadd.f32 1.0, %v2607_v7 }
  0x1e   :  { %v2611_v16 = vpop.eup %2610  ;;  %2630 = vrcp.f32 %v1308_v8  ;;  %v1310_v17 = vadd.f32 1.0, %v2609_v11 }
  0x1f   :  { %v2613_v21 = vpop.eup %2612  ;;  %2067 = vst.msk [vmem:[%s5702_s2] sm:$0xff] %vm2066_vm0, %v2611_v16  ;;  %2632 = vrcp.f32 %v1309_v12  ;;  %v300_v12 = vadd.f32 %v3633_v1, %v37_v3  ;;  %v301_v16 = vadd.f32 %v3633_v1, %v38_v6 }
  0x20   :  { %v2615_v25 = vpop.eup %2614  ;;  %2068 = vst.msk [vmem:[%s5702_s2 + $0x8] sm:$0xff] %vm2066_vm0, %v2613_v21  ;;  %2634 = vrcp.f32 %v1310_v17  ;;  %v41_v17 = vld [vmem:[%s5700_s0 + $0xf0] sm:$0xff]  ;;  %v42_v21 = vld [vmem:[%s5700_s0 + $0xf8] sm:$0xff] }
  0x21   :  { %v2617_v29 = vpop.eup %2616  ;;  %2069 = vst.msk [vmem:[%s5702_s2 + $0x10] sm:$0xff] %vm2066_vm0, %v2615_v25  ;;  %2636 = vpow2.f32 %v2341_v13  ;;  %v40_v13 = vld [vmem:[%s5700_s0 + $0xe8] sm:$0xff]  ;;  %v43_v25 = vld [vmem:[%s5700_s0 + $0x100] sm:$0xff]  ;;  %v2354_v28 = vmul.f32 -1.442695, %v300_v12 }
  0x22   :  { %v2619_v33 = vpop.eup %2618  ;;  %2070 = vst.msk [vmem:[%s5702_s2 + $0x18] sm:$0xff] %vm2066_vm0, %v2617_v29  ;;  %2638 = vpow2.f32 %v2342_v18  ;;  %v303_v24 = vadd.f32 %v3633_v1, %v40_v13  ;;  %v304_v29 = vadd.f32 %v3633_v1, %v41_v17 }
  0x23   :  { %v2621_v37 = vpop.eup %2620  ;;  %2071 = vst.msk [vmem:[%s5702_s2 + $0x20] sm:$0xff] %vm2066_vm0, %v2619_v33  ;;  %2640 = vpow2.f32 %v2343_v22  ;;  %v2355_v33 = vmul.f32 -1.442695, %v301_v16 }
  0x24   :  { %v2623_v40 = vpop.eup %2622  ;;  %2072 = vst.msk [vmem:[%s5702_s2 + $0x28] sm:$0xff] %vm2066_vm0, %v2621_v37  ;;  %2642 = vpow2.f32 %v2344_v26  ;;  %v2356_v37 = vmul.f32 -1.442695, %v302_v20  ;;  %v2358_v45 = vmul.f32 -1.442695, %v304_v29 }
  0x25   :  { %v2625_v43 = vpop.eup %2624  ;;  %2073 = vst.msk [vmem:[%s5702_s2 + $0x30] sm:$0xff] %vm2066_vm0, %v2623_v40  ;;  %2644 = vpow2.f32 %v2345_v30  ;;  %v44_v30 = vld [vmem:[%s5700_s0 + $0x108] sm:$0xff] }
  0x26   :  { %v2627_v46 = vpop.eup %2626  ;;  %2074 = vst.msk [vmem:[%s5702_s2 + $0x38] sm:$0xff] %vm2066_vm0, %v2625_v43  ;;  %2646 = vpow2.f32 %v2346_v34  ;;  %v305_v34 = vadd.f32 %v3633_v1, %v42_v21  ;;  %v307_v42 = vadd.f32 %v3633_v1, %v44_v30  ;;  %v47_v43 = vld [vmem:[%s5700_s0 + $0x120] sm:$0xff] }
  0x27   :  { %v2629_v48 = vpop.eup %2628  ;;  %2075 = vst.msk [vmem:[%s5702_s2 + $0x40] sm:$0xff] %vm2066_vm0, %v2627_v46  ;;  %2648 = vpow2.f32 %v2347_v38  ;;  %v306_v38 = vadd.f32 %v3633_v1, %v43_v25  ;;  %v308_v46 = vadd.f32 %v3633_v1, %v45_v35  ;;  %v51_v21 = vld [vmem:[%s5700_s0 + $0x140] sm:$0xff] }
  0x28   :  { %v2631_v50 = vpop.eup %2630  ;;  %2076 = vst.msk [vmem:[%s5702_s2 + $0x48] sm:$0xff] %vm2066_vm0, %v2629_v48  ;;  %2650 = vpow2.f32 %v2348_v41  ;;  %v2357_v41 = vmul.f32 -1.442695, %v303_v24  ;;  %v52_v24 = vld [vmem:[%s5700_s0 + $0x148] sm:$0xff] }
  0x29   :  { %v2633_v52 = vpop.eup %2632  ;;  %2077 = vst.msk [vmem:[%s5702_s2 + $0x50] sm:$0xff] %vm2066_vm0, %v2631_v50  ;;  %2652 = vpow2.f32 %v2349_v44  ;;  %v309_v50 = vadd.f32 %v3633_v1, %v46_v39  ;;  %v315_v35 = vadd.f32 %v3633_v1, %v52_v24 }
  0x2a   :  { %v2635_v54 = vpop.eup %2634  ;;  %2078 = vst.msk [vmem:[%s5702_s2 + $0x58] sm:$0xff] %vm2066_vm0, %v2633_v52  ;;  %2654 = vpow2.f32 %v2350_v47  ;;  %v48_v47 = vld [vmem:[%s5700_s0 + $0x128] sm:$0xff] }
  0x2b   :  { %v2637_v55 = vpop.eup %2636  ;;  %2079 = vst.msk [vmem:[%s5702_s2 + $0x60] sm:$0xff] %vm2066_vm0, %v2635_v54  ;;  %2656 = vpow2.f32 %v2351_v49  ;;  %v2359_v49 = vmul.f32 -1.442695, %v305_v34  ;;  %v310_v54 = vadd.f32 %v3633_v1, %v47_v43 }
  0x2c   :  { %v2639_v56 = vpop.eup %2638  ;;  %v1311_v57 = vadd.f32 1.0, %v2637_v55  ;;  %2658 = vpow2.f32 %v2352_v51  ;;  %v49_v51 = vld [vmem:[%s5700_s0 + $0x130] sm:$0xff] }
  0x2d   :  { %v2641_v58 = vpop.eup %2640  ;;  %v1312_v59 = vadd.f32 1.0, %v2639_v56  ;;  %2660 = vpow2.f32 %v2353_v53  ;;  %v2360_v53 = vmul.f32 -1.442695, %v306_v38  ;;  %v2361_v56 = vmul.f32 -1.442695, %v307_v42 }
  0x2e   :  { %v2643_v60 = vpop.eup %2642  ;;  %2662 = vrcp.f32 %v1311_v57  ;;  %v1313_v61 = vadd.f32 1.0, %v2641_v58  ;;  %v311_v57 = vadd.f32 %v3633_v1, %v48_v47 }
  0x2f   :  { %v2645_v62 = vpop.eup %2644  ;;  %2664 = vrcp.f32 %v1312_v59  ;;  %v1314_v63 = vadd.f32 1.0, %v2643_v60  ;;  %v2362_v59 = vmul.f32 -1.442695, %v308_v46  ;;  %v312_v60 = vadd.f32 %v3633_v1, %v49_v51 }
  0x30   :  { %v2647_v0 = vpop.eup %2646  ;;  %2666 = vrcp.f32 %v1313_v61  ;;  %v1315_v2 = vadd.f32 1.0, %v2645_v62  ;;  %v2363_v62 = vmul.f32 -1.442695, %v309_v50  ;;  %v2365_v3 = vmul.f32 -1.442695, %v311_v57  ;;  %v58_v50 = vld [vmem:[%s5700_s0 + $0x178] sm:$0xff] }
  0x31   :  { %v2649_v4 = vpop.eup %2648  ;;  %2668 = vrcp.f32 %v1314_v63  ;;  %v1316_v5 = vadd.f32 1.0, %v2647_v0  ;;  %v2364_v0 = vmul.f32 -1.442695, %v310_v54  ;;  %v59_v54 = vld [vmem:[%s5700_s0 + $0x180] sm:$0xff] }
  0x32   :  { %v2651_v7 = vpop.eup %2650  ;;  %2670 = vrcp.f32 %v1315_v2  ;;  %v1317_v8 = vadd.f32 1.0, %v2649_v4 }
  0x33   :  { %v2653_v10 = vpop.eup %2652  ;;  %2672 = vrcp.f32 %v1316_v5  ;;  %v1318_v11 = vadd.f32 1.0, %v2651_v7  ;;  %v2366_v5 = vmul.f32 -1.442695, %v312_v60 }
  0x34   :  { %v2655_v14 = vpop.eup %2654  ;;  %2674 = vrcp.f32 %v1317_v8  ;;  %v1319_v15 = vadd.f32 1.0, %v2653_v10 }
  0x35   :  { %v2657_v18 = vpop.eup %2656  ;;  %2676 = vrcp.f32 %v1318_v11  ;;  %v1320_v19 = vadd.f32 1.0, %v2655_v14 }
  0x36   :  { %v2659_v22 = vpop.eup %2658  ;;  %2678 = vrcp.f32 %v1319_v15  ;;  %v1321_v23 = vadd.f32 1.0, %v2657_v18  ;;  %v50_v18 = vld [vmem:[%s5700_s0 + $0x138] sm:$0xff] }
  0x37   :  { %v2661_v26 = vpop.eup %2660  ;;  %2680 = vrcp.f32 %v1320_v19  ;;  %v1322_v27 = vadd.f32 1.0, %v2659_v22 }
  0x38   :  { %v2663_v31 = vpop.eup %2662  ;;  %2682 = vrcp.f32 %v1321_v23  ;;  %v1323_v32 = vadd.f32 1.0, %v2661_v26 }
  0x39   :  { %v2665_v36 = vpop.eup %2664  ;;  %2080 = vst.msk [vmem:[%s5702_s2 + $0x68] sm:$0xff] %vm2066_vm0, %v2663_v31  ;;  %2684 = vrcp.f32 %v1322_v27  ;;  %v313_v27 = vadd.f32 %v3633_v1, %v50_v18  ;;  %v314_v31 = vadd.f32 %v3633_v1, %v51_v21 }
  0x3a   :  { %v2667_v40 = vpop.eup %2666  ;;  %2081 = vst.msk [vmem:[%s5702_s2 + $0x70] sm:$0xff] %vm2066_vm0, %v2665_v36  ;;  %2686 = vrcp.f32 %v1323_v32  ;;  %v54_v32 = vld [vmem:[%s5700_s0 + $0x158] sm:$0xff]  ;;  %v55_v36 = vld [vmem:[%s5700_s0 + $0x160] sm:$0xff] }
  0x3b   :  { %v2669_v44 = vpop.eup %2668  ;;  %2082 = vst.msk [vmem:[%s5702_s2 + $0x78] sm:$0xff] %vm2066_vm0, %v2667_v40  ;;  %2688 = vpow2.f32 %v2354_v28  ;;  %v53_v28 = vld [vmem:[%s5700_s0 + $0x150] sm:$0xff]  ;;  %v56_v40 = vld [vmem:[%s5700_s0 + $0x168] sm:$0xff]  ;;  %v2367_v43 = vmul.f32 -1.442695, %v313_v27 }
  0x3c   :  { %v2671_v48 = vpop.eup %2670  ;;  %2083 = vst.msk [vmem:[%s5702_s2 + $0x80] sm:$0xff] %vm2066_vm0, %v2669_v44  ;;  %2690 = vpow2.f32 %v2355_v33  ;;  %v316_v39 = vadd.f32 %v3633_v1, %v53_v28  ;;  %v317_v44 = vadd.f32 %v3633_v1, %v54_v32 }
  0x3d   :  { %v2673_v52 = vpop.eup %2672  ;;  %2084 = vst.msk [vmem:[%s5702_s2 + $0x88] sm:$0xff] %vm2066_vm0, %v2671_v48  ;;  %2692 = vpow2.f32 %v2356_v37  ;;  %v2368_v48 = vmul.f32 -1.442695, %v314_v31 }
  0x3e   :  { %v2675_v55 = vpop.eup %2674  ;;  %2085 = vst.msk [vmem:[%s5702_s2 + $0x90] sm:$0xff] %vm2066_vm0, %v2673_v52  ;;  %2694 = vpow2.f32 %v2357_v41  ;;  %v2369_v52 = vmul.f32 -1.442695, %v315_v35  ;;  %v2371_v60 = vmul.f32 -1.442695, %v317_v44 }
  0x3f   :  { %v2677_v58 = vpop.eup %2676  ;;  %2086 = vst.msk [vmem:[%s5702_s2 + $0x98] sm:$0xff] %vm2066_vm0, %v2675_v55  ;;  %2696 = vpow2.f32 %v2358_v45  ;;  %v57_v45 = vld [vmem:[%s5700_s0 + $0x170] sm:$0xff] }
  0x40   :  { %v2679_v61 = vpop.eup %2678  ;;  %2087 = vst.msk [vmem:[%s5702_s2 + $0xa0] sm:$0xff] %vm2066_vm0, %v2677_v58  ;;  %2698 = vpow2.f32 %v2359_v49  ;;  %v318_v49 = vadd.f32 %v3633_v1, %v55_v36  ;;  %v320_v57 = vadd.f32 %v3633_v1, %v57_v45  ;;  %v60_v58 = vld [vmem:[%s5700_s0 + $0x188] sm:$0xff] }
  0x41   :  { %v2681_v63 = vpop.eup %2680  ;;  %2088 = vst.msk [vmem:[%s5702_s2 + $0xa8] sm:$0xff] %vm2066_vm0, %v2679_v61  ;;  %2700 = vpow2.f32 %v2360_v53  ;;  %v319_v53 = vadd.f32 %v3633_v1, %v56_v40  ;;  %v321_v61 = vadd.f32 %v3633_v1, %v58_v50  ;;  %v64_v36 = vld [vmem:[%s5700_s0 + $0x1a8] sm:$0xff] }
  0x42   :  { %v2683_v2 = vpop.eup %2682  ;;  %2089 = vst.msk [vmem:[%s5702_s2 + $0xb0] sm:$0xff] %vm2066_vm0, %v2681_v63  ;;  %2702 = vpow2.f32 %v2361_v56  ;;  %v2370_v56 = vmul.f32 -1.442695, %v316_v39  ;;  %v65_v39 = vld [vmem:[%s5700_s0 + $0x1b0] sm:$0xff] }
  0x43   :  { %v2685_v4 = vpop.eup %2684  ;;  %2090 = vst.msk [vmem:[%s5702_s2 + $0xb8] sm:$0xff] %vm2066_vm0, %v2683_v2  ;;  %2704 = vpow2.f32 %v2362_v59  ;;  %v322_v2 = vadd.f32 %v3633_v1, %v59_v54  ;;  %v328_v50 = vadd.f32 %v3633_v1, %v65_v39 }
  0x44   :  { %v2687_v6 = vpop.eup %2686  ;;  %2091 = vst.msk [vmem:[%s5702_s2 + $0xc0] sm:$0xff] %vm2066_vm0, %v2685_v4  ;;  %2706 = vpow2.f32 %v2363_v62  ;;  %v61_v62 = vld [vmem:[%s5700_s0 + $0x190] sm:$0xff] }
  0x45   :  { %v2689_v7 = vpop.eup %2688  ;;  %2092 = vst.msk [vmem:[%s5702_s2 + $0xc8] sm:$0xff] %vm2066_vm0, %v2687_v6  ;;  %2708 = vpow2.f32 %v2364_v0  ;;  %v2372_v0 = vmul.f32 -1.442695, %v318_v49  ;;  %v323_v6 = vadd.f32 %v3633_v1, %v60_v58 }
  0x46   :  { %v2691_v8 = vpop.eup %2690  ;;  %v1324_v9 = vadd.f32 1.0, %v2689_v7  ;;  %2710 = vpow2.f32 %v2365_v3  ;;  %v62_v3 = vld [vmem:[%s5700_s0 + $0x198] sm:$0xff] }
  0x47   :  { %v2693_v10 = vpop.eup %2692  ;;  %v1325_v11 = vadd.f32 1.0, %v2691_v8  ;;  %2712 = vpow2.f32 %v2366_v5  ;;  %v2373_v5 = vmul.f32 -1.442695, %v319_v53  ;;  %v2374_v8 = vmul.f32 -1.442695, %v320_v57 }
  0x48   :  { %v2695_v12 = vpop.eup %2694  ;;  %2714 = vrcp.f32 %v1324_v9  ;;  %v1326_v13 = vadd.f32 1.0, %v2693_v10  ;;  %v324_v9 = vadd.f32 %v3633_v1, %v61_v62 }
  0x49   :  { %v2697_v14 = vpop.eup %2696  ;;  %2716 = vrcp.f32 %v1325_v11  ;;  %v1327_v15 = vadd.f32 1.0, %v2695_v12  ;;  %v2375_v11 = vmul.f32 -1.442695, %v321_v61  ;;  %v325_v12 = vadd.f32 %v3633_v1, %v62_v3 }
  0x4a   :  { %v2699_v16 = vpop.eup %2698  ;;  %2718 = vrcp.f32 %v1326_v13  ;;  %v1328_v17 = vadd.f32 1.0, %v2697_v14  ;;  %v2376_v14 = vmul.f32 -1.442695, %v322_v2  ;;  %v2378_v18 = vmul.f32 -1.442695, %v324_v9  ;;  %v71_v2 = vld [vmem:[%s5700_s0 + $0x1e0] sm:$0xff] }
  0x4b   :  { %v2701_v19 = vpop.eup %2700  ;;  %2720 = vrcp.f32 %v1327_v15  ;;  %v1329_v20 = vadd.f32 1.0, %v2699_v16  ;;  %v2377_v16 = vmul.f32 -1.442695, %v323_v6  ;;  %v72_v6 = vld [vmem:[%s5700_s0 + $0x1e8] sm:$0xff] }
  0x4c   :  { %v2703_v22 = vpop.eup %2702  ;;  %2722 = vrcp.f32 %v1328_v17  ;;  %v1330_v23 = vadd.f32 1.0, %v2701_v19 }
  0x4d   :  { %v2705_v25 = vpop.eup %2704  ;;  %2724 = vrcp.f32 %v1329_v20  ;;  %v1331_v26 = vadd.f32 1.0, %v2703_v22  ;;  %v2379_v20 = vmul.f32 -1.442695, %v325_v12 }
  0x4e   :  { %v2707_v29 = vpop.eup %2706  ;;  %2726 = vrcp.f32 %v1330_v23  ;;  %v1332_v30 = vadd.f32 1.0, %v2705_v25 }
  0x4f   :  { %v2709_v33 = vpop.eup %2708  ;;  %2728 = vrcp.f32 %v1331_v26  ;;  %v1333_v34 = vadd.f32 1.0, %v2707_v29 }
  0x50   :  { %v2711_v37 = vpop.eup %2710  ;;  %2730 = vrcp.f32 %v1332_v30  ;;  %v1334_v38 = vadd.f32 1.0, %v2709_v33  ;;  %v63_v33 = vld [vmem:[%s5700_s0 + $0x1a0] sm:$0xff] }
  0x51   :  { %v2713_v41 = vpop.eup %2712  ;;  %2732 = vrcp.f32 %v1333_v34  ;;  %v1335_v42 = vadd.f32 1.0, %v2711_v37 }
  0x52   :  { %v2715_v46 = vpop.eup %2714  ;;  %2734 = vrcp.f32 %v1334_v38  ;;  %v1336_v47 = vadd.f32 1.0, %v2713_v41 }
  0x53   :  { %v2717_v51 = vpop.eup %2716  ;;  %2093 = vst.msk [vmem:[%s5702_s2 + $0xd0] sm:$0xff] %vm2066_vm0, %v2715_v46  ;;  %2736 = vrcp.f32 %v1335_v42  ;;  %v326_v42 = vadd.f32 %v3633_v1, %v63_v33  ;;  %v327_v46 = vadd.f32 %v3633_v1, %v64_v36 }
  0x54   :  { %v2719_v55 = vpop.eup %2718  ;;  %2094 = vst.msk [vmem:[%s5702_s2 + $0xd8] sm:$0xff] %vm2066_vm0, %v2717_v51  ;;  %2738 = vrcp.f32 %v1336_v47  ;;  %v67_v47 = vld [vmem:[%s5700_s0 + $0x1c0] sm:$0xff]  ;;  %v68_v51 = vld [vmem:[%s5700_s0 + $0x1c8] sm:$0xff] }
  0x55   :  { %v2721_v59 = vpop.eup %2720  ;;  %2095 = vst.msk [vmem:[%s5702_s2 + $0xe0] sm:$0xff] %vm2066_vm0, %v2719_v55  ;;  %2740 = vpow2.f32 %v2367_v43  ;;  %v66_v43 = vld [vmem:[%s5700_s0 + $0x1b8] sm:$0xff]  ;;  %v69_v55 = vld [vmem:[%s5700_s0 + $0x1d0] sm:$0xff]  ;;  %v2380_v58 = vmul.f32 -1.442695, %v326_v42 }
  0x56   :  { %v2723_v63 = vpop.eup %2722  ;;  %2096 = vst.msk [vmem:[%s5702_s2 + $0xe8] sm:$0xff] %vm2066_vm0, %v2721_v59  ;;  %2742 = vpow2.f32 %v2368_v48  ;;  %v329_v54 = vadd.f32 %v3633_v1, %v66_v43  ;;  %v330_v59 = vadd.f32 %v3633_v1, %v67_v47  ;;  %v76_v47 = vld [vmem:[%s5700_s0 + $0x208] sm:$0xff] }
  0x57   :  { %v2725_v4 = vpop.eup %2724  ;;  %2097 = vst.msk [vmem:[%s5702_s2 + $0xf0] sm:$0xff] %vm2066_vm0, %v2723_v63  ;;  %2744 = vpow2.f32 %v2369_v52  ;;  %v2381_v63 = vmul.f32 -1.442695, %v327_v46 }
  0x58   :  { %v2727_v7 = vpop.eup %2726  ;;  %2098 = vst.msk [vmem:[%s5702_s2 + $0xf8] sm:$0xff] %vm2066_vm0, %v2725_v4  ;;  %2746 = vpow2.f32 %v2370_v56  ;;  %v2382_v4 = vmul.f32 -1.442695, %v328_v50  ;;  %v2384_v12 = vmul.f32 -1.442695, %v330_v59  ;;  %v77_v50 = vld [vmem:[%s5700_s0 + $0x210] sm:$0xff] }
  0x59   :  { %v2729_v10 = vpop.eup %2728  ;;  %2099 = vst.msk [vmem:[%s5702_s2 + $0x100] sm:$0xff] %vm2066_vm0, %v2727_v7  ;;  %2748 = vpow2.f32 %v2371_v60  ;;  %v70_v60 = vld [vmem:[%s5700_s0 + $0x1d8] sm:$0xff] }
  0x5a   :  { %v2731_v13 = vpop.eup %2730  ;;  %2100 = vst.msk [vmem:[%s5702_s2 + $0x108] sm:$0xff] %vm2066_vm0, %v2729_v10  ;;  %2750 = vpow2.f32 %v2372_v0  ;;  %v331_v0 = vadd.f32 %v3633_v1, %v68_v51  ;;  %v333_v9 = vadd.f32 %v3633_v1, %v70_v60  ;;  %v73_v10 = vld [vmem:[%s5700_s0 + $0x1f0] sm:$0xff] }
  0x5b   :  { %v2733_v15 = vpop.eup %2732  ;;  %2101 = vst.msk [vmem:[%s5702_s2 + $0x110] sm:$0xff] %vm2066_vm0, %v2731_v13  ;;  %2752 = vpow2.f32 %v2373_v5  ;;  %v332_v5 = vadd.f32 %v3633_v1, %v69_v55  ;;  %v334_v13 = vadd.f32 %v3633_v1, %v71_v2 }
  0x5c   :  { %v2735_v17 = vpop.eup %2734  ;;  %2102 = vst.msk [vmem:[%s5702_s2 + $0x118] sm:$0xff] %vm2066_vm0, %v2733_v15  ;;  %2754 = vpow2.f32 %v2374_v8  ;;  %v2383_v8 = vmul.f32 -1.442695, %v329_v54 }
  0x5d   :  { %v2737_v19 = vpop.eup %2736  ;;  %2103 = vst.msk [vmem:[%s5702_s2 + $0x120] sm:$0xff] %vm2066_vm0, %v2735_v17  ;;  %2756 = vpow2.f32 %v2375_v11  ;;  %v335_v17 = vadd.f32 %v3633_v1, %v72_v6 }
  0x5e   :  { %v2739_v21 = vpop.eup %2738  ;;  %2104 = vst.msk [vmem:[%s5702_s2 + $0x128] sm:$0xff] %vm2066_vm0, %v2737_v19  ;;  %2758 = vpow2.f32 %v2376_v14  ;;  %v74_v14 = vld [vmem:[%s5700_s0 + $0x1f8] sm:$0xff] }
  0x5f   :  { %v2741_v22 = vpop.eup %2740  ;;  %2105 = vst.msk [vmem:[%s5702_s2 + $0x130] sm:$0xff] %vm2066_vm0, %v2739_v21  ;;  %2760 = vpow2.f32 %v2377_v16  ;;  %v2385_v16 = vmul.f32 -1.442695, %v331_v0  ;;  %v336_v21 = vadd.f32 %v3633_v1, %v73_v10 }
  0x60   :  { %v2743_v23 = vpop.eup %2742  ;;  %v1337_v24 = vadd.f32 1.0, %v2741_v22  ;;  %2762 = vpow2.f32 %v2378_v18  ;;  %v75_v18 = vld [vmem:[%s5700_s0 + $0x200] sm:$0xff] }
  0x61   :  { %v2745_v25 = vpop.eup %2744  ;;  %v1338_v26 = vadd.f32 1.0, %v2743_v23  ;;  %2764 = vpow2.f32 %v2379_v20  ;;  %v2386_v20 = vmul.f32 -1.442695, %v332_v5  ;;  %v2387_v23 = vmul.f32 -1.442695, %v333_v9 }
  0x62   :  { %v2747_v27 = vpop.eup %2746  ;;  %2766 = vrcp.f32 %v1337_v24  ;;  %v1339_v28 = vadd.f32 1.0, %v2745_v25  ;;  %v337_v24 = vadd.f32 %v3633_v1, %v74_v14 }
  0x63   :  { %v2749_v29 = vpop.eup %2748  ;;  %2768 = vrcp.f32 %v1338_v26  ;;  %v1340_v30 = vadd.f32 1.0, %v2747_v27  ;;  %v2388_v26 = vmul.f32 -1.442695, %v334_v13  ;;  %v338_v27 = vadd.f32 %v3633_v1, %v75_v18 }
  0x64   :  { %v2751_v31 = vpop.eup %2750  ;;  %2770 = vrcp.f32 %v1339_v28  ;;  %v1341_v32 = vadd.f32 1.0, %v2749_v29  ;;  %v2389_v29 = vmul.f32 -1.442695, %v335_v17  ;;  %v2391_v1 = vmul.f32 -1.442695, %v337_v24  ;;  %v84_v17 = vld [vmem:[%s5700_s0 + $0x248] sm:$0xff] }
  0x65   :  { %v2753_v34 = vpop.eup %2752  ;;  %2772 = vrcp.f32 %v1340_v30  ;;  %v1342_v35 = vadd.f32 1.0, %v2751_v31  ;;  %v2390_v31 = vmul.f32 -1.442695, %v336_v21  ;;  %v85_v21 = vld [vmem:[%s5700_s0 + $0x250] sm:$0xff] }
  0x66   :  { %v2755_v37 = vpop.eup %2754  ;;  %2774 = vrcp.f32 %v1341_v32  ;;  %v1343_v38 = vadd.f32 1.0, %v2753_v34  ;;  %v2392_v34 = vmul.f32 -1.442695, %v338_v27 }
  0x67   :  { %v2757_v40 = vpop.eup %2756  ;;  %2776 = vrcp.f32 %v1342_v35  ;;  %v1344_v41 = vadd.f32 1.0, %v2755_v37 }
  0x68   :  { %v2759_v44 = vpop.eup %2758  ;;  %2778 = vrcp.f32 %v1343_v38  ;;  %v1345_v45 = vadd.f32 1.0, %v2757_v40 }
  0x69   :  { %v2761_v48 = vpop.eup %2760  ;;  %2780 = vrcp.f32 %v1344_v41  ;;  %v1346_v49 = vadd.f32 1.0, %v2759_v44 }
  0x6a   :  { %v2763_v52 = vpop.eup %2762  ;;  %2782 = vrcp.f32 %v1345_v45  ;;  %v1347_v53 = vadd.f32 1.0, %v2761_v48 }
  0x6b   :  { %v2765_v56 = vpop.eup %2764  ;;  %2784 = vrcp.f32 %v1346_v49  ;;  %v1348_v57 = vadd.f32 1.0, %v2763_v52 }
  0x6c   :  { %v2767_v61 = vpop.eup %2766  ;;  %2786 = vrcp.f32 %v1347_v53  ;;  %v1349_v62 = vadd.f32 1.0, %v2765_v56  ;;  %v78_v53 = vld [vmem:[%s5700_s0 + $0x218] sm:$0xff]  ;;  %v4112_v56 = vld [vmem:[%s5701_s1] ss:$0 sm:$0xff] }
  0x6d   :  { %v2769_v3 = vpop.eup %2768  ;;  %2106 = vst.msk [vmem:[%s5702_s2 + $0x138] sm:$0xff] %vm2066_vm0, %v2767_v61  ;;  %2788 = vrcp.f32 %v1348_v57  ;;  %v339_v57 = vadd.f32 %v4112_v56, %v76_v47  ;;  %v340_v61 = vadd.f32 %v4112_v56, %v77_v50  ;;  %v341_v2 = vadd.f32 %v4112_v56, %v78_v53 }
  0x6e   :  { %v2771_v7 = vpop.eup %2770  ;;  %2107 = vst.msk [vmem:[%s5702_s2 + $0x140] sm:$0xff] %vm2066_vm0, %v2769_v3  ;;  %2790 = vrcp.f32 %v1349_v62  ;;  %v80_v62 = vld [vmem:[%s5700_s0 + $0x228] sm:$0xff]  ;;  %v81_v3 = vld [vmem:[%s5700_s0 + $0x230] sm:$0xff] }
  0x6f   :  { %v2773_v11 = vpop.eup %2772  ;;  %2108 = vst.msk [vmem:[%s5702_s2 + $0x148] sm:$0xff] %vm2066_vm0, %v2771_v7  ;;  %2792 = vpow2.f32 %v2380_v58  ;;  %v79_v58 = vld [vmem:[%s5700_s0 + $0x220] sm:$0xff]  ;;  %v82_v7 = vld [vmem:[%s5700_s0 + $0x238] sm:$0xff]  ;;  %v2393_v10 = vmul.f32 -1.442695, %v339_v57 }
  0x70   :  { %v2775_v15 = vpop.eup %2774  ;;  %2109 = vst.msk [vmem:[%s5702_s2 + $0x150] sm:$0xff] %vm2066_vm0, %v2773_v11  ;;  %2794 = vpow2.f32 %v2381_v63  ;;  %v342_v6 = vadd.f32 %v4112_v56, %v79_v58  ;;  %v343_v11 = vadd.f32 %v4112_v56, %v80_v62 }
  0x71   :  { %v2777_v19 = vpop.eup %2776  ;;  %2110 = vst.msk [vmem:[%s5702_s2 + $0x158] sm:$0xff] %vm2066_vm0, %v2775_v15  ;;  %2796 = vpow2.f32 %v2382_v4  ;;  %v2394_v15 = vmul.f32 -1.442695, %v340_v61 }
  0x72   :  { %v2779_v22 = vpop.eup %2778  ;;  %2111 = vst.msk [vmem:[%s5702_s2 + $0x160] sm:$0xff] %vm2066_vm0, %v2777_v19  ;;  %2798 = vpow2.f32 %v2383_v8  ;;  %v2395_v19 = vmul.f32 -1.442695, %v341_v2  ;;  %v2397_v27 = vmul.f32 -1.442695, %v343_v11 }
  0x73   :  { %v2781_v25 = vpop.eup %2780  ;;  %2112 = vst.msk [vmem:[%s5702_s2 + $0x168] sm:$0xff] %vm2066_vm0, %v2779_v22  ;;  %2800 = vpow2.f32 %v2384_v12  ;;  %v83_v12 = vld [vmem:[%s5700_s0 + $0x240] sm:$0xff] }
  0x74   :  { %v2783_v28 = vpop.eup %2782  ;;  %2113 = vst.msk [vmem:[%s5702_s2 + $0x170] sm:$0xff] %vm2066_vm0, %v2781_v25  ;;  %2802 = vpow2.f32 %v2385_v16  ;;  %v344_v16 = vadd.f32 %v4112_v56, %v81_v3  ;;  %v346_v24 = vadd.f32 %v4112_v56, %v83_v12  ;;  %v86_v25 = vld [vmem:[%s5700_s0 + $0x258] sm:$0xff] }
  0x75   :  { %v2785_v30 = vpop.eup %2784  ;;  %2114 = vst.msk [vmem:[%s5702_s2 + $0x178] sm:$0xff] %vm2066_vm0, %v2783_v28  ;;  %2804 = vpow2.f32 %v2386_v20  ;;  %v345_v20 = vadd.f32 %v4112_v56, %v82_v7  ;;  %v347_v28 = vadd.f32 %v4112_v56, %v84_v17  ;;  %v90_v3 = vld [vmem:[%s5700_s0 + $0x278] sm:$0xff] }
  0x76   :  { %v2787_v32 = vpop.eup %2786  ;;  %2115 = vst.msk [vmem:[%s5702_s2 + $0x180] sm:$0xff] %vm2066_vm0, %v2785_v30  ;;  %2806 = vpow2.f32 %v2387_v23  ;;  %v2396_v23 = vmul.f32 -1.442695, %v342_v6  ;;  %v91_v6 = vld [vmem:[%s5700_s0 + $0x280] sm:$0xff] }
  0x77   :  { %v2789_v33 = vpop.eup %2788  ;;  %2116 = vst.msk [vmem:[%s5702_s2 + $0x188] sm:$0xff] %vm2066_vm0, %v2787_v32  ;;  %2808 = vpow2.f32 %v2388_v26  ;;  %v348_v32 = vadd.f32 %v4112_v56, %v85_v21  ;;  %v354_v17 = vadd.f32 %v4112_v56, %v91_v6 }
  0x78   :  { %v2791_v35 = vpop.eup %2790  ;;  %2117 = vst.msk [vmem:[%s5702_s2 + $0x190] sm:$0xff] %vm2066_vm0, %v2789_v33  ;;  %2810 = vpow2.f32 %v2389_v29  ;;  %v87_v29 = vld [vmem:[%s5700_s0 + $0x260] sm:$0xff] }
  0x79   :  { %v2793_v36 = vpop.eup %2792  ;;  %2118 = vst.msk [vmem:[%s5702_s2 + $0x198] sm:$0xff] %vm2066_vm0, %v2791_v35  ;;  %2812 = vpow2.f32 %v2390_v31  ;;  %v2398_v31 = vmul.f32 -1.442695, %v344_v16  ;;  %v349_v35 = vadd.f32 %v4112_v56, %v86_v25 }
  0x7a   :  { %v2795_v37 = vpop.eup %2794  ;;  %v1350_v38 = vadd.f32 1.0, %v2793_v36  ;;  %2814 = vpow2.f32 %v2391_v1  ;;  %v88_v1 = vld [vmem:[%s5700_s0 + $0x268] sm:$0xff] }
  0x7b   :  { %v2797_v39 = vpop.eup %2796  ;;  %v1351_v40 = vadd.f32 1.0, %v2795_v37  ;;  %2816 = vpow2.f32 %v2392_v34  ;;  %v2399_v34 = vmul.f32 -1.442695, %v345_v20  ;;  %v2400_v37 = vmul.f32 -1.442695, %v346_v24 }
  0x7c   :  { %v2799_v41 = vpop.eup %2798  ;;  %2818 = vrcp.f32 %v1350_v38  ;;  %v1352_v42 = vadd.f32 1.0, %v2797_v39  ;;  %v350_v38 = vadd.f32 %v4112_v56, %v87_v29 }
  0x7d   :  { %v2801_v43 = vpop.eup %2800  ;;  %2820 = vrcp.f32 %v1351_v40  ;;  %v1353_v44 = vadd.f32 1.0, %v2799_v41  ;;  %v2401_v40 = vmul.f32 -1.442695, %v347_v28  ;;  %v351_v41 = vadd.f32 %v4112_v56, %v88_v1 }
  0x7e   :  { %v2803_v45 = vpop.eup %2802  ;;  %2822 = vrcp.f32 %v1352_v42  ;;  %v1354_v46 = vadd.f32 1.0, %v2801_v43  ;;  %v2402_v43 = vmul.f32 -1.442695, %v348_v32  ;;  %v2404_v47 = vmul.f32 -1.442695, %v350_v38  ;;  %v97_v32 = vld [vmem:[%s5700_s0 + $0x2b0] sm:$0xff] }
  0x7f   :  { %v2805_v48 = vpop.eup %2804  ;;  %2824 = vrcp.f32 %v1353_v44  ;;  %v1355_v49 = vadd.f32 1.0, %v2803_v45  ;;  %v2403_v45 = vmul.f32 -1.442695, %v349_v35  ;;  %v98_v35 = vld [vmem:[%s5700_s0 + $0x2b8] sm:$0xff] }
  0x80   :  { %v2807_v51 = vpop.eup %2806  ;;  %2826 = vrcp.f32 %v1354_v46  ;;  %v1356_v52 = vadd.f32 1.0, %v2805_v48 }
  0x81   :  { %v2809_v54 = vpop.eup %2808  ;;  %2828 = vrcp.f32 %v1355_v49  ;;  %v1357_v55 = vadd.f32 1.0, %v2807_v51  ;;  %v2405_v49 = vmul.f32 -1.442695, %v351_v41 }
  0x82   :  { %v2811_v59 = vpop.eup %2810  ;;  %2830 = vrcp.f32 %v1356_v52  ;;  %v1358_v60 = vadd.f32 1.0, %v2809_v54 }
  0x83   :  { %v2813_v63 = vpop.eup %2812  ;;  %2832 = vrcp.f32 %v1357_v55  ;;  %v1359_v0 = vadd.f32 1.0, %v2811_v59 }
  0x84   :  { %v2815_v4 = vpop.eup %2814  ;;  %2834 = vrcp.f32 %v1358_v60  ;;  %v1360_v5 = vadd.f32 1.0, %v2813_v63  ;;  %v89_v63 = vld [vmem:[%s5700_s0 + $0x270] sm:$0xff] }
  0x85   :  { %v2817_v8 = vpop.eup %2816  ;;  %2836 = vrcp.f32 %v1359_v0  ;;  %v1361_v9 = vadd.f32 1.0, %v2815_v4 }
  0x86   :  { %v2819_v13 = vpop.eup %2818  ;;  %2838 = vrcp.f32 %v1360_v5  ;;  %v1362_v14 = vadd.f32 1.0, %v2817_v8 }
  0x87   :  { %v2821_v18 = vpop.eup %2820  ;;  %2119 = vst.msk [vmem:[%s5702_s2 + $0x1a0] sm:$0xff] %vm2066_vm0, %v2819_v13  ;;  %2840 = vrcp.f32 %v1361_v9  ;;  %v352_v9 = vadd.f32 %v4112_v56, %v89_v63  ;;  %v353_v13 = vadd.f32 %v4112_v56, %v90_v3 }
  0x88   :  { %v2823_v22 = vpop.eup %2822  ;;  %2120 = vst.msk [vmem:[%s5702_s2 + $0x1a8] sm:$0xff] %vm2066_vm0, %v2821_v18  ;;  %2842 = vrcp.f32 %v1362_v14  ;;  %v93_v14 = vld [vmem:[%s5700_s0 + $0x290] sm:$0xff]  ;;  %v94_v18 = vld [vmem:[%s5700_s0 + $0x298] sm:$0xff] }
  0x89   :  { %v2825_v26 = vpop.eup %2824  ;;  %2121 = vst.msk [vmem:[%s5702_s2 + $0x1b0] sm:$0xff] %vm2066_vm0, %v2823_v22  ;;  %2844 = vpow2.f32 %v2393_v10  ;;  %v92_v10 = vld [vmem:[%s5700_s0 + $0x288] sm:$0xff]  ;;  %v95_v22 = vld [vmem:[%s5700_s0 + $0x2a0] sm:$0xff]  ;;  %v2406_v25 = vmul.f32 -1.442695, %v352_v9 }
  0x8a   :  { %v2827_v30 = vpop.eup %2826  ;;  %2122 = vst.msk [vmem:[%s5702_s2 + $0x1b8] sm:$0xff] %vm2066_vm0, %v2825_v26  ;;  %2846 = vpow2.f32 %v2394_v15  ;;  %v355_v21 = vadd.f32 %v4112_v56, %v92_v10  ;;  %v356_v26 = vadd.f32 %v4112_v56, %v93_v14 }
  0x8b   :  { %v2829_v33 = vpop.eup %2828  ;;  %2123 = vst.msk [vmem:[%s5702_s2 + $0x1c0] sm:$0xff] %vm2066_vm0, %v2827_v30  ;;  %2848 = vpow2.f32 %v2395_v19  ;;  %v2407_v30 = vmul.f32 -1.442695, %v353_v13 }
  0x8c   :  { %v2831_v36 = vpop.eup %2830  ;;  %2124 = vst.msk [vmem:[%s5702_s2 + $0x1c8] sm:$0xff] %vm2066_vm0, %v2829_v33  ;;  %2850 = vpow2.f32 %v2396_v23  ;;  %v2408_v33 = vmul.f32 -1.442695, %v354_v17  ;;  %v2410_v41 = vmul.f32 -1.442695, %v356_v26 }
  0x8d   :  { %v2833_v39 = vpop.eup %2832  ;;  %2125 = vst.msk [vmem:[%s5702_s2 + $0x1d0] sm:$0xff] %vm2066_vm0, %v2831_v36  ;;  %2852 = vpow2.f32 %v2397_v27  ;;  %v96_v27 = vld [vmem:[%s5700_s0 + $0x2a8] sm:$0xff] }
  0x8e   :  { %v2835_v42 = vpop.eup %2834  ;;  %2126 = vst.msk [vmem:[%s5702_s2 + $0x1d8] sm:$0xff] %vm2066_vm0, %v2833_v39  ;;  %2854 = vpow2.f32 %v2398_v31  ;;  %v357_v31 = vadd.f32 %v4112_v56, %v94_v18  ;;  %v359_v38 = vadd.f32 %v4112_v56, %v96_v27  ;;  %v99_v39 = vld [vmem:[%s5700_s0 + $0x2c0] sm:$0xff] }
  0x8f   :  { %v2837_v44 = vpop.eup %2836  ;;  %2127 = vst.msk [vmem:[%s5702_s2 + $0x1e0] sm:$0xff] %vm2066_vm0, %v2835_v42  ;;  %2856 = vpow2.f32 %v2399_v34  ;;  %v358_v34 = vadd.f32 %v4112_v56, %v95_v22  ;;  %v360_v42 = vadd.f32 %v4112_v56, %v97_v32  ;;  %v103_v18 = vld [vmem:[%s5700_s0 + $0x2e0] sm:$0xff] }
  0x90   :  { %v2839_v46 = vpop.eup %2838  ;;  %2128 = vst.msk [vmem:[%s5702_s2 + $0x1e8] sm:$0xff] %vm2066_vm0, %v2837_v44  ;;  %2858 = vpow2.f32 %v2400_v37  ;;  %v2409_v37 = vmul.f32 -1.442695, %v355_v21  ;;  %v104_v21 = vld [vmem:[%s5700_s0 + $0x2e8] sm:$0xff] }
  0x91   :  { %v2841_v48 = vpop.eup %2840  ;;  %2129 = vst.msk [vmem:[%s5702_s2 + $0x1f0] sm:$0xff] %vm2066_vm0, %v2839_v46  ;;  %2860 = vpow2.f32 %v2401_v40  ;;  %v361_v46 = vadd.f32 %v4112_v56, %v98_v35  ;;  %v367_v32 = vadd.f32 %v4112_v56, %v104_v21 }
  0x92   :  { %v2843_v50 = vpop.eup %2842  ;;  %2130 = vst.msk [vmem:[%s5702_s2 + $0x1f8] sm:$0xff] %vm2066_vm0, %v2841_v48  ;;  %2862 = vpow2.f32 %v2402_v43  ;;  %v100_v43 = vld [vmem:[%s5700_s0 + $0x2c8] sm:$0xff] }
  0x93   :  { %v2845_v51 = vpop.eup %2844  ;;  %2131 = vst.msk [vmem:[%s5702_s2 + $0x200] sm:$0xff] %vm2066_vm0, %v2843_v50  ;;  %2864 = vpow2.f32 %v2403_v45  ;;  %v2411_v45 = vmul.f32 -1.442695, %v357_v31  ;;  %v362_v50 = vadd.f32 %v4112_v56, %v99_v39 }
  0x94   :  { %v2847_v52 = vpop.eup %2846  ;;  %v1363_v53 = vadd.f32 1.0, %v2845_v51  ;;  %2866 = vpow2.f32 %v2404_v47  ;;  %v101_v47 = vld [vmem:[%s5700_s0 + $0x2d0] sm:$0xff] }
  0x95   :  { %v2849_v54 = vpop.eup %2848  ;;  %v1364_v55 = vadd.f32 1.0, %v2847_v52  ;;  %2868 = vpow2.f32 %v2405_v49  ;;  %v2412_v49 = vmul.f32 -1.442695, %v358_v34  ;;  %v2413_v52 = vmul.f32 -1.442695, %v359_v38 }
  0x96   :  { %v2851_v57 = vpop.eup %2850  ;;  %2870 = vrcp.f32 %v1363_v53  ;;  %v1365_v58 = vadd.f32 1.0, %v2849_v54  ;;  %v363_v53 = vadd.f32 %v4112_v56, %v100_v43 }
  0x97   :  { %v2853_v59 = vpop.eup %2852  ;;  %2872 = vrcp.f32 %v1364_v55  ;;  %v1366_v60 = vadd.f32 1.0, %v2851_v57  ;;  %v2414_v55 = vmul.f32 -1.442695, %v360_v42  ;;  %v364_v57 = vadd.f32 %v4112_v56, %v101_v47 }
  0x98   :  { %v2855_v61 = vpop.eup %2854  ;;  %2874 = vrcp.f32 %v1365_v58  ;;  %v1367_v62 = vadd.f32 1.0, %v2853_v59  ;;  %v2415_v59 = vmul.f32 -1.442695, %v361_v46  ;;  %v2417_v63 = vmul.f32 -1.442695, %v363_v53  ;;  %v110_v46 = vld [vmem:[%s5700_s0 + $0x318] sm:$0xff] }
  0x99   :  { %v2857_v0 = vpop.eup %2856  ;;  %2876 = vrcp.f32 %v1366_v60  ;;  %v1368_v2 = vadd.f32 1.0, %v2855_v61  ;;  %v2416_v61 = vmul.f32 -1.442695, %v362_v50  ;;  %v111_v50 = vld [vmem:[%s5700_s0 + $0x320] sm:$0xff] }
  0x9a   :  { %v2859_v4 = vpop.eup %2858  ;;  %2878 = vrcp.f32 %v1367_v62  ;;  %v1369_v5 = vadd.f32 1.0, %v2857_v0 }
  0x9b   :  { %v2861_v7 = vpop.eup %2860  ;;  %2880 = vrcp.f32 %v1368_v2  ;;  %v1370_v8 = vadd.f32 1.0, %v2859_v4  ;;  %v2418_v2 = vmul.f32 -1.442695, %v364_v57 }
  0x9c   :  { %v2863_v11 = vpop.eup %2862  ;;  %2882 = vrcp.f32 %v1369_v5  ;;  %v1371_v12 = vadd.f32 1.0, %v2861_v7 }
  0x9d   :  { %v2865_v15 = vpop.eup %2864  ;;  %2884 = vrcp.f32 %v1370_v8  ;;  %v1372_v16 = vadd.f32 1.0, %v2863_v11 }
  0x9e   :  { %v2867_v19 = vpop.eup %2866  ;;  %2886 = vrcp.f32 %v1371_v12  ;;  %v1373_v20 = vadd.f32 1.0, %v2865_v15  ;;  %v102_v15 = vld [vmem:[%s5700_s0 + $0x2d8] sm:$0xff] }
  0x9f   :  { %v2869_v23 = vpop.eup %2868  ;;  %2888 = vrcp.f32 %v1372_v16  ;;  %v1374_v24 = vadd.f32 1.0, %v2867_v19 }
  0xa0   :  { %v2871_v28 = vpop.eup %2870  ;;  %2890 = vrcp.f32 %v1373_v20  ;;  %v1375_v29 = vadd.f32 1.0, %v2869_v23 }
  0xa1   :  { %v2873_v1 = vpop.eup %2872  ;;  %2132 = vst.msk [vmem:[%s5702_s2 + $0x208] sm:$0xff] %vm2066_vm0, %v2871_v28  ;;  %2892 = vrcp.f32 %v1374_v24  ;;  %v365_v24 = vadd.f32 %v4112_v56, %v102_v15  ;;  %v366_v28 = vadd.f32 %v4112_v56, %v103_v18 }
  0xa2   :  { %v2875_v36 = vpop.eup %2874  ;;  %2133 = vst.msk [vmem:[%s5702_s2 + $0x210] sm:$0xff] %vm2066_vm0, %v2873_v1  ;;  %2894 = vrcp.f32 %v1375_v29  ;;  %v106_v29 = vld [vmem:[%s5700_s0 + $0x2f8] sm:$0xff]  ;;  %v107_v1 = vld [vmem:[%s5700_s0 + $0x300] sm:$0xff] }
  0xa3   :  { %v2877_v40 = vpop.eup %2876  ;;  %2134 = vst.msk [vmem:[%s5702_s2 + $0x218] sm:$0xff] %vm2066_vm0, %v2875_v36  ;;  %2896 = vpow2.f32 %v2406_v25  ;;  %v105_v25 = vld [vmem:[%s5700_s0 + $0x2f0] sm:$0xff]  ;;  %v108_v36 = vld [vmem:[%s5700_s0 + $0x308] sm:$0xff]  ;;  %v2419_v39 = vmul.f32 -1.442695, %v365_v24 }
  0xa4   :  { %v2879_v44 = vpop.eup %2878  ;;  %2135 = vst.msk [vmem:[%s5702_s2 + $0x220] sm:$0xff] %vm2066_vm0, %v2877_v40  ;;  %2898 = vpow2.f32 %v2407_v30  ;;  %v368_v35 = vadd.f32 %v4112_v56, %v105_v25  ;;  %v369_v40 = vadd.f32 %v4112_v56, %v106_v29 }
  0xa5   :  { %v2881_v48 = vpop.eup %2880  ;;  %2136 = vst.msk [vmem:[%s5702_s2 + $0x228] sm:$0xff] %vm2066_vm0, %v2879_v44  ;;  %2900 = vpow2.f32 %v2408_v33  ;;  %v2420_v44 = vmul.f32 -1.442695, %v366_v28 }
  0xa6   :  { %v2883_v51 = vpop.eup %2882  ;;  %2137 = vst.msk [vmem:[%s5702_s2 + $0x230] sm:$0xff] %vm2066_vm0, %v2881_v48  ;;  %2902 = vpow2.f32 %v2409_v37  ;;  %v2421_v48 = vmul.f32 -1.442695, %v367_v32  ;;  %v2423_v57 = vmul.f32 -1.442695, %v369_v40 }
  0xa7   :  { %v2885_v54 = vpop.eup %2884  ;;  %2138 = vst.msk [vmem:[%s5702_s2 + $0x238] sm:$0xff] %vm2066_vm0, %v2883_v51  ;;  %2904 = vpow2.f32 %v2410_v41  ;;  %v109_v41 = vld [vmem:[%s5700_s0 + $0x310] sm:$0xff] }
  0xa8   :  { %v2887_v58 = vpop.eup %2886  ;;  %2139 = vst.msk [vmem:[%s5702_s2 + $0x240] sm:$0xff] %vm2066_vm0, %v2885_v54  ;;  %2906 = vpow2.f32 %v2411_v45  ;;  %v370_v45 = vadd.f32 %v4112_v56, %v107_v1  ;;  %v372_v53 = vadd.f32 %v4112_v56, %v109_v41  ;;  %v112_v54 = vld [vmem:[%s5700_s0 + $0x328] sm:$0xff] }
  0xa9   :  { %v2889_v60 = vpop.eup %2888  ;;  %2140 = vst.msk [vmem:[%s5702_s2 + $0x248] sm:$0xff] %vm2066_vm0, %v2887_v58  ;;  %2908 = vpow2.f32 %v2412_v49  ;;  %v371_v49 = vadd.f32 %v4112_v56, %v108_v36  ;;  %v373_v58 = vadd.f32 %v4112_v56, %v110_v46  ;;  %v116_v1 = vld [vmem:[%s5700_s0 + $0x348] sm:$0xff] }
  0xaa   :  { %v2891_v62 = vpop.eup %2890  ;;  %2141 = vst.msk [vmem:[%s5702_s2 + $0x250] sm:$0xff] %vm2066_vm0, %v2889_v60  ;;  %2910 = vpow2.f32 %v2413_v52  ;;  %v2422_v52 = vmul.f32 -1.442695, %v368_v35  ;;  %v117_v35 = vld [vmem:[%s5700_s0 + $0x350] sm:$0xff] }
  0xab   :  { %v2893_v0 = vpop.eup %2892  ;;  %2142 = vst.msk [vmem:[%s5702_s2 + $0x258] sm:$0xff] %vm2066_vm0, %v2891_v62  ;;  %2912 = vpow2.f32 %v2414_v55  ;;  %v374_v62 = vadd.f32 %v4112_v56, %v111_v50  ;;  %v380_v46 = vadd.f32 %v4112_v56, %v117_v35 }
  0xac   :  { %v2895_v3 = vpop.eup %2894  ;;  %2143 = vst.msk [vmem:[%s5702_s2 + $0x260] sm:$0xff] %vm2066_vm0, %v2893_v0  ;;  %2914 = vpow2.f32 %v2415_v59  ;;  %v113_v59 = vld [vmem:[%s5700_s0 + $0x330] sm:$0xff] }
  0xad   :  { %v2897_v4 = vpop.eup %2896  ;;  %2144 = vst.msk [vmem:[%s5702_s2 + $0x268] sm:$0xff] %vm2066_vm0, %v2895_v3  ;;  %2916 = vpow2.f32 %v2416_v61  ;;  %v2424_v61 = vmul.f32 -1.442695, %v370_v45  ;;  %v375_v3 = vadd.f32 %v4112_v56, %v112_v54 }
  0xae   :  { %v2899_v5 = vpop.eup %2898  ;;  %v1376_v6 = vadd.f32 1.0, %v2897_v4  ;;  %2918 = vpow2.f32 %v2417_v63  ;;  %v114_v63 = vld [vmem:[%s5700_s0 + $0x338] sm:$0xff] }
  0xaf   :  { %v2901_v7 = vpop.eup %2900  ;;  %v1377_v8 = vadd.f32 1.0, %v2899_v5  ;;  %2920 = vpow2.f32 %v2418_v2  ;;  %v2425_v2 = vmul.f32 -1.442695, %v371_v49  ;;  %v2426_v5 = vmul.f32 -1.442695, %v372_v53 }
  0xb0   :  { %v2903_v9 = vpop.eup %2902  ;;  %2922 = vrcp.f32 %v1376_v6  ;;  %v1378_v10 = vadd.f32 1.0, %v2901_v7  ;;  %v376_v6 = vadd.f32 %v4112_v56, %v113_v59 }
  0xb1   :  { %v2905_v11 = vpop.eup %2904  ;;  %2924 = vrcp.f32 %v1377_v8  ;;  %v1379_v12 = vadd.f32 1.0, %v2903_v9  ;;  %v2427_v8 = vmul.f32 -1.442695, %v373_v58  ;;  %v377_v9 = vadd.f32 %v4112_v56, %v114_v63 }
  0xb2   :  { %v2907_v13 = vpop.eup %2906  ;;  %2926 = vrcp.f32 %v1378_v10  ;;  %v1380_v14 = vadd.f32 1.0, %v2905_v11  ;;  %v2428_v11 = vmul.f32 -1.442695, %v374_v62  ;;  %v2430_v15 = vmul.f32 -1.442695, %v376_v6  ;;  %v123_v62 = vld [vmem:[%s5700_s0 + $0x380] sm:$0xff] }
  0xb3   :  { %v2909_v16 = vpop.eup %2908  ;;  %2928 = vrcp.f32 %v1379_v12  ;;  %v1381_v17 = vadd.f32 1.0, %v2907_v13  ;;  %v2429_v13 = vmul.f32 -1.442695, %v375_v3  ;;  %v124_v3 = vld [vmem:[%s5700_s0 + $0x388] sm:$0xff] }
  0xb4   :  { %v2911_v19 = vpop.eup %2910  ;;  %2930 = vrcp.f32 %v1380_v14  ;;  %v1382_v20 = vadd.f32 1.0, %v2909_v16 }
  0xb5   :  { %v2913_v22 = vpop.eup %2912  ;;  %2932 = vrcp.f32 %v1381_v17  ;;  %v1383_v23 = vadd.f32 1.0, %v2911_v19  ;;  %v2431_v17 = vmul.f32 -1.442695, %v377_v9 }
  0xb6   :  { %v2915_v26 = vpop.eup %2914  ;;  %2934 = vrcp.f32 %v1382_v20  ;;  %v1384_v27 = vadd.f32 1.0, %v2913_v22 }
  0xb7   :  { %v2917_v30 = vpop.eup %2916  ;;  %2936 = vrcp.f32 %v1383_v23  ;;  %v1385_v31 = vadd.f32 1.0, %v2915_v26 }
  0xb8   :  { %v2919_v33 = vpop.eup %2918  ;;  %2938 = vrcp.f32 %v1384_v27  ;;  %v1386_v34 = vadd.f32 1.0, %v2917_v30  ;;  %v115_v30 = vld [vmem:[%s5700_s0 + $0x340] sm:$0xff] }
  0xb9   :  { %v2921_v37 = vpop.eup %2920  ;;  %2940 = vrcp.f32 %v1385_v31  ;;  %v1387_v38 = vadd.f32 1.0, %v2919_v33 }
  0xba   :  { %v2923_v42 = vpop.eup %2922  ;;  %2942 = vrcp.f32 %v1386_v34  ;;  %v1388_v43 = vadd.f32 1.0, %v2921_v37 }
  0xbb   :  { %v2925_v47 = vpop.eup %2924  ;;  %2145 = vst.msk [vmem:[%s5702_s2 + $0x270] sm:$0xff] %vm2066_vm0, %v2923_v42  ;;  %2944 = vrcp.f32 %v1387_v38  ;;  %v378_v38 = vadd.f32 %v4112_v56, %v115_v30  ;;  %v379_v42 = vadd.f32 %v4112_v56, %v116_v1 }
  0xbc   :  { %v2927_v51 = vpop.eup %2926  ;;  %2146 = vst.msk [vmem:[%s5702_s2 + $0x278] sm:$0xff] %vm2066_vm0, %v2925_v47  ;;  %2946 = vrcp.f32 %v1388_v43  ;;  %v119_v43 = vld [vmem:[%s5700_s0 + $0x360] sm:$0xff]  ;;  %v120_v47 = vld [vmem:[%s5700_s0 + $0x368] sm:$0xff] }
  0xbd   :  { %v2929_v55 = vpop.eup %2928  ;;  %2147 = vst.msk [vmem:[%s5702_s2 + $0x280] sm:$0xff] %vm2066_vm0, %v2927_v51  ;;  %2948 = vpow2.f32 %v2419_v39  ;;  %v118_v39 = vld [vmem:[%s5700_s0 + $0x358] sm:$0xff]  ;;  %v121_v51 = vld [vmem:[%s5700_s0 + $0x370] sm:$0xff]  ;;  %v2432_v54 = vmul.f32 -1.442695, %v378_v38 }
  0xbe   :  { %v2931_v60 = vpop.eup %2930  ;;  %2148 = vst.msk [vmem:[%s5702_s2 + $0x288] sm:$0xff] %vm2066_vm0, %v2929_v55  ;;  %2950 = vpow2.f32 %v2420_v44  ;;  %v381_v50 = vadd.f32 %v4112_v56, %v118_v39  ;;  %v382_v55 = vadd.f32 %v4112_v56, %v119_v43 }
  0xbf   :  { %v2933_v0 = vpop.eup %2932  ;;  %2149 = vst.msk [vmem:[%s5702_s2 + $0x290] sm:$0xff] %vm2066_vm0, %v2931_v60  ;;  %2952 = vpow2.f32 %v2421_v48  ;;  %v2433_v60 = vmul.f32 -1.442695, %v379_v42 }
  0xc0   :  { %v2935_v4 = vpop.eup %2934  ;;  %2150 = vst.msk [vmem:[%s5702_s2 + $0x298] sm:$0xff] %vm2066_vm0, %v2933_v0  ;;  %2954 = vpow2.f32 %v2422_v52  ;;  %v2434_v0 = vmul.f32 -1.442695, %v380_v46  ;;  %v2436_v9 = vmul.f32 -1.442695, %v382_v55 }
  0xc1   :  { %v2937_v7 = vpop.eup %2936  ;;  %2151 = vst.msk [vmem:[%s5702_s2 + $0x2a0] sm:$0xff] %vm2066_vm0, %v2935_v4  ;;  %2956 = vpow2.f32 %v2423_v57  ;;  %v122_v57 = vld [vmem:[%s5700_s0 + $0x378] sm:$0xff] }
  0xc2   :  { %v2939_v10 = vpop.eup %2938  ;;  %2152 = vst.msk [vmem:[%s5702_s2 + $0x2a8] sm:$0xff] %vm2066_vm0, %v2937_v7  ;;  %2958 = vpow2.f32 %v2424_v61  ;;  %v383_v61 = vadd.f32 %v4112_v56, %v120_v47  ;;  %v385_v6 = vadd.f32 %v4112_v56, %v122_v57  ;;  %v125_v7 = vld [vmem:[%s5700_s0 + $0x390] sm:$0xff] }
  0xc3   :  { %v2941_v12 = vpop.eup %2940  ;;  %2153 = vst.msk [vmem:[%s5702_s2 + $0x2b0] sm:$0xff] %vm2066_vm0, %v2939_v10  ;;  %2960 = vpow2.f32 %v2425_v2  ;;  %v384_v2 = vadd.f32 %v4112_v56, %v121_v51  ;;  %v386_v10 = vadd.f32 %v4112_v56, %v123_v62  ;;  %v129_v47 = vld [vmem:[%s5700_s0 + $0x3b0] sm:$0xff] }
  0xc4   :  { %v2943_v14 = vpop.eup %2942  ;;  %2154 = vst.msk [vmem:[%s5702_s2 + $0x2b8] sm:$0xff] %vm2066_vm0, %v2941_v12  ;;  %2962 = vpow2.f32 %v2426_v5  ;;  %v2435_v5 = vmul.f32 -1.442695, %v381_v50  ;;  %v130_v50 = vld [vmem:[%s5700_s0 + $0x3b8] sm:$0xff] }
  0xc5   :  { %v2945_v16 = vpop.eup %2944  ;;  %2155 = vst.msk [vmem:[%s5702_s2 + $0x2c0] sm:$0xff] %vm2066_vm0, %v2943_v14  ;;  %2964 = vpow2.f32 %v2427_v8  ;;  %v387_v14 = vadd.f32 %v4112_v56, %v124_v3  ;;  %v393_v62 = vadd.f32 %v4112_v56, %v130_v50 }
  0xc6   :  { %v2947_v18 = vpop.eup %2946  ;;  %2156 = vst.msk [vmem:[%s5702_s2 + $0x2c8] sm:$0xff] %vm2066_vm0, %v2945_v16  ;;  %2966 = vpow2.f32 %v2428_v11  ;;  %v126_v11 = vld [vmem:[%s5700_s0 + $0x398] sm:$0xff] }
  0xc7   :  { %v2949_v19 = vpop.eup %2948  ;;  %2157 = vst.msk [vmem:[%s5702_s2 + $0x2d0] sm:$0xff] %vm2066_vm0, %v2947_v18  ;;  %2968 = vpow2.f32 %v2429_v13  ;;  %v2437_v13 = vmul.f32 -1.442695, %v383_v61  ;;  %v388_v18 = vadd.f32 %v4112_v56, %v125_v7 }
  0xc8   :  { %v2951_v20 = vpop.eup %2950  ;;  %v1389_v21 = vadd.f32 1.0, %v2949_v19  ;;  %2970 = vpow2.f32 %v2430_v15  ;;  %v127_v15 = vld [vmem:[%s5700_s0 + $0x3a0] sm:$0xff] }
  0xc9   :  { %v2953_v22 = vpop.eup %2952  ;;  %v1390_v23 = vadd.f32 1.0, %v2951_v20  ;;  %2972 = vpow2.f32 %v2431_v17  ;;  %v2438_v17 = vmul.f32 -1.442695, %v384_v2  ;;  %v2439_v20 = vmul.f32 -1.442695, %v385_v6 }
  0xca   :  { %v2955_v24 = vpop.eup %2954  ;;  %2974 = vrcp.f32 %v1389_v21  ;;  %v1391_v25 = vadd.f32 1.0, %v2953_v22  ;;  %v389_v21 = vadd.f32 %v4112_v56, %v126_v11 }
  0xcb   :  { %v2957_v26 = vpop.eup %2956  ;;  %2976 = vrcp.f32 %v1390_v23  ;;  %v1392_v27 = vadd.f32 1.0, %v2955_v24  ;;  %v2440_v23 = vmul.f32 -1.442695, %v386_v10  ;;  %v390_v24 = vadd.f32 %v4112_v56, %v127_v15 }
  0xcc   :  { %v2959_v28 = vpop.eup %2958  ;;  %2978 = vrcp.f32 %v1391_v25  ;;  %v1393_v29 = vadd.f32 1.0, %v2957_v26  ;;  %v2441_v26 = vmul.f32 -1.442695, %v387_v14  ;;  %v2443_v30 = vmul.f32 -1.442695, %v389_v21  ;;  %v136_v14 = vld [vmem:[%s5700_s0 + $0x3e8] sm:$0xff] }
  0xcd   :  { %v2961_v31 = vpop.eup %2960  ;;  %2980 = vrcp.f32 %v1392_v27  ;;  %v1394_v32 = vadd.f32 1.0, %v2959_v28  ;;  %v2442_v28 = vmul.f32 -1.442695, %v388_v18  ;;  %v137_v18 = vld [vmem:[%s5700_s0 + $0x3f0] sm:$0xff] }
  0xce   :  { %v2963_v33 = vpop.eup %2962  ;;  %2982 = vrcp.f32 %v1393_v29  ;;  %v1395_v34 = vadd.f32 1.0, %v2961_v31 }
  0xcf   :  { %v2965_v36 = vpop.eup %2964  ;;  %2984 = vrcp.f32 %v1394_v32  ;;  %v1396_v37 = vadd.f32 1.0, %v2963_v33  ;;  %v2444_v32 = vmul.f32 -1.442695, %v390_v24 }
  0xd0   :  { %v2967_v40 = vpop.eup %2966  ;;  %2986 = vrcp.f32 %v1395_v34  ;;  %v1397_v41 = vadd.f32 1.0, %v2965_v36 }
  0xd1   :  { %v2969_v44 = vpop.eup %2968  ;;  %2988 = vrcp.f32 %v1396_v37  ;;  %v1398_v45 = vadd.f32 1.0, %v2967_v40 }
  0xd2   :  { %v2971_v48 = vpop.eup %2970  ;;  %2990 = vrcp.f32 %v1397_v41  ;;  %v1399_v49 = vadd.f32 1.0, %v2969_v44  ;;  %v128_v44 = vld [vmem:[%s5700_s0 + $0x3a8] sm:$0xff] }
  0xd3   :  { %v2973_v52 = vpop.eup %2972  ;;  %2992 = vrcp.f32 %v1398_v45  ;;  %v1400_v53 = vadd.f32 1.0, %v2971_v48 }
  0xd4   :  { %v2975_v58 = vpop.eup %2974  ;;  %2994 = vrcp.f32 %v1399_v49  ;;  %v1401_v59 = vadd.f32 1.0, %v2973_v52 }
  0xd5   :  { %v2977_v63 = vpop.eup %2976  ;;  %2158 = vst.msk [vmem:[%s5702_s2 + $0x2d8] sm:$0xff] %vm2066_vm0, %v2975_v58  ;;  %2996 = vrcp.f32 %v1400_v53  ;;  %v391_v53 = vadd.f32 %v4112_v56, %v128_v44  ;;  %v392_v58 = vadd.f32 %v4112_v56, %v129_v47 }
  0xd6   :  { %v2979_v4 = vpop.eup %2978  ;;  %2159 = vst.msk [vmem:[%s5702_s2 + $0x2e0] sm:$0xff] %vm2066_vm0, %v2977_v63  ;;  %2998 = vrcp.f32 %v1401_v59  ;;  %v132_v59 = vld [vmem:[%s5700_s0 + $0x3c8] sm:$0xff]  ;;  %v133_v63 = vld [vmem:[%s5700_s0 + $0x3d0] sm:$0xff] }
  0xd7   :  { %v2981_v8 = vpop.eup %2980  ;;  %2160 = vst.msk [vmem:[%s5702_s2 + $0x2e8] sm:$0xff] %vm2066_vm0, %v2979_v4  ;;  %3000 = vpow2.f32 %v2432_v54  ;;  %v131_v54 = vld [vmem:[%s5700_s0 + $0x3c0] sm:$0xff]  ;;  %v134_v4 = vld [vmem:[%s5700_s0 + $0x3d8] sm:$0xff]  ;;  %v2445_v7 = vmul.f32 -1.442695, %v391_v53 }
  0xd8   :  { %v2983_v12 = vpop.eup %2982  ;;  %2161 = vst.msk [vmem:[%s5702_s2 + $0x2f0] sm:$0xff] %vm2066_vm0, %v2981_v8  ;;  %3002 = vpow2.f32 %v2433_v60  ;;  %v394_v3 = vadd.f32 %v4112_v56, %v131_v54  ;;  %v395_v8 = vadd.f32 %v4112_v56, %v132_v59 }
  0xd9   :  { %v2985_v16 = vpop.eup %2984  ;;  %2162 = vst.msk [vmem:[%s5702_s2 + $0x2f8] sm:$0xff] %vm2066_vm0, %v2983_v12  ;;  %3004 = vpow2.f32 %v2434_v0  ;;  %v2446_v12 = vmul.f32 -1.442695, %v392_v58 }
  0xda   :  { %v2987_v19 = vpop.eup %2986  ;;  %2163 = vst.msk [vmem:[%s5702_s2 + $0x300] sm:$0xff] %vm2066_vm0, %v2985_v16  ;;  %3006 = vpow2.f32 %v2435_v5  ;;  %v2447_v16 = vmul.f32 -1.442695, %v393_v62  ;;  %v2449_v24 = vmul.f32 -1.442695, %v395_v8 }
  0xdb   :  { %v2989_v22 = vpop.eup %2988  ;;  %2164 = vst.msk [vmem:[%s5702_s2 + $0x308] sm:$0xff] %vm2066_vm0, %v2987_v19  ;;  %3008 = vpow2.f32 %v2436_v9  ;;  %v135_v9 = vld [vmem:[%s5700_s0 + $0x3e0] sm:$0xff] }
  0xdc   :  { %v2991_v25 = vpop.eup %2990  ;;  %2165 = vst.msk [vmem:[%s5702_s2 + $0x310] sm:$0xff] %vm2066_vm0, %v2989_v22  ;;  %3010 = vpow2.f32 %v2437_v13  ;;  %v396_v13 = vadd.f32 %v4112_v56, %v133_v63  ;;  %v398_v21 = vadd.f32 %v4112_v56, %v135_v9  ;;  %v138_v22 = vld [vmem:[%s5700_s0 + $0x3f8] sm:$0xff] }
  0xdd   :  { %v2993_v27 = vpop.eup %2992  ;;  %2166 = vst.msk [vmem:[%s5702_s2 + $0x318] sm:$0xff] %vm2066_vm0, %v2991_v25  ;;  %3012 = vpow2.f32 %v2438_v17  ;;  %v397_v17 = vadd.f32 %v4112_v56, %v134_v4  ;;  %v4577_v25 = vld [vmem:[%s5701_s1] ss:$0 sm:$0xff]  ;;  %v142_v63 = vld [vmem:[%s5700_s0 + $0x418] sm:$0xff] }
  0xde   :  { %v2995_v29 = vpop.eup %2994  ;;  %2167 = vst.msk [vmem:[%s5702_s2 + $0x320] sm:$0xff] %vm2066_vm0, %v2993_v27  ;;  %3014 = vpow2.f32 %v2439_v20  ;;  %v2448_v20 = vmul.f32 -1.442695, %v394_v3  ;;  %v139_v56 = vld [vmem:[%s5700_s0 + $0x400] sm:$0xff] }
  0xdf   :  { %v2997_v31 = vpop.eup %2996  ;;  %2168 = vst.msk [vmem:[%s5702_s2 + $0x328] sm:$0xff] %vm2066_vm0, %v2995_v29  ;;  %3016 = vpow2.f32 %v2440_v23  ;;  %v400_v29 = vadd.f32 %v4577_v25, %v137_v18  ;;  %v143_v3 = vld [vmem:[%s5700_s0 + $0x420] sm:$0xff] }
  0xe0   :  { %v2999_v1 = vpop.eup %2998  ;;  %2169 = vst.msk [vmem:[%s5702_s2 + $0x330] sm:$0xff] %vm2066_vm0, %v2997_v31  ;;  %3018 = vpow2.f32 %v2441_v26  ;;  %v399_v26 = vadd.f32 %v4577_v25, %v136_v14  ;;  %v406_v14 = vadd.f32 %v4577_v25, %v143_v3 }
  0xe1   :  { %v3001_v33 = vpop.eup %3000  ;;  %2170 = vst.msk [vmem:[%s5702_s2 + $0x338] sm:$0xff] %vm2066_vm0, %v2999_v1  ;;  %3020 = vpow2.f32 %v2442_v28  ;;  %v2450_v28 = vmul.f32 -1.442695, %v396_v13  ;;  %v401_v1 = vadd.f32 %v4577_v25, %v138_v22 }
  0xe2   :  { %v3003_v34 = vpop.eup %3002  ;;  %v1402_v35 = vadd.f32 1.0, %v3001_v33  ;;  %3022 = vpow2.f32 %v2443_v30  ;;  %v140_v30 = vld [vmem:[%s5700_s0 + $0x408] sm:$0xff] }
  0xe3   :  { %v3005_v36 = vpop.eup %3004  ;;  %v1403_v37 = vadd.f32 1.0, %v3003_v34  ;;  %3024 = vpow2.f32 %v2444_v32  ;;  %v2451_v32 = vmul.f32 -1.442695, %v397_v17  ;;  %v2452_v34 = vmul.f32 -1.442695, %v398_v21 }
  0xe4   :  { %v3007_v38 = vpop.eup %3006  ;;  %3026 = vrcp.f32 %v1402_v35  ;;  %v1404_v39 = vadd.f32 1.0, %v3005_v36  ;;  %v402_v35 = vadd.f32 %v4577_v25, %v139_v56 }
  0xe5   :  { %v3009_v40 = vpop.eup %3008  ;;  %3028 = vrcp.f32 %v1403_v37  ;;  %v1405_v41 = vadd.f32 1.0, %v3007_v38  ;;  %v2453_v37 = vmul.f32 -1.442695, %v399_v26  ;;  %v403_v38 = vadd.f32 %v4577_v25, %v140_v30 }
  0xe6   :  { %v3011_v42 = vpop.eup %3010  ;;  %3030 = vrcp.f32 %v1404_v39  ;;  %v1406_v43 = vadd.f32 1.0, %v3009_v40  ;;  %v2454_v40 = vmul.f32 -1.442695, %v400_v29  ;;  %v2456_v44 = vmul.f32 -1.442695, %v402_v35  ;;  %v149_v29 = vld [vmem:[%s5700_s0 + $0x450] sm:$0xff] }
  0xe7   :  { %v3013_v45 = vpop.eup %3012  ;;  %3032 = vrcp.f32 %v1405_v41  ;;  %v1407_v46 = vadd.f32 1.0, %v3011_v42  ;;  %v2455_v42 = vmul.f32 -1.442695, %v401_v1  ;;  %v150_v1 = vld [vmem:[%s5700_s0 + $0x458] sm:$0xff] }
  0xe8   :  { %v3015_v48 = vpop.eup %3014  ;;  %3034 = vrcp.f32 %v1406_v43  ;;  %v1408_v49 = vadd.f32 1.0, %v3013_v45 }
  0xe9   :  { %v3017_v51 = vpop.eup %3016  ;;  %3036 = vrcp.f32 %v1407_v46  ;;  %v1409_v52 = vadd.f32 1.0, %v3015_v48  ;;  %v2457_v46 = vmul.f32 -1.442695, %v403_v38 }
  0xea   :  { %v3019_v55 = vpop.eup %3018  ;;  %3038 = vrcp.f32 %v1408_v49  ;;  %v1410_v57 = vadd.f32 1.0, %v3017_v51 }
  0xeb   :  { %v3021_v60 = vpop.eup %3020  ;;  %3040 = vrcp.f32 %v1409_v52  ;;  %v1411_v61 = vadd.f32 1.0, %v3019_v55 }
  0xec   :  { %v3023_v0 = vpop.eup %3022  ;;  %3042 = vrcp.f32 %v1410_v57  ;;  %v1412_v2 = vadd.f32 1.0, %v3021_v60  ;;  %v141_v60 = vld [vmem:[%s5700_s0 + $0x410] sm:$0xff] }
  0xed   :  { %v3025_v5 = vpop.eup %3024  ;;  %3044 = vrcp.f32 %v1411_v61  ;;  %v1413_v6 = vadd.f32 1.0, %v3023_v0 }
  0xee   :  { %v3027_v10 = vpop.eup %3026  ;;  %3046 = vrcp.f32 %v1412_v2  ;;  %v1414_v11 = vadd.f32 1.0, %v3025_v5 }
  0xef   :  { %v3029_v15 = vpop.eup %3028  ;;  %2171 = vst.msk [vmem:[%s5702_s2 + $0x340] sm:$0xff] %vm2066_vm0, %v3027_v10  ;;  %3048 = vrcp.f32 %v1413_v6  ;;  %v404_v6 = vadd.f32 %v4577_v25, %v141_v60  ;;  %v405_v10 = vadd.f32 %v4577_v25, %v142_v63 }
  0xf0   :  { %v3031_v19 = vpop.eup %3030  ;;  %2172 = vst.msk [vmem:[%s5702_s2 + $0x348] sm:$0xff] %vm2066_vm0, %v3029_v15  ;;  %3050 = vrcp.f32 %v1414_v11  ;;  %v145_v11 = vld [vmem:[%s5700_s0 + $0x430] sm:$0xff]  ;;  %v146_v15 = vld [vmem:[%s5700_s0 + $0x438] sm:$0xff] }
  0xf1   :  { %v3033_v23 = vpop.eup %3032  ;;  %2173 = vst.msk [vmem:[%s5702_s2 + $0x350] sm:$0xff] %vm2066_vm0, %v3031_v19  ;;  %3052 = vpow2.f32 %v2445_v7  ;;  %v144_v7 = vld [vmem:[%s5700_s0 + $0x428] sm:$0xff]  ;;  %v147_v19 = vld [vmem:[%s5700_s0 + $0x440] sm:$0xff]  ;;  %v2458_v22 = vmul.f32 -1.442695, %v404_v6 }
  0xf2   :  { %v3035_v27 = vpop.eup %3034  ;;  %2174 = vst.msk [vmem:[%s5702_s2 + $0x358] sm:$0xff] %vm2066_vm0, %v3033_v23  ;;  %3054 = vpow2.f32 %v2446_v12  ;;  %v407_v18 = vadd.f32 %v4577_v25, %v144_v7  ;;  %v408_v23 = vadd.f32 %v4577_v25, %v145_v11 }
  0xf3   :  { %v3037_v31 = vpop.eup %3036  ;;  %2175 = vst.msk [vmem:[%s5702_s2 + $0x360] sm:$0xff] %vm2066_vm0, %v3035_v27  ;;  %3056 = vpow2.f32 %v2447_v16  ;;  %v2459_v27 = vmul.f32 -1.442695, %v405_v10 }
  0xf4   :  { %v3039_v33 = vpop.eup %3038  ;;  %2176 = vst.msk [vmem:[%s5702_s2 + $0x368] sm:$0xff] %vm2066_vm0, %v3037_v31  ;;  %3058 = vpow2.f32 %v2448_v20  ;;  %v2460_v31 = vmul.f32 -1.442695, %v406_v14  ;;  %v2462_v38 = vmul.f32 -1.442695, %v408_v23 }
  0xf5   :  { %v3041_v36 = vpop.eup %3040  ;;  %2177 = vst.msk [vmem:[%s5702_s2 + $0x370] sm:$0xff] %vm2066_vm0, %v3039_v33  ;;  %3060 = vpow2.f32 %v2449_v24  ;;  %v148_v24 = vld [vmem:[%s5700_s0 + $0x448] sm:$0xff] }
  0xf6   :  { %v3043_v39 = vpop.eup %3042  ;;  %2178 = vst.msk [vmem:[%s5702_s2 + $0x378] sm:$0xff] %vm2066_vm0, %v3041_v36  ;;  %3062 = vpow2.f32 %v2450_v28  ;;  %v409_v28 = vadd.f32 %v4577_v25, %v146_v15  ;;  %v411_v35 = vadd.f32 %v4577_v25, %v148_v24  ;;  %v151_v36 = vld [vmem:[%s5700_s0 + $0x460] sm:$0xff] }
  0xf7   :  { %v3045_v41 = vpop.eup %3044  ;;  %2179 = vst.msk [vmem:[%s5702_s2 + $0x380] sm:$0xff] %vm2066_vm0, %v3043_v39  ;;  %3064 = vpow2.f32 %v2451_v32  ;;  %v410_v32 = vadd.f32 %v4577_v25, %v147_v19  ;;  %v412_v39 = vadd.f32 %v4577_v25, %v149_v29  ;;  %v155_v15 = vld [vmem:[%s5700_s0 + $0x480] sm:$0xff] }
  0xf8   :  { %v3047_v43 = vpop.eup %3046  ;;  %2180 = vst.msk [vmem:[%s5702_s2 + $0x388] sm:$0xff] %vm2066_vm0, %v3045_v41  ;;  %3066 = vpow2.f32 %v2452_v34  ;;  %v2461_v34 = vmul.f32 -1.442695, %v407_v18  ;;  %v156_v18 = vld [vmem:[%s5700_s0 + $0x488] sm:$0xff] }
  0xf9   :  { %v3049_v45 = vpop.eup %3048  ;;  %2181 = vst.msk [vmem:[%s5702_s2 + $0x390] sm:$0xff] %vm2066_vm0, %v3047_v43  ;;  %3068 = vpow2.f32 %v2453_v37  ;;  %v413_v43 = vadd.f32 %v4577_v25, %v150_v1  ;;  %v419_v29 = vadd.f32 %v4577_v25, %v156_v18 }
  0xfa   :  { %v3051_v47 = vpop.eup %3050  ;;  %2182 = vst.msk [vmem:[%s5702_s2 + $0x398] sm:$0xff] %vm2066_vm0, %v3049_v45  ;;  %3070 = vpow2.f32 %v2454_v40  ;;  %v152_v40 = vld [vmem:[%s5700_s0 + $0x468] sm:$0xff] }
  0xfb   :  { %v3053_v48 = vpop.eup %3052  ;;  %2183 = vst.msk [vmem:[%s5702_s2 + $0x3a0] sm:$0xff] %vm2066_vm0, %v3051_v47  ;;  %3072 = vpow2.f32 %v2455_v42  ;;  %v2463_v42 = vmul.f32 -1.442695, %v409_v28  ;;  %v414_v47 = vadd.f32 %v4577_v25, %v151_v36 }
  0xfc   :  { %v3055_v49 = vpop.eup %3054  ;;  %v1415_v50 = vadd.f32 1.0, %v3053_v48  ;;  %3074 = vpow2.f32 %v2456_v44  ;;  %v153_v44 = vld [vmem:[%s5700_s0 + $0x470] sm:$0xff] }
  0xfd   :  { %v3057_v51 = vpop.eup %3056  ;;  %v1416_v52 = vadd.f32 1.0, %v3055_v49  ;;  %3076 = vpow2.f32 %v2457_v46  ;;  %v2464_v46 = vmul.f32 -1.442695, %v410_v32  ;;  %v2465_v49 = vmul.f32 -1.442695, %v411_v35 }
  0xfe   :  { %v3059_v53 = vpop.eup %3058  ;;  %3078 = vrcp.f32 %v1415_v50  ;;  %v1417_v54 = vadd.f32 1.0, %v3057_v51  ;;  %v415_v50 = vadd.f32 %v4577_v25, %v152_v40 }
  0xff   :  { %v3061_v55 = vpop.eup %3060  ;;  %3080 = vrcp.f32 %v1416_v52  ;;  %v1418_v57 = vadd.f32 1.0, %v3059_v53  ;;  %v2466_v52 = vmul.f32 -1.442695, %v412_v39  ;;  %v416_v53 = vadd.f32 %v4577_v25, %v153_v44 }
 0x100   :  { %v3063_v58 = vpop.eup %3062  ;;  %3082 = vrcp.f32 %v1417_v54  ;;  %v1419_v59 = vadd.f32 1.0, %v3061_v55  ;;  %v2467_v55 = vmul.f32 -1.442695, %v413_v43  ;;  %v2469_v60 = vmul.f32 -1.442695, %v415_v50  ;;  %v162_v43 = vld [vmem:[%s5700_s0 + $0x4b8] sm:$0xff] }
 0x101   :  { %v3065_v61 = vpop.eup %3064  ;;  %3084 = vrcp.f32 %v1418_v57  ;;  %v1420_v62 = vadd.f32 1.0, %v3063_v58  ;;  %v2468_v58 = vmul.f32 -1.442695, %v414_v47  ;;  %v163_v47 = vld [vmem:[%s5700_s0 + $0x4c0] sm:$0xff] }
 0x102   :  { %v3067_v0 = vpop.eup %3066  ;;  %3086 = vrcp.f32 %v1419_v59  ;;  %v1421_v2 = vadd.f32 1.0, %v3065_v61 }
 0x103   :  { %v3069_v4 = vpop.eup %3068  ;;  %3088 = vrcp.f32 %v1420_v62  ;;  %v1422_v5 = vadd.f32 1.0, %v3067_v0  ;;  %v2470_v62 = vmul.f32 -1.442695, %v416_v53 }
 0x104   :  { %v3071_v8 = vpop.eup %3070  ;;  %3090 = vrcp.f32 %v1421_v2  ;;  %v1423_v9 = vadd.f32 1.0, %v3069_v4 }
 0x105   :  { %v3073_v12 = vpop.eup %3072  ;;  %3092 = vrcp.f32 %v1422_v5  ;;  %v1424_v13 = vadd.f32 1.0, %v3071_v8 }
 0x106   :  { %v3075_v16 = vpop.eup %3074  ;;  %3094 = vrcp.f32 %v1423_v9  ;;  %v1425_v17 = vadd.f32 1.0, %v3073_v12  ;;  %v154_v12 = vld [vmem:[%s5700_s0 + $0x478] sm:$0xff] }
 0x107   :  { %v3077_v20 = vpop.eup %3076  ;;  %3096 = vrcp.f32 %v1424_v13  ;;  %v1426_v21 = vadd.f32 1.0, %v3075_v16 }
 0x108   :  { %v3079_v26 = vpop.eup %3078  ;;  %3098 = vrcp.f32 %v1425_v17  ;;  %v1427_v56 = vadd.f32 1.0, %v3077_v20 }
 0x109   :  { %v3081_v30 = vpop.eup %3080  ;;  %2184 = vst.msk [vmem:[%s5702_s2 + $0x3a8] sm:$0xff] %vm2066_vm0, %v3079_v26  ;;  %3100 = vrcp.f32 %v1426_v21  ;;  %v417_v21 = vadd.f32 %v4577_v25, %v154_v12  ;;  %v418_v26 = vadd.f32 %v4577_v25, %v155_v15 }
 0x10a   :  { %v3083_v33 = vpop.eup %3082  ;;  %2185 = vst.msk [vmem:[%s5702_s2 + $0x3b0] sm:$0xff] %vm2066_vm0, %v3081_v30  ;;  %3102 = vrcp.f32 %v1427_v56  ;;  %v158_v56 = vld [vmem:[%s5700_s0 + $0x498] sm:$0xff]  ;;  %v159_v30 = vld [vmem:[%s5700_s0 + $0x4a0] sm:$0xff] }
 0x10b   :  { %v3085_v37 = vpop.eup %3084  ;;  %2186 = vst.msk [vmem:[%s5702_s2 + $0x3b8] sm:$0xff] %vm2066_vm0, %v3083_v33  ;;  %3104 = vpow2.f32 %v2458_v22  ;;  %v157_v22 = vld [vmem:[%s5700_s0 + $0x490] sm:$0xff]  ;;  %v160_v33 = vld [vmem:[%s5700_s0 + $0x4a8] sm:$0xff]  ;;  %v2471_v36 = vmul.f32 -1.442695, %v417_v21 }
 0x10c   :  { %v3087_v41 = vpop.eup %3086  ;;  %2187 = vst.msk [vmem:[%s5702_s2 + $0x3c0] sm:$0xff] %vm2066_vm0, %v3085_v37  ;;  %3106 = vpow2.f32 %v2459_v27  ;;  %v420_v1 = vadd.f32 %v4577_v25, %v157_v22  ;;  %v421_v37 = vadd.f32 %v4577_v25, %v158_v56 }
 0x10d   :  { %v3089_v45 = vpop.eup %3088  ;;  %2188 = vst.msk [vmem:[%s5702_s2 + $0x3c8] sm:$0xff] %vm2066_vm0, %v3087_v41  ;;  %3108 = vpow2.f32 %v2460_v31  ;;  %v2472_v41 = vmul.f32 -1.442695, %v418_v26 }
 0x10e   :  { %v3091_v48 = vpop.eup %3090  ;;  %2189 = vst.msk [vmem:[%s5702_s2 + $0x3d0] sm:$0xff] %vm2066_vm0, %v3089_v45  ;;  %3110 = vpow2.f32 %v2461_v34  ;;  %v2473_v45 = vmul.f32 -1.442695, %v419_v29  ;;  %v2475_v53 = vmul.f32 -1.442695, %v421_v37 }
 0x10f   :  { %v3093_v51 = vpop.eup %3092  ;;  %2190 = vst.msk [vmem:[%s5702_s2 + $0x3d8] sm:$0xff] %vm2066_vm0, %v3091_v48  ;;  %3112 = vpow2.f32 %v2462_v38  ;;  %v161_v38 = vld [vmem:[%s5700_s0 + $0x4b0] sm:$0xff] }
 0x110   :  { %v3095_v54 = vpop.eup %3094  ;;  %2191 = vst.msk [vmem:[%s5702_s2 + $0x3e0] sm:$0xff] %vm2066_vm0, %v3093_v51  ;;  %3114 = vpow2.f32 %v2463_v42  ;;  %v422_v42 = vadd.f32 %v4577_v25, %v159_v30  ;;  %v424_v50 = vadd.f32 %v4577_v25, %v161_v38  ;;  %v164_v51 = vld [vmem:[%s5700_s0 + $0x4c8] sm:$0xff] }
 0x111   :  { %v3097_v57 = vpop.eup %3096  ;;  %2192 = vst.msk [vmem:[%s5702_s2 + $0x3e8] sm:$0xff] %vm2066_vm0, %v3095_v54  ;;  %3116 = vpow2.f32 %v2464_v46  ;;  %v423_v46 = vadd.f32 %v4577_v25, %v160_v33  ;;  %v425_v54 = vadd.f32 %v4577_v25, %v162_v43  ;;  %v168_v30 = vld [vmem:[%s5700_s0 + $0x4e8] sm:$0xff] }
 0x112   :  { %v3099_v59 = vpop.eup %3098  ;;  %2193 = vst.msk [vmem:[%s5702_s2 + $0x3f0] sm:$0xff] %vm2066_vm0, %v3097_v57  ;;  %3118 = vpow2.f32 %v2465_v49  ;;  %v2474_v49 = vmul.f32 -1.442695, %v420_v1  ;;  %v169_v1 = vld [vmem:[%s5700_s0 + $0x4f0] sm:$0xff] }
 0x113   :  { %v3101_v61 = vpop.eup %3100  ;;  %2194 = vst.msk [vmem:[%s5702_s2 + $0x3f8] sm:$0xff] %vm2066_vm0, %v3099_v59  ;;  %3120 = vpow2.f32 %v2466_v52  ;;  %v426_v59 = vadd.f32 %v4577_v25, %v163_v47  ;;  %v432_v43 = vadd.f32 %v4577_v25, %v169_v1 }
 0x114   :  { %v3103_v63 = vpop.eup %3102  ;;  %2195 = vst.msk [vmem:[%s5702_s2 + $0x400] sm:$0xff] %vm2066_vm0, %v3101_v61  ;;  %3122 = vpow2.f32 %v2467_v55  ;;  %v165_v55 = vld [vmem:[%s5700_s0 + $0x4d0] sm:$0xff] }
 0x115   :  { %v3105_v0 = vpop.eup %3104  ;;  %2196 = vst.msk [vmem:[%s5702_s2 + $0x408] sm:$0xff] %vm2066_vm0, %v3103_v63  ;;  %3124 = vpow2.f32 %v2468_v58  ;;  %v2476_v58 = vmul.f32 -1.442695, %v422_v42  ;;  %v427_v63 = vadd.f32 %v4577_v25, %v164_v51 }
 0x116   :  { %v3107_v2 = vpop.eup %3106  ;;  %v1428_v3 = vadd.f32 1.0, %v3105_v0  ;;  %3126 = vpow2.f32 %v2469_v60  ;;  %v166_v60 = vld [vmem:[%s5700_s0 + $0x4d8] sm:$0xff] }
 0x117   :  { %v3109_v4 = vpop.eup %3108  ;;  %v1429_v5 = vadd.f32 1.0, %v3107_v2  ;;  %3128 = vpow2.f32 %v2470_v62  ;;  %v2477_v62 = vmul.f32 -1.442695, %v423_v46  ;;  %v2478_v2 = vmul.f32 -1.442695, %v424_v50 }
 0x118   :  { %v3111_v6 = vpop.eup %3110  ;;  %3130 = vrcp.f32 %v1428_v3  ;;  %v1430_v7 = vadd.f32 1.0, %v3109_v4  ;;  %v428_v3 = vadd.f32 %v4577_v25, %v165_v55 }
 0x119   :  { %v3113_v8 = vpop.eup %3112  ;;  %3132 = vrcp.f32 %v1429_v5  ;;  %v1431_v9 = vadd.f32 1.0, %v3111_v6  ;;  %v2479_v5 = vmul.f32 -1.442695, %v425_v54  ;;  %v429_v6 = vadd.f32 %v4577_v25, %v166_v60 }
 0x11a   :  { %v3115_v10 = vpop.eup %3114  ;;  %3134 = vrcp.f32 %v1430_v7  ;;  %v1432_v11 = vadd.f32 1.0, %v3113_v8  ;;  %v2480_v8 = vmul.f32 -1.442695, %v426_v59  ;;  %v2482_v12 = vmul.f32 -1.442695, %v428_v3  ;;  %v175_v59 = vld [vmem:[%s5700_s0 + $0x520] sm:$0xff] }
 0x11b   :  { %v3117_v13 = vpop.eup %3116  ;;  %3136 = vrcp.f32 %v1431_v9  ;;  %v1433_v14 = vadd.f32 1.0, %v3115_v10  ;;  %v2481_v10 = vmul.f32 -1.442695, %v427_v63  ;;  %v176_v63 = vld [vmem:[%s5700_s0 + $0x528] sm:$0xff] }
 0x11c   :  { %v3119_v16 = vpop.eup %3118  ;;  %3138 = vrcp.f32 %v1432_v11  ;;  %v1434_v17 = vadd.f32 1.0, %v3117_v13 }
 0x11d   :  { %v3121_v19 = vpop.eup %3120  ;;  %3140 = vrcp.f32 %v1433_v14  ;;  %v1435_v20 = vadd.f32 1.0, %v3119_v16  ;;  %v2483_v14 = vmul.f32 -1.442695, %v429_v6 }
 0x11e   :  { %v3123_v23 = vpop.eup %3122  ;;  %3142 = vrcp.f32 %v1434_v17  ;;  %v1436_v24 = vadd.f32 1.0, %v3121_v19 }
 0x11f   :  { %v3125_v27 = vpop.eup %3124  ;;  %3144 = vrcp.f32 %v1435_v20  ;;  %v1437_v28 = vadd.f32 1.0, %v3123_v23 }
 0x120   :  { %v3127_v31 = vpop.eup %3126  ;;  %3146 = vrcp.f32 %v1436_v24  ;;  %v1438_v32 = vadd.f32 1.0, %v3125_v27  ;;  %v167_v27 = vld [vmem:[%s5700_s0 + $0x4e0] sm:$0xff] }
 0x121   :  { %v3129_v34 = vpop.eup %3128  ;;  %3148 = vrcp.f32 %v1437_v28  ;;  %v1439_v35 = vadd.f32 1.0, %v3127_v31 }
 0x122   :  { %v3131_v39 = vpop.eup %3130  ;;  %3150 = vrcp.f32 %v1438_v32  ;;  %v1440_v40 = vadd.f32 1.0, %v3129_v34 }
 0x123   :  { %v3133_v44 = vpop.eup %3132  ;;  %2197 = vst.msk [vmem:[%s5702_s2 + $0x410] sm:$0xff] %vm2066_vm0, %v3131_v39  ;;  %3152 = vrcp.f32 %v1439_v35  ;;  %v430_v35 = vadd.f32 %v4577_v25, %v167_v27  ;;  %v431_v39 = vadd.f32 %v4577_v25, %v168_v30 }
 0x124   :  { %v3135_v48 = vpop.eup %3134  ;;  %2198 = vst.msk [vmem:[%s5702_s2 + $0x418] sm:$0xff] %vm2066_vm0, %v3133_v44  ;;  %3154 = vrcp.f32 %v1440_v40  ;;  %v171_v40 = vld [vmem:[%s5700_s0 + $0x500] sm:$0xff]  ;;  %v172_v44 = vld [vmem:[%s5700_s0 + $0x508] sm:$0xff] }
 0x125   :  { %v3137_v52 = vpop.eup %3136  ;;  %2199 = vst.msk [vmem:[%s5702_s2 + $0x420] sm:$0xff] %vm2066_vm0, %v3135_v48  ;;  %3156 = vpow2.f32 %v2471_v36  ;;  %v170_v36 = vld [vmem:[%s5700_s0 + $0x4f8] sm:$0xff]  ;;  %v173_v48 = vld [vmem:[%s5700_s0 + $0x510] sm:$0xff]  ;;  %v2484_v51 = vmul.f32 -1.442695, %v430_v35 }
 0x126   :  { %v3139_v57 = vpop.eup %3138  ;;  %2200 = vst.msk [vmem:[%s5702_s2 + $0x428] sm:$0xff] %vm2066_vm0, %v3137_v52  ;;  %3158 = vpow2.f32 %v2472_v41  ;;  %v433_v47 = vadd.f32 %v4577_v25, %v170_v36  ;;  %v434_v52 = vadd.f32 %v4577_v25, %v171_v40 }
 0x127   :  { %v3141_v61 = vpop.eup %3140  ;;  %2201 = vst.msk [vmem:[%s5702_s2 + $0x430] sm:$0xff] %vm2066_vm0, %v3139_v57  ;;  %3160 = vpow2.f32 %v2473_v45  ;;  %v2485_v57 = vmul.f32 -1.442695, %v431_v39 }
 0x128   :  { %v3143_v0 = vpop.eup %3142  ;;  %2202 = vst.msk [vmem:[%s5702_s2 + $0x438] sm:$0xff] %vm2066_vm0, %v3141_v61  ;;  %3162 = vpow2.f32 %v2474_v49  ;;  %v2486_v61 = vmul.f32 -1.442695, %v432_v43  ;;  %v2488_v6 = vmul.f32 -1.442695, %v434_v52 }
 0x129   :  { %v3145_v4 = vpop.eup %3144  ;;  %2203 = vst.msk [vmem:[%s5702_s2 + $0x440] sm:$0xff] %vm2066_vm0, %v3143_v0  ;;  %3164 = vpow2.f32 %v2475_v53  ;;  %v174_v53 = vld [vmem:[%s5700_s0 + $0x518] sm:$0xff] }
 0x12a   :  { %v3147_v7 = vpop.eup %3146  ;;  %2204 = vst.msk [vmem:[%s5702_s2 + $0x448] sm:$0xff] %vm2066_vm0, %v3145_v4  ;;  %3166 = vpow2.f32 %v2476_v58  ;;  %v435_v58 = vadd.f32 %v4577_v25, %v172_v44  ;;  %v437_v3 = vadd.f32 %v4577_v25, %v174_v53  ;;  %v177_v4 = vld [vmem:[%s5700_s0 + $0x530] sm:$0xff] }
 0x12b   :  { %v3149_v9 = vpop.eup %3148  ;;  %2205 = vst.msk [vmem:[%s5702_s2 + $0x450] sm:$0xff] %vm2066_vm0, %v3147_v7  ;;  %3168 = vpow2.f32 %v2477_v62  ;;  %v436_v62 = vadd.f32 %v4577_v25, %v173_v48  ;;  %v438_v7 = vadd.f32 %v4577_v25, %v175_v59  ;;  %v181_v44 = vld [vmem:[%s5700_s0 + $0x550] sm:$0xff] }
 0x12c   :  { %v3151_v11 = vpop.eup %3150  ;;  %2206 = vst.msk [vmem:[%s5702_s2 + $0x458] sm:$0xff] %vm2066_vm0, %v3149_v9  ;;  %3170 = vpow2.f32 %v2478_v2  ;;  %v2487_v2 = vmul.f32 -1.442695, %v433_v47  ;;  %v182_v47 = vld [vmem:[%s5700_s0 + $0x558] sm:$0xff] }
 0x12d   :  { %v3153_v13 = vpop.eup %3152  ;;  %2207 = vst.msk [vmem:[%s5702_s2 + $0x460] sm:$0xff] %vm2066_vm0, %v3151_v11  ;;  %3172 = vpow2.f32 %v2479_v5  ;;  %v439_v11 = vadd.f32 %v4577_v25, %v176_v63  ;;  %v445_v59 = vadd.f32 %v4577_v25, %v182_v47 }
 0x12e   :  { %v3155_v15 = vpop.eup %3154  ;;  %2208 = vst.msk [vmem:[%s5702_s2 + $0x468] sm:$0xff] %vm2066_vm0, %v3153_v13  ;;  %3174 = vpow2.f32 %v2480_v8  ;;  %v178_v8 = vld [vmem:[%s5700_s0 + $0x538] sm:$0xff] }
 0x12f   :  { %v3157_v16 = vpop.eup %3156  ;;  %2209 = vst.msk [vmem:[%s5702_s2 + $0x470] sm:$0xff] %vm2066_vm0, %v3155_v15  ;;  %3176 = vpow2.f32 %v2481_v10  ;;  %v2489_v10 = vmul.f32 -1.442695, %v435_v58  ;;  %v440_v15 = vadd.f32 %v4577_v25, %v177_v4 }
 0x130   :  { %v3159_v17 = vpop.eup %3158  ;;  %v1441_v18 = vadd.f32 1.0, %v3157_v16  ;;  %3178 = vpow2.f32 %v2482_v12  ;;  %v179_v12 = vld [vmem:[%s5700_s0 + $0x540] sm:$0xff] }
 0x131   :  { %v3161_v19 = vpop.eup %3160  ;;  %v1442_v20 = vadd.f32 1.0, %v3159_v17  ;;  %3180 = vpow2.f32 %v2483_v14  ;;  %v2490_v14 = vmul.f32 -1.442695, %v436_v62  ;;  %v2491_v17 = vmul.f32 -1.442695, %v437_v3 }
 0x132   :  { %v3163_v21 = vpop.eup %3162  ;;  %3182 = vrcp.f32 %v1441_v18  ;;  %v1443_v22 = vadd.f32 1.0, %v3161_v19  ;;  %v441_v18 = vadd.f32 %v4577_v25, %v178_v8 }
 0x133   :  { %v3165_v23 = vpop.eup %3164  ;;  %3184 = vrcp.f32 %v1442_v20  ;;  %v1444_v24 = vadd.f32 1.0, %v3163_v21  ;;  %v2492_v20 = vmul.f32 -1.442695, %v438_v7  ;;  %v442_v21 = vadd.f32 %v4577_v25, %v179_v12 }
 0x134   :  { %v3167_v26 = vpop.eup %3166  ;;  %3186 = vrcp.f32 %v1443_v22  ;;  %v1445_v56 = vadd.f32 1.0, %v3165_v23  ;;  %v2493_v23 = vmul.f32 -1.442695, %v439_v11  ;;  %v2495_v27 = vmul.f32 -1.442695, %v441_v18  ;;  %v188_v11 = vld [vmem:[%s5700_s0 + $0x588] sm:$0xff] }
 0x135   :  { %v3169_v28 = vpop.eup %3168  ;;  %3188 = vrcp.f32 %v1444_v24  ;;  %v1446_v29 = vadd.f32 1.0, %v3167_v26  ;;  %v2494_v26 = vmul.f32 -1.442695, %v440_v15  ;;  %v189_v15 = vld [vmem:[%s5700_s0 + $0x590] sm:$0xff] }
 0x136   :  { %v3171_v31 = vpop.eup %3170  ;;  %3190 = vrcp.f32 %v1445_v56  ;;  %v1447_v32 = vadd.f32 1.0, %v3169_v28 }
 0x137   :  { %v3173_v33 = vpop.eup %3172  ;;  %3192 = vrcp.f32 %v1446_v29  ;;  %v1448_v34 = vadd.f32 1.0, %v3171_v31  ;;  %v2496_v29 = vmul.f32 -1.442695, %v442_v21 }
 0x138   :  { %v3175_v37 = vpop.eup %3174  ;;  %3194 = vrcp.f32 %v1447_v32  ;;  %v1449_v38 = vadd.f32 1.0, %v3173_v33 }
 0x139   :  { %v3177_v41 = vpop.eup %3176  ;;  %3196 = vrcp.f32 %v1448_v34  ;;  %v1450_v42 = vadd.f32 1.0, %v3175_v37 }
 0x13a   :  { %v3179_v45 = vpop.eup %3178  ;;  %3198 = vrcp.f32 %v1449_v38  ;;  %v1451_v46 = vadd.f32 1.0, %v3177_v41  ;;  %v180_v41 = vld [vmem:[%s5700_s0 + $0x548] sm:$0xff] }
 0x13b   :  { %v3181_v49 = vpop.eup %3180  ;;  %3200 = vrcp.f32 %v1450_v42  ;;  %v1452_v50 = vadd.f32 1.0, %v3179_v45 }
 0x13c   :  { %v3183_v54 = vpop.eup %3182  ;;  %3202 = vrcp.f32 %v1451_v46  ;;  %v1453_v55 = vadd.f32 1.0, %v3181_v49 }
 0x13d   :  { %v3185_v60 = vpop.eup %3184  ;;  %2210 = vst.msk [vmem:[%s5702_s2 + $0x478] sm:$0xff] %vm2066_vm0, %v3183_v54  ;;  %3204 = vrcp.f32 %v1452_v50  ;;  %v443_v50 = vadd.f32 %v4577_v25, %v180_v41  ;;  %v444_v54 = vadd.f32 %v4577_v25, %v181_v44 }
 0x13e   :  { %v3187_v0 = vpop.eup %3186  ;;  %2211 = vst.msk [vmem:[%s5702_s2 + $0x480] sm:$0xff] %vm2066_vm0, %v3185_v60  ;;  %3206 = vrcp.f32 %v1453_v55  ;;  %v184_v55 = vld [vmem:[%s5700_s0 + $0x568] sm:$0xff]  ;;  %v185_v60 = vld [vmem:[%s5700_s0 + $0x570] sm:$0xff] }
 0x13f   :  { %v3189_v5 = vpop.eup %3188  ;;  %2212 = vst.msk [vmem:[%s5702_s2 + $0x488] sm:$0xff] %vm2066_vm0, %v3187_v0  ;;  %3208 = vpow2.f32 %v2484_v51  ;;  %v183_v51 = vld [vmem:[%s5700_s0 + $0x560] sm:$0xff]  ;;  %v186_v0 = vld [vmem:[%s5700_s0 + $0x578] sm:$0xff]  ;;  %v2497_v4 = vmul.f32 -1.442695, %v443_v50 }
 0x140   :  { %v3191_v9 = vpop.eup %3190  ;;  %2213 = vst.msk [vmem:[%s5702_s2 + $0x490] sm:$0xff] %vm2066_vm0, %v3189_v5  ;;  %3210 = vpow2.f32 %v2485_v57  ;;  %v446_v63 = vadd.f32 %v4577_v25, %v183_v51  ;;  %v447_v5 = vadd.f32 %v4577_v25, %v184_v55  ;;  %v193_v55 = vld [vmem:[%s5700_s0 + $0x5b0] sm:$0xff] }
 0x141   :  { %v3193_v13 = vpop.eup %3192  ;;  %2214 = vst.msk [vmem:[%s5702_s2 + $0x498] sm:$0xff] %vm2066_vm0, %v3191_v9  ;;  %3212 = vpow2.f32 %v2486_v61  ;;  %v2498_v9 = vmul.f32 -1.442695, %v444_v54 }
 0x142   :  { %v3195_v16 = vpop.eup %3194  ;;  %2215 = vst.msk [vmem:[%s5702_s2 + $0x4a0] sm:$0xff] %vm2066_vm0, %v3193_v13  ;;  %3214 = vpow2.f32 %v2487_v2  ;;  %v2499_v13 = vmul.f32 -1.442695, %v445_v59  ;;  %v2501_v21 = vmul.f32 -1.442695, %v447_v5  ;;  %v194_v59 = vld [vmem:[%s5700_s0 + $0x5b8] sm:$0xff] }
 0x143   :  { %v3197_v19 = vpop.eup %3196  ;;  %2216 = vst.msk [vmem:[%s5702_s2 + $0x4a8] sm:$0xff] %vm2066_vm0, %v3195_v16  ;;  %3216 = vpow2.f32 %v2488_v6  ;;  %v187_v6 = vld [vmem:[%s5700_s0 + $0x580] sm:$0xff] }
 0x144   :  { %v3199_v22 = vpop.eup %3198  ;;  %2217 = vst.msk [vmem:[%s5702_s2 + $0x4b0] sm:$0xff] %vm2066_vm0, %v3197_v19  ;;  %3218 = vpow2.f32 %v2489_v10  ;;  %v448_v10 = vadd.f32 %v4577_v25, %v185_v60  ;;  %v450_v18 = vadd.f32 %v4577_v25, %v187_v6  ;;  %v190_v19 = vld [vmem:[%s5700_s0 + $0x598] sm:$0xff] }
 0x145   :  { %v3201_v24 = vpop.eup %3200  ;;  %2218 = vst.msk [vmem:[%s5702_s2 + $0x4b8] sm:$0xff] %vm2066_vm0, %v3199_v22  ;;  %3220 = vpow2.f32 %v2490_v14  ;;  %v449_v14 = vadd.f32 %v4577_v25, %v186_v0  ;;  %v451_v22 = vadd.f32 %v4577_v25, %v188_v11 }
 0x146   :  { %v3203_v56 = vpop.eup %3202  ;;  %2219 = vst.msk [vmem:[%s5702_s2 + $0x4c0] sm:$0xff] %vm2066_vm0, %v3201_v24  ;;  %3222 = vpow2.f32 %v2491_v17  ;;  %v2500_v17 = vmul.f32 -1.442695, %v446_v63 }
 0x147   :  { %v3205_v28 = vpop.eup %3204  ;;  %2220 = vst.msk [vmem:[%s5702_s2 + $0x4c8] sm:$0xff] %vm2066_vm0, %v3203_v56  ;;  %3224 = vpow2.f32 %v2492_v20  ;;  %v452_v56 = vadd.f32 %v4577_v25, %v189_v15 }
 0x148   :  { %v3207_v30 = vpop.eup %3206  ;;  %2221 = vst.msk [vmem:[%s5702_s2 + $0x4d0] sm:$0xff] %vm2066_vm0, %v3205_v28  ;;  %3226 = vpow2.f32 %v2493_v23  ;;  %v191_v23 = vld [vmem:[%s5700_s0 + $0x5a0] sm:$0xff] }
 0x149   :  { %v3209_v31 = vpop.eup %3208  ;;  %2222 = vst.msk [vmem:[%s5702_s2 + $0x4d8] sm:$0xff] %vm2066_vm0, %v3207_v30  ;;  %3228 = vpow2.f32 %v2494_v26  ;;  %v2502_v26 = vmul.f32 -1.442695, %v448_v10  ;;  %v453_v30 = vadd.f32 %v4577_v25, %v190_v19 }
 0x14a   :  { %v3211_v32 = vpop.eup %3210  ;;  %v1454_v1 = vadd.f32 1.0, %v3209_v31  ;;  %3230 = vpow2.f32 %v2495_v27  ;;  %v192_v27 = vld [vmem:[%s5700_s0 + $0x5a8] sm:$0xff] }
 0x14b   :  { %v3213_v33 = vpop.eup %3212  ;;  %v1455_v34 = vadd.f32 1.0, %v3211_v32  ;;  %3232 = vpow2.f32 %v2496_v29  ;;  %v2503_v29 = vmul.f32 -1.442695, %v449_v14  ;;  %v2504_v32 = vmul.f32 -1.442695, %v450_v18 }
 0x14c   :  { %v3215_v35 = vpop.eup %3214  ;;  %3234 = vrcp.f32 %v1454_v1  ;;  %v1456_v36 = vadd.f32 1.0, %v3213_v33  ;;  %v454_v1 = vadd.f32 %v4577_v25, %v191_v23 }
 0x14d   :  { %v3217_v37 = vpop.eup %3216  ;;  %3236 = vrcp.f32 %v1455_v34  ;;  %v1457_v38 = vadd.f32 1.0, %v3215_v35  ;;  %v2505_v34 = vmul.f32 -1.442695, %v451_v22  ;;  %v455_v35 = vadd.f32 %v4577_v25, %v192_v27 }
 0x14e   :  { %v3219_v39 = vpop.eup %3218  ;;  %3238 = vrcp.f32 %v1456_v36  ;;  %v1458_v40 = vadd.f32 1.0, %v3217_v37  ;;  %v2506_v37 = vmul.f32 -1.442695, %v452_v56  ;;  %v2508_v25 = vmul.f32 -1.442695, %v454_v1  ;;  %v201_v56 = vld [vmem:[%s5700_s0 + $0x5f0] sm:$0xff] }
 0x14f   :  { %v3221_v42 = vpop.eup %3220  ;;  %3240 = vrcp.f32 %v1457_v38  ;;  %v1459_v43 = vadd.f32 1.0, %v3219_v39  ;;  %v2507_v39 = vmul.f32 -1.442695, %v453_v30  ;;  %v202_v30 = vld [vmem:[%s5700_s0 + $0x5f8] sm:$0xff] }
 0x150   :  { %v3223_v45 = vpop.eup %3222  ;;  %3242 = vrcp.f32 %v1458_v40  ;;  %v1460_v46 = vadd.f32 1.0, %v3221_v42  ;;  %v2509_v42 = vmul.f32 -1.442695, %v455_v35 }
 0x151   :  { %v3225_v48 = vpop.eup %3224  ;;  %3244 = vrcp.f32 %v1459_v43  ;;  %v1461_v49 = vadd.f32 1.0, %v3223_v45 }
 0x152   :  { %v3227_v52 = vpop.eup %3226  ;;  %3246 = vrcp.f32 %v1460_v46  ;;  %v1462_v53 = vadd.f32 1.0, %v3225_v48 }
 0x153   :  { %v3229_v57 = vpop.eup %3228  ;;  %3248 = vrcp.f32 %v1461_v49  ;;  %v1463_v58 = vadd.f32 1.0, %v3227_v52 }
 0x154   :  { %v3231_v61 = vpop.eup %3230  ;;  %3250 = vrcp.f32 %v1462_v53  ;;  %v1464_v62 = vadd.f32 1.0, %v3229_v57 }
 0x155   :  { %v3233_v2 = vpop.eup %3232  ;;  %3252 = vrcp.f32 %v1463_v58  ;;  %v1465_v3 = vadd.f32 1.0, %v3231_v61 }
 0x156   :  { %v3235_v7 = vpop.eup %3234  ;;  %3254 = vrcp.f32 %v1464_v62  ;;  %v1466_v8 = vadd.f32 1.0, %v3233_v2  ;;  %v195_v62 = vld [vmem:[%s5700_s0 + $0x5c0] sm:$0xff] }
 0x157   :  { %v3237_v12 = vpop.eup %3236  ;;  %2223 = vst.msk [vmem:[%s5702_s2 + $0x4e0] sm:$0xff] %vm2066_vm0, %v3235_v7  ;;  %3256 = vrcp.f32 %v1465_v3  ;;  %v5058_v2 = vld [vmem:[%s5701_s1] ss:$0 sm:$0xff] }
 0x158   :  { %v3239_v16 = vpop.eup %3238  ;;  %2224 = vst.msk [vmem:[%s5702_s2 + $0x4e8] sm:$0xff] %vm2066_vm0, %v3237_v12  ;;  %3258 = vrcp.f32 %v1466_v8  ;;  %v456_v3 = vadd.f32 %v5058_v2, %v193_v55  ;;  %v457_v7 = vadd.f32 %v5058_v2, %v194_v59  ;;  %v197_v8 = vld [vmem:[%s5700_s0 + $0x5d0] sm:$0xff]  ;;  %v458_v11 = vadd.f32 %v5058_v2, %v195_v62  ;;  %v198_v12 = vld [vmem:[%s5700_s0 + $0x5d8] sm:$0xff] }
 0x159   :  { %v3241_v20 = vpop.eup %3240  ;;  %2225 = vst.msk [vmem:[%s5702_s2 + $0x4f0] sm:$0xff] %vm2066_vm0, %v3239_v16  ;;  %3260 = vpow2.f32 %v2497_v4  ;;  %v196_v4 = vld [vmem:[%s5700_s0 + $0x5c8] sm:$0xff]  ;;  %v199_v16 = vld [vmem:[%s5700_s0 + $0x5e0] sm:$0xff] }
 0x15a   :  { %v3243_v24 = vpop.eup %3242  ;;  %2226 = vst.msk [vmem:[%s5702_s2 + $0x4f8] sm:$0xff] %vm2066_vm0, %v3241_v20  ;;  %3262 = vpow2.f32 %v2498_v9  ;;  %v459_v15 = vadd.f32 %v5058_v2, %v196_v4  ;;  %v2510_v19 = vmul.f32 -1.442695, %v456_v3  ;;  %v460_v20 = vadd.f32 %v5058_v2, %v197_v8 }
 0x15b   :  { %v3245_v28 = vpop.eup %3244  ;;  %2227 = vst.msk [vmem:[%s5702_s2 + $0x500] sm:$0xff] %vm2066_vm0, %v3243_v24  ;;  %3264 = vpow2.f32 %v2499_v13  ;;  %v2511_v24 = vmul.f32 -1.442695, %v457_v7 }
 0x15c   :  { %v3247_v31 = vpop.eup %3246  ;;  %2228 = vst.msk [vmem:[%s5702_s2 + $0x508] sm:$0xff] %vm2066_vm0, %v3245_v28  ;;  %3266 = vpow2.f32 %v2500_v17  ;;  %v2512_v28 = vmul.f32 -1.442695, %v458_v11  ;;  %v2514_v35 = vmul.f32 -1.442695, %v460_v20 }
 0x15d   :  { %v3249_v33 = vpop.eup %3248  ;;  %2229 = vst.msk [vmem:[%s5702_s2 + $0x510] sm:$0xff] %vm2066_vm0, %v3247_v31  ;;  %3268 = vpow2.f32 %v2501_v21  ;;  %v200_v21 = vld [vmem:[%s5700_s0 + $0x5e8] sm:$0xff] }
 0x15e   :  { %v3251_v36 = vpop.eup %3250  ;;  %2230 = vst.msk [vmem:[%s5702_s2 + $0x518] sm:$0xff] %vm2066_vm0, %v3249_v33  ;;  %3270 = vpow2.f32 %v2502_v26  ;;  %v461_v26 = vadd.f32 %v5058_v2, %v198_v12  ;;  %v463_v1 = vadd.f32 %v5058_v2, %v200_v21  ;;  %v203_v33 = vld [vmem:[%s5700_s0 + $0x600] sm:$0xff] }
 0x15f   :  { %v3253_v38 = vpop.eup %3252  ;;  %2231 = vst.msk [vmem:[%s5702_s2 + $0x520] sm:$0xff] %vm2066_vm0, %v3251_v36  ;;  %3272 = vpow2.f32 %v2503_v29  ;;  %v462_v29 = vadd.f32 %v5058_v2, %v199_v16  ;;  %v464_v36 = vadd.f32 %v5058_v2, %v201_v56  ;;  %v207_v12 = vld [vmem:[%s5700_s0 + $0x620] sm:$0xff] }
 0x160   :  { %v3255_v40 = vpop.eup %3254  ;;  %2232 = vst.msk [vmem:[%s5702_s2 + $0x528] sm:$0xff] %vm2066_vm0, %v3253_v38  ;;  %3274 = vpow2.f32 %v2504_v32  ;;  %v2513_v32 = vmul.f32 -1.442695, %v459_v15  ;;  %v208_v15 = vld [vmem:[%s5700_s0 + $0x628] sm:$0xff] }
 0x161   :  { %v3257_v41 = vpop.eup %3256  ;;  %2233 = vst.msk [vmem:[%s5702_s2 + $0x530] sm:$0xff] %vm2066_vm0, %v3255_v40  ;;  %3276 = vpow2.f32 %v2505_v34  ;;  %v465_v40 = vadd.f32 %v5058_v2, %v202_v30  ;;  %v471_v56 = vadd.f32 %v5058_v2, %v208_v15 }
 0x162   :  { %v3259_v43 = vpop.eup %3258  ;;  %2234 = vst.msk [vmem:[%s5702_s2 + $0x538] sm:$0xff] %vm2066_vm0, %v3257_v41  ;;  %3278 = vpow2.f32 %v2506_v37  ;;  %v204_v37 = vld [vmem:[%s5700_s0 + $0x608] sm:$0xff] }
 0x163   :  { %v3261_v44 = vpop.eup %3260  ;;  %2235 = vst.msk [vmem:[%s5702_s2 + $0x540] sm:$0xff] %vm2066_vm0, %v3259_v43  ;;  %3280 = vpow2.f32 %v2507_v39  ;;  %v2515_v39 = vmul.f32 -1.442695, %v461_v26  ;;  %v466_v43 = vadd.f32 %v5058_v2, %v203_v33 }
 0x164   :  { %v3263_v45 = vpop.eup %3262  ;;  %v1467_v46 = vadd.f32 1.0, %v3261_v44  ;;  %3282 = vpow2.f32 %v2508_v25  ;;  %v205_v25 = vld [vmem:[%s5700_s0 + $0x610] sm:$0xff] }
 0x165   :  { %v3265_v47 = vpop.eup %3264  ;;  %v1468_v48 = vadd.f32 1.0, %v3263_v45  ;;  %3284 = vpow2.f32 %v2509_v42  ;;  %v2516_v42 = vmul.f32 -1.442695, %v462_v29  ;;  %v2517_v45 = vmul.f32 -1.442695, %v463_v1 }
 0x166   :  { %v3267_v49 = vpop.eup %3266  ;;  %3286 = vrcp.f32 %v1467_v46  ;;  %v1469_v50 = vadd.f32 1.0, %v3265_v47  ;;  %v467_v46 = vadd.f32 %v5058_v2, %v204_v37 }
 0x167   :  { %v3269_v51 = vpop.eup %3268  ;;  %3288 = vrcp.f32 %v1468_v48  ;;  %v1470_v52 = vadd.f32 1.0, %v3267_v49  ;;  %v2518_v48 = vmul.f32 -1.442695, %v464_v36  ;;  %v468_v49 = vadd.f32 %v5058_v2, %v205_v25 }
 0x168   :  { %v3271_v53 = vpop.eup %3270  ;;  %3290 = vrcp.f32 %v1469_v50  ;;  %v1471_v54 = vadd.f32 1.0, %v3269_v51  ;;  %v2519_v51 = vmul.f32 -1.442695, %v465_v40  ;;  %v2521_v55 = vmul.f32 -1.442695, %v467_v46  ;;  %v214_v40 = vld [vmem:[%s5700_s0 + $0x658] sm:$0xff] }
 0x169   :  { %v3273_v57 = vpop.eup %3272  ;;  %3292 = vrcp.f32 %v1470_v52  ;;  %v1472_v58 = vadd.f32 1.0, %v3271_v53  ;;  %v2520_v53 = vmul.f32 -1.442695, %v466_v43  ;;  %v215_v43 = vld [vmem:[%s5700_s0 + $0x660] sm:$0xff] }
 0x16a   :  { %v3275_v60 = vpop.eup %3274  ;;  %3294 = vrcp.f32 %v1471_v54  ;;  %v1473_v61 = vadd.f32 1.0, %v3273_v57 }
 0x16b   :  { %v3277_v63 = vpop.eup %3276  ;;  %3296 = vrcp.f32 %v1472_v58  ;;  %v1474_v0 = vadd.f32 1.0, %v3275_v60  ;;  %v2522_v58 = vmul.f32 -1.442695, %v468_v49 }
 0x16c   :  { %v3279_v5 = vpop.eup %3278  ;;  %3298 = vrcp.f32 %v1473_v61  ;;  %v1475_v6 = vadd.f32 1.0, %v3277_v63 }
 0x16d   :  { %v3281_v9 = vpop.eup %3280  ;;  %3300 = vrcp.f32 %v1474_v0  ;;  %v1476_v10 = vadd.f32 1.0, %v3279_v5 }
 0x16e   :  { %v3283_v13 = vpop.eup %3282  ;;  %3302 = vrcp.f32 %v1475_v6  ;;  %v1477_v14 = vadd.f32 1.0, %v3281_v9  ;;  %v206_v9 = vld [vmem:[%s5700_s0 + $0x618] sm:$0xff] }
 0x16f   :  { %v3285_v17 = vpop.eup %3284  ;;  %3304 = vrcp.f32 %v1476_v10  ;;  %v1478_v18 = vadd.f32 1.0, %v3283_v13 }
 0x170   :  { %v3287_v22 = vpop.eup %3286  ;;  %3306 = vrcp.f32 %v1477_v14  ;;  %v1479_v23 = vadd.f32 1.0, %v3285_v17 }
 0x171   :  { %v3289_v27 = vpop.eup %3288  ;;  %2236 = vst.msk [vmem:[%s5702_s2 + $0x548] sm:$0xff] %vm2066_vm0, %v3287_v22  ;;  %3308 = vrcp.f32 %v1478_v18  ;;  %v469_v18 = vadd.f32 %v5058_v2, %v206_v9  ;;  %v470_v22 = vadd.f32 %v5058_v2, %v207_v12 }
 0x172   :  { %v3291_v31 = vpop.eup %3290  ;;  %2237 = vst.msk [vmem:[%s5702_s2 + $0x550] sm:$0xff] %vm2066_vm0, %v3289_v27  ;;  %3310 = vrcp.f32 %v1479_v23  ;;  %v210_v23 = vld [vmem:[%s5700_s0 + $0x638] sm:$0xff]  ;;  %v211_v27 = vld [vmem:[%s5700_s0 + $0x640] sm:$0xff] }
 0x173   :  { %v3293_v34 = vpop.eup %3292  ;;  %2238 = vst.msk [vmem:[%s5702_s2 + $0x558] sm:$0xff] %vm2066_vm0, %v3291_v31  ;;  %3312 = vpow2.f32 %v2510_v19  ;;  %v209_v19 = vld [vmem:[%s5700_s0 + $0x630] sm:$0xff]  ;;  %v212_v31 = vld [vmem:[%s5700_s0 + $0x648] sm:$0xff]  ;;  %v2523_v33 = vmul.f32 -1.442695, %v469_v18 }
 0x174   :  { %v3295_v38 = vpop.eup %3294  ;;  %2239 = vst.msk [vmem:[%s5702_s2 + $0x560] sm:$0xff] %vm2066_vm0, %v3293_v34  ;;  %3314 = vpow2.f32 %v2511_v24  ;;  %v472_v30 = vadd.f32 %v5058_v2, %v209_v19  ;;  %v473_v34 = vadd.f32 %v5058_v2, %v210_v23 }
 0x175   :  { %v3297_v41 = vpop.eup %3296  ;;  %2240 = vst.msk [vmem:[%s5702_s2 + $0x568] sm:$0xff] %vm2066_vm0, %v3295_v38  ;;  %3316 = vpow2.f32 %v2512_v28  ;;  %v2524_v38 = vmul.f32 -1.442695, %v470_v22 }
 0x176   :  { %v3299_v44 = vpop.eup %3298  ;;  %2241 = vst.msk [vmem:[%s5702_s2 + $0x570] sm:$0xff] %vm2066_vm0, %v3297_v41  ;;  %3318 = vpow2.f32 %v2513_v32  ;;  %v2525_v41 = vmul.f32 -1.442695, %v471_v56  ;;  %v2527_v49 = vmul.f32 -1.442695, %v473_v34 }
 0x177   :  { %v3301_v47 = vpop.eup %3300  ;;  %2242 = vst.msk [vmem:[%s5702_s2 + $0x578] sm:$0xff] %vm2066_vm0, %v3299_v44  ;;  %3320 = vpow2.f32 %v2514_v35  ;;  %v213_v35 = vld [vmem:[%s5700_s0 + $0x650] sm:$0xff] }
 0x178   :  { %v3303_v50 = vpop.eup %3302  ;;  %2243 = vst.msk [vmem:[%s5702_s2 + $0x580] sm:$0xff] %vm2066_vm0, %v3301_v47  ;;  %3322 = vpow2.f32 %v2515_v39  ;;  %v474_v39 = vadd.f32 %v5058_v2, %v211_v27  ;;  %v476_v46 = vadd.f32 %v5058_v2, %v213_v35  ;;  %v216_v47 = vld [vmem:[%s5700_s0 + $0x668] sm:$0xff] }
 0x179   :  { %v3305_v52 = vpop.eup %3304  ;;  %2244 = vst.msk [vmem:[%s5702_s2 + $0x588] sm:$0xff] %vm2066_vm0, %v3303_v50  ;;  %3324 = vpow2.f32 %v2516_v42  ;;  %v475_v42 = vadd.f32 %v5058_v2, %v212_v31  ;;  %v477_v50 = vadd.f32 %v5058_v2, %v214_v40  ;;  %v220_v27 = vld [vmem:[%s5700_s0 + $0x688] sm:$0xff] }
 0x17a   :  { %v3307_v54 = vpop.eup %3306  ;;  %2245 = vst.msk [vmem:[%s5702_s2 + $0x590] sm:$0xff] %vm2066_vm0, %v3305_v52  ;;  %3326 = vpow2.f32 %v2517_v45  ;;  %v2526_v45 = vmul.f32 -1.442695, %v472_v30  ;;  %v221_v30 = vld [vmem:[%s5700_s0 + $0x690] sm:$0xff] }
 0x17b   :  { %v3309_v57 = vpop.eup %3308  ;;  %2246 = vst.msk [vmem:[%s5702_s2 + $0x598] sm:$0xff] %vm2066_vm0, %v3307_v54  ;;  %3328 = vpow2.f32 %v2518_v48  ;;  %v478_v54 = vadd.f32 %v5058_v2, %v215_v43  ;;  %v484_v40 = vadd.f32 %v5058_v2, %v221_v30 }
 0x17c   :  { %v3311_v59 = vpop.eup %3310  ;;  %2247 = vst.msk [vmem:[%s5702_s2 + $0x5a0] sm:$0xff] %vm2066_vm0, %v3309_v57  ;;  %3330 = vpow2.f32 %v2519_v51  ;;  %v217_v51 = vld [vmem:[%s5700_s0 + $0x670] sm:$0xff] }
 0x17d   :  { %v3313_v60 = vpop.eup %3312  ;;  %2248 = vst.msk [vmem:[%s5702_s2 + $0x5a8] sm:$0xff] %vm2066_vm0, %v3311_v59  ;;  %3332 = vpow2.f32 %v2520_v53  ;;  %v2528_v53 = vmul.f32 -1.442695, %v474_v39  ;;  %v479_v59 = vadd.f32 %v5058_v2, %v216_v47 }
 0x17e   :  { %v3315_v61 = vpop.eup %3314  ;;  %v1480_v62 = vadd.f32 1.0, %v3313_v60  ;;  %3334 = vpow2.f32 %v2521_v55  ;;  %v218_v55 = vld [vmem:[%s5700_s0 + $0x678] sm:$0xff] }
 0x17f   :  { %v3317_v63 = vpop.eup %3316  ;;  %v1481_v0 = vadd.f32 1.0, %v3315_v61  ;;  %3336 = vpow2.f32 %v2522_v58  ;;  %v2529_v58 = vmul.f32 -1.442695, %v475_v42  ;;  %v2530_v61 = vmul.f32 -1.442695, %v476_v46 }
 0x180   :  { %v3319_v3 = vpop.eup %3318  ;;  %3338 = vrcp.f32 %v1480_v62  ;;  %v1482_v4 = vadd.f32 1.0, %v3317_v63  ;;  %v480_v62 = vadd.f32 %v5058_v2, %v217_v51 }
 0x181   :  { %v3321_v5 = vpop.eup %3320  ;;  %3340 = vrcp.f32 %v1481_v0  ;;  %v1483_v6 = vadd.f32 1.0, %v3319_v3  ;;  %v2531_v0 = vmul.f32 -1.442695, %v477_v50  ;;  %v481_v3 = vadd.f32 %v5058_v2, %v218_v55 }
 0x182   :  { %v3323_v7 = vpop.eup %3322  ;;  %3342 = vrcp.f32 %v1482_v4  ;;  %v1484_v8 = vadd.f32 1.0, %v3321_v5  ;;  %v2532_v5 = vmul.f32 -1.442695, %v478_v54  ;;  %v2534_v9 = vmul.f32 -1.442695, %v480_v62  ;;  %v227_v54 = vld [vmem:[%s5700_s0 + $0x6c0] sm:$0xff] }
 0x183   :  { %v3325_v10 = vpop.eup %3324  ;;  %3344 = vrcp.f32 %v1483_v6  ;;  %v1485_v11 = vadd.f32 1.0, %v3323_v7  ;;  %v2533_v7 = vmul.f32 -1.442695, %v479_v59  ;;  %v228_v59 = vld [vmem:[%s5700_s0 + $0x6c8] sm:$0xff] }
 0x184   :  { %v3327_v13 = vpop.eup %3326  ;;  %3346 = vrcp.f32 %v1484_v8  ;;  %v1486_v14 = vadd.f32 1.0, %v3325_v10 }
 0x185   :  { %v3329_v16 = vpop.eup %3328  ;;  %3348 = vrcp.f32 %v1485_v11  ;;  %v1487_v17 = vadd.f32 1.0, %v3327_v13  ;;  %v2535_v11 = vmul.f32 -1.442695, %v481_v3 }
 0x186   :  { %v3331_v20 = vpop.eup %3330  ;;  %3350 = vrcp.f32 %v1486_v14  ;;  %v1488_v21 = vadd.f32 1.0, %v3329_v16 }
 0x187   :  { %v3333_v24 = vpop.eup %3332  ;;  %3352 = vrcp.f32 %v1487_v17  ;;  %v1489_v26 = vadd.f32 1.0, %v3331_v20 }
 0x188   :  { %v3335_v28 = vpop.eup %3334  ;;  %3354 = vrcp.f32 %v1488_v21  ;;  %v1490_v29 = vadd.f32 1.0, %v3333_v24  ;;  %v219_v24 = vld [vmem:[%s5700_s0 + $0x680] sm:$0xff] }
 0x189   :  { %v3337_v32 = vpop.eup %3336  ;;  %3356 = vrcp.f32 %v1489_v26  ;;  %v1491_v1 = vadd.f32 1.0, %v3335_v28 }
 0x18a   :  { %v3339_v36 = vpop.eup %3338  ;;  %3358 = vrcp.f32 %v1490_v29  ;;  %v1492_v37 = vadd.f32 1.0, %v3337_v32 }
 0x18b   :  { %v3341_v25 = vpop.eup %3340  ;;  %2249 = vst.msk [vmem:[%s5702_s2 + $0x5b0] sm:$0xff] %vm2066_vm0, %v3339_v36  ;;  %3360 = vrcp.f32 %v1491_v1  ;;  %v482_v1 = vadd.f32 %v5058_v2, %v219_v24  ;;  %v483_v36 = vadd.f32 %v5058_v2, %v220_v27 }
 0x18c   :  { %v3343_v44 = vpop.eup %3342  ;;  %2250 = vst.msk [vmem:[%s5702_s2 + $0x5b8] sm:$0xff] %vm2066_vm0, %v3341_v25  ;;  %3362 = vrcp.f32 %v1492_v37  ;;  %v223_v37 = vld [vmem:[%s5700_s0 + $0x6a0] sm:$0xff]  ;;  %v224_v25 = vld [vmem:[%s5700_s0 + $0x6a8] sm:$0xff] }
 0x18d   :  { %v3345_v48 = vpop.eup %3344  ;;  %2251 = vst.msk [vmem:[%s5702_s2 + $0x5c0] sm:$0xff] %vm2066_vm0, %v3343_v44  ;;  %3364 = vpow2.f32 %v2523_v33  ;;  %v222_v33 = vld [vmem:[%s5700_s0 + $0x698] sm:$0xff]  ;;  %v225_v44 = vld [vmem:[%s5700_s0 + $0x6b0] sm:$0xff]  ;;  %v2536_v47 = vmul.f32 -1.442695, %v482_v1 }
 0x18e   :  { %v3347_v52 = vpop.eup %3346  ;;  %2252 = vst.msk [vmem:[%s5702_s2 + $0x5c8] sm:$0xff] %vm2066_vm0, %v3345_v48  ;;  %3366 = vpow2.f32 %v2524_v38  ;;  %v485_v43 = vadd.f32 %v5058_v2, %v222_v33  ;;  %v486_v48 = vadd.f32 %v5058_v2, %v223_v37 }
 0x18f   :  { %v3349_v57 = vpop.eup %3348  ;;  %2253 = vst.msk [vmem:[%s5702_s2 + $0x5d0] sm:$0xff] %vm2066_vm0, %v3347_v52  ;;  %3368 = vpow2.f32 %v2525_v41  ;;  %v2537_v52 = vmul.f32 -1.442695, %v483_v36 }
 0x190   :  { %v3351_v60 = vpop.eup %3350  ;;  %2254 = vst.msk [vmem:[%s5702_s2 + $0x5d8] sm:$0xff] %vm2066_vm0, %v3349_v57  ;;  %3370 = vpow2.f32 %v2526_v45  ;;  %v2538_v57 = vmul.f32 -1.442695, %v484_v40  ;;  %v2540_v3 = vmul.f32 -1.442695, %v486_v48 }
 0x191   :  { %v3353_v63 = vpop.eup %3352  ;;  %2255 = vst.msk [vmem:[%s5702_s2 + $0x5e0] sm:$0xff] %vm2066_vm0, %v3351_v60  ;;  %3372 = vpow2.f32 %v2527_v49  ;;  %v226_v49 = vld [vmem:[%s5700_s0 + $0x6b8] sm:$0xff] }
 0x192   :  { %v3355_v4 = vpop.eup %3354  ;;  %2256 = vst.msk [vmem:[%s5702_s2 + $0x5e8] sm:$0xff] %vm2066_vm0, %v3353_v63  ;;  %3374 = vpow2.f32 %v2528_v53  ;;  %v487_v53 = vadd.f32 %v5058_v2, %v224_v25  ;;  %v489_v62 = vadd.f32 %v5058_v2, %v226_v49  ;;  %v229_v63 = vld [vmem:[%s5700_s0 + $0x6d0] sm:$0xff] }
 0x193   :  { %v3357_v6 = vpop.eup %3356  ;;  %2257 = vst.msk [vmem:[%s5702_s2 + $0x5f0] sm:$0xff] %vm2066_vm0, %v3355_v4  ;;  %3376 = vpow2.f32 %v2529_v58  ;;  %v488_v58 = vadd.f32 %v5058_v2, %v225_v44  ;;  %v490_v4 = vadd.f32 %v5058_v2, %v227_v54  ;;  %v233_v25 = vld [vmem:[%s5700_s0 + $0x6f0] sm:$0xff] }
 0x194   :  { %v3359_v8 = vpop.eup %3358  ;;  %2258 = vst.msk [vmem:[%s5702_s2 + $0x5f8] sm:$0xff] %vm2066_vm0, %v3357_v6  ;;  %3378 = vpow2.f32 %v2530_v61  ;;  %v2539_v61 = vmul.f32 -1.442695, %v485_v43  ;;  %v234_v43 = vld [vmem:[%s5700_s0 + $0x6f8] sm:$0xff] }
 0x195   :  { %v3361_v10 = vpop.eup %3360  ;;  %2259 = vst.msk [vmem:[%s5702_s2 + $0x600] sm:$0xff] %vm2066_vm0, %v3359_v8  ;;  %3380 = vpow2.f32 %v2531_v0  ;;  %v491_v8 = vadd.f32 %v5058_v2, %v228_v59  ;;  %v497_v54 = vadd.f32 %v5058_v2, %v234_v43 }
 0x196   :  { %v3363_v12 = vpop.eup %3362  ;;  %2260 = vst.msk [vmem:[%s5702_s2 + $0x608] sm:$0xff] %vm2066_vm0, %v3361_v10  ;;  %3382 = vpow2.f32 %v2532_v5  ;;  %v230_v5 = vld [vmem:[%s5700_s0 + $0x6d8] sm:$0xff] }
 0x197   :  { %v3365_v13 = vpop.eup %3364  ;;  %2261 = vst.msk [vmem:[%s5702_s2 + $0x610] sm:$0xff] %vm2066_vm0, %v3363_v12  ;;  %3384 = vpow2.f32 %v2533_v7  ;;  %v2541_v7 = vmul.f32 -1.442695, %v487_v53  ;;  %v492_v12 = vadd.f32 %v5058_v2, %v229_v63 }
 0x198   :  { %v3367_v14 = vpop.eup %3366  ;;  %v1493_v15 = vadd.f32 1.0, %v3365_v13  ;;  %3386 = vpow2.f32 %v2534_v9  ;;  %v231_v9 = vld [vmem:[%s5700_s0 + $0x6e0] sm:$0xff] }
 0x199   :  { %v3369_v16 = vpop.eup %3368  ;;  %v1494_v17 = vadd.f32 1.0, %v3367_v14  ;;  %3388 = vpow2.f32 %v2535_v11  ;;  %v2542_v11 = vmul.f32 -1.442695, %v488_v58  ;;  %v2543_v14 = vmul.f32 -1.442695, %v489_v62 }
 0x19a   :  { %v3371_v18 = vpop.eup %3370  ;;  %3390 = vrcp.f32 %v1493_v15  ;;  %v1495_v19 = vadd.f32 1.0, %v3369_v16  ;;  %v493_v15 = vadd.f32 %v5058_v2, %v230_v5 }
 0x19b   :  { %v3373_v20 = vpop.eup %3372  ;;  %3392 = vrcp.f32 %v1494_v17  ;;  %v1496_v21 = vadd.f32 1.0, %v3371_v18  ;;  %v2544_v17 = vmul.f32 -1.442695, %v490_v4  ;;  %v494_v18 = vadd.f32 %v5058_v2, %v231_v9 }
 0x19c   :  { %v3375_v22 = vpop.eup %3374  ;;  %3394 = vrcp.f32 %v1495_v19  ;;  %v1497_v23 = vadd.f32 1.0, %v3373_v20  ;;  %v2545_v20 = vmul.f32 -1.442695, %v491_v8  ;;  %v2547_v24 = vmul.f32 -1.442695, %v493_v15  ;;  %v240_v8 = vld [vmem:[%s5700_s0 + $0x728] sm:$0xff] }
 0x19d   :  { %v3377_v26 = vpop.eup %3376  ;;  %3396 = vrcp.f32 %v1496_v21  ;;  %v1498_v56 = vadd.f32 1.0, %v3375_v22  ;;  %v2546_v22 = vmul.f32 -1.442695, %v492_v12  ;;  %v241_v12 = vld [vmem:[%s5700_s0 + $0x730] sm:$0xff] }
 0x19e   :  { %v3379_v28 = vpop.eup %3378  ;;  %3398 = vrcp.f32 %v1497_v23  ;;  %v1499_v29 = vadd.f32 1.0, %v3377_v26 }
 0x19f   :  { %v3381_v31 = vpop.eup %3380  ;;  %3400 = vrcp.f32 %v1498_v56  ;;  %v1500_v32 = vadd.f32 1.0, %v3379_v28  ;;  %v2548_v56 = vmul.f32 -1.442695, %v494_v18 }
 0x1a0   :  { %v3383_v34 = vpop.eup %3382  ;;  %3402 = vrcp.f32 %v1499_v29  ;;  %v1501_v35 = vadd.f32 1.0, %v3381_v31 }
 0x1a1   :  { %v3385_v38 = vpop.eup %3384  ;;  %3404 = vrcp.f32 %v1500_v32  ;;  %v1502_v39 = vadd.f32 1.0, %v3383_v34 }
 0x1a2   :  { %v3387_v41 = vpop.eup %3386  ;;  %3406 = vrcp.f32 %v1501_v35  ;;  %v1503_v42 = vadd.f32 1.0, %v3385_v38  ;;  %v232_v38 = vld [vmem:[%s5700_s0 + $0x6e8] sm:$0xff] }
 0x1a3   :  { %v3389_v45 = vpop.eup %3388  ;;  %3408 = vrcp.f32 %v1502_v39  ;;  %v1504_v46 = vadd.f32 1.0, %v3387_v41 }
 0x1a4   :  { %v3391_v50 = vpop.eup %3390  ;;  %3410 = vrcp.f32 %v1503_v42  ;;  %v1505_v51 = vadd.f32 1.0, %v3389_v45 }
 0x1a5   :  { %v3393_v55 = vpop.eup %3392  ;;  %2262 = vst.msk [vmem:[%s5702_s2 + $0x618] sm:$0xff] %vm2066_vm0, %v3391_v50  ;;  %3412 = vrcp.f32 %v1504_v46  ;;  %v495_v46 = vadd.f32 %v5058_v2, %v232_v38  ;;  %v496_v50 = vadd.f32 %v5058_v2, %v233_v25 }
 0x1a6   :  { %v3395_v60 = vpop.eup %3394  ;;  %2263 = vst.msk [vmem:[%s5702_s2 + $0x620] sm:$0xff] %vm2066_vm0, %v3393_v55  ;;  %3414 = vrcp.f32 %v1505_v51  ;;  %v236_v51 = vld [vmem:[%s5700_s0 + $0x708] sm:$0xff]  ;;  %v237_v55 = vld [vmem:[%s5700_s0 + $0x710] sm:$0xff] }
 0x1a7   :  { %v3397_v0 = vpop.eup %3396  ;;  %2264 = vst.msk [vmem:[%s5702_s2 + $0x628] sm:$0xff] %vm2066_vm0, %v3395_v60  ;;  %3416 = vpow2.f32 %v2536_v47  ;;  %v235_v47 = vld [vmem:[%s5700_s0 + $0x700] sm:$0xff]  ;;  %v238_v60 = vld [vmem:[%s5700_s0 + $0x718] sm:$0xff]  ;;  %v2549_v63 = vmul.f32 -1.442695, %v495_v46 }
 0x1a8   :  { %v3399_v6 = vpop.eup %3398  ;;  %2265 = vst.msk [vmem:[%s5702_s2 + $0x630] sm:$0xff] %vm2066_vm0, %v3397_v0  ;;  %3418 = vpow2.f32 %v2537_v52  ;;  %v498_v59 = vadd.f32 %v5058_v2, %v235_v47  ;;  %v499_v0 = vadd.f32 %v5058_v2, %v236_v51 }
 0x1a9   :  { %v3401_v10 = vpop.eup %3400  ;;  %2266 = vst.msk [vmem:[%s5702_s2 + $0x638] sm:$0xff] %vm2066_vm0, %v3399_v6  ;;  %3420 = vpow2.f32 %v2538_v57  ;;  %v2550_v6 = vmul.f32 -1.442695, %v496_v50 }
 0x1aa   :  { %v3403_v13 = vpop.eup %3402  ;;  %2267 = vst.msk [vmem:[%s5702_s2 + $0x640] sm:$0xff] %vm2066_vm0, %v3401_v10  ;;  %3422 = vpow2.f32 %v2539_v61  ;;  %v2551_v10 = vmul.f32 -1.442695, %v497_v54  ;;  %v2553_v18 = vmul.f32 -1.442695, %v499_v0 }
 0x1ab   :  { %v3405_v16 = vpop.eup %3404  ;;  %2268 = vst.msk [vmem:[%s5702_s2 + $0x648] sm:$0xff] %vm2066_vm0, %v3403_v13  ;;  %3424 = vpow2.f32 %v2540_v3  ;;  %v239_v3 = vld [vmem:[%s5700_s0 + $0x720] sm:$0xff] }
 0x1ac   :  { %v3407_v19 = vpop.eup %3406  ;;  %2269 = vst.msk [vmem:[%s5702_s2 + $0x650] sm:$0xff] %vm2066_vm0, %v3405_v16  ;;  %3426 = vpow2.f32 %v2541_v7  ;;  %v500_v7 = vadd.f32 %v5058_v2, %v237_v55  ;;  %v502_v15 = vadd.f32 %v5058_v2, %v239_v3  ;;  %v242_v16 = vld [vmem:[%s5700_s0 + $0x738] sm:$0xff] }
 0x1ad   :  { %v3409_v21 = vpop.eup %3408  ;;  %2270 = vst.msk [vmem:[%s5702_s2 + $0x658] sm:$0xff] %vm2066_vm0, %v3407_v19  ;;  %3428 = vpow2.f32 %v2542_v11  ;;  %v501_v11 = vadd.f32 %v5058_v2, %v238_v60  ;;  %v503_v19 = vadd.f32 %v5058_v2, %v240_v8  ;;  %v246_v55 = vld [vmem:[%s5700_s0 + $0x758] sm:$0xff] }
 0x1ae   :  { %v3411_v23 = vpop.eup %3410  ;;  %2271 = vst.msk [vmem:[%s5702_s2 + $0x660] sm:$0xff] %vm2066_vm0, %v3409_v21  ;;  %3430 = vpow2.f32 %v2543_v14  ;;  %v2552_v14 = vmul.f32 -1.442695, %v498_v59  ;;  %v247_v59 = vld [vmem:[%s5700_s0 + $0x760] sm:$0xff] }
 0x1af   :  { %v3413_v26 = vpop.eup %3412  ;;  %2272 = vst.msk [vmem:[%s5702_s2 + $0x668] sm:$0xff] %vm2066_vm0, %v3411_v23  ;;  %3432 = vpow2.f32 %v2544_v17  ;;  %v504_v23 = vadd.f32 %v5058_v2, %v241_v12  ;;  %v510_v8 = vadd.f32 %v5058_v2, %v247_v59 }
 0x1b0   :  { %v3415_v27 = vpop.eup %3414  ;;  %2273 = vst.msk [vmem:[%s5702_s2 + $0x670] sm:$0xff] %vm2066_vm0, %v3413_v26  ;;  %3434 = vpow2.f32 %v2545_v20  ;;  %v243_v20 = vld [vmem:[%s5700_s0 + $0x740] sm:$0xff] }
 0x1b1   :  { %v3417_v28 = vpop.eup %3416  ;;  %2274 = vst.msk [vmem:[%s5702_s2 + $0x678] sm:$0xff] %vm2066_vm0, %v3415_v27  ;;  %3436 = vpow2.f32 %v2546_v22  ;;  %v2554_v22 = vmul.f32 -1.442695, %v500_v7  ;;  %v505_v27 = vadd.f32 %v5058_v2, %v242_v16 }
 0x1b2   :  { %v3419_v29 = vpop.eup %3418  ;;  %v1506_v30 = vadd.f32 1.0, %v3417_v28  ;;  %3438 = vpow2.f32 %v2547_v24  ;;  %v244_v24 = vld [vmem:[%s5700_s0 + $0x748] sm:$0xff] }
 0x1b3   :  { %v3421_v31 = vpop.eup %3420  ;;  %v1507_v32 = vadd.f32 1.0, %v3419_v29  ;;  %3440 = vpow2.f32 %v2548_v56  ;;  %v2555_v56 = vmul.f32 -1.442695, %v501_v11  ;;  %v2556_v29 = vmul.f32 -1.442695, %v502_v15 }
 0x1b4   :  { %v3423_v1 = vpop.eup %3422  ;;  %3442 = vrcp.f32 %v1506_v30  ;;  %v1508_v33 = vadd.f32 1.0, %v3421_v31  ;;  %v506_v30 = vadd.f32 %v5058_v2, %v243_v20 }
 0x1b5   :  { %v3425_v34 = vpop.eup %3424  ;;  %3444 = vrcp.f32 %v1507_v32  ;;  %v1509_v35 = vadd.f32 1.0, %v3423_v1  ;;  %v2557_v32 = vmul.f32 -1.442695, %v503_v19  ;;  %v507_v1 = vadd.f32 %v5058_v2, %v244_v24 }
 0x1b6   :  { %v3427_v36 = vpop.eup %3426  ;;  %3446 = vrcp.f32 %v1508_v33  ;;  %v1510_v37 = vadd.f32 1.0, %v3425_v34  ;;  %v2558_v34 = vmul.f32 -1.442695, %v504_v23  ;;  %v2560_v38 = vmul.f32 -1.442695, %v506_v30  ;;  %v253_v23 = vld [vmem:[%s5700_s0 + $0x790] sm:$0xff] }
 0x1b7   :  { %v3429_v39 = vpop.eup %3428  ;;  %3448 = vrcp.f32 %v1509_v35  ;;  %v1511_v40 = vadd.f32 1.0, %v3427_v36  ;;  %v2559_v36 = vmul.f32 -1.442695, %v505_v27  ;;  %v254_v27 = vld [vmem:[%s5700_s0 + $0x798] sm:$0xff] }
 0x1b8   :  { %v3431_v41 = vpop.eup %3430  ;;  %3450 = vrcp.f32 %v1510_v37  ;;  %v1512_v42 = vadd.f32 1.0, %v3429_v39 }
 0x1b9   :  { %v3433_v44 = vpop.eup %3432  ;;  %3452 = vrcp.f32 %v1511_v40  ;;  %v1513_v45 = vadd.f32 1.0, %v3431_v41  ;;  %v2561_v40 = vmul.f32 -1.442695, %v507_v1 }
 0x1ba   :  { %v3435_v48 = vpop.eup %3434  ;;  %3454 = vrcp.f32 %v1512_v42  ;;  %v1514_v49 = vadd.f32 1.0, %v3433_v44 }
 0x1bb   :  { %v3437_v52 = vpop.eup %3436  ;;  %3456 = vrcp.f32 %v1513_v45  ;;  %v1515_v53 = vadd.f32 1.0, %v3435_v48 }
 0x1bc   :  { %v3439_v57 = vpop.eup %3438  ;;  %3458 = vrcp.f32 %v1514_v49  ;;  %v1516_v58 = vadd.f32 1.0, %v3437_v52  ;;  %v245_v52 = vld [vmem:[%s5700_s0 + $0x750] sm:$0xff] }
 0x1bd   :  { %v3441_v61 = vpop.eup %3440  ;;  %3460 = vrcp.f32 %v1515_v53  ;;  %v1517_v62 = vadd.f32 1.0, %v3439_v57 }
 0x1be   :  { %v3443_v4 = vpop.eup %3442  ;;  %3462 = vrcp.f32 %v1516_v58  ;;  %v1518_v5 = vadd.f32 1.0, %v3441_v61 }
 0x1bf   :  { %v3445_v9 = vpop.eup %3444  ;;  %2275 = vst.msk [vmem:[%s5702_s2 + $0x680] sm:$0xff] %vm2066_vm0, %v3443_v4  ;;  %3464 = vrcp.f32 %v1517_v62  ;;  %v508_v62 = vadd.f32 %v5058_v2, %v245_v52  ;;  %v509_v4 = vadd.f32 %v5058_v2, %v246_v55 }
 0x1c0   :  { %v3447_v13 = vpop.eup %3446  ;;  %2276 = vst.msk [vmem:[%s5702_s2 + $0x688] sm:$0xff] %vm2066_vm0, %v3445_v9  ;;  %3466 = vrcp.f32 %v1518_v5  ;;  %v249_v5 = vld [vmem:[%s5700_s0 + $0x770] sm:$0xff]  ;;  %v250_v9 = vld [vmem:[%s5700_s0 + $0x778] sm:$0xff] }
 0x1c1   :  { %v3449_v17 = vpop.eup %3448  ;;  %2277 = vst.msk [vmem:[%s5702_s2 + $0x690] sm:$0xff] %vm2066_vm0, %v3447_v13  ;;  %3468 = vpow2.f32 %v2549_v63  ;;  %v248_v63 = vld [vmem:[%s5700_s0 + $0x768] sm:$0xff]  ;;  %v251_v13 = vld [vmem:[%s5700_s0 + $0x780] sm:$0xff]  ;;  %v2562_v16 = vmul.f32 -1.442695, %v508_v62 }
 0x1c2   :  { %v3451_v21 = vpop.eup %3450  ;;  %2278 = vst.msk [vmem:[%s5702_s2 + $0x698] sm:$0xff] %vm2066_vm0, %v3449_v17  ;;  %3470 = vpow2.f32 %v2550_v6  ;;  %v511_v12 = vadd.f32 %v5058_v2, %v248_v63  ;;  %v512_v17 = vadd.f32 %v5058_v2, %v249_v5 }
 0x1c3   :  { %v3453_v26 = vpop.eup %3452  ;;  %2279 = vst.msk [vmem:[%s5702_s2 + $0x6a0] sm:$0xff] %vm2066_vm0, %v3451_v21  ;;  %3472 = vpow2.f32 %v2551_v10  ;;  %v2563_v21 = vmul.f32 -1.442695, %v509_v4 }
 0x1c4   :  { %v3455_v28 = vpop.eup %3454  ;;  %2280 = vst.msk [vmem:[%s5702_s2 + $0x6a8] sm:$0xff] %vm2066_vm0, %v3453_v26  ;;  %3474 = vpow2.f32 %v2552_v14  ;;  %v2564_v26 = vmul.f32 -1.442695, %v510_v8  ;;  %v2566_v1 = vmul.f32 -1.442695, %v512_v17 }
 0x1c5   :  { %v3457_v31 = vpop.eup %3456  ;;  %2281 = vst.msk [vmem:[%s5702_s2 + $0x6b0] sm:$0xff] %vm2066_vm0, %v3455_v28  ;;  %3476 = vpow2.f32 %v2553_v18  ;;  %v252_v18 = vld [vmem:[%s5700_s0 + $0x788] sm:$0xff] }
 0x1c6   :  { %v3459_v33 = vpop.eup %3458  ;;  %2282 = vst.msk [vmem:[%s5702_s2 + $0x6b8] sm:$0xff] %vm2066_vm0, %v3457_v31  ;;  %3478 = vpow2.f32 %v2554_v22  ;;  %v513_v22 = vadd.f32 %v5058_v2, %v250_v9  ;;  %v515_v30 = vadd.f32 %v5058_v2, %v252_v18  ;;  %v255_v31 = vld [vmem:[%s5700_s0 + $0x7a0] sm:$0xff] }
 0x1c7   :  { %v3461_v35 = vpop.eup %3460  ;;  %2283 = vst.msk [vmem:[%s5702_s2 + $0x6c0] sm:$0xff] %vm2066_vm0, %v3459_v33  ;;  %3480 = vpow2.f32 %v2555_v56  ;;  %v514_v56 = vadd.f32 %v5058_v2, %v251_v13  ;;  %v5523_v33 = vld [vmem:[%s5701_s1] ss:$0 sm:$0xff]  ;;  %v256_v2 = vld [vmem:[%s5700_s0 + $0x7a8] sm:$0xff] }
 0x1c8   :  { %v3463_v37 = vpop.eup %3462  ;;  %2284 = vst.msk [vmem:[%s5702_s2 + $0x6c8] sm:$0xff] %vm2066_vm0, %v3461_v35  ;;  %3482 = vpow2.f32 %v2556_v29  ;;  %v2565_v29 = vmul.f32 -1.442695, %v511_v12  ;;  %v259_v9 = vld [vmem:[%s5700_s0 + $0x7c0] sm:$0xff]  ;;  %v260_v12 = vld [vmem:[%s5700_s0 + $0x7c8] sm:$0xff] }
 0x1c9   :  { %v3465_v39 = vpop.eup %3464  ;;  %2285 = vst.msk [vmem:[%s5702_s2 + $0x6d0] sm:$0xff] %vm2066_vm0, %v3463_v37  ;;  %3484 = vpow2.f32 %v2557_v32  ;;  %v517_v37 = vadd.f32 %v5523_v33, %v254_v27 }
 0x1ca   :  { %v3467_v25 = vpop.eup %3466  ;;  %2286 = vst.msk [vmem:[%s5702_s2 + $0x6d8] sm:$0xff] %vm2066_vm0, %v3465_v39  ;;  %3486 = vpow2.f32 %v2558_v34  ;;  %v516_v34 = vadd.f32 %v5523_v33, %v253_v23  ;;  %v523_v23 = vadd.f32 %v5523_v33, %v260_v12 }
 0x1cb   :  { %v3469_v41 = vpop.eup %3468  ;;  %2287 = vst.msk [vmem:[%s5702_s2 + $0x6e0] sm:$0xff] %vm2066_vm0, %v3467_v25  ;;  %3488 = vpow2.f32 %v2559_v36  ;;  %v2567_v36 = vmul.f32 -1.442695, %v513_v22  ;;  %v518_v25 = vadd.f32 %v5523_v33, %v255_v31 }
 0x1cc   :  { %v3471_v42 = vpop.eup %3470  ;;  %v1519_v43 = vadd.f32 1.0, %v3469_v41  ;;  %3490 = vpow2.f32 %v2560_v38  ;;  %v257_v38 = vld [vmem:[%s5700_s0 + $0x7b0] sm:$0xff] }
 0x1cd   :  { %v3473_v44 = vpop.eup %3472  ;;  %v1520_v45 = vadd.f32 1.0, %v3471_v42  ;;  %3492 = vpow2.f32 %v2561_v40  ;;  %v2568_v40 = vmul.f32 -1.442695, %v514_v56  ;;  %v2569_v42 = vmul.f32 -1.442695, %v515_v30 }
 0x1ce   :  { %v3475_v46 = vpop.eup %3474  ;;  %3494 = vrcp.f32 %v1519_v43  ;;  %v1521_v47 = vadd.f32 1.0, %v3473_v44  ;;  %v519_v43 = vadd.f32 %v5523_v33, %v256_v2 }
 0x1cf   :  { %v3477_v48 = vpop.eup %3476  ;;  %3496 = vrcp.f32 %v1520_v45  ;;  %v1522_v49 = vadd.f32 1.0, %v3475_v46  ;;  %v2570_v45 = vmul.f32 -1.442695, %v516_v34  ;;  %v520_v46 = vadd.f32 %v5523_v33, %v257_v38 }
 0x1d0   :  { %v3479_v50 = vpop.eup %3478  ;;  %3498 = vrcp.f32 %v1521_v47  ;;  %v1523_v51 = vadd.f32 1.0, %v3477_v48  ;;  %v2571_v48 = vmul.f32 -1.442695, %v517_v37  ;;  %v2573_v52 = vmul.f32 -1.442695, %v519_v43  ;;  %v266_v37 = vld [vmem:[%s5700_s0 + $0x7f8] sm:$0xff] }
 0x1d1   :  { %v3481_v53 = vpop.eup %3480  ;;  %3500 = vrcp.f32 %v1522_v49  ;;  %v1524_v54 = vadd.f32 1.0, %v3479_v50  ;;  %v2572_v50 = vmul.f32 -1.442695, %v518_v25 }
 0x1d2   :  { %v3483_v57 = vpop.eup %3482  ;;  %3502 = vrcp.f32 %v1523_v51  ;;  %v1525_v58 = vadd.f32 1.0, %v3481_v53 }
 0x1d3   :  { %v3485_v60 = vpop.eup %3484  ;;  %3504 = vrcp.f32 %v1524_v54  ;;  %v1526_v61 = vadd.f32 1.0, %v3483_v57  ;;  %v2574_v54 = vmul.f32 -1.442695, %v520_v46 }
 0x1d4   :  { %v3487_v0 = vpop.eup %3486  ;;  %3506 = vrcp.f32 %v1525_v58  ;;  %v1527_v3 = vadd.f32 1.0, %v3485_v60 }
 0x1d5   :  { %v3489_v6 = vpop.eup %3488  ;;  %3508 = vrcp.f32 %v1526_v61  ;;  %v1528_v7 = vadd.f32 1.0, %v3487_v0 }
 0x1d6   :  { %v3491_v10 = vpop.eup %3490  ;;  %3510 = vrcp.f32 %v1527_v3  ;;  %v1529_v11 = vadd.f32 1.0, %v3489_v6  ;;  %v258_v6 = vld [vmem:[%s5700_s0 + $0x7b8] sm:$0xff] }
 0x1d7   :  { %v3493_v14 = vpop.eup %3492  ;;  %3512 = vrcp.f32 %v1528_v7  ;;  %v1530_v15 = vadd.f32 1.0, %v3491_v10 }
 0x1d8   :  { %v3495_v19 = vpop.eup %3494  ;;  %3514 = vrcp.f32 %v1529_v11  ;;  %v1531_v20 = vadd.f32 1.0, %v3493_v14 }
 0x1d9   :  { %v3497_v24 = vpop.eup %3496  ;;  %2288 = vst.msk [vmem:[%s5702_s2 + $0x6e8] sm:$0xff] %vm2066_vm0, %v3495_v19  ;;  %3516 = vrcp.f32 %v1530_v15  ;;  %v521_v15 = vadd.f32 %v5523_v33, %v258_v6  ;;  %v522_v19 = vadd.f32 %v5523_v33, %v259_v9 }
 0x1da   :  { %v3499_v28 = vpop.eup %3498  ;;  %2289 = vst.msk [vmem:[%s5702_s2 + $0x6f0] sm:$0xff] %vm2066_vm0, %v3497_v24  ;;  %3518 = vrcp.f32 %v1531_v20  ;;  %v262_v20 = vld [vmem:[%s5700_s0 + $0x7d8] sm:$0xff]  ;;  %v263_v24 = vld [vmem:[%s5700_s0 + $0x7e0] sm:$0xff] }
 0x1db   :  { %v3501_v32 = vpop.eup %3500  ;;  %2290 = vst.msk [vmem:[%s5702_s2 + $0x6f8] sm:$0xff] %vm2066_vm0, %v3499_v28  ;;  %3520 = vpow2.f32 %v2562_v16  ;;  %v261_v16 = vld [vmem:[%s5700_s0 + $0x7d0] sm:$0xff]  ;;  %v264_v28 = vld [vmem:[%s5700_s0 + $0x7e8] sm:$0xff]  ;;  %v2575_v31 = vmul.f32 -1.442695, %v521_v15 }
 0x1dc   :  { %v3503_v35 = vpop.eup %3502  ;;  %2291 = vst.msk [vmem:[%s5702_s2 + $0x700] sm:$0xff] %vm2066_vm0, %v3501_v32  ;;  %3522 = vpow2.f32 %v2563_v21  ;;  %v524_v27 = vadd.f32 %v5523_v33, %v261_v16  ;;  %v525_v32 = vadd.f32 %v5523_v33, %v262_v20 }
 0x1dd   :  { %v3505_v39 = vpop.eup %3504  ;;  %2292 = vst.msk [vmem:[%s5702_s2 + $0x708] sm:$0xff] %vm2066_vm0, %v3503_v35  ;;  %3524 = vpow2.f32 %v2564_v26  ;;  %v2576_v35 = vmul.f32 -1.442695, %v522_v19 }
 0x1de   :  { %v3507_v41 = vpop.eup %3506  ;;  %2293 = vst.msk [vmem:[%s5702_s2 + $0x710] sm:$0xff] %vm2066_vm0, %v3505_v39  ;;  %3526 = vpow2.f32 %v2565_v29  ;;  %v2577_v39 = vmul.f32 -1.442695, %v523_v23 }
 0x1df   :  { %v3509_v44 = vpop.eup %3508  ;;  %2294 = vst.msk [vmem:[%s5702_s2 + $0x718] sm:$0xff] %vm2066_vm0, %v3507_v41  ;;  %3528 = vpow2.f32 %v2566_v1  ;;  %v265_v1 = vld [vmem:[%s5700_s0 + $0x7f0] sm:$0xff]  ;;  %v2578_v41 = vmul.f32 -1.442695, %v524_v27 }
 0x1e0   :  { %v3511_v47 = vpop.eup %3510  ;;  %2295 = vst.msk [vmem:[%s5702_s2 + $0x720] sm:$0xff] %vm2066_vm0, %v3509_v44  ;;  %3530 = vpow2.f32 %v2567_v36  ;;  %v526_v36 = vadd.f32 %v5523_v33, %v263_v24  ;;  %v2579_v44 = vmul.f32 -1.442695, %v525_v32 }
 0x1e1   :  { %v3513_v49 = vpop.eup %3512  ;;  %2296 = vst.msk [vmem:[%s5702_s2 + $0x728] sm:$0xff] %vm2066_vm0, %v3511_v47  ;;  %3532 = vpow2.f32 %v2568_v40  ;;  %v527_v40 = vadd.f32 %v5523_v33, %v264_v28 }
 0x1e2   :  { %v3515_v51 = vpop.eup %3514  ;;  %2297 = vst.msk [vmem:[%s5702_s2 + $0x730] sm:$0xff] %vm2066_vm0, %v3513_v49  ;;  %3534 = vpow2.f32 %v2569_v42  ;;  %v528_v42 = vadd.f32 %v5523_v33, %v265_v1  ;;  %v2580_v47 = vmul.f32 -1.442695, %v526_v36 }
 0x1e3   :  { %v3517_v53 = vpop.eup %3516  ;;  %2298 = vst.msk [vmem:[%s5702_s2 + $0x738] sm:$0xff] %vm2066_vm0, %v3515_v51  ;;  %3536 = vpow2.f32 %v2570_v45  ;;  %v529_v45 = vadd.f32 %v5523_v33, %v266_v37  ;;  %v2581_v49 = vmul.f32 -1.442695, %v527_v40 }
 0x1e4   :  { %v3519_v55 = vpop.eup %3518  ;;  %2299 = vst.msk [vmem:[%s5702_s2 + $0x740] sm:$0xff] %vm2066_vm0, %v3517_v53  ;;  %3538 = vpow2.f32 %v2571_v48  ;;  %v2582_v33 = vmul.f32 -1.442695, %v528_v42 }
 0x1e5   :  { %v3521_v57 = vpop.eup %3520  ;;  %2300 = vst.msk [vmem:[%s5702_s2 + $0x748] sm:$0xff] %vm2066_vm0, %v3519_v55  ;;  %3540 = vpow2.f32 %v2572_v50 }
 0x1e6   :  { %v3523_v58 = vpop.eup %3522  ;;  %v1532_v59 = vadd.f32 1.0, %v3521_v57  ;;  %3542 = vpow2.f32 %v2573_v52  ;;  %v2583_v52 = vmul.f32 -1.442695, %v529_v45 }
 0x1e7   :  { %v3525_v60 = vpop.eup %3524  ;;  %v1533_v61 = vadd.f32 1.0, %v3523_v58  ;;  %3544 = vpow2.f32 %v2574_v54 }
 0x1e8   :  { %v3527_v62 = vpop.eup %3526  ;;  %3546 = vrcp.f32 %v1532_v59  ;;  %v1534_v63 = vadd.f32 1.0, %v3525_v60 }
 0x1e9   :  { %v3529_v0 = vpop.eup %3528  ;;  %3548 = vrcp.f32 %v1533_v61  ;;  %v1535_v3 = vadd.f32 1.0, %v3527_v62 }
 0x1ea   :  { %v3531_v4 = vpop.eup %3530  ;;  %3550 = vrcp.f32 %v1534_v63  ;;  %v1536_v5 = vadd.f32 1.0, %v3529_v0 }
 0x1eb   :  { %v3533_v7 = vpop.eup %3532  ;;  %3552 = vrcp.f32 %v1535_v3  ;;  %v1537_v8 = vadd.f32 1.0, %v3531_v4 }
 0x1ec   :  { %v3535_v10 = vpop.eup %3534  ;;  %3554 = vrcp.f32 %v1536_v5  ;;  %v1538_v11 = vadd.f32 1.0, %v3533_v7 }
 0x1ed   :  { %v3537_v13 = vpop.eup %3536  ;;  %3556 = vrcp.f32 %v1537_v8  ;;  %v1539_v14 = vadd.f32 1.0, %v3535_v10 }
 0x1ee   :  { %v3539_v17 = vpop.eup %3538  ;;  %3558 = vrcp.f32 %v1538_v11  ;;  %v1540_v18 = vadd.f32 1.0, %v3537_v13 }
 0x1ef   :  { %v3541_v21 = vpop.eup %3540  ;;  %3560 = vrcp.f32 %v1539_v14  ;;  %v1541_v22 = vadd.f32 1.0, %v3539_v17 }
 0x1f0   :  { %v3543_v26 = vpop.eup %3542  ;;  %3562 = vrcp.f32 %v1540_v18  ;;  %v1542_v56 = vadd.f32 1.0, %v3541_v21 }
 0x1f1   :  { %v3545_v29 = vpop.eup %3544  ;;  %3564 = vrcp.f32 %v1541_v22  ;;  %v1543_v30 = vadd.f32 1.0, %v3543_v26 }
 0x1f2   :  { %v3547_v34 = vpop.eup %3546  ;;  %3566 = vrcp.f32 %v1542_v56  ;;  %v1544_v2 = vadd.f32 1.0, %v3545_v29 }
 0x1f3   :  { %v3549_v38 = vpop.eup %3548  ;;  %2301 = vst.msk [vmem:[%s5702_s2 + $0x750] sm:$0xff] %vm2066_vm0, %v3547_v34  ;;  %3568 = vrcp.f32 %v1543_v30 }
 0x1f4   :  { %v3551_v25 = vpop.eup %3550  ;;  %2302 = vst.msk [vmem:[%s5702_s2 + $0x758] sm:$0xff] %vm2066_vm0, %v3549_v38  ;;  %3570 = vrcp.f32 %v1544_v2 }
 0x1f5   :  { %v3553_v43 = vpop.eup %3552  ;;  %2303 = vst.msk [vmem:[%s5702_s2 + $0x760] sm:$0xff] %vm2066_vm0, %v3551_v25  ;;  %3572 = vpow2.f32 %v2575_v31 }
 0x1f6   :  { %v3555_v46 = vpop.eup %3554  ;;  %2304 = vst.msk [vmem:[%s5702_s2 + $0x768] sm:$0xff] %vm2066_vm0, %v3553_v43  ;;  %3574 = vpow2.f32 %v2576_v35 }
 0x1f7   :  { %v3557_v48 = vpop.eup %3556  ;;  %2305 = vst.msk [vmem:[%s5702_s2 + $0x770] sm:$0xff] %vm2066_vm0, %v3555_v46  ;;  %3576 = vpow2.f32 %v2577_v39 }
 0x1f8   :  { %v3559_v50 = vpop.eup %3558  ;;  %2306 = vst.msk [vmem:[%s5702_s2 + $0x778] sm:$0xff] %vm2066_vm0, %v3557_v48  ;;  %3578 = vpow2.f32 %v2578_v41 }
 0x1f9   :  { %v3561_v51 = vpop.eup %3560  ;;  %2307 = vst.msk [vmem:[%s5702_s2 + $0x780] sm:$0xff] %vm2066_vm0, %v3559_v50  ;;  %3580 = vpow2.f32 %v2579_v44 }
 0x1fa   :  { %v3563_v53 = vpop.eup %3562  ;;  %2308 = vst.msk [vmem:[%s5702_s2 + $0x788] sm:$0xff] %vm2066_vm0, %v3561_v51  ;;  %3582 = vpow2.f32 %v2580_v47 }
 0x1fb   :  { %v3565_v54 = vpop.eup %3564  ;;  %2309 = vst.msk [vmem:[%s5702_s2 + $0x790] sm:$0xff] %vm2066_vm0, %v3563_v53  ;;  %3584 = vpow2.f32 %v2581_v49 }
 0x1fc   :  { %v3567_v55 = vpop.eup %3566  ;;  %2310 = vst.msk [vmem:[%s5702_s2 + $0x798] sm:$0xff] %vm2066_vm0, %v3565_v54  ;;  %3586 = vpow2.f32 %v2582_v33 }
 0x1fd   :  { %v3569_v57 = vpop.eup %3568  ;;  %2311 = vst.msk [vmem:[%s5702_s2 + $0x7a0] sm:$0xff] %vm2066_vm0, %v3567_v55  ;;  %3588 = vpow2.f32 %v2583_v52 }
 0x1fe   :  { %v3571_v58 = vpop.eup %3570  ;;  %2312 = vst.msk [vmem:[%s5702_s2 + $0x7a8] sm:$0xff] %vm2066_vm0, %v3569_v57 }
 0x1ff   :  { %v3573_v59 = vpop.eup %3572  ;;  %2313 = vst.msk [vmem:[%s5702_s2 + $0x7b0] sm:$0xff] %vm2066_vm0, %v3571_v58 }
 0x200   :  { %v3575_v60 = vpop.eup %3574  ;;  %v1545_v61 = vadd.f32 1.0, %v3573_v59 }
 0x201   :  { %v3577_v62 = vpop.eup %3576  ;;  %v1546_v63 = vadd.f32 1.0, %v3575_v60 }
 0x202   :  { %v3579_v0 = vpop.eup %3578  ;;  %3590 = vrcp.f32 %v1545_v61  ;;  %v1547_v3 = vadd.f32 1.0, %v3577_v62 }
 0x203   :  { %v3581_v4 = vpop.eup %3580  ;;  %3592 = vrcp.f32 %v1546_v63  ;;  %v1548_v5 = vadd.f32 1.0, %v3579_v0 }
 0x204   :  { %v3583_v6 = vpop.eup %3582  ;;  %3594 = vrcp.f32 %v1547_v3  ;;  %v1549_v7 = vadd.f32 1.0, %v3581_v4 }
 0x205   :  { %v3585_v8 = vpop.eup %3584  ;;  %3596 = vrcp.f32 %v1548_v5  ;;  %v1550_v9 = vadd.f32 1.0, %v3583_v6 }
 0x206   :  { %v3587_v10 = vpop.eup %3586  ;;  %3598 = vrcp.f32 %v1549_v7  ;;  %v1551_v11 = vadd.f32 1.0, %v3585_v8 }
 0x207   :  { %v3589_v12 = vpop.eup %3588  ;;  %3600 = vrcp.f32 %v1550_v9  ;;  %v1552_v13 = vadd.f32 1.0, %v3587_v10 }
 0x208   :  { %3602 = vrcp.f32 %v1551_v11  ;;  %v1553_v14 = vadd.f32 1.0, %v3589_v12 }
 0x209   :  { %3604 = vrcp.f32 %v1552_v13 }
 0x20a   :  { %3606 = vrcp.f32 %v1553_v14 }
 0x20c   :  { %v3591_v15 = vpop.eup %3590 }
 0x20d   :  { %v3593_v16 = vpop.eup %3592  ;;  %2314 = vst.msk [vmem:[%s5702_s2 + $0x7b8] sm:$0xff] %vm2066_vm0, %v3591_v15 }
 0x20e   :  { %v3595_v17 = vpop.eup %3594  ;;  %2315 = vst.msk [vmem:[%s5702_s2 + $0x7c0] sm:$0xff] %vm2066_vm0, %v3593_v16 }
 0x20f   :  { %v3597_v18 = vpop.eup %3596  ;;  %2316 = vst.msk [vmem:[%s5702_s2 + $0x7c8] sm:$0xff] %vm2066_vm0, %v3595_v17 }
 0x210   :  { %v3599_v19 = vpop.eup %3598  ;;  %2317 = vst.msk [vmem:[%s5702_s2 + $0x7d0] sm:$0xff] %vm2066_vm0, %v3597_v18 }
 0x211   :  { %v3601_v20 = vpop.eup %3600  ;;  %2318 = vst.msk [vmem:[%s5702_s2 + $0x7d8] sm:$0xff] %vm2066_vm0, %v3599_v19 }
 0x212   :  { %v3603_v21 = vpop.eup %3602  ;;  %2319 = vst.msk [vmem:[%s5702_s2 + $0x7e0] sm:$0xff] %vm2066_vm0, %v3601_v20 }
 0x213   :  { %v3605_v22 = vpop.eup %3604  ;;  %2320 = vst.msk [vmem:[%s5702_s2 + $0x7e8] sm:$0xff] %vm2066_vm0, %v3603_v21 }
 0x214   :  { %v3607_v23 = vpop.eup %3606  ;;  %2321 = vst.msk [vmem:[%s5702_s2 + $0x7f0] sm:$0xff] %vm2066_vm0, %v3605_v22 }
 0x215   :  { %2322 = vst.msk [vmem:[%s5702_s2 + $0x7f8] sm:$0xff] %vm2066_vm0, %v3607_v23 }

</bundles_post_ra>
